<compile_context>
chip_gen: v6e
topology: v6e:2x2x1
jax: 0.10.0
libtpu: 0.0.40
codegen_flags: <defaults>
</compile_context>

<pallas_src>
import math

import jax
import jax.numpy as jnp
from jax import lax
from jax.experimental import pallas as pl
from jax.experimental.pallas import tpu as pltpu


def _round_up(v, m):
    return ((v + m - 1) // m) * m


def _pair(v):
    if isinstance(v, (int, float)):
        return (int(v), int(v))
    return tuple(v)


def _vmem_capacity_bytes():
    try:
        info = pltpu.get_tpu_info()
        return int(getattr(info, "vmem_capacity_bytes", 128 * 2**20))
    except Exception:  # off-TPU tracing / older runtimes
        return 128 * 2**20


def _max_tile_for_vmem(ckp, k_fused, out_dim, cap_bytes):
    """Largest lane tile (<=1024) whose working set fits a conservative VMEM
    budget (per-chunk temporaries live in vregs, so only blocks + scratch)."""
    budget = max(8 << 20, int(0.30 * cap_bytes))   # headroom for pipeline/compiler
    fixed = 2 * out_dim * k_fused * 4 + (4 << 20)
    per_col = (2 * ckp + 2 * out_dim + k_fused) * 4
    tile = 128
    for cand in (256, 512, 1024):
        if per_col * cand + fixed <= budget:
            tile = cand
    return tile


def _pick_tile_n(n_cols, max_tile_n, min_steps=2):
    """Lane tile: multiple of 128, <= max_tile_n, >= min_steps grid steps when
    enough columns exist (v7x: 2 TensorCores), and <~12.5% padding waste."""
    best = 128
    for t in (128, 256, 512, 1024):
        if t > max_tile_n:
            break
        steps = -(-n_cols // t)
        if steps < min_steps and n_cols > 128:
            continue
        pad = steps * t - n_cols
        if pad * 8 > max(n_cols, 128):
            continue
        best = t
    return best


# --------------------------------------------------------------------------
# Pallas kernel: one KANLinear applied to a (in_dim_p, tile_n) block of
# patches (patches in lanes).  out = W_fused @ [silu(x); B_0(x); ...; B_nb-1(x)]
# --------------------------------------------------------------------------
def make_kan_linear_kernel(in_dim_p, n_bases, spline_order, grid_lo, grid_hi,
                           grid_size, tile_n):
    p = int(spline_order)
    h = (grid_hi - grid_lo) / grid_size
    g0 = grid_lo - p * h          # first knot of the extended uniform grid
    inv_h = 1.0 / h
    n_chunks = tile_n // 128
    n_masks = n_bases + p         # reachable degree-0 intervals

    def kernel(x_ref, w_ref, o_ref, feat_ref):
        # Spline evaluation is chunked over 128-lane columns so x/u/f/j0 and
        # the small de Boor table stay in vregs instead of full-tile VMEM
        # slabs that every placement pass would reload.
        def chunk_body(c, carry):
            col = pl.multiple_of(c * 128, 128)
            x = x_ref[:, pl.ds(col, 128)].astype(jnp.float32)

            # ---- slab 0: SiLU base branch ---------------------------------
            feat_ref[pl.ds(0, in_dim_p), pl.ds(col, 128)] = jax.nn.silu(x)

            # ---- uniform-knot (cardinal) B-spline bases --------------------
            # u: knot coordinate; j0: containing degree-0 interval; f in [0,1).
            u = (x - g0) * inv_h
            j0 = jnp.floor(u)
            f = u - j0

            # de Boor table on the fractional offset only; t = f + m hoisted
            # out of the k-loop (reused by every order):
            #   v[m] = N_p(f + m), m = 0..p (the only bases that can be nonzero)
            ts = [f + float(m) for m in range(p + 1)]
            v = [jnp.ones_like(f)]
            for k in range(1, p + 1):
                inv_k = 1.0 / k
                nv = []
                for m in range(k + 1):
                    acc = None
                    if m <= k - 1:
                        acc = ts[m] * v[m]
                    if m >= 1:
                        r = (float(k + 1) - ts[m]) * v[m - 1]
                        acc = r if acc is None else acc + r
                    nv.append(acc * inv_k)
                v = nv

            # ---- place v[m] into basis slot i = j0 - m ----------------------
            # Hoisted equality masks (exact: jnp.floor yields representable
            # integers — do NOT replace with an int cast of u).  Each slot is a
            # (p+1)-deep select chain with a 0.0 tail; x outside the extended
            # grid (all masks false) yields an all-zero basis row, matching the
            # half-open Cox–de Boor convention.
            eq = [j0 == float(c_) for c_ in range(n_masks)]

            for i in range(n_bases):
                b_i = jnp.where(eq[i + p], v[p], 0.0)
                for m in range(p - 1, -1, -1):
                    b_i = jnp.where(eq[i + m], v[m], b_i)
                feat_ref[pl.ds((i + 1) * in_dim_p, in_dim_p),
                         pl.ds(col, 128)] = b_i
            return carry

        lax.fori_loop(0, n_chunks, chunk_body, 0, unroll=True)

        # ---- single fused MXU matmul: (out, K) @ (K, tile_n) ----------------
        o_ref[...] = jnp.dot(
            w_ref[...], feat_ref[...],
            preferred_element_type=jnp.float32).astype(o_ref.dtype)

    return kernel


def kan_linear_pallas(x_unf, w_fused, kern_consts, *, max_tile_n=None):
    """x_unf: (in_dim_p, N) f32 — patches in lanes, N = B*out_h*out_w.
    w_fused: (out, (n_bases+1)*in_dim_p) f32.  Returns (out, N) f32."""
    ckp, n_cols = x_unf.shape
    out_dim, k_fused = w_fused.shape

    cap = _vmem_capacity_bytes()
    if max_tile_n is None:
        max_tile_n = _max_tile_for_vmem(ckp, k_fused, out_dim, cap)
    tile_n = _pick_tile_n(n_cols, max_tile_n)
    n_pad = _round_up(n_cols, tile_n)
    if n_pad != n_cols:
        # Padded patch columns produce unused outputs; sliced off below.
        x_unf = jnp.pad(x_unf, ((0, 0), (0, n_pad - n_cols)))

    kern = make_kan_linear_kernel(tile_n=tile_n, **kern_consts)

    # Explicit VMEM budget: double-buffered blocks + feature scratch + a small
    # constant allowance (per-chunk temporaries live in vregs, not VMEM),
    # capped per generation (v7x: 64 MiB per TensorCore).
    est = (2 * (ckp * tile_n * 4 + out_dim * tile_n * 4 + out_dim * k_fused * 4)
           + k_fused * tile_n * 4 + (4 << 20))
    vmem_cap = min(48 << 20, int(0.65 * cap))
    vmem_limit = int(min(vmem_cap, max(32 << 20, 2 * est)))

    out = pl.pallas_call(
        kern,
        out_shape=jax.ShapeDtypeStruct((out_dim, n_pad), jnp.float32),
        grid=(n_pad // tile_n,),
        in_specs=[
            pl.BlockSpec((ckp, tile_n), lambda l: (0, l)),
            # Resident weight (same block every step).
            # TODO(synk): mark with pipeline_mode=pl.Buffered(1) to drop its
            # unused second buffer once verified on all target generations.
            pl.BlockSpec((out_dim, k_fused), lambda l: (0, 0)),
        ],
        out_specs=pl.BlockSpec((out_dim, tile_n), lambda l: (0, l)),
        scratch_shapes=[pltpu.VMEM((k_fused, tile_n), jnp.float32)],
        compiler_params=pltpu.CompilerParams(
            dimension_semantics=("parallel",),
            vmem_limit_bytes=vmem_limit),
    )(x_unf, w_fused)

    return out[:, :n_cols]


# --------------------------------------------------------------------------
# Plain-JAX glue: unfold (F.unfold semantics, channel-major patch ordering,
# emitted directly in the kernel's lane-major layout), parameter init,
# layer forward, stacked module.
# --------------------------------------------------------------------------
def unfold_nchw_cols(x, kernel_size, stride, padding, dilation):
    """torch.nn.functional.unfold semantics, returned as (C*kh*kw, B*oh*ow):
    rows are channel-major patch elements, columns are batch-major patches."""
    B, C, H, W = x.shape
    kh, kw = kernel_size
    sh, sw = stride
    ph, pw = padding
    dh, dw = dilation

    xp = jnp.pad(x, ((0, 0), (0, 0), (ph, ph), (pw, pw)))
    Hp, Wp = H + 2 * ph, W + 2 * pw
    out_h = (Hp - dh * (kh - 1) - 1) // sh + 1
    out_w = (Wp - dw * (kw - 1) - 1) // sw + 1

    # Transpose the (small) padded input once so the kh*kw-expanded copy is
    # built directly in (C, kh*kw, B, oh, ow) order — no transpose of the
    # expanded array and no wrapper transpose on the kernel input.
    xt = jnp.transpose(xp, (1, 0, 2, 3))                 # (C, B, Hp, Wp)

    # TODO(synk): for large images, fuse this im2col into the Pallas kernel
    # (manual DMA of the kh*kw shifted row windows per lane tile) to avoid the
    # kh*kw-expanded HBM round trip.
    cols = []
    for i in range(kh):
        for j in range(kw):
            patch = xt[:, :,
                       i * dh: i * dh + sh * (out_h - 1) + 1: sh,
                       j * dw: j * dw + sw * (out_w - 1) + 1: sw]
            cols.append(patch)                           # (C, B, oh, ow)
    col = jnp.stack(cols, axis=1)                        # (C, kh*kw, B, oh, ow)
    col = col.reshape(C * kh * kw, B * out_h * out_w)    # (CK, B*L)
    return col, out_h, out_w


def init_kan_conv2d_params(key, in_channels, out_channels, kernel_size,
                           grid_size, spline_order, scale_base, scale_spline,
                           grid_range):
    """Deterministic synthetic init (shapes match the PyTorch module)."""
    kh, kw = _pair(kernel_size)
    in_dim = in_channels * kh * kw
    in_dim_p = _round_up(in_dim, 8)          # sublane-aligned feature slabs
    out_dim = out_channels
    n_bases = grid_size + spline_order

    k1, k2, k3 = jax.random.split(key, 3)
    bound = 1.0 / math.sqrt(in_dim)
    base_weight = scale_base * jax.random.uniform(
        k1, (out_dim, in_dim), jnp.float32, -bound, bound)
    spline_weight = 0.1 * jax.random.uniform(
        k2, (out_dim, in_dim, n_bases), jnp.float32, -bound, bound)
    spline_scaler = scale_spline * jax.random.uniform(
        k3, (out_dim, in_dim), jnp.float32, -bound, bound)
    # enable_standalone_scale_spline=True
    scaled_spline = spline_weight * spline_scaler[:, :, None]   # (out, in, nb)

    # Fused lane-major 2-D weight: [base | spline_0 | ... | spline_{nb-1}].
    # Each slab is zero-padded in_dim -> in_dim_p so the kernel's feature
    # slabs stay sublane-aligned; padded features hit zero weights (exact) —
    # any change to this packing must preserve that invariant.
    pad = in_dim_p - in_dim
    base_p = jnp.pad(base_weight, ((0, 0), (0, pad)))
    spl_p = jnp.pad(scaled_spline, ((0, 0), (0, pad), (0, 0)))
    w_fused = jnp.concatenate(
        [base_p] + [spl_p[:, :, j] for j in range(n_bases)], axis=1)

    h = (grid_range[1] - grid_range[0]) / grid_size
    grid_pts = [grid_range[0] + i * h
                for i in range(-spline_order, grid_size + spline_order + 1)]

    kern_consts = dict(in_dim_p=in_dim_p, n_bases=n_bases,
                       spline_order=spline_order,
                       grid_lo=float(grid_range[0]),
                       grid_hi=float(grid_range[1]),
                       grid_size=grid_size)

    return dict(w_fused=w_fused, in_dim=in_dim, in_dim_p=in_dim_p,
                out_channels=out_channels, kernel_size=(kh, kw),
                kern_consts=kern_consts,
                # unfused copies kept only for the pure-JAX reference check
                base_weight=base_weight, scaled_spline=scaled_spline,
                grid_pts=grid_pts)


def kan_conv2d_forward(x, params, cfg):
    """One KANConv2d layer (groups=1, padding_mode='zeros', no-effect bias)."""
    B = x.shape[0]
    x_unf, out_h, out_w = unfold_nchw_cols(x, params["kernel_size"],
                                           cfg["stride"], cfg["padding"],
                                           cfg["dilation"])   # (CK, B*L)
    ck = x_unf.shape[0]
    if params["in_dim_p"] != ck:
        x_unf = jnp.pad(x_unf, ((0, params["in_dim_p"] - ck), (0, 0)))
    y = kan_linear_pallas(x_unf, params["w_fused"], params["kern_consts"])
    # Kernel output (out_ch, B*L) is lane-dense; reshape to NCHW in the wrapper.
    y = y.reshape(params["out_channels"], B, out_h, out_w)
    return jnp.transpose(y, (1, 0, 2, 3))


# ---- pure-JAX reference of the same forward math (self-check only) --------
def _b_splines_ref(x2, grid_pts, spline_order):
    # Cox–de Boor on the explicit (non-uniform-capable) extended knot vector:
    # kept as the guard for the cardinal closed form used in the kernel.
    g = jnp.asarray(grid_pts, jnp.float32)
    xe = x2[:, :, None]
    bases = ((xe >= g[:-1]) & (xe < g[1:])).astype(jnp.float32)
    for k in range(1, spline_order + 1):
        bases = ((xe - g[: -(k + 1)]) / (g[k:-1] - g[: -(k + 1)])
                 * bases[..., :-1]
                 + (g[k + 1:] - xe) / (g[k + 1:] - g[1:-k]) * bases[..., 1:])
    return bases   # (N, in_dim, n_bases)


def _kan_conv2d_reference(x, params, cfg, spline_order):
    B = x.shape[0]
    x_unf, out_h, out_w = unfold_nchw_cols(x, params["kernel_size"],
                                           cfg["stride"], cfg["padding"],
                                           cfg["dilation"])   # (CK, B*L)
    x2 = x_unf.T                                              # (B*L, CK)
    base_out = jax.nn.silu(x2) @ params["base_weight"].T
    bs = _b_splines_ref(x2, params["grid_pts"], spline_order)
    spl_out = jnp.einsum("nib,oib->no", bs, params["scaled_spline"])
    y2 = base_out + spl_out                                   # (B*L, out)
    y = y2.T.reshape(params["out_channels"], B, out_h, out_w)
    return jnp.transpose(y, (1, 0, 2, 3))


class KANConv2dStack:
    """JAX/Pallas equivalent of the PyTorch KAN_conv2d module (forward only)."""

    def __init__(self, kwargs, key):
        layers_hidden = kwargs["layers_hidden"]
        kernel_sizes = kwargs["kernel_sizes"]
        strides = kwargs["strides"]
        paddings = kwargs["paddings"]
        self.grid_size = kwargs["grid_size"]
        self.spline_order = kwargs["spline_order"]
        scale_base = kwargs.get("scale_base", 1.0)
        scale_spline = kwargs.get("scale_spline", 1.0)
        grid_range = kwargs.get("grid_range", (-1, 1))

        self.layer_params = []
        self.layer_cfg = []
        keys = jax.random.split(key, len(layers_hidden) - 1)
        for idx, (cin, cout, ks, st, pad) in enumerate(
                zip(layers_hidden[:-1], layers_hidden[1:],
                    kernel_sizes, strides, paddings)):
            p = init_kan_conv2d_params(
                keys[idx], cin, cout, ks, self.grid_size, self.spline_order,
                scale_base, scale_spline, grid_range)
            self.layer_params.append(p)
            self.layer_cfg.append(dict(stride=_pair(st), padding=_pair(pad),
                                       dilation=(1, 1)))
            # TODO(synk): update_grid / regularization_loss not implemented
            # (training-time utilities, not part of the forward hot path).

    def __call__(self, x):
        for p, cfg in zip(self.layer_params, self.layer_cfg):
            x = kan_conv2d_forward(x, p, cfg)
        return x

    def reference(self, x):
        for p, cfg in zip(self.layer_params, self.layer_cfg):
            x = _kan_conv2d_reference(x, p, cfg, self.spline_order)
        return x


# --------------------------------------------------------------------------
if __name__ == "__main__":
    cfg = dict(
        layers_hidden=[4, 8, 8],
        kernel_sizes=[3, 3],
        strides=[1, 1],
        paddings=[1, 1],
        grid_size=5,
        spline_order=3,
        scale_noise=0.1,
        scale_base=1.0,
        scale_spline=1.0,
        base_activation="silu",
        grid_eps=0.02,
        grid_range=(-1, 1),
    )

    key = jax.random.PRNGKey(0)
    k_x, k_w = jax.random.split(key)
    x = jax.random.normal(k_x, (2, 4, 16, 16), dtype=jnp.float32)  # NCHW

    model = KANConv2dStack(cfg, k_w)
    fwd = jax.jit(model.__call__)

    y = fwd(x)
    jax.block_until_ready(y)
    assert y.shape == (2, 8, 16, 16), y.shape
    assert bool(jnp.all(jnp.isfinite(y)))

    # Cross-check the fused cardinal-B-spline Pallas path against a plain-JAX
    # Cox–de Boor reference of the same forward math (all f32 -> tight match).
    y_ref = jax.jit(model.reference)(x)
    jax.block_until_ready(y_ref)
    err = float(jnp.max(jnp.abs(y - y_ref)))
    scale = float(jnp.max(jnp.abs(y_ref))) + 1e-6
    assert err <= 3e-3 * scale + 1e-4, ("mismatch vs reference", err, scale)

    print("KERNEL_OK")
</pallas_src>

<mosaic_0001>
module attributes {stable_mosaic.version = 11 : i64} {
  func.func @kernel(%arg0: i32, %arg1: memref<40x256xf32, #tpu.memory_space<vmem>>, %arg2: memref<8x360xf32, #tpu.memory_space<vmem>>, %arg3: memref<8x256xf32, #tpu.memory_space<vmem>>, %arg4: memref<360x256xf32, #tpu.memory_space<vmem>>) attributes {dimension_semantics = [#tpu.dimension_semantics<parallel>], iteration_bounds = array<i64: 2>, scalar_prefetch = 0 : i64, scratch_operands = 1 : i64, tpu.core_type = #tpu.core_type<tc>, window_params = [{transform_indices = @transform_0, window_bounds = array<i64: 40, 256>}, {pipeline_mode = #tpu.pipeline_mode<synchronous>, transform_indices = @transform_1, window_bounds = array<i64: 8, 360>}, {transform_indices = @transform_2, window_bounds = array<i64: 8, 256>}]} {
    %c0_i32 = arith.constant 0 : i32
    %c128_i32 = arith.constant 128 : i32
    %0 = arith.muli %c0_i32, %c128_i32 : i32
    %1 = tpu.assume_multiple %0, 128 : i32
    %c0 = arith.constant 0 : index
    %2 = arith.index_cast %1 : i32 to index
    %3 = vector.load %arg1[%c0, %2] : memref<40x256xf32, #tpu.memory_space<vmem>>, vector<40x128xf32>
    %4 = arith.negf %3 : vector<40x128xf32>
    %5 = math.exp %4 : vector<40x128xf32>
    %cst = arith.constant 1.000000e+00 : f32
    %6 = vector.broadcast %cst : f32 to vector<40x128xf32>
    %7 = arith.addf %6, %5 : vector<40x128xf32>
    %8 = arith.divf %6, %7 : vector<40x128xf32>
    %9 = arith.mulf %3, %8 : vector<40x128xf32>
    %c0_0 = arith.constant 0 : index
    %10 = arith.index_cast %1 : i32 to index
    %11 = vector.load %arg4[%c0_0, %10] : memref<360x256xf32, #tpu.memory_space<vmem>>, vector<40x128xf32>
    tpu.vector_store %arg4[%c0_0, %10], %9 {strides = array<i32>} : memref<360x256xf32, #tpu.memory_space<vmem>>, vector<40x128xf32>,
    %cst_1 = arith.constant -2.200000e+00 : f32
    %12 = vector.broadcast %cst_1 : f32 to vector<40x128xf32>
    %13 = arith.subf %3, %12 : vector<40x128xf32>
    %cst_2 = arith.constant 2.500000e+00 : f32
    %14 = vector.broadcast %cst_2 : f32 to vector<40x128xf32>
    %15 = arith.mulf %13, %14 : vector<40x128xf32>
    %16 = math.floor %15 : vector<40x128xf32>
    %17 = arith.subf %15, %16 : vector<40x128xf32>
    %cst_3 = arith.constant 0.000000e+00 : f32
    %18 = vector.broadcast %cst_3 : f32 to vector<40x128xf32>
    %19 = arith.addf %17, %18 : vector<40x128xf32>
    %cst_4 = arith.constant 1.000000e+00 : f32
    %20 = vector.broadcast %cst_4 : f32 to vector<40x128xf32>
    %21 = arith.addf %17, %20 : vector<40x128xf32>
    %cst_5 = arith.constant 2.000000e+00 : f32
    %22 = vector.broadcast %cst_5 : f32 to vector<40x128xf32>
    %23 = arith.addf %17, %22 : vector<40x128xf32>
    %cst_6 = arith.constant 3.000000e+00 : f32
    %24 = vector.broadcast %cst_6 : f32 to vector<40x128xf32>
    %25 = arith.addf %17, %24 : vector<40x128xf32>
    %cst_7 = arith.constant 1.000000e+00 : f32
    %26 = vector.broadcast %cst_7 : f32 to vector<40x128xf32>
    %27 = arith.mulf %19, %26 : vector<40x128xf32>
    %cst_8 = arith.constant 1.000000e+00 : f32
    %28 = vector.broadcast %cst_8 : f32 to vector<40x128xf32>
    %29 = arith.mulf %27, %28 : vector<40x128xf32>
    %cst_9 = arith.constant 2.000000e+00 : f32
    %30 = vector.broadcast %cst_9 : f32 to vector<40x128xf32>
    %31 = arith.subf %30, %21 : vector<40x128xf32>
    %32 = arith.mulf %31, %26 : vector<40x128xf32>
    %cst_10 = arith.constant 1.000000e+00 : f32
    %33 = vector.broadcast %cst_10 : f32 to vector<40x128xf32>
    %34 = arith.mulf %32, %33 : vector<40x128xf32>
    %35 = arith.mulf %19, %29 : vector<40x128xf32>
    %cst_11 = arith.constant 5.000000e-01 : f32
    %36 = vector.broadcast %cst_11 : f32 to vector<40x128xf32>
    %37 = arith.mulf %35, %36 : vector<40x128xf32>
    %38 = arith.mulf %21, %34 : vector<40x128xf32>
    %cst_12 = arith.constant 3.000000e+00 : f32
    %39 = vector.broadcast %cst_12 : f32 to vector<40x128xf32>
    %40 = arith.subf %39, %21 : vector<40x128xf32>
    %41 = arith.mulf %40, %29 : vector<40x128xf32>
    %42 = arith.addf %38, %41 : vector<40x128xf32>
    %cst_13 = arith.constant 5.000000e-01 : f32
    %43 = vector.broadcast %cst_13 : f32 to vector<40x128xf32>
    %44 = arith.mulf %42, %43 : vector<40x128xf32>
    %cst_14 = arith.constant 3.000000e+00 : f32
    %45 = vector.broadcast %cst_14 : f32 to vector<40x128xf32>
    %46 = arith.subf %45, %23 : vector<40x128xf32>
    %47 = arith.mulf %46, %34 : vector<40x128xf32>
    %cst_15 = arith.constant 5.000000e-01 : f32
    %48 = vector.broadcast %cst_15 : f32 to vector<40x128xf32>
    %49 = arith.mulf %47, %48 : vector<40x128xf32>
    %50 = arith.mulf %19, %37 : vector<40x128xf32>
    %cst_16 = arith.constant 0.333333343 : f32
    %51 = vector.broadcast %cst_16 : f32 to vector<40x128xf32>
    %52 = arith.mulf %50, %51 : vector<40x128xf32>
    %53 = arith.mulf %21, %44 : vector<40x128xf32>
    %cst_17 = arith.constant 4.000000e+00 : f32
    %54 = vector.broadcast %cst_17 : f32 to vector<40x128xf32>
    %55 = arith.subf %54, %21 : vector<40x128xf32>
    %56 = arith.mulf %55, %37 : vector<40x128xf32>
    %57 = arith.addf %53, %56 : vector<40x128xf32>
    %cst_18 = arith.constant 0.333333343 : f32
    %58 = vector.broadcast %cst_18 : f32 to vector<40x128xf32>
    %59 = arith.mulf %57, %58 : vector<40x128xf32>
    %60 = arith.mulf %23, %49 : vector<40x128xf32>
    %cst_19 = arith.constant 4.000000e+00 : f32
    %61 = vector.broadcast %cst_19 : f32 to vector<40x128xf32>
    %62 = arith.subf %61, %23 : vector<40x128xf32>
    %63 = arith.mulf %62, %44 : vector<40x128xf32>
    %64 = arith.addf %60, %63 : vector<40x128xf32>
    %cst_20 = arith.constant 0.333333343 : f32
    %65 = vector.broadcast %cst_20 : f32 to vector<40x128xf32>
    %66 = arith.mulf %64, %65 : vector<40x128xf32>
    %cst_21 = arith.constant 4.000000e+00 : f32
    %67 = vector.broadcast %cst_21 : f32 to vector<40x128xf32>
    %68 = arith.subf %67, %25 : vector<40x128xf32>
    %69 = arith.mulf %68, %49 : vector<40x128xf32>
    %cst_22 = arith.constant 0.333333343 : f32
    %70 = vector.broadcast %cst_22 : f32 to vector<40x128xf32>
    %71 = arith.mulf %69, %70 : vector<40x128xf32>
    %cst_23 = arith.constant 0.000000e+00 : f32
    %72 = vector.broadcast %cst_23 : f32 to vector<40x128xf32>
    %73 = arith.cmpf oeq, %16, %72 : vector<40x128xf32>
    %cst_24 = arith.constant 1.000000e+00 : f32
    %74 = vector.broadcast %cst_24 : f32 to vector<40x128xf32>
    %75 = arith.cmpf oeq, %16, %74 : vector<40x128xf32>
    %cst_25 = arith.constant 2.000000e+00 : f32
    %76 = vector.broadcast %cst_25 : f32 to vector<40x128xf32>
    %77 = arith.cmpf oeq, %16, %76 : vector<40x128xf32>
    %cst_26 = arith.constant 3.000000e+00 : f32
    %78 = vector.broadcast %cst_26 : f32 to vector<40x128xf32>
    %79 = arith.cmpf oeq, %16, %78 : vector<40x128xf32>
    %cst_27 = arith.constant 4.000000e+00 : f32
    %80 = vector.broadcast %cst_27 : f32 to vector<40x128xf32>
    %81 = arith.cmpf oeq, %16, %80 : vector<40x128xf32>
    %cst_28 = arith.constant 5.000000e+00 : f32
    %82 = vector.broadcast %cst_28 : f32 to vector<40x128xf32>
    %83 = arith.cmpf oeq, %16, %82 : vector<40x128xf32>
    %cst_29 = arith.constant 6.000000e+00 : f32
    %84 = vector.broadcast %cst_29 : f32 to vector<40x128xf32>
    %85 = arith.cmpf oeq, %16, %84 : vector<40x128xf32>
    %cst_30 = arith.constant 7.000000e+00 : f32
    %86 = vector.broadcast %cst_30 : f32 to vector<40x128xf32>
    %87 = arith.cmpf oeq, %16, %86 : vector<40x128xf32>
    %cst_31 = arith.constant 8.000000e+00 : f32
    %88 = vector.broadcast %cst_31 : f32 to vector<40x128xf32>
    %89 = arith.cmpf oeq, %16, %88 : vector<40x128xf32>
    %cst_32 = arith.constant 9.000000e+00 : f32
    %90 = vector.broadcast %cst_32 : f32 to vector<40x128xf32>
    %91 = arith.cmpf oeq, %16, %90 : vector<40x128xf32>
    %cst_33 = arith.constant 1.000000e+01 : f32
    %92 = vector.broadcast %cst_33 : f32 to vector<40x128xf32>
    %93 = arith.cmpf oeq, %16, %92 : vector<40x128xf32>
    %cst_34 = arith.constant 0.000000e+00 : f32
    %94 = vector.broadcast %cst_34 : f32 to vector<40x128xf32>
    %95 = arith.select %79, %71, %94 : vector<40x128xi1>, vector<40x128xf32>
    %96 = arith.select %77, %66, %95 : vector<40x128xi1>, vector<40x128xf32>
    %97 = arith.select %75, %59, %96 : vector<40x128xi1>, vector<40x128xf32>
    %98 = arith.select %73, %52, %97 : vector<40x128xi1>, vector<40x128xf32>
    %c40 = arith.constant 40 : index
    %99 = arith.index_cast %1 : i32 to index
    %100 = vector.load %arg4[%c40, %99] : memref<360x256xf32, #tpu.memory_space<vmem>>, vector<40x128xf32>
    tpu.vector_store %arg4[%c40, %99], %98 {strides = array<i32>} : memref<360x256xf32, #tpu.memory_space<vmem>>, vector<40x128xf32>,
    %cst_35 = arith.constant 0.000000e+00 : f32
    %101 = vector.broadcast %cst_35 : f32 to vector<40x128xf32>
    %102 = arith.select %81, %71, %101 : vector<40x128xi1>, vector<40x128xf32>
    %103 = arith.select %79, %66, %102 : vector<40x128xi1>, vector<40x128xf32>
    %104 = arith.select %77, %59, %103 : vector<40x128xi1>, vector<40x128xf32>
    %105 = arith.select %75, %52, %104 : vector<40x128xi1>, vector<40x128xf32>
    %c80 = arith.constant 80 : index
    %106 = arith.index_cast %1 : i32 to index
    %107 = vector.load %arg4[%c80, %106] : memref<360x256xf32, #tpu.memory_space<vmem>>, vector<40x128xf32>
    tpu.vector_store %arg4[%c80, %106], %105 {strides = array<i32>} : memref<360x256xf32, #tpu.memory_space<vmem>>, vector<40x128xf32>,
    %cst_36 = arith.constant 0.000000e+00 : f32
    %108 = vector.broadcast %cst_36 : f32 to vector<40x128xf32>
    %109 = arith.select %83, %71, %108 : vector<40x128xi1>, vector<40x128xf32>
    %110 = arith.select %81, %66, %109 : vector<40x128xi1>, vector<40x128xf32>
    %111 = arith.select %79, %59, %110 : vector<40x128xi1>, vector<40x128xf32>
    %112 = arith.select %77, %52, %111 : vector<40x128xi1>, vector<40x128xf32>
    %c120 = arith.constant 120 : index
    %113 = arith.index_cast %1 : i32 to index
    %114 = vector.load %arg4[%c120, %113] : memref<360x256xf32, #tpu.memory_space<vmem>>, vector<40x128xf32>
    tpu.vector_store %arg4[%c120, %113], %112 {strides = array<i32>} : memref<360x256xf32, #tpu.memory_space<vmem>>, vector<40x128xf32>,
    %cst_37 = arith.constant 0.000000e+00 : f32
    %115 = vector.broadcast %cst_37 : f32 to vector<40x128xf32>
    %116 = arith.select %85, %71, %115 : vector<40x128xi1>, vector<40x128xf32>
    %117 = arith.select %83, %66, %116 : vector<40x128xi1>, vector<40x128xf32>
    %118 = arith.select %81, %59, %117 : vector<40x128xi1>, vector<40x128xf32>
    %119 = arith.select %79, %52, %118 : vector<40x128xi1>, vector<40x128xf32>
    %c160 = arith.constant 160 : index
    %120 = arith.index_cast %1 : i32 to index
    %121 = vector.load %arg4[%c160, %120] : memref<360x256xf32, #tpu.memory_space<vmem>>, vector<40x128xf32>
    tpu.vector_store %arg4[%c160, %120], %119 {strides = array<i32>} : memref<360x256xf32, #tpu.memory_space<vmem>>, vector<40x128xf32>,
    %cst_38 = arith.constant 0.000000e+00 : f32
    %122 = vector.broadcast %cst_38 : f32 to vector<40x128xf32>
    %123 = arith.select %87, %71, %122 : vector<40x128xi1>, vector<40x128xf32>
    %124 = arith.select %85, %66, %123 : vector<40x128xi1>, vector<40x128xf32>
    %125 = arith.select %83, %59, %124 : vector<40x128xi1>, vector<40x128xf32>
    %126 = arith.select %81, %52, %125 : vector<40x128xi1>, vector<40x128xf32>
    %c200 = arith.constant 200 : index
    %127 = arith.index_cast %1 : i32 to index
    %128 = vector.load %arg4[%c200, %127] : memref<360x256xf32, #tpu.memory_space<vmem>>, vector<40x128xf32>
    tpu.vector_store %arg4[%c200, %127], %126 {strides = array<i32>} : memref<360x256xf32, #tpu.memory_space<vmem>>, vector<40x128xf32>,
    %cst_39 = arith.constant 0.000000e+00 : f32
    %129 = vector.broadcast %cst_39 : f32 to vector<40x128xf32>
    %130 = arith.select %89, %71, %129 : vector<40x128xi1>, vector<40x128xf32>
    %131 = arith.select %87, %66, %130 : vector<40x128xi1>, vector<40x128xf32>
    %132 = arith.select %85, %59, %131 : vector<40x128xi1>, vector<40x128xf32>
    %133 = arith.select %83, %52, %132 : vector<40x128xi1>, vector<40x128xf32>
    %c240 = arith.constant 240 : index
    %134 = arith.index_cast %1 : i32 to index
    %135 = vector.load %arg4[%c240, %134] : memref<360x256xf32, #tpu.memory_space<vmem>>, vector<40x128xf32>
    tpu.vector_store %arg4[%c240, %134], %133 {strides = array<i32>} : memref<360x256xf32, #tpu.memory_space<vmem>>, vector<40x128xf32>,
    %cst_40 = arith.constant 0.000000e+00 : f32
    %136 = vector.broadcast %cst_40 : f32 to vector<40x128xf32>
    %137 = arith.select %91, %71, %136 : vector<40x128xi1>, vector<40x128xf32>
    %138 = arith.select %89, %66, %137 : vector<40x128xi1>, vector<40x128xf32>
    %139 = arith.select %87, %59, %138 : vector<40x128xi1>, vector<40x128xf32>
    %140 = arith.select %85, %52, %139 : vector<40x128xi1>, vector<40x128xf32>
    %c280 = arith.constant 280 : index
    %141 = arith.index_cast %1 : i32 to index
    %142 = vector.load %arg4[%c280, %141] : memref<360x256xf32, #tpu.memory_space<vmem>>, vector<40x128xf32>
    tpu.vector_store %arg4[%c280, %141], %140 {strides = array<i32>} : memref<360x256xf32, #tpu.memory_space<vmem>>, vector<40x128xf32>,
    %cst_41 = arith.constant 0.000000e+00 : f32
    %143 = vector.broadcast %cst_41 : f32 to vector<40x128xf32>
    %144 = arith.select %93, %71, %143 : vector<40x128xi1>, vector<40x128xf32>
    %145 = arith.select %91, %66, %144 : vector<40x128xi1>, vector<40x128xf32>
    %146 = arith.select %89, %59, %145 : vector<40x128xi1>, vector<40x128xf32>
    %147 = arith.select %87, %52, %146 : vector<40x128xi1>, vector<40x128xf32>
    %c320 = arith.constant 320 : index
    %148 = arith.index_cast %1 : i32 to index
    %149 = vector.load %arg4[%c320, %148] : memref<360x256xf32, #tpu.memory_space<vmem>>, vector<40x128xf32>
    tpu.vector_store %arg4[%c320, %148], %147 {strides = array<i32>} : memref<360x256xf32, #tpu.memory_space<vmem>>, vector<40x128xf32>,
    %c1_i32 = arith.constant 1 : i32
    %c128_i32_42 = arith.constant 128 : i32
    %150 = arith.muli %c1_i32, %c128_i32_42 : i32
    %151 = tpu.assume_multiple %150, 128 : i32
    %c0_43 = arith.constant 0 : index
    %152 = arith.index_cast %151 : i32 to index
    %153 = vector.load %arg1[%c0_43, %152] : memref<40x256xf32, #tpu.memory_space<vmem>>, vector<40x128xf32>
    %154 = arith.negf %153 : vector<40x128xf32>
    %155 = math.exp %154 : vector<40x128xf32>
    %cst_44 = arith.constant 1.000000e+00 : f32
    %156 = vector.broadcast %cst_44 : f32 to vector<40x128xf32>
    %157 = arith.addf %156, %155 : vector<40x128xf32>
    %158 = arith.divf %156, %157 : vector<40x128xf32>
    %159 = arith.mulf %153, %158 : vector<40x128xf32>
    %c0_45 = arith.constant 0 : index
    %160 = arith.index_cast %151 : i32 to index
    %161 = vector.load %arg4[%c0_45, %160] : memref<360x256xf32, #tpu.memory_space<vmem>>, vector<40x128xf32>
    tpu.vector_store %arg4[%c0_45, %160], %159 {strides = array<i32>} : memref<360x256xf32, #tpu.memory_space<vmem>>, vector<40x128xf32>,
    %cst_46 = arith.constant -2.200000e+00 : f32
    %162 = vector.broadcast %cst_46 : f32 to vector<40x128xf32>
    %163 = arith.subf %153, %162 : vector<40x128xf32>
    %cst_47 = arith.constant 2.500000e+00 : f32
    %164 = vector.broadcast %cst_47 : f32 to vector<40x128xf32>
    %165 = arith.mulf %163, %164 : vector<40x128xf32>
    %166 = math.floor %165 : vector<40x128xf32>
    %167 = arith.subf %165, %166 : vector<40x128xf32>
    %cst_48 = arith.constant 0.000000e+00 : f32
    %168 = vector.broadcast %cst_48 : f32 to vector<40x128xf32>
    %169 = arith.addf %167, %168 : vector<40x128xf32>
    %cst_49 = arith.constant 1.000000e+00 : f32
    %170 = vector.broadcast %cst_49 : f32 to vector<40x128xf32>
    %171 = arith.addf %167, %170 : vector<40x128xf32>
    %cst_50 = arith.constant 2.000000e+00 : f32
    %172 = vector.broadcast %cst_50 : f32 to vector<40x128xf32>
    %173 = arith.addf %167, %172 : vector<40x128xf32>
    %cst_51 = arith.constant 3.000000e+00 : f32
    %174 = vector.broadcast %cst_51 : f32 to vector<40x128xf32>
    %175 = arith.addf %167, %174 : vector<40x128xf32>
    %cst_52 = arith.constant 1.000000e+00 : f32
    %176 = vector.broadcast %cst_52 : f32 to vector<40x128xf32>
    %177 = arith.mulf %169, %176 : vector<40x128xf32>
    %cst_53 = arith.constant 1.000000e+00 : f32
    %178 = vector.broadcast %cst_53 : f32 to vector<40x128xf32>
    %179 = arith.mulf %177, %178 : vector<40x128xf32>
    %cst_54 = arith.constant 2.000000e+00 : f32
    %180 = vector.broadcast %cst_54 : f32 to vector<40x128xf32>
    %181 = arith.subf %180, %171 : vector<40x128xf32>
    %182 = arith.mulf %181, %176 : vector<40x128xf32>
    %cst_55 = arith.constant 1.000000e+00 : f32
    %183 = vector.broadcast %cst_55 : f32 to vector<40x128xf32>
    %184 = arith.mulf %182, %183 : vector<40x128xf32>
    %185 = arith.mulf %169, %179 : vector<40x128xf32>
    %cst_56 = arith.constant 5.000000e-01 : f32
    %186 = vector.broadcast %cst_56 : f32 to vector<40x128xf32>
    %187 = arith.mulf %185, %186 : vector<40x128xf32>
    %188 = arith.mulf %171, %184 : vector<40x128xf32>
    %cst_57 = arith.constant 3.000000e+00 : f32
    %189 = vector.broadcast %cst_57 : f32 to vector<40x128xf32>
    %190 = arith.subf %189, %171 : vector<40x128xf32>
    %191 = arith.mulf %190, %179 : vector<40x128xf32>
    %192 = arith.addf %188, %191 : vector<40x128xf32>
    %cst_58 = arith.constant 5.000000e-01 : f32
    %193 = vector.broadcast %cst_58 : f32 to vector<40x128xf32>
    %194 = arith.mulf %192, %193 : vector<40x128xf32>
    %cst_59 = arith.constant 3.000000e+00 : f32
    %195 = vector.broadcast %cst_59 : f32 to vector<40x128xf32>
    %196 = arith.subf %195, %173 : vector<40x128xf32>
    %197 = arith.mulf %196, %184 : vector<40x128xf32>
    %cst_60 = arith.constant 5.000000e-01 : f32
    %198 = vector.broadcast %cst_60 : f32 to vector<40x128xf32>
    %199 = arith.mulf %197, %198 : vector<40x128xf32>
    %200 = arith.mulf %169, %187 : vector<40x128xf32>
    %cst_61 = arith.constant 0.333333343 : f32
    %201 = vector.broadcast %cst_61 : f32 to vector<40x128xf32>
    %202 = arith.mulf %200, %201 : vector<40x128xf32>
    %203 = arith.mulf %171, %194 : vector<40x128xf32>
    %cst_62 = arith.constant 4.000000e+00 : f32
    %204 = vector.broadcast %cst_62 : f32 to vector<40x128xf32>
    %205 = arith.subf %204, %171 : vector<40x128xf32>
    %206 = arith.mulf %205, %187 : vector<40x128xf32>
    %207 = arith.addf %203, %206 : vector<40x128xf32>
    %cst_63 = arith.constant 0.333333343 : f32
    %208 = vector.broadcast %cst_63 : f32 to vector<40x128xf32>
    %209 = arith.mulf %207, %208 : vector<40x128xf32>
    %210 = arith.mulf %173, %199 : vector<40x128xf32>
    %cst_64 = arith.constant 4.000000e+00 : f32
    %211 = vector.broadcast %cst_64 : f32 to vector<40x128xf32>
    %212 = arith.subf %211, %173 : vector<40x128xf32>
    %213 = arith.mulf %212, %194 : vector<40x128xf32>
    %214 = arith.addf %210, %213 : vector<40x128xf32>
    %cst_65 = arith.constant 0.333333343 : f32
    %215 = vector.broadcast %cst_65 : f32 to vector<40x128xf32>
    %216 = arith.mulf %214, %215 : vector<40x128xf32>
    %cst_66 = arith.constant 4.000000e+00 : f32
    %217 = vector.broadcast %cst_66 : f32 to vector<40x128xf32>
    %218 = arith.subf %217, %175 : vector<40x128xf32>
    %219 = arith.mulf %218, %199 : vector<40x128xf32>
    %cst_67 = arith.constant 0.333333343 : f32
    %220 = vector.broadcast %cst_67 : f32 to vector<40x128xf32>
    %221 = arith.mulf %219, %220 : vector<40x128xf32>
    %cst_68 = arith.constant 0.000000e+00 : f32
    %222 = vector.broadcast %cst_68 : f32 to vector<40x128xf32>
    %223 = arith.cmpf oeq, %166, %222 : vector<40x128xf32>
    %cst_69 = arith.constant 1.000000e+00 : f32
    %224 = vector.broadcast %cst_69 : f32 to vector<40x128xf32>
    %225 = arith.cmpf oeq, %166, %224 : vector<40x128xf32>
    %cst_70 = arith.constant 2.000000e+00 : f32
    %226 = vector.broadcast %cst_70 : f32 to vector<40x128xf32>
    %227 = arith.cmpf oeq, %166, %226 : vector<40x128xf32>
    %cst_71 = arith.constant 3.000000e+00 : f32
    %228 = vector.broadcast %cst_71 : f32 to vector<40x128xf32>
    %229 = arith.cmpf oeq, %166, %228 : vector<40x128xf32>
    %cst_72 = arith.constant 4.000000e+00 : f32
    %230 = vector.broadcast %cst_72 : f32 to vector<40x128xf32>
    %231 = arith.cmpf oeq, %166, %230 : vector<40x128xf32>
    %cst_73 = arith.constant 5.000000e+00 : f32
    %232 = vector.broadcast %cst_73 : f32 to vector<40x128xf32>
    %233 = arith.cmpf oeq, %166, %232 : vector<40x128xf32>
    %cst_74 = arith.constant 6.000000e+00 : f32
    %234 = vector.broadcast %cst_74 : f32 to vector<40x128xf32>
    %235 = arith.cmpf oeq, %166, %234 : vector<40x128xf32>
    %cst_75 = arith.constant 7.000000e+00 : f32
    %236 = vector.broadcast %cst_75 : f32 to vector<40x128xf32>
    %237 = arith.cmpf oeq, %166, %236 : vector<40x128xf32>
    %cst_76 = arith.constant 8.000000e+00 : f32
    %238 = vector.broadcast %cst_76 : f32 to vector<40x128xf32>
    %239 = arith.cmpf oeq, %166, %238 : vector<40x128xf32>
    %cst_77 = arith.constant 9.000000e+00 : f32
    %240 = vector.broadcast %cst_77 : f32 to vector<40x128xf32>
    %241 = arith.cmpf oeq, %166, %240 : vector<40x128xf32>
    %cst_78 = arith.constant 1.000000e+01 : f32
    %242 = vector.broadcast %cst_78 : f32 to vector<40x128xf32>
    %243 = arith.cmpf oeq, %166, %242 : vector<40x128xf32>
    %cst_79 = arith.constant 0.000000e+00 : f32
    %244 = vector.broadcast %cst_79 : f32 to vector<40x128xf32>
    %245 = arith.select %229, %221, %244 : vector<40x128xi1>, vector<40x128xf32>
    %246 = arith.select %227, %216, %245 : vector<40x128xi1>, vector<40x128xf32>
    %247 = arith.select %225, %209, %246 : vector<40x128xi1>, vector<40x128xf32>
    %248 = arith.select %223, %202, %247 : vector<40x128xi1>, vector<40x128xf32>
    %c40_80 = arith.constant 40 : index
    %249 = arith.index_cast %151 : i32 to index
    %250 = vector.load %arg4[%c40_80, %249] : memref<360x256xf32, #tpu.memory_space<vmem>>, vector<40x128xf32>
    tpu.vector_store %arg4[%c40_80, %249], %248 {strides = array<i32>} : memref<360x256xf32, #tpu.memory_space<vmem>>, vector<40x128xf32>,
    %cst_81 = arith.constant 0.000000e+00 : f32
    %251 = vector.broadcast %cst_81 : f32 to vector<40x128xf32>
    %252 = arith.select %231, %221, %251 : vector<40x128xi1>, vector<40x128xf32>
    %253 = arith.select %229, %216, %252 : vector<40x128xi1>, vector<40x128xf32>
    %254 = arith.select %227, %209, %253 : vector<40x128xi1>, vector<40x128xf32>
    %255 = arith.select %225, %202, %254 : vector<40x128xi1>, vector<40x128xf32>
    %c80_82 = arith.constant 80 : index
    %256 = arith.index_cast %151 : i32 to index
    %257 = vector.load %arg4[%c80_82, %256] : memref<360x256xf32, #tpu.memory_space<vmem>>, vector<40x128xf32>
    tpu.vector_store %arg4[%c80_82, %256], %255 {strides = array<i32>} : memref<360x256xf32, #tpu.memory_space<vmem>>, vector<40x128xf32>,
    %cst_83 = arith.constant 0.000000e+00 : f32
    %258 = vector.broadcast %cst_83 : f32 to vector<40x128xf32>
    %259 = arith.select %233, %221, %258 : vector<40x128xi1>, vector<40x128xf32>
    %260 = arith.select %231, %216, %259 : vector<40x128xi1>, vector<40x128xf32>
    %261 = arith.select %229, %209, %260 : vector<40x128xi1>, vector<40x128xf32>
    %262 = arith.select %227, %202, %261 : vector<40x128xi1>, vector<40x128xf32>
    %c120_84 = arith.constant 120 : index
    %263 = arith.index_cast %151 : i32 to index
    %264 = vector.load %arg4[%c120_84, %263] : memref<360x256xf32, #tpu.memory_space<vmem>>, vector<40x128xf32>
    tpu.vector_store %arg4[%c120_84, %263], %262 {strides = array<i32>} : memref<360x256xf32, #tpu.memory_space<vmem>>, vector<40x128xf32>,
    %cst_85 = arith.constant 0.000000e+00 : f32
    %265 = vector.broadcast %cst_85 : f32 to vector<40x128xf32>
    %266 = arith.select %235, %221, %265 : vector<40x128xi1>, vector<40x128xf32>
    %267 = arith.select %233, %216, %266 : vector<40x128xi1>, vector<40x128xf32>
    %268 = arith.select %231, %209, %267 : vector<40x128xi1>, vector<40x128xf32>
    %269 = arith.select %229, %202, %268 : vector<40x128xi1>, vector<40x128xf32>
    %c160_86 = arith.constant 160 : index
    %270 = arith.index_cast %151 : i32 to index
    %271 = vector.load %arg4[%c160_86, %270] : memref<360x256xf32, #tpu.memory_space<vmem>>, vector<40x128xf32>
    tpu.vector_store %arg4[%c160_86, %270], %269 {strides = array<i32>} : memref<360x256xf32, #tpu.memory_space<vmem>>, vector<40x128xf32>,
    %cst_87 = arith.constant 0.000000e+00 : f32
    %272 = vector.broadcast %cst_87 : f32 to vector<40x128xf32>
    %273 = arith.select %237, %221, %272 : vector<40x128xi1>, vector<40x128xf32>
    %274 = arith.select %235, %216, %273 : vector<40x128xi1>, vector<40x128xf32>
    %275 = arith.select %233, %209, %274 : vector<40x128xi1>, vector<40x128xf32>
    %276 = arith.select %231, %202, %275 : vector<40x128xi1>, vector<40x128xf32>
    %c200_88 = arith.constant 200 : index
    %277 = arith.index_cast %151 : i32 to index
    %278 = vector.load %arg4[%c200_88, %277] : memref<360x256xf32, #tpu.memory_space<vmem>>, vector<40x128xf32>
    tpu.vector_store %arg4[%c200_88, %277], %276 {strides = array<i32>} : memref<360x256xf32, #tpu.memory_space<vmem>>, vector<40x128xf32>,
    %cst_89 = arith.constant 0.000000e+00 : f32
    %279 = vector.broadcast %cst_89 : f32 to vector<40x128xf32>
    %280 = arith.select %239, %221, %279 : vector<40x128xi1>, vector<40x128xf32>
    %281 = arith.select %237, %216, %280 : vector<40x128xi1>, vector<40x128xf32>
    %282 = arith.select %235, %209, %281 : vector<40x128xi1>, vector<40x128xf32>
    %283 = arith.select %233, %202, %282 : vector<40x128xi1>, vector<40x128xf32>
    %c240_90 = arith.constant 240 : index
    %284 = arith.index_cast %151 : i32 to index
    %285 = vector.load %arg4[%c240_90, %284] : memref<360x256xf32, #tpu.memory_space<vmem>>, vector<40x128xf32>
    tpu.vector_store %arg4[%c240_90, %284], %283 {strides = array<i32>} : memref<360x256xf32, #tpu.memory_space<vmem>>, vector<40x128xf32>,
    %cst_91 = arith.constant 0.000000e+00 : f32
    %286 = vector.broadcast %cst_91 : f32 to vector<40x128xf32>
    %287 = arith.select %241, %221, %286 : vector<40x128xi1>, vector<40x128xf32>
    %288 = arith.select %239, %216, %287 : vector<40x128xi1>, vector<40x128xf32>
    %289 = arith.select %237, %209, %288 : vector<40x128xi1>, vector<40x128xf32>
    %290 = arith.select %235, %202, %289 : vector<40x128xi1>, vector<40x128xf32>
    %c280_92 = arith.constant 280 : index
    %291 = arith.index_cast %151 : i32 to index
    %292 = vector.load %arg4[%c280_92, %291] : memref<360x256xf32, #tpu.memory_space<vmem>>, vector<40x128xf32>
    tpu.vector_store %arg4[%c280_92, %291], %290 {strides = array<i32>} : memref<360x256xf32, #tpu.memory_space<vmem>>, vector<40x128xf32>,
    %cst_93 = arith.constant 0.000000e+00 : f32
    %293 = vector.broadcast %cst_93 : f32 to vector<40x128xf32>
    %294 = arith.select %243, %221, %293 : vector<40x128xi1>, vector<40x128xf32>
    %295 = arith.select %241, %216, %294 : vector<40x128xi1>, vector<40x128xf32>
    %296 = arith.select %239, %209, %295 : vector<40x128xi1>, vector<40x128xf32>
    %297 = arith.select %237, %202, %296 : vector<40x128xi1>, vector<40x128xf32>
    %c320_94 = arith.constant 320 : index
    %298 = arith.index_cast %151 : i32 to index
    %299 = vector.load %arg4[%c320_94, %298] : memref<360x256xf32, #tpu.memory_space<vmem>>, vector<40x128xf32>
    tpu.vector_store %arg4[%c320_94, %298], %297 {strides = array<i32>} : memref<360x256xf32, #tpu.memory_space<vmem>>, vector<40x128xf32>,
    %c2_i32 = arith.constant 2 : i32
    %c0_95 = arith.constant 0 : index
    %c0_96 = arith.constant 0 : index
    %300 = vector.load %arg2[%c0_95, %c0_96] : memref<8x360xf32, #tpu.memory_space<vmem>>, vector<8x360xf32>
    %c0_97 = arith.constant 0 : index
    %c0_98 = arith.constant 0 : index
    %301 = vector.load %arg4[%c0_97, %c0_98] : memref<360x256xf32, #tpu.memory_space<vmem>>, vector<360x256xf32>
    %cst_99 = arith.constant dense<0.000000e+00> : vector<8x256xf32>
    %302 = tpu.matmul %300, %301, %cst_99 {dimension_numbers = #tpu.dot_dimension_numbers<[1], [0], [0], [1], [0, 0, 1, 1], [], []>} : vector<8x360xf32>, vector<360x256xf32>, vector<8x256xf32> -> vector<8x256xf32>
    %c0_100 = arith.constant 0 : index
    %c0_101 = arith.constant 0 : index
    %303 = vector.load %arg3[%c0_100, %c0_101] : memref<8x256xf32, #tpu.memory_space<vmem>>, vector<8x256xf32>
    tpu.vector_store %arg3[%c0_100, %c0_101], %302 {strides = array<i32>} : memref<8x256xf32, #tpu.memory_space<vmem>>, vector<8x256xf32>,
    return
  }
  func.func @transform_0(%arg0: i32) -> (i32, i32) {
    %c0_i32 = arith.constant 0 : i32
    %c0_i32_0 = arith.constant 0 : i32
    return %c0_i32, %arg0 : i32, i32
  }
  func.func @transform_1(%arg0: i32) -> (i32, i32) {
    %c0_i32 = arith.constant 0 : i32
    %c0_i32_0 = arith.constant 0 : i32
    %c0_i32_1 = arith.constant 0 : i32
    return %c0_i32, %c0_i32_0 : i32, i32
  }
  func.func @transform_2(%arg0: i32) -> (i32, i32) {
    %c0_i32 = arith.constant 0 : i32
    %c0_i32_0 = arith.constant 0 : i32
    return %c0_i32, %arg0 : i32, i32
  }
}

module attributes {stable_mosaic.version = 11 : i64} {
  func.func @kernel(%arg0: i32, %arg1: memref<72x256xf32, #tpu.memory_space<vmem>>, %arg2: memref<8x648xf32, #tpu.memory_space<vmem>>, %arg3: memref<8x256xf32, #tpu.memory_space<vmem>>, %arg4: memref<648x256xf32, #tpu.memory_space<vmem>>) attributes {dimension_semantics = [#tpu.dimension_semantics<parallel>], iteration_bounds = array<i64: 2>, scalar_prefetch = 0 : i64, scratch_operands = 1 : i64, tpu.core_type = #tpu.core_type<tc>, window_params = [{transform_indices = @transform_0, window_bounds = array<i64: 72, 256>}, {pipeline_mode = #tpu.pipeline_mode<synchronous>, transform_indices = @transform_1, window_bounds = array<i64: 8, 648>}, {transform_indices = @transform_2, window_bounds = array<i64: 8, 256>}]} {
    %c0_i32 = arith.constant 0 : i32
    %c128_i32 = arith.constant 128 : i32
    %0 = arith.muli %c0_i32, %c128_i32 : i32
    %1 = tpu.assume_multiple %0, 128 : i32
    %c0 = arith.constant 0 : index
    %2 = arith.index_cast %1 : i32 to index
    %3 = vector.load %arg1[%c0, %2] : memref<72x256xf32, #tpu.memory_space<vmem>>, vector<72x128xf32>
    %4 = arith.negf %3 : vector<72x128xf32>
    %5 = math.exp %4 : vector<72x128xf32>
    %cst = arith.constant 1.000000e+00 : f32
    %6 = vector.broadcast %cst : f32 to vector<72x128xf32>
    %7 = arith.addf %6, %5 : vector<72x128xf32>
    %8 = arith.divf %6, %7 : vector<72x128xf32>
    %9 = arith.mulf %3, %8 : vector<72x128xf32>
    %c0_0 = arith.constant 0 : index
    %10 = arith.index_cast %1 : i32 to index
    %11 = vector.load %arg4[%c0_0, %10] : memref<648x256xf32, #tpu.memory_space<vmem>>, vector<72x128xf32>
    tpu.vector_store %arg4[%c0_0, %10], %9 {strides = array<i32>} : memref<648x256xf32, #tpu.memory_space<vmem>>, vector<72x128xf32>,
    %cst_1 = arith.constant -2.200000e+00 : f32
    %12 = vector.broadcast %cst_1 : f32 to vector<72x128xf32>
    %13 = arith.subf %3, %12 : vector<72x128xf32>
    %cst_2 = arith.constant 2.500000e+00 : f32
    %14 = vector.broadcast %cst_2 : f32 to vector<72x128xf32>
    %15 = arith.mulf %13, %14 : vector<72x128xf32>
    %16 = math.floor %15 : vector<72x128xf32>
    %17 = arith.subf %15, %16 : vector<72x128xf32>
    %cst_3 = arith.constant 0.000000e+00 : f32
    %18 = vector.broadcast %cst_3 : f32 to vector<72x128xf32>
    %19 = arith.addf %17, %18 : vector<72x128xf32>
    %cst_4 = arith.constant 1.000000e+00 : f32
    %20 = vector.broadcast %cst_4 : f32 to vector<72x128xf32>
    %21 = arith.addf %17, %20 : vector<72x128xf32>
    %cst_5 = arith.constant 2.000000e+00 : f32
    %22 = vector.broadcast %cst_5 : f32 to vector<72x128xf32>
    %23 = arith.addf %17, %22 : vector<72x128xf32>
    %cst_6 = arith.constant 3.000000e+00 : f32
    %24 = vector.broadcast %cst_6 : f32 to vector<72x128xf32>
    %25 = arith.addf %17, %24 : vector<72x128xf32>
    %cst_7 = arith.constant 1.000000e+00 : f32
    %26 = vector.broadcast %cst_7 : f32 to vector<72x128xf32>
    %27 = arith.mulf %19, %26 : vector<72x128xf32>
    %cst_8 = arith.constant 1.000000e+00 : f32
    %28 = vector.broadcast %cst_8 : f32 to vector<72x128xf32>
    %29 = arith.mulf %27, %28 : vector<72x128xf32>
    %cst_9 = arith.constant 2.000000e+00 : f32
    %30 = vector.broadcast %cst_9 : f32 to vector<72x128xf32>
    %31 = arith.subf %30, %21 : vector<72x128xf32>
    %32 = arith.mulf %31, %26 : vector<72x128xf32>
    %cst_10 = arith.constant 1.000000e+00 : f32
    %33 = vector.broadcast %cst_10 : f32 to vector<72x128xf32>
    %34 = arith.mulf %32, %33 : vector<72x128xf32>
    %35 = arith.mulf %19, %29 : vector<72x128xf32>
    %cst_11 = arith.constant 5.000000e-01 : f32
    %36 = vector.broadcast %cst_11 : f32 to vector<72x128xf32>
    %37 = arith.mulf %35, %36 : vector<72x128xf32>
    %38 = arith.mulf %21, %34 : vector<72x128xf32>
    %cst_12 = arith.constant 3.000000e+00 : f32
    %39 = vector.broadcast %cst_12 : f32 to vector<72x128xf32>
    %40 = arith.subf %39, %21 : vector<72x128xf32>
    %41 = arith.mulf %40, %29 : vector<72x128xf32>
    %42 = arith.addf %38, %41 : vector<72x128xf32>
    %cst_13 = arith.constant 5.000000e-01 : f32
    %43 = vector.broadcast %cst_13 : f32 to vector<72x128xf32>
    %44 = arith.mulf %42, %43 : vector<72x128xf32>
    %cst_14 = arith.constant 3.000000e+00 : f32
    %45 = vector.broadcast %cst_14 : f32 to vector<72x128xf32>
    %46 = arith.subf %45, %23 : vector<72x128xf32>
    %47 = arith.mulf %46, %34 : vector<72x128xf32>
    %cst_15 = arith.constant 5.000000e-01 : f32
    %48 = vector.broadcast %cst_15 : f32 to vector<72x128xf32>
    %49 = arith.mulf %47, %48 : vector<72x128xf32>
    %50 = arith.mulf %19, %37 : vector<72x128xf32>
    %cst_16 = arith.constant 0.333333343 : f32
    %51 = vector.broadcast %cst_16 : f32 to vector<72x128xf32>
    %52 = arith.mulf %50, %51 : vector<72x128xf32>
    %53 = arith.mulf %21, %44 : vector<72x128xf32>
    %cst_17 = arith.constant 4.000000e+00 : f32
    %54 = vector.broadcast %cst_17 : f32 to vector<72x128xf32>
    %55 = arith.subf %54, %21 : vector<72x128xf32>
    %56 = arith.mulf %55, %37 : vector<72x128xf32>
    %57 = arith.addf %53, %56 : vector<72x128xf32>
    %cst_18 = arith.constant 0.333333343 : f32
    %58 = vector.broadcast %cst_18 : f32 to vector<72x128xf32>
    %59 = arith.mulf %57, %58 : vector<72x128xf32>
    %60 = arith.mulf %23, %49 : vector<72x128xf32>
    %cst_19 = arith.constant 4.000000e+00 : f32
    %61 = vector.broadcast %cst_19 : f32 to vector<72x128xf32>
    %62 = arith.subf %61, %23 : vector<72x128xf32>
    %63 = arith.mulf %62, %44 : vector<72x128xf32>
    %64 = arith.addf %60, %63 : vector<72x128xf32>
    %cst_20 = arith.constant 0.333333343 : f32
    %65 = vector.broadcast %cst_20 : f32 to vector<72x128xf32>
    %66 = arith.mulf %64, %65 : vector<72x128xf32>
    %cst_21 = arith.constant 4.000000e+00 : f32
    %67 = vector.broadcast %cst_21 : f32 to vector<72x128xf32>
    %68 = arith.subf %67, %25 : vector<72x128xf32>
    %69 = arith.mulf %68, %49 : vector<72x128xf32>
    %cst_22 = arith.constant 0.333333343 : f32
    %70 = vector.broadcast %cst_22 : f32 to vector<72x128xf32>
    %71 = arith.mulf %69, %70 : vector<72x128xf32>
    %cst_23 = arith.constant 0.000000e+00 : f32
    %72 = vector.broadcast %cst_23 : f32 to vector<72x128xf32>
    %73 = arith.cmpf oeq, %16, %72 : vector<72x128xf32>
    %cst_24 = arith.constant 1.000000e+00 : f32
    %74 = vector.broadcast %cst_24 : f32 to vector<72x128xf32>
    %75 = arith.cmpf oeq, %16, %74 : vector<72x128xf32>
    %cst_25 = arith.constant 2.000000e+00 : f32
    %76 = vector.broadcast %cst_25 : f32 to vector<72x128xf32>
    %77 = arith.cmpf oeq, %16, %76 : vector<72x128xf32>
    %cst_26 = arith.constant 3.000000e+00 : f32
    %78 = vector.broadcast %cst_26 : f32 to vector<72x128xf32>
    %79 = arith.cmpf oeq, %16, %78 : vector<72x128xf32>
    %cst_27 = arith.constant 4.000000e+00 : f32
    %80 = vector.broadcast %cst_27 : f32 to vector<72x128xf32>
    %81 = arith.cmpf oeq, %16, %80 : vector<72x128xf32>
    %cst_28 = arith.constant 5.000000e+00 : f32
    %82 = vector.broadcast %cst_28 : f32 to vector<72x128xf32>
    %83 = arith.cmpf oeq, %16, %82 : vector<72x128xf32>
    %cst_29 = arith.constant 6.000000e+00 : f32
    %84 = vector.broadcast %cst_29 : f32 to vector<72x128xf32>
    %85 = arith.cmpf oeq, %16, %84 : vector<72x128xf32>
    %cst_30 = arith.constant 7.000000e+00 : f32
    %86 = vector.broadcast %cst_30 : f32 to vector<72x128xf32>
    %87 = arith.cmpf oeq, %16, %86 : vector<72x128xf32>
    %cst_31 = arith.constant 8.000000e+00 : f32
    %88 = vector.broadcast %cst_31 : f32 to vector<72x128xf32>
    %89 = arith.cmpf oeq, %16, %88 : vector<72x128xf32>
    %cst_32 = arith.constant 9.000000e+00 : f32
    %90 = vector.broadcast %cst_32 : f32 to vector<72x128xf32>
    %91 = arith.cmpf oeq, %16, %90 : vector<72x128xf32>
    %cst_33 = arith.constant 1.000000e+01 : f32
    %92 = vector.broadcast %cst_33 : f32 to vector<72x128xf32>
    %93 = arith.cmpf oeq, %16, %92 : vector<72x128xf32>
    %cst_34 = arith.constant 0.000000e+00 : f32
    %94 = vector.broadcast %cst_34 : f32 to vector<72x128xf32>
    %95 = arith.select %79, %71, %94 : vector<72x128xi1>, vector<72x128xf32>
    %96 = arith.select %77, %66, %95 : vector<72x128xi1>, vector<72x128xf32>
    %97 = arith.select %75, %59, %96 : vector<72x128xi1>, vector<72x128xf32>
    %98 = arith.select %73, %52, %97 : vector<72x128xi1>, vector<72x128xf32>
    %c72 = arith.constant 72 : index
    %99 = arith.index_cast %1 : i32 to index
    %100 = vector.load %arg4[%c72, %99] : memref<648x256xf32, #tpu.memory_space<vmem>>, vector<72x128xf32>
    tpu.vector_store %arg4[%c72, %99], %98 {strides = array<i32>} : memref<648x256xf32, #tpu.memory_space<vmem>>, vector<72x128xf32>,
    %cst_35 = arith.constant 0.000000e+00 : f32
    %101 = vector.broadcast %cst_35 : f32 to vector<72x128xf32>
    %102 = arith.select %81, %71, %101 : vector<72x128xi1>, vector<72x128xf32>
    %103 = arith.select %79, %66, %102 : vector<72x128xi1>, vector<72x128xf32>
    %104 = arith.select %77, %59, %103 : vector<72x128xi1>, vector<72x128xf32>
    %105 = arith.select %75, %52, %104 : vector<72x128xi1>, vector<72x128xf32>
    %c144 = arith.constant 144 : index
    %106 = arith.index_cast %1 : i32 to index
    %107 = vector.load %arg4[%c144, %106] : memref<648x256xf32, #tpu.memory_space<vmem>>, vector<72x128xf32>
    tpu.vector_store %arg4[%c144, %106], %105 {strides = array<i32>} : memref<648x256xf32, #tpu.memory_space<vmem>>, vector<72x128xf32>,
    %cst_36 = arith.constant 0.000000e+00 : f32
    %108 = vector.broadcast %cst_36 : f32 to vector<72x128xf32>
    %109 = arith.select %83, %71, %108 : vector<72x128xi1>, vector<72x128xf32>
    %110 = arith.select %81, %66, %109 : vector<72x128xi1>, vector<72x128xf32>
    %111 = arith.select %79, %59, %110 : vector<72x128xi1>, vector<72x128xf32>
    %112 = arith.select %77, %52, %111 : vector<72x128xi1>, vector<72x128xf32>
    %c216 = arith.constant 216 : index
    %113 = arith.index_cast %1 : i32 to index
    %114 = vector.load %arg4[%c216, %113] : memref<648x256xf32, #tpu.memory_space<vmem>>, vector<72x128xf32>
    tpu.vector_store %arg4[%c216, %113], %112 {strides = array<i32>} : memref<648x256xf32, #tpu.memory_space<vmem>>, vector<72x128xf32>,
    %cst_37 = arith.constant 0.000000e+00 : f32
    %115 = vector.broadcast %cst_37 : f32 to vector<72x128xf32>
    %116 = arith.select %85, %71, %115 : vector<72x128xi1>, vector<72x128xf32>
    %117 = arith.select %83, %66, %116 : vector<72x128xi1>, vector<72x128xf32>
    %118 = arith.select %81, %59, %117 : vector<72x128xi1>, vector<72x128xf32>
    %119 = arith.select %79, %52, %118 : vector<72x128xi1>, vector<72x128xf32>
    %c288 = arith.constant 288 : index
    %120 = arith.index_cast %1 : i32 to index
    %121 = vector.load %arg4[%c288, %120] : memref<648x256xf32, #tpu.memory_space<vmem>>, vector<72x128xf32>
    tpu.vector_store %arg4[%c288, %120], %119 {strides = array<i32>} : memref<648x256xf32, #tpu.memory_space<vmem>>, vector<72x128xf32>,
    %cst_38 = arith.constant 0.000000e+00 : f32
    %122 = vector.broadcast %cst_38 : f32 to vector<72x128xf32>
    %123 = arith.select %87, %71, %122 : vector<72x128xi1>, vector<72x128xf32>
    %124 = arith.select %85, %66, %123 : vector<72x128xi1>, vector<72x128xf32>
    %125 = arith.select %83, %59, %124 : vector<72x128xi1>, vector<72x128xf32>
    %126 = arith.select %81, %52, %125 : vector<72x128xi1>, vector<72x128xf32>
    %c360 = arith.constant 360 : index
    %127 = arith.index_cast %1 : i32 to index
    %128 = vector.load %arg4[%c360, %127] : memref<648x256xf32, #tpu.memory_space<vmem>>, vector<72x128xf32>
    tpu.vector_store %arg4[%c360, %127], %126 {strides = array<i32>} : memref<648x256xf32, #tpu.memory_space<vmem>>, vector<72x128xf32>,
    %cst_39 = arith.constant 0.000000e+00 : f32
    %129 = vector.broadcast %cst_39 : f32 to vector<72x128xf32>
    %130 = arith.select %89, %71, %129 : vector<72x128xi1>, vector<72x128xf32>
    %131 = arith.select %87, %66, %130 : vector<72x128xi1>, vector<72x128xf32>
    %132 = arith.select %85, %59, %131 : vector<72x128xi1>, vector<72x128xf32>
    %133 = arith.select %83, %52, %132 : vector<72x128xi1>, vector<72x128xf32>
    %c432 = arith.constant 432 : index
    %134 = arith.index_cast %1 : i32 to index
    %135 = vector.load %arg4[%c432, %134] : memref<648x256xf32, #tpu.memory_space<vmem>>, vector<72x128xf32>
    tpu.vector_store %arg4[%c432, %134], %133 {strides = array<i32>} : memref<648x256xf32, #tpu.memory_space<vmem>>, vector<72x128xf32>,
    %cst_40 = arith.constant 0.000000e+00 : f32
    %136 = vector.broadcast %cst_40 : f32 to vector<72x128xf32>
    %137 = arith.select %91, %71, %136 : vector<72x128xi1>, vector<72x128xf32>
    %138 = arith.select %89, %66, %137 : vector<72x128xi1>, vector<72x128xf32>
    %139 = arith.select %87, %59, %138 : vector<72x128xi1>, vector<72x128xf32>
    %140 = arith.select %85, %52, %139 : vector<72x128xi1>, vector<72x128xf32>
    %c504 = arith.constant 504 : index
    %141 = arith.index_cast %1 : i32 to index
    %142 = vector.load %arg4[%c504, %141] : memref<648x256xf32, #tpu.memory_space<vmem>>, vector<72x128xf32>
    tpu.vector_store %arg4[%c504, %141], %140 {strides = array<i32>} : memref<648x256xf32, #tpu.memory_space<vmem>>, vector<72x128xf32>,
    %cst_41 = arith.constant 0.000000e+00 : f32
    %143 = vector.broadcast %cst_41 : f32 to vector<72x128xf32>
    %144 = arith.select %93, %71, %143 : vector<72x128xi1>, vector<72x128xf32>
    %145 = arith.select %91, %66, %144 : vector<72x128xi1>, vector<72x128xf32>
    %146 = arith.select %89, %59, %145 : vector<72x128xi1>, vector<72x128xf32>
    %147 = arith.select %87, %52, %146 : vector<72x128xi1>, vector<72x128xf32>
    %c576 = arith.constant 576 : index
    %148 = arith.index_cast %1 : i32 to index
    %149 = vector.load %arg4[%c576, %148] : memref<648x256xf32, #tpu.memory_space<vmem>>, vector<72x128xf32>
    tpu.vector_store %arg4[%c576, %148], %147 {strides = array<i32>} : memref<648x256xf32, #tpu.memory_space<vmem>>, vector<72x128xf32>,
    %c1_i32 = arith.constant 1 : i32
    %c128_i32_42 = arith.constant 128 : i32
    %150 = arith.muli %c1_i32, %c128_i32_42 : i32
    %151 = tpu.assume_multiple %150, 128 : i32
    %c0_43 = arith.constant 0 : index
    %152 = arith.index_cast %151 : i32 to index
    %153 = vector.load %arg1[%c0_43, %152] : memref<72x256xf32, #tpu.memory_space<vmem>>, vector<72x128xf32>
    %154 = arith.negf %153 : vector<72x128xf32>
    %155 = math.exp %154 : vector<72x128xf32>
    %cst_44 = arith.constant 1.000000e+00 : f32
    %156 = vector.broadcast %cst_44 : f32 to vector<72x128xf32>
    %157 = arith.addf %156, %155 : vector<72x128xf32>
    %158 = arith.divf %156, %157 : vector<72x128xf32>
    %159 = arith.mulf %153, %158 : vector<72x128xf32>
    %c0_45 = arith.constant 0 : index
    %160 = arith.index_cast %151 : i32 to index
    %161 = vector.load %arg4[%c0_45, %160] : memref<648x256xf32, #tpu.memory_space<vmem>>, vector<72x128xf32>
    tpu.vector_store %arg4[%c0_45, %160], %159 {strides = array<i32>} : memref<648x256xf32, #tpu.memory_space<vmem>>, vector<72x128xf32>,
    %cst_46 = arith.constant -2.200000e+00 : f32
    %162 = vector.broadcast %cst_46 : f32 to vector<72x128xf32>
    %163 = arith.subf %153, %162 : vector<72x128xf32>
    %cst_47 = arith.constant 2.500000e+00 : f32
    %164 = vector.broadcast %cst_47 : f32 to vector<72x128xf32>
    %165 = arith.mulf %163, %164 : vector<72x128xf32>
    %166 = math.floor %165 : vector<72x128xf32>
    %167 = arith.subf %165, %166 : vector<72x128xf32>
    %cst_48 = arith.constant 0.000000e+00 : f32
    %168 = vector.broadcast %cst_48 : f32 to vector<72x128xf32>
    %169 = arith.addf %167, %168 : vector<72x128xf32>
    %cst_49 = arith.constant 1.000000e+00 : f32
    %170 = vector.broadcast %cst_49 : f32 to vector<72x128xf32>
    %171 = arith.addf %167, %170 : vector<72x128xf32>
    %cst_50 = arith.constant 2.000000e+00 : f32
    %172 = vector.broadcast %cst_50 : f32 to vector<72x128xf32>
    %173 = arith.addf %167, %172 : vector<72x128xf32>
    %cst_51 = arith.constant 3.000000e+00 : f32
    %174 = vector.broadcast %cst_51 : f32 to vector<72x128xf32>
    %175 = arith.addf %167, %174 : vector<72x128xf32>
    %cst_52 = arith.constant 1.000000e+00 : f32
    %176 = vector.broadcast %cst_52 : f32 to vector<72x128xf32>
    %177 = arith.mulf %169, %176 : vector<72x128xf32>
    %cst_53 = arith.constant 1.000000e+00 : f32
    %178 = vector.broadcast %cst_53 : f32 to vector<72x128xf32>
    %179 = arith.mulf %177, %178 : vector<72x128xf32>
    %cst_54 = arith.constant 2.000000e+00 : f32
    %180 = vector.broadcast %cst_54 : f32 to vector<72x128xf32>
    %181 = arith.subf %180, %171 : vector<72x128xf32>
    %182 = arith.mulf %181, %176 : vector<72x128xf32>
    %cst_55 = arith.constant 1.000000e+00 : f32
    %183 = vector.broadcast %cst_55 : f32 to vector<72x128xf32>
    %184 = arith.mulf %182, %183 : vector<72x128xf32>
    %185 = arith.mulf %169, %179 : vector<72x128xf32>
    %cst_56 = arith.constant 5.000000e-01 : f32
    %186 = vector.broadcast %cst_56 : f32 to vector<72x128xf32>
    %187 = arith.mulf %185, %186 : vector<72x128xf32>
    %188 = arith.mulf %171, %184 : vector<72x128xf32>
    %cst_57 = arith.constant 3.000000e+00 : f32
    %189 = vector.broadcast %cst_57 : f32 to vector<72x128xf32>
    %190 = arith.subf %189, %171 : vector<72x128xf32>
    %191 = arith.mulf %190, %179 : vector<72x128xf32>
    %192 = arith.addf %188, %191 : vector<72x128xf32>
    %cst_58 = arith.constant 5.000000e-01 : f32
    %193 = vector.broadcast %cst_58 : f32 to vector<72x128xf32>
    %194 = arith.mulf %192, %193 : vector<72x128xf32>
    %cst_59 = arith.constant 3.000000e+00 : f32
    %195 = vector.broadcast %cst_59 : f32 to vector<72x128xf32>
    %196 = arith.subf %195, %173 : vector<72x128xf32>
    %197 = arith.mulf %196, %184 : vector<72x128xf32>
    %cst_60 = arith.constant 5.000000e-01 : f32
    %198 = vector.broadcast %cst_60 : f32 to vector<72x128xf32>
    %199 = arith.mulf %197, %198 : vector<72x128xf32>
    %200 = arith.mulf %169, %187 : vector<72x128xf32>
    %cst_61 = arith.constant 0.333333343 : f32
    %201 = vector.broadcast %cst_61 : f32 to vector<72x128xf32>
    %202 = arith.mulf %200, %201 : vector<72x128xf32>
    %203 = arith.mulf %171, %194 : vector<72x128xf32>
    %cst_62 = arith.constant 4.000000e+00 : f32
    %204 = vector.broadcast %cst_62 : f32 to vector<72x128xf32>
    %205 = arith.subf %204, %171 : vector<72x128xf32>
    %206 = arith.mulf %205, %187 : vector<72x128xf32>
    %207 = arith.addf %203, %206 : vector<72x128xf32>
    %cst_63 = arith.constant 0.333333343 : f32
    %208 = vector.broadcast %cst_63 : f32 to vector<72x128xf32>
    %209 = arith.mulf %207, %208 : vector<72x128xf32>
    %210 = arith.mulf %173, %199 : vector<72x128xf32>
    %cst_64 = arith.constant 4.000000e+00 : f32
    %211 = vector.broadcast %cst_64 : f32 to vector<72x128xf32>
    %212 = arith.subf %211, %173 : vector<72x128xf32>
    %213 = arith.mulf %212, %194 : vector<72x128xf32>
    %214 = arith.addf %210, %213 : vector<72x128xf32>
    %cst_65 = arith.constant 0.333333343 : f32
    %215 = vector.broadcast %cst_65 : f32 to vector<72x128xf32>
    %216 = arith.mulf %214, %215 : vector<72x128xf32>
    %cst_66 = arith.constant 4.000000e+00 : f32
    %217 = vector.broadcast %cst_66 : f32 to vector<72x128xf32>
    %218 = arith.subf %217, %175 : vector<72x128xf32>
    %219 = arith.mulf %218, %199 : vector<72x128xf32>
    %cst_67 = arith.constant 0.333333343 : f32
    %220 = vector.broadcast %cst_67 : f32 to vector<72x128xf32>
    %221 = arith.mulf %219, %220 : vector<72x128xf32>
    %cst_68 = arith.constant 0.000000e+00 : f32
    %222 = vector.broadcast %cst_68 : f32 to vector<72x128xf32>
    %223 = arith.cmpf oeq, %166, %222 : vector<72x128xf32>
    %cst_69 = arith.constant 1.000000e+00 : f32
    %224 = vector.broadcast %cst_69 : f32 to vector<72x128xf32>
    %225 = arith.cmpf oeq, %166, %224 : vector<72x128xf32>
    %cst_70 = arith.constant 2.000000e+00 : f32
    %226 = vector.broadcast %cst_70 : f32 to vector<72x128xf32>
    %227 = arith.cmpf oeq, %166, %226 : vector<72x128xf32>
    %cst_71 = arith.constant 3.000000e+00 : f32
    %228 = vector.broadcast %cst_71 : f32 to vector<72x128xf32>
    %229 = arith.cmpf oeq, %166, %228 : vector<72x128xf32>
    %cst_72 = arith.constant 4.000000e+00 : f32
    %230 = vector.broadcast %cst_72 : f32 to vector<72x128xf32>
    %231 = arith.cmpf oeq, %166, %230 : vector<72x128xf32>
    %cst_73 = arith.constant 5.000000e+00 : f32
    %232 = vector.broadcast %cst_73 : f32 to vector<72x128xf32>
    %233 = arith.cmpf oeq, %166, %232 : vector<72x128xf32>
    %cst_74 = arith.constant 6.000000e+00 : f32
    %234 = vector.broadcast %cst_74 : f32 to vector<72x128xf32>
    %235 = arith.cmpf oeq, %166, %234 : vector<72x128xf32>
    %cst_75 = arith.constant 7.000000e+00 : f32
    %236 = vector.broadcast %cst_75 : f32 to vector<72x128xf32>
    %237 = arith.cmpf oeq, %166, %236 : vector<72x128xf32>
    %cst_76 = arith.constant 8.000000e+00 : f32
    %238 = vector.broadcast %cst_76 : f32 to vector<72x128xf32>
    %239 = arith.cmpf oeq, %166, %238 : vector<72x128xf32>
    %cst_77 = arith.constant 9.000000e+00 : f32
    %240 = vector.broadcast %cst_77 : f32 to vector<72x128xf32>
    %241 = arith.cmpf oeq, %166, %240 : vector<72x128xf32>
    %cst_78 = arith.constant 1.000000e+01 : f32
    %242 = vector.broadcast %cst_78 : f32 to vector<72x128xf32>
    %243 = arith.cmpf oeq, %166, %242 : vector<72x128xf32>
    %cst_79 = arith.constant 0.000000e+00 : f32
    %244 = vector.broadcast %cst_79 : f32 to vector<72x128xf32>
    %245 = arith.select %229, %221, %244 : vector<72x128xi1>, vector<72x128xf32>
    %246 = arith.select %227, %216, %245 : vector<72x128xi1>, vector<72x128xf32>
    %247 = arith.select %225, %209, %246 : vector<72x128xi1>, vector<72x128xf32>
    %248 = arith.select %223, %202, %247 : vector<72x128xi1>, vector<72x128xf32>
    %c72_80 = arith.constant 72 : index
    %249 = arith.index_cast %151 : i32 to index
    %250 = vector.load %arg4[%c72_80, %249] : memref<648x256xf32, #tpu.memory_space<vmem>>, vector<72x128xf32>
    tpu.vector_store %arg4[%c72_80, %249], %248 {strides = array<i32>} : memref<648x256xf32, #tpu.memory_space<vmem>>, vector<72x128xf32>,
    %cst_81 = arith.constant 0.000000e+00 : f32
    %251 = vector.broadcast %cst_81 : f32 to vector<72x128xf32>
    %252 = arith.select %231, %221, %251 : vector<72x128xi1>, vector<72x128xf32>
    %253 = arith.select %229, %216, %252 : vector<72x128xi1>, vector<72x128xf32>
    %254 = arith.select %227, %209, %253 : vector<72x128xi1>, vector<72x128xf32>
    %255 = arith.select %225, %202, %254 : vector<72x128xi1>, vector<72x128xf32>
    %c144_82 = arith.constant 144 : index
    %256 = arith.index_cast %151 : i32 to index
    %257 = vector.load %arg4[%c144_82, %256] : memref<648x256xf32, #tpu.memory_space<vmem>>, vector<72x128xf32>
    tpu.vector_store %arg4[%c144_82, %256], %255 {strides = array<i32>} : memref<648x256xf32, #tpu.memory_space<vmem>>, vector<72x128xf32>,
    %cst_83 = arith.constant 0.000000e+00 : f32
    %258 = vector.broadcast %cst_83 : f32 to vector<72x128xf32>
    %259 = arith.select %233, %221, %258 : vector<72x128xi1>, vector<72x128xf32>
    %260 = arith.select %231, %216, %259 : vector<72x128xi1>, vector<72x128xf32>
    %261 = arith.select %229, %209, %260 : vector<72x128xi1>, vector<72x128xf32>
    %262 = arith.select %227, %202, %261 : vector<72x128xi1>, vector<72x128xf32>
    %c216_84 = arith.constant 216 : index
    %263 = arith.index_cast %151 : i32 to index
    %264 = vector.load %arg4[%c216_84, %263] : memref<648x256xf32, #tpu.memory_space<vmem>>, vector<72x128xf32>
    tpu.vector_store %arg4[%c216_84, %263], %262 {strides = array<i32>} : memref<648x256xf32, #tpu.memory_space<vmem>>, vector<72x128xf32>,
    %cst_85 = arith.constant 0.000000e+00 : f32
    %265 = vector.broadcast %cst_85 : f32 to vector<72x128xf32>
    %266 = arith.select %235, %221, %265 : vector<72x128xi1>, vector<72x128xf32>
    %267 = arith.select %233, %216, %266 : vector<72x128xi1>, vector<72x128xf32>
    %268 = arith.select %231, %209, %267 : vector<72x128xi1>, vector<72x128xf32>
    %269 = arith.select %229, %202, %268 : vector<72x128xi1>, vector<72x128xf32>
    %c288_86 = arith.constant 288 : index
    %270 = arith.index_cast %151 : i32 to index
    %271 = vector.load %arg4[%c288_86, %270] : memref<648x256xf32, #tpu.memory_space<vmem>>, vector<72x128xf32>
    tpu.vector_store %arg4[%c288_86, %270], %269 {strides = array<i32>} : memref<648x256xf32, #tpu.memory_space<vmem>>, vector<72x128xf32>,
    %cst_87 = arith.constant 0.000000e+00 : f32
    %272 = vector.broadcast %cst_87 : f32 to vector<72x128xf32>
    %273 = arith.select %237, %221, %272 : vector<72x128xi1>, vector<72x128xf32>
    %274 = arith.select %235, %216, %273 : vector<72x128xi1>, vector<72x128xf32>
    %275 = arith.select %233, %209, %274 : vector<72x128xi1>, vector<72x128xf32>
    %276 = arith.select %231, %202, %275 : vector<72x128xi1>, vector<72x128xf32>
    %c360_88 = arith.constant 360 : index
    %277 = arith.index_cast %151 : i32 to index
    %278 = vector.load %arg4[%c360_88, %277] : memref<648x256xf32, #tpu.memory_space<vmem>>, vector<72x128xf32>
    tpu.vector_store %arg4[%c360_88, %277], %276 {strides = array<i32>} : memref<648x256xf32, #tpu.memory_space<vmem>>, vector<72x128xf32>,
    %cst_89 = arith.constant 0.000000e+00 : f32
    %279 = vector.broadcast %cst_89 : f32 to vector<72x128xf32>
    %280 = arith.select %239, %221, %279 : vector<72x128xi1>, vector<72x128xf32>
    %281 = arith.select %237, %216, %280 : vector<72x128xi1>, vector<72x128xf32>
    %282 = arith.select %235, %209, %281 : vector<72x128xi1>, vector<72x128xf32>
    %283 = arith.select %233, %202, %282 : vector<72x128xi1>, vector<72x128xf32>
    %c432_90 = arith.constant 432 : index
    %284 = arith.index_cast %151 : i32 to index
    %285 = vector.load %arg4[%c432_90, %284] : memref<648x256xf32, #tpu.memory_space<vmem>>, vector<72x128xf32>
    tpu.vector_store %arg4[%c432_90, %284], %283 {strides = array<i32>} : memref<648x256xf32, #tpu.memory_space<vmem>>, vector<72x128xf32>,
    %cst_91 = arith.constant 0.000000e+00 : f32
    %286 = vector.broadcast %cst_91 : f32 to vector<72x128xf32>
    %287 = arith.select %241, %221, %286 : vector<72x128xi1>, vector<72x128xf32>
    %288 = arith.select %239, %216, %287 : vector<72x128xi1>, vector<72x128xf32>
    %289 = arith.select %237, %209, %288 : vector<72x128xi1>, vector<72x128xf32>
    %290 = arith.select %235, %202, %289 : vector<72x128xi1>, vector<72x128xf32>
    %c504_92 = arith.constant 504 : index
    %291 = arith.index_cast %151 : i32 to index
    %292 = vector.load %arg4[%c504_92, %291] : memref<648x256xf32, #tpu.memory_space<vmem>>, vector<72x128xf32>
    tpu.vector_store %arg4[%c504_92, %291], %290 {strides = array<i32>} : memref<648x256xf32, #tpu.memory_space<vmem>>, vector<72x128xf32>,
    %cst_93 = arith.constant 0.000000e+00 : f32
    %293 = vector.broadcast %cst_93 : f32 to vector<72x128xf32>
    %294 = arith.select %243, %221, %293 : vector<72x128xi1>, vector<72x128xf32>
    %295 = arith.select %241, %216, %294 : vector<72x128xi1>, vector<72x128xf32>
    %296 = arith.select %239, %209, %295 : vector<72x128xi1>, vector<72x128xf32>
    %297 = arith.select %237, %202, %296 : vector<72x128xi1>, vector<72x128xf32>
    %c576_94 = arith.constant 576 : index
    %298 = arith.index_cast %151 : i32 to index
    %299 = vector.load %arg4[%c576_94, %298] : memref<648x256xf32, #tpu.memory_space<vmem>>, vector<72x128xf32>
    tpu.vector_store %arg4[%c576_94, %298], %297 {strides = array<i32>} : memref<648x256xf32, #tpu.memory_space<vmem>>, vector<72x128xf32>,
    %c2_i32 = arith.constant 2 : i32
    %c0_95 = arith.constant 0 : index
    %c0_96 = arith.constant 0 : index
    %300 = vector.load %arg2[%c0_95, %c0_96] : memref<8x648xf32, #tpu.memory_space<vmem>>, vector<8x648xf32>
    %c0_97 = arith.constant 0 : index
    %c0_98 = arith.constant 0 : index
    %301 = vector.load %arg4[%c0_97, %c0_98] : memref<648x256xf32, #tpu.memory_space<vmem>>, vector<648x256xf32>
    %cst_99 = arith.constant dense<0.000000e+00> : vector<8x256xf32>
    %302 = tpu.matmul %300, %301, %cst_99 {dimension_numbers = #tpu.dot_dimension_numbers<[1], [0], [0], [1], [0, 0, 1, 1], [], []>} : vector<8x648xf32>, vector<648x256xf32>, vector<8x256xf32> -> vector<8x256xf32>
    %c0_100 = arith.constant 0 : index
    %c0_101 = arith.constant 0 : index
    %303 = vector.load %arg3[%c0_100, %c0_101] : memref<8x256xf32, #tpu.memory_space<vmem>>, vector<8x256xf32>
    tpu.vector_store %arg3[%c0_100, %c0_101], %302 {strides = array<i32>} : memref<8x256xf32, #tpu.memory_space<vmem>>, vector<8x256xf32>,
    return
  }
  func.func @transform_0(%arg0: i32) -> (i32, i32) {
    %c0_i32 = arith.constant 0 : i32
    %c0_i32_0 = arith.constant 0 : i32
    return %c0_i32, %arg0 : i32, i32
  }
  func.func @transform_1(%arg0: i32) -> (i32, i32) {
    %c0_i32 = arith.constant 0 : i32
    %c0_i32_0 = arith.constant 0 : i32
    %c0_i32_1 = arith.constant 0 : i32
    return %c0_i32, %c0_i32_0 : i32, i32
  }
  func.func @transform_2(%arg0: i32) -> (i32, i32) {
    %c0_i32 = arith.constant 0 : i32
    %c0_i32_0 = arith.constant 0 : i32
    return %c0_i32, %arg0 : i32, i32
  }
}

</mosaic_0001>

<bundles_post_ra>
// kernel: a_call__.2
= control target key start
LH: loop header
LB: loop body
LE: loop exit
PB: predicated region body
PF: predicated region fallthrough
CT: control target
= control target key end

     0   :  { %s1582_s9 = smov 0   ;;  %s1584_s10 = smov 0   ;;  %s2936_s0 = inlined_call_operand.vmem [shape: f32[40,512], index: 0, kind: input, shape index: {}]   ;;  %s2937_s1 = inlined_call_operand.vmem [shape: f32[8,360], index: 1, kind: input, shape index: {}]   ;;  %s2938_s2 = inlined_call_operand.vmem [shape: f32[8,512], index: 2, kind: output, shape index: {}]  }
   0x1   :  { %s1586_s11 = smov 0  }
   0x2 LB: > { %s1429_s12 = sadd.s32 4294967295, %s1564_s11   ;;  %s1599_s13 = sadd.s32 1, %s1564_s11   ;;  %s1564_s11 = sphi %s1586_s11, %s3288_s11   ;;  %s1560_s10 = sphi %s1584_s10, %s3287_s10   ;;  %s1556_s9 = sphi %s1582_s9, %s3286_s9  }
   0x3   : > { %s16_s14 = ssub.s32 %s1564_s11, %s1599_s13  ;;  %s19_s15 = sadd.s32 1, %s1560_s10 }
   0x4   : > { %p17_p0 = scmp.eq.s32.totalorder %s16_s14, 0  ;;  %p26_p1 = scmp.ne.s32.totalorder %s1560_s10, %s1556_s9 }
   0x5   : > { %p27_p2 = scmp.eq.s32.totalorder %s1564_s11, 0  ;;  %p1432_p4 = scmp.ge.s32.totalorder %s1564_s11, 2 }
   0x6   : > { %s1608_s16 = scalar_select %p17_p0, %s1560_s10, %s19_s15  }
   0x7   : > { %p28_p3 = por %p27_p2, %p26_p1  ;;  %102 = sbr.rel (%p1432_p4) target bundleno = 21 (0x15), region = 20 }
   0xc   : > { %105 = sbr.rel (!%p28_p3) target bundleno = 21 (0x15), region = 24  ;;  %s107_s17 = sand.u32 (%p28_p3), 1, %s1560_s10  }
   0xd   : > { %s1466_s18 = sshll.u32 (%p28_p3), %s1564_s11, 4  ;;  %s1467_s19 = smul.u32 (%p28_p3), 80, %s107_s17 }
   0xe   : > { %s112_s22 = scalar_lea.vmem (%p28_p3), %s2936_s0, %s1466_s18 }
   0xf   : > { %v125_v0 = vld [vmem:[%s112_s22] sm:$0xff] (%p28_p3)  ;;  %v127_v1 = vld [vmem:[%s112_s22 + $0x8] sm:$0xff] (%p28_p3)  ;;  %s109_s23 = scalar_lea.vmem (%p28_p3), [#allocation3], %s1467_s19 }
  0x10   : > { %v129_v2 = vld [vmem:[%s112_s22 + $0x20] sm:$0xff] (%p28_p3)  ;;  %v131_v3 = vld [vmem:[%s112_s22 + $0x28] sm:$0xff] (%p28_p3)  ;;  %126 = vst [vmem:[%s109_s23] sm:$0xff] (%p28_p3), %v125_v0  ;;  %128 = vst [vmem:[%s109_s23 + $0x8] sm:$0xff] (%p28_p3), %v127_v1 }
  0x11   : > { %v133_v4 = vld [vmem:[%s112_s22 + $0x40] sm:$0xff]  ;;  %v135_v5 = vld [vmem:[%s112_s22 + $0x48] sm:$0xff]  ;;  %130 = vst [vmem:[%s109_s23 + $0x10] sm:$0xff] %v129_v2  ;;  %132 = vst [vmem:[%s109_s23 + $0x18] sm:$0xff] %v131_v3 }
  0x12   : > { %134 = vst [vmem:[%s109_s23 + $0x20] sm:$0xff] %v133_v4  ;;  %136 = vst [vmem:[%s109_s23 + $0x28] sm:$0xff] %v135_v5  ;;  %v137_v6 = vld [vmem:[%s112_s22 + $0x60] sm:$0xff]  ;;  %v139_v7 = vld [vmem:[%s112_s22 + $0x68] sm:$0xff] }
  0x13   : > { %v141_v8 = vld [vmem:[%s112_s22 + $0x80] sm:$0xff]  ;;  %138 = vst [vmem:[%s109_s23 + $0x30] sm:$0xff] %v137_v6  ;;  %140 = vst [vmem:[%s109_s23 + $0x38] sm:$0xff] %v139_v7  ;;  %v143_v9 = vld [vmem:[%s112_s22 + $0x88] sm:$0xff] }
  0x14   : > { %142 = vst [vmem:[%s109_s23 + $0x40] sm:$0xff] %v141_v8  ;;  %144 = vst [vmem:[%s109_s23 + $0x48] sm:$0xff] %v143_v9 }
  0x15 PF: > { %p1435_p5 = scmp.ge.s32.totalorder %s1564_s11, 1  ;;  %p149_p6 = scmp.lt.s32.totalorder %s1564_s11, 3 }
  0x17   : > { %p150_p7 = pnand %p1435_p5, %p149_p6 }
  0x19   : > { %153 = sbr.rel (%p150_p7) target bundleno = 478 (0x1de), region = 47 }
  0x1e   : > { %s156_s24 = sand.u32 1, %s1556_s9   ;;  %s1436_s5 = sshll.u32 %s1429_s12, 1 }
  0x1f   : > { %s1468_s25 = smul.u32 80, %s156_s24  ;;  %p179_p8 = scmp.lt.s32.totalorder %s1436_s5, 3 }
  0x21   : > { %s1619_s26 = scalar_lea.vmem [#allocation3], %s1468_s25  ;;  %s3290_s5 = smov (!%p179_p8, %s1436_s5), 3 }
  0x22   : > { %v1448_v10 = vld [vmem:[%s1619_s26 + $0x8] sm:$0xff]  ;;  %v184_v11 = vld [vmem:[%s1619_s26] sm:$0xff]  ;;  %v1630_v20 = vld [vmem:[%s1619_s26 + $0x38] sm:$0xff]  ;;  %s1437_s6 = sshll.u32 %s3290_s5, 3 }
  0x23   : > { %v1452_v12 = vld [vmem:[%s1619_s26 + $0x48] sm:$0xff]  ;;  %v1458_v13 = vadd.f32 2.2, %v1448_v10  ;;  %v1443_v14 = vadd.f32 2.2, %v184_v11  ;;  %v1625_v18 = vld [vmem:[%s1619_s26 + $0x40] sm:$0xff]  ;;  %s182_s9 = scalar_lea.vmem %s2938_s2, %s1437_s6 }
  0x24   : > { %v1462_v15 = vadd.f32 2.2, %v1452_v12  ;;  %3059 = vst [vmem:[#allocation4_spill] sm:$0xff] %v1625_v18  ;;  %3060 = vst [vmem:[#allocation5_spill] sm:$0xff] %v1630_v20  ;;  %v1637_v23 = vld [vmem:[%s1619_s26 + $0x30] sm:$0xff]  ;;  %v1640_v24 = vld [vmem:[%s1619_s26 + $0x28] sm:$0xff] }
  0x25   : > { %v706_v16 = vmul.f32 2.5, %v1458_v13  ;;  %v234_v17 = vmul.f32 2.5, %v1443_v14  ;;  %3061 = vst [vmem:[#allocation6_spill] sm:$0xff] %v1637_v23  ;;  %3062 = vst [vmem:[#allocation7_spill] sm:$0xff] %v1640_v24  ;;  %v1447_v25 = vadd.f32 2.2, %v1625_v18 }
  0x26   : > { %v1627_v19 = vmul.f32 2.5, %v1462_v15  ;;  %v1645_v27 = vadd.f32 2.2, %v1630_v20  ;;  %v1647_v28 = vmul.f32 -1.442695, %v1452_v12 }
  0x27   : > { %v1632_v21 = vfloor.f32 %v706_v16  ;;  %v1634_v22 = vfloor.f32 %v234_v17  ;;  %v1654_v31 = vadd.f32 2.2, %v1637_v23  ;;  %v1657_v32 = vadd.f32 2.2, %v1640_v24 }
  0x28   : > { %v1651_v30 = vfloor.f32 %v1627_v19  ;;  %v1660_v39 = vmul.f32 2.5, %v1447_v25  ;;  %1494 = vpow2.f32 %v1647_v28 }
  0x29   : > { %v716_v26 = vsub.f32 %v706_v16, %v1632_v21  ;;  %v244_v29 = vsub.f32 %v234_v17, %v1634_v22  ;;  %vm2942_vm0 = vcmp.eq.f32.partialorder %v1632_v21, 5.0  ;;  %vm2962_vm1 = vcmp.eq.f32.partialorder %v1632_v21, 4.0 }
  0x2a   : > { %vm2963_vm2 = vcmp.eq.f32.partialorder %v1632_v21, 3.0  ;;  %vm881_vm3 = vcmp.eq.f32.partialorder %v1632_v21, 2.0  ;;  %vm2994_vm4 = vcmp.eq.f32.partialorder %v1634_v22, 3.0  ;;  %v720_v14 = vsub.f32 %v1627_v19, %v1651_v30 }
  0x2b   : > { %v726_v33 = vadd.f32 1.0, %v716_v26  ;;  %v731_v34 = vadd.f32 2.0, %v716_v26  ;;  %v736_v35 = vadd.f32 3.0, %v716_v26  ;;  %v746_v36 = vmul.f32 %v716_v26, %v716_v26 }
  0x2c   : > { %v254_v37 = vadd.f32 1.0, %v244_v29  ;;  %v274_v38 = vmul.f32 %v244_v29, %v244_v29  ;;  %v259_v43 = vadd.f32 2.0, %v244_v29  ;;  %v264_v46 = vadd.f32 3.0, %v244_v29 }
  0x2d   : > { %v741_v40 = vsub.f32 2.0, %v726_v33  ;;  %v761_v41 = vsub.f32 3.0, %v726_v33  ;;  %v781_v42 = vsub.f32 3.0, %v731_v34  ;;  %v751_v44 = vmul.f32 0.5, %v746_v36 }
  0x2e   : > { %v811_v45 = vsub.f32 4.0, %v726_v33  ;;  %v269_v47 = vsub.f32 2.0, %v254_v37  ;;  %v856_v51 = vsub.f32 4.0, %v736_v35  ;;  %v836_v52 = vsub.f32 4.0, %v731_v34 }
  0x2f   : > { %v756_v48 = vmul.f32 %v741_v40, %v726_v33  ;;  %v766_v49 = vmul.f32 %v761_v41, %v716_v26  ;;  %v786_v50 = vmul.f32 %v781_v42, %v741_v40  ;;  %v279_v53 = vmul.f32 0.5, %v274_v38 }
  0x30   : > { %v284_v54 = vmul.f32 %v269_v47, %v254_v37  ;;  %v289_v55 = vsub.f32 3.0, %v254_v37  ;;  %v796_v58 = vmul.f32 %v751_v44, %v716_v26  ;;  %v309_v59 = vsub.f32 3.0, %v259_v43 }
  0x31   : > { %v771_v56 = vadd.f32 %v766_v49, %v756_v48  ;;  %v791_v57 = vmul.f32 0.5, %v786_v50  ;;  %v816_v60 = vmul.f32 %v811_v45, %v751_v44  ;;  %v324_v62 = vmul.f32 %v279_v53, %v244_v29 }
  0x32   : > { %v294_v61 = vmul.f32 %v289_v55, %v244_v29  ;;  %v339_v63 = vsub.f32 4.0, %v254_v37  ;;  %v314_v3 = vmul.f32 %v309_v59, %v269_v47  ;;  %v364_v5 = vsub.f32 4.0, %v259_v43 }
  0x33   : > { %v776_v0 = vmul.f32 0.5, %v771_v56  ;;  %v831_v1 = vmul.f32 %v791_v57, %v731_v34  ;;  %v861_v2 = vmul.f32 %v856_v51, %v791_v57  ;;  %v384_v6 = vsub.f32 4.0, %v264_v46  ;;  %v1706_v56 = vld [vmem:[%s1619_s26 + $0x20] sm:$0xff] }
  0x34   : > { %v299_v4 = vadd.f32 %v294_v61, %v284_v54  ;;  %v319_v10 = vmul.f32 0.5, %v314_v3  ;;  %v1668_v11 = vmul.f32 0.33333334, %v796_v58  ;;  %v344_v13 = vmul.f32 %v339_v63, %v279_v53  ;;  %3066 = vst [vmem:[#allocation11_spill] sm:$0xff] %v1706_v56 }
  0x35   : > { %v806_v7 = vmul.f32 %v776_v0, %v726_v33  ;;  %v841_v8 = vmul.f32 %v836_v52, %v776_v0  ;;  %v1666_v9 = vmul.f32 0.33333334, %v861_v2  ;;  %v1675_v25 = vmul.f32 0.33333334, %v324_v62 }
  0x36   : > { %3064 = vst [vmem:[#allocation9_spill] sm:$0xff] %v1668_v11  ;;  %v304_v12 = vmul.f32 0.5, %v299_v4  ;;  %v359_v29 = vmul.f32 %v319_v10, %v259_v43  ;;  %v389_v34 = vmul.f32 %v384_v6, %v319_v10  ;;  %vm2941_vm5 = vcmp.eq.f32.partialorder %v1634_v22, 5.0 }
  0x37   : > { %3063 = vst [vmem:[#allocation8_spill] sm:$0xff] %v1666_v9  ;;  %v821_v15 = vadd.f32 %v816_v60, %v806_v7  ;;  %v846_v16 = vadd.f32 %v841_v8, %v831_v1  ;;  %v976_v17 = vsel %vm2942_vm0, %v1666_v9, 0.0  ;;  %v730_v38 = vadd.f32 1.0, %v720_v14 }
  0x38   : > { %v334_v26 = vmul.f32 %v304_v12, %v254_v37  ;;  %v369_v33 = vmul.f32 %v364_v5, %v304_v12  ;;  %v1682_v41 = vmul.f32 0.33333334, %v389_v34  ;;  %v735_v42 = vadd.f32 2.0, %v720_v14 }
  0x39   : > { %v1677_v35 = vmul.f32 0.33333334, %v821_v15  ;;  %v1679_v36 = vmul.f32 0.33333334, %v846_v16  ;;  %vm3003_vm6 = vcmp.eq.f32.partialorder %v1634_v22, 4.0  ;;  %v745_v37 = vsub.f32 2.0, %v730_v38 }
  0x3a   : > { %v349_v19 = vadd.f32 %v344_v13, %v334_v26  ;;  %v374_v40 = vadd.f32 %v369_v33, %v359_v29  ;;  %v750_v43 = vmul.f32 %v720_v14, %v720_v14  ;;  %v740_v48 = vadd.f32 3.0, %v720_v14 }
  0x3b   : > { %3065 = vst [vmem:[#allocation10_spill] sm:$0xff] %v1679_v36  ;;  %v981_v44 = vsel %vm2962_vm1, %v1679_v36, %v976_v17  ;;  %vm409_vm7 = vcmp.eq.f32.partialorder %v1634_v22, 2.0  ;;  %v504_v50 = vsel %vm2941_vm5, %v1682_v41, 0.0  ;;  %v760_v53 = vmul.f32 %v745_v37, %v730_v38 }
  0x3c   : > { %v986_v45 = vsel %vm2963_vm2, %v1677_v35, %v981_v44  ;;  %v1691_v46 = vmul.f32 0.33333334, %v349_v19  ;;  %v1693_v47 = vmul.f32 0.33333334, %v374_v40  ;;  %v755_v51 = vmul.f32 0.5, %v750_v43 }
  0x3d   : > { %v991_v49 = vsel %vm881_vm3, %v1668_v11, %v986_v45  ;;  %v765_v54 = vsub.f32 3.0, %v730_v38  ;;  %v785_v55 = vsub.f32 3.0, %v735_v42  ;;  %v815_v59 = vsub.f32 4.0, %v730_v38 }
  0x3e   : > { %1223 = vmatprep.subr.mxu0 %v991_v49  ;;  %v509_v52 = vsel %vm3003_vm6, %v1693_v47, %v504_v50  ;;  %v800_v58 = vmul.f32 %v755_v51, %v720_v14  ;;  %v709_v60 = vmul.f32 2.5, %v1645_v27  ;;  %v860_v0 = vsub.f32 4.0, %v740_v48 }
  0x3f   : > { %v514_v57 = vsel %vm2994_vm4, %v1691_v46, %v509_v52  ;;  %v770_v62 = vmul.f32 %v765_v54, %v720_v14  ;;  %v790_v63 = vmul.f32 %v785_v55, %v745_v37  ;;  %v1716_v1 = vmul.f32 2.5, %v1654_v31 }
  0x40   : > { %v519_v61 = vsel %vm409_vm7, %v1675_v25, %v514_v57  ;;  %v1719_v2 = vmul.f32 2.5, %v1657_v32  ;;  %v1722_v3 = vadd.f32 2.2, %v1706_v56  ;;  %v1725_v5 = vmul.f32 0.33333334, %v800_v58 }
  0x41   : > { %1224 = vmatpush1.msra.mxu0 %v519_v61  ;;  %v775_v27 = vadd.f32 %v770_v62, %v760_v53  ;;  %v795_v4 = vmul.f32 0.5, %v790_v63  ;;  %v840_v6 = vsub.f32 4.0, %v735_v42  ;;  %v820_v7 = vmul.f32 %v815_v59, %v755_v51  ;;  %v1762_v63 = vpop.eup %1494 }
  0x42   : > { %3067 = vst [vmem:[#allocation12_spill] sm:$0xff] %v1725_v5  ;;  %vm880_vm8 = vcmp.eq.f32.partialorder %v1651_v30, 1.0  ;;  %vm2995_vm9 = vcmp.eq.f32.partialorder %v1651_v30, 2.0  ;;  %v1730_v31 = vfloor.f32 %v1660_v39  ;;  %v1732_v12 = vfloor.f32 %v709_v60  ;;  %3069 = vst [vmem:[#allocation14_spill] sm:$0xff] %v1762_v63 }
  0x43   : > { %v780_v32 = vmul.f32 0.5, %v775_v27  ;;  %v835_v8 = vmul.f32 %v795_v4, %v735_v42  ;;  %v865_v10 = vmul.f32 %v860_v0, %v795_v4  ;;  %vm3002_vm10 = vcmp.eq.f32.partialorder %v1651_v30, 3.0 }
  0x44   : > { %3068 = vst [vmem:[#allocation13_spill] sm:$0xff] %v1732_v12  ;;  %vm2940_vm11 = vcmp.eq.f32.partialorder %v1651_v30, 4.0  ;;  %v248_v28 = vsub.f32 %v1660_v39, %v1730_v31  ;;  %v1739_v13 = vfloor.f32 %v1716_v1  ;;  %v1744_v17 = vfloor.f32 %v1719_v2 }
  0x45   : > { %v810_v14 = vmul.f32 %v780_v32, %v730_v38  ;;  %v845_v15 = vmul.f32 %v840_v6, %v780_v32  ;;  %v1741_v16 = vmul.f32 0.33333334, %v865_v10  ;;  %v719_v42 = vsub.f32 %v709_v60, %v1732_v12 }
  0x46   : > { %v258_v26 = vadd.f32 1.0, %v248_v28  ;;  %v263_v29 = vadd.f32 2.0, %v248_v28  ;;  %v268_v33 = vadd.f32 3.0, %v248_v28  ;;  %v278_v34 = vmul.f32 %v248_v28, %v248_v28 }
  0x47   : > { %v825_v19 = vadd.f32 %v820_v7, %v810_v14  ;;  %v850_v40 = vadd.f32 %v845_v15, %v835_v8  ;;  %v955_v39 = vsel %vm2940_vm11, %v1741_v16, 0.0  ;;  %vm2939_vm12 = vcmp.eq.f32.partialorder %v1730_v31, 4.0 }
  0x48   : > { %v273_v44 = vsub.f32 2.0, %v258_v26  ;;  %v283_v38 = vmul.f32 0.5, %v278_v34  ;;  %v293_v37 = vsub.f32 3.0, %v258_v26  ;;  %v313_v43 = vsub.f32 3.0, %v263_v29 }
  0x49   : > { %v1750_v45 = vmul.f32 0.33333334, %v825_v19  ;;  %v1752_v48 = vmul.f32 0.33333334, %v850_v40  ;;  %v343_v49 = vsub.f32 4.0, %v258_v26  ;;  %v368_v53 = vsub.f32 4.0, %v263_v29 }
  0x4a   : > { %v288_v50 = vmul.f32 %v273_v44, %v258_v26  ;;  %v298_v51 = vmul.f32 %v293_v37, %v248_v28  ;;  %v318_v52 = vmul.f32 %v313_v43, %v273_v44  ;;  %v328_v55 = vmul.f32 %v283_v38, %v248_v28 }
  0x4b   : > { %v960_v54 = vsel %vm3002_vm10, %v1752_v48, %v955_v39  ;;  %v388_v57 = vsub.f32 4.0, %v268_v33  ;;  %v729_v58 = vadd.f32 1.0, %v719_v42  ;;  %v348_v62 = vmul.f32 %v343_v49, %v283_v38 }
  0x4c   : > { %v965_v59 = vsel %vm2995_vm9, %v1750_v45, %v960_v54  ;;  %v303_v60 = vadd.f32 %v298_v51, %v288_v50  ;;  %v323_v61 = vmul.f32 0.5, %v318_v52  ;;  %vm2997_vm13 = vcmp.eq.f32.partialorder %v1730_v31, 2.0 }
  0x4d   : > { %v970_v0 = vsel %vm880_vm8, %v1725_v5, %v965_v59  ;;  %vm2992_vm14 = vcmp.eq.f32.partialorder %v1730_v31, 1.0  ;;  %v734_v27 = vadd.f32 2.0, %v719_v42  ;;  %v739_v4 = vadd.f32 3.0, %v719_v42 }
  0x4e   : > { %v744_v6 = vsub.f32 2.0, %v729_v58  ;;  %1225 = vmatprep.subr.mxu0 %v970_v0  ;;  %v308_v7 = vmul.f32 0.5, %v303_v60  ;;  %v363_v32 = vmul.f32 %v323_v61, %v263_v29  ;;  %v393_v8 = vmul.f32 %v388_v57, %v323_v61 }
  0x4f   : > { %v749_v10 = vmul.f32 %v719_v42, %v719_v42  ;;  %v764_v14 = vsub.f32 3.0, %v729_v58  ;;  %v784_v15 = vsub.f32 3.0, %v734_v27  ;;  %v814_v33 = vsub.f32 4.0, %v729_v58 }
  0x50   : > { %v759_v28 = vmul.f32 %v744_v6, %v729_v58  ;;  %v338_v34 = vmul.f32 %v308_v7, %v258_v26  ;;  %v373_v19 = vmul.f32 %v368_v53, %v308_v7  ;;  %v1768_v40 = vmul.f32 0.33333334, %v393_v8 }
  0x51   : > { %v754_v39 = vmul.f32 0.5, %v749_v10  ;;  %vm2996_vm15 = vcmp.eq.f32.partialorder %v1730_v31, 3.0  ;;  %v769_v44 = vmul.f32 %v764_v14, %v719_v42  ;;  %v789_v38 = vmul.f32 %v784_v15, %v744_v6 }
  0x52   : > { %v859_v37 = vsub.f32 4.0, %v739_v4  ;;  %v1771_v43 = vmul.f32 0.33333334, %v328_v55  ;;  %v353_v49 = vadd.f32 %v348_v62, %v338_v34  ;;  %v378_v29 = vadd.f32 %v373_v19, %v363_v32 }
  0x53   : > { %v799_v50 = vmul.f32 %v754_v39, %v719_v42  ;;  %v483_v51 = vsel %vm2939_vm12, %v1768_v40, 0.0  ;;  %v774_v52 = vadd.f32 %v769_v44, %v759_v28  ;;  %v794_v26 = vmul.f32 0.5, %v789_v38 }
  0x54   : > { %v839_v53 = vsub.f32 4.0, %v734_v27  ;;  %v1776_v54 = vmul.f32 0.33333334, %v353_v49  ;;  %v1778_v57 = vmul.f32 0.33333334, %v378_v29  ;;  %v819_v59 = vmul.f32 %v814_v33, %v754_v39 }
  0x55   : > { %v247_v60 = vsub.f32 %v1716_v1, %v1739_v13  ;;  %v779_v55 = vmul.f32 0.5, %v774_v52  ;;  %v1782_v61 = vmul.f32 0.33333334, %v799_v50  ;;  %v834_v62 = vmul.f32 %v794_v26, %v734_v27 }
  0x56   : > { %v864_v42 = vmul.f32 %v859_v37, %v794_v26  ;;  %v488_v0 = vsel %vm2996_vm15, %v1778_v57, %v483_v51  ;;  %vm2944_vm12 = vcmp.eq.f32.partialorder %v1732_v12, 2.0  ;;  %vm2943_vm11 = vcmp.eq.f32.partialorder %v1732_v12, 4.0 }
  0x57   : > { %3070 = vst [vmem:[#allocation15_spill] sm:$0xff] %v1782_v61  ;;  %v257_v4 = vadd.f32 1.0, %v247_v60  ;;  %v493_v6 = vsel %vm2997_vm13, %v1776_v54, %v488_v0  ;;  %v809_v7 = vmul.f32 %v779_v55, %v729_v58  ;;  %v844_v1 = vmul.f32 %v839_v53, %v779_v55 }
  0x58   : > { %v1792_v32 = vmul.f32 0.33333334, %v864_v42  ;;  %v498_v27 = vsel %vm2992_vm14, %v1771_v43, %v493_v6  ;;  %v262_v8 = vadd.f32 2.0, %v247_v60  ;;  %v267_v10 = vadd.f32 3.0, %v247_v60 }
  0x59   : > { %v272_v28 = vsub.f32 2.0, %v257_v4  ;;  %1226 = vmatpush1.msra.mxu0 %v498_v27  ;;  %v824_v14 = vadd.f32 %v819_v59, %v809_v7  ;;  %v849_v15 = vadd.f32 %v844_v1, %v834_v62  ;;  %vm2945_vm5 = vcmp.eq.f32.partialorder %v1732_v12, 3.0 }
  0x5a   : > { %v277_v33 = vmul.f32 %v247_v60, %v247_v60  ;;  %v954_v58 = vsel %vm2943_vm11, %v1792_v32, 0.0  ;;  %v292_v19 = vsub.f32 3.0, %v257_v4  ;;  %v312_v39 = vsub.f32 3.0, %v262_v8 }
  0x5b   : > { %v287_v34 = vmul.f32 %v272_v28, %v257_v4  ;;  %v1801_v44 = vmul.f32 0.33333334, %v824_v14  ;;  %v1803_v38 = vmul.f32 0.33333334, %v849_v15  ;;  %v342_v49 = vsub.f32 4.0, %v257_v4 }
  0x5c   : > { %v282_v37 = vmul.f32 0.5, %v277_v33  ;;  %vm2946_vm0 = vcmp.eq.f32.partialorder %v1732_v12, 1.0  ;;  %v297_v29 = vmul.f32 %v292_v19, %v247_v60  ;;  %v317_v50 = vmul.f32 %v312_v39, %v272_v28 }
  0x5d   : > { %3071 = vst [vmem:[#allocation16_spill] sm:$0xff] %v1801_v44  ;;  %3072 = vst [vmem:[#allocation17_spill] sm:$0xff] %v1803_v38  ;;  %v387_v51 = vsub.f32 4.0, %v267_v10  ;;  %v926_v52 = vsel %vm2963_vm2, %v1666_v9, 0.0  ;;  %v454_v26 = vsel %vm2994_vm4, %v1682_v41, 0.0  ;;  %v959_v53 = vsel %vm2945_vm5, %v1803_v38, %v954_v58 }
  0x5e   : > { %v236_v59 = vmul.f32 2.5, %v1722_v3  ;;  %v964_v55 = vsel %vm2944_vm12, %v1801_v44, %v959_v53  ;;  %v302_v62 = vadd.f32 %v297_v29, %v287_v34  ;;  %v322_v42 = vmul.f32 0.5, %v317_v50 }
  0x5f   : > { %v367_v0 = vsub.f32 4.0, %v262_v8  ;;  %v969_v6 = vsel %vm2946_vm0, %v1782_v61, %v964_v55  ;;  %v327_v7 = vmul.f32 %v282_v37, %v247_v60  ;;  %v347_v1 = vmul.f32 %v342_v49, %v282_v37 }
  0x60   : > { %vm2949_vm11 = vcmp.eq.f32.partialorder %v1739_v13, 1.0  ;;  %v718_v27 = vsub.f32 %v1719_v2, %v1744_v17  ;;  %1227 = vmatprep.subr.mxu0 %v969_v6  ;;  %v307_v3 = vmul.f32 0.5, %v302_v62  ;;  %v362_v10 = vmul.f32 %v322_v42, %v262_v8 }
  0x61   : > { %v392_v28 = vmul.f32 %v387_v51, %v322_v42  ;;  %vm2948_vm12 = vcmp.eq.f32.partialorder %v1739_v13, 2.0  ;;  %vm2950_vm5 = vcmp.eq.f32.partialorder %v1739_v13, 3.0  ;;  %vm2947_vm0 = vcmp.eq.f32.partialorder %v1739_v13, 4.0 }
  0x62   : > { %v728_v14 = vadd.f32 1.0, %v718_v27  ;;  %v733_v15 = vadd.f32 2.0, %v718_v27  ;;  %v748_v33 = vmul.f32 %v718_v27, %v718_v27  ;;  %v337_v58 = vmul.f32 %v307_v3, %v257_v4 }
  0x63   : > { %v372_v34 = vmul.f32 %v367_v0, %v307_v3  ;;  %v1827_v60 = vmul.f32 0.33333334, %v392_v28  ;;  %v738_v19 = vadd.f32 3.0, %v718_v27  ;;  %v1836_v62 = vsel %vm881_vm3, %v1679_v36, %v926_v52 }
  0x64   : > { %v743_v39 = vsub.f32 2.0, %v728_v14  ;;  %v763_v2 = vsub.f32 3.0, %v728_v14  ;;  %v783_v37 = vsub.f32 3.0, %v733_v15  ;;  %v352_v49 = vadd.f32 %v347_v1, %v337_v58 }
  0x65   : > { %3073 = vst [vmem:[#allocation18_spill] sm:$0xff] %v1827_v60  ;;  %v377_v8 = vadd.f32 %v372_v34, %v362_v10  ;;  %v753_v29 = vmul.f32 0.5, %v748_v33  ;;  %v813_v50 = vsub.f32 4.0, %v728_v14  ;;  %v482_v51 = vsel %vm2947_vm0, %v1827_v60, 0.0 }
  0x66   : > { %v758_v53 = vmul.f32 %v743_v39, %v728_v14  ;;  %v768_v55 = vmul.f32 %v763_v2, %v718_v27  ;;  %v788_v4 = vmul.f32 %v783_v37, %v743_v39  ;;  %v1838_v42 = vmul.f32 0.33333334, %v327_v7 }
  0x67   : > { %v1840_v0 = vmul.f32 0.33333334, %v352_v49  ;;  %v1842_v6 = vmul.f32 0.33333334, %v377_v8  ;;  %v838_v10 = vsub.f32 4.0, %v733_v15  ;;  %v858_v28 = vsub.f32 4.0, %v738_v19 }
  0x68   : > { %3074 = vst [vmem:[#allocation19_spill] sm:$0xff] %v1838_v42  ;;  %v773_v1 = vadd.f32 %v768_v55, %v758_v53  ;;  %v793_v3 = vmul.f32 0.5, %v788_v4  ;;  %v798_v58 = vmul.f32 %v753_v29, %v718_v27  ;;  %v818_v34 = vmul.f32 %v813_v50, %v753_v29 }
  0x69   : > { %3075 = vst [vmem:[#allocation20_spill] sm:$0xff] %v1840_v0  ;;  %3076 = vst [vmem:[#allocation21_spill] sm:$0xff] %v1842_v6  ;;  %v487_v33 = vsel %vm2950_vm5, %v1842_v6, %v482_v51  ;;  %v1847_v39 = vfloor.f32 %v236_v59  ;;  %v1855_v49 = vsel %vm409_vm7, %v1693_v47, %v454_v26  ;;  %vm2959_vm0 = vcmp.eq.f32.partialorder %v1744_v17, 2.0 }
  0x6a   : > { %v492_v52 = vsel %vm2948_vm12, %v1840_v0, %v487_v33  ;;  %v778_v7 = vmul.f32 0.5, %v773_v1  ;;  %v833_v2 = vmul.f32 %v793_v3, %v733_v15  ;;  %v863_v37 = vmul.f32 %v858_v28, %v793_v3  ;;  %3078 = vst [vmem:[#allocation23_spill] sm:$0xff] %v1855_v49  ;;  %v1872_v28 = vld [vmem:[%s1619_s26 + $0x18] sm:$0xff] }
  0x6b   : > { %3077 = vst [vmem:[#allocation22_spill] sm:$0xff] %v1847_v39  ;;  %v497_v19 = vsel %vm2949_vm11, %v1838_v42, %v492_v52  ;;  %v246_v27 = vsub.f32 %v236_v59, %v1847_v39  ;;  %vm2958_vm12 = vcmp.eq.f32.partialorder %v1744_v17, 4.0  ;;  %v1865_v15 = vmul.f32 0.33333334, %v798_v58  ;;  %3080 = vst [vmem:[#allocation25_spill] sm:$0xff] %v1872_v28 }
  0x6c   : > { %1228 = vmatpush1.msra.mxu0 %v497_v19  ;;  %v808_v8 = vmul.f32 %v778_v7, %v728_v14  ;;  %v843_v29 = vmul.f32 %v838_v10, %v778_v7  ;;  %v1862_v50 = vmul.f32 0.33333334, %v863_v37  ;;  %vm2960_vm11 = vcmp.eq.f32.partialorder %v1744_v17, 3.0  ;;  %v1880_v19 = vld [vmem:[%s1619_s26 + $0x10] sm:$0xff] }
  0x6d   : > { %3079 = vst [vmem:[#allocation24_spill] sm:$0xff] %v1865_v15  ;;  %v256_v26 = vadd.f32 1.0, %v246_v27  ;;  %v261_v51 = vadd.f32 2.0, %v246_v27  ;;  %v276_v53 = vmul.f32 %v246_v27, %v246_v27  ;;  %v266_v1 = vadd.f32 3.0, %v246_v27  ;;  %3083 = vst [vmem:[#allocation28_spill] sm:$0xff] %v1880_v19 }
  0x6e   : > { %v823_v55 = vadd.f32 %v818_v34, %v808_v8  ;;  %v848_v4 = vadd.f32 %v843_v29, %v833_v2  ;;  %v953_v59 = vsel %vm2958_vm12, %v1862_v50, 0.0  ;;  %vm2961_vm5 = vcmp.eq.f32.partialorder %v1744_v17, 1.0  ;;  %v1127_v8 = vld [vmem:[%s2937_s1 + $0x8] sm:$0xff] }
  0x6f   : > { %v271_v14 = vsub.f32 2.0, %v256_v26  ;;  %v291_v3 = vsub.f32 3.0, %v256_v26  ;;  %v311_v10 = vsub.f32 3.0, %v261_v51  ;;  %v281_v52 = vmul.f32 0.5, %v276_v53  ;;  %1287 = vmatprep.mubr.f32.mxu0 %v1127_v8 }
  0x70   : > { %v1874_v33 = vmul.f32 0.33333334, %v823_v55  ;;  %v1876_v58 = vmul.f32 0.33333334, %v848_v4  ;;  %v341_v34 = vsub.f32 4.0, %v256_v26  ;;  %v366_v55 = vsub.f32 4.0, %v261_v51 }
  0x71   : > { %v286_v7 = vmul.f32 %v271_v14, %v256_v26  ;;  %v296_v2 = vmul.f32 %v291_v3, %v246_v27  ;;  %v316_v37 = vmul.f32 %v311_v10, %v271_v14  ;;  %v386_v4 = vsub.f32 4.0, %v266_v1 }
  0x72   : > { %3081 = vst [vmem:[#allocation26_spill] sm:$0xff] %v1874_v33  ;;  %3082 = vst [vmem:[#allocation27_spill] sm:$0xff] %v1876_v58  ;;  %v958_v29 = vsel %vm2960_vm11, %v1876_v58, %v953_v59  ;;  %v1459_v53 = vadd.f32 2.2, %v1872_v28  ;;  %v326_v56 = vmul.f32 %v281_v52, %v246_v27  ;;  %v346_v23 = vmul.f32 %v341_v34, %v281_v52 }
  0x73   : > { %v963_v3 = vsel %vm2959_vm0, %v1874_v33, %v958_v29  ;;  %v301_v14 = vadd.f32 %v296_v2, %v286_v7  ;;  %v321_v10 = vmul.f32 0.5, %v316_v37  ;;  %v1444_v59 = vadd.f32 2.2, %v1880_v19 }
  0x74   : > { %v968_v24 = vsel %vm2961_vm5, %v1865_v15, %v963_v3  ;;  %v707_v20 = vmul.f32 2.5, %v1459_v53  ;;  %v951_v8 = vsel %vm2962_vm1, %v1666_v9, 0.0  ;;  %vm2971_vm12 = vcmp.eq.f32.partialorder %v1847_v39, 1.0 }
  0x75   : > { %1229 = vmatprep.subr.mxu0 %v968_v24  ;;  %v306_v1 = vmul.f32 0.5, %v301_v14  ;;  %v361_v18 = vmul.f32 %v321_v10, %v261_v51  ;;  %v391_v28 = vmul.f32 %v386_v4, %v321_v10  ;;  %vm2978_vm0 = vcmp.eq.f32.partialorder %v1847_v39, 2.0 }
  0x76   : > { %vm2970_vm11 = vcmp.eq.f32.partialorder %v1847_v39, 4.0  ;;  %v1902_v27 = vfloor.f32 %v707_v20  ;;  %v235_v24 = vmul.f32 2.5, %v1444_v59  ;;  %v1906_v2 = vmul.f32 0.33333334, %v326_v56 }
  0x77   : > { %v336_v52 = vmul.f32 %v306_v1, %v256_v26  ;;  %v371_v34 = vmul.f32 %v366_v55, %v306_v1  ;;  %v1904_v7 = vmul.f32 0.33333334, %v391_v28  ;;  %vm2991_vm5 = vcmp.eq.f32.partialorder %v1847_v39, 3.0 }
  0x78   : > { %3085 = vst [vmem:[#allocation30_spill] sm:$0xff] %v1906_v2  ;;  %v717_v51 = vsub.f32 %v707_v20, %v1902_v27  ;;  %v956_v37 = vsel %vm2963_vm2, %v1679_v36, %v951_v8  ;;  %vm876_vm1 = vcmp.eq.f32.partialorder %v1632_v21, 1.0  ;;  %v1921_v20 = vfloor.f32 %v235_v24 }
  0x79   : > { %3084 = vst [vmem:[#allocation29_spill] sm:$0xff] %v1904_v7  ;;  %v351_v29 = vadd.f32 %v346_v23, %v336_v52  ;;  %v376_v4 = vadd.f32 %v371_v34, %v361_v18  ;;  %v481_v26 = vsel %vm2970_vm11, %v1904_v7, 0.0  ;;  %v961_v18 = vsel %vm881_vm3, %v1677_v35, %v956_v37 }
  0x7a   : > { %v727_v28 = vadd.f32 1.0, %v717_v51  ;;  %v732_v55 = vadd.f32 2.0, %v717_v51  ;;  %v737_v56 = vadd.f32 3.0, %v717_v51  ;;  %v747_v53 = vmul.f32 %v717_v51, %v717_v51 }
  0x7b   : > { %v1917_v3 = vmul.f32 0.33333334, %v351_v29  ;;  %v1919_v14 = vmul.f32 0.33333334, %v376_v4  ;;  %vm2993_vm2 = vcmp.eq.f32.partialorder %v1902_v27, 4.0  ;;  %vm3001_vm3 = vcmp.eq.f32.partialorder %v1902_v27, 3.0 }
  0x7c   : > { %v742_v23 = vsub.f32 2.0, %v727_v28  ;;  %v752_v10 = vmul.f32 0.5, %v747_v53  ;;  %v762_v59 = vsub.f32 3.0, %v727_v28  ;;  %v782_v1 = vsub.f32 3.0, %v732_v55 }
  0x7d   : > { %3086 = vst [vmem:[#allocation31_spill] sm:$0xff] %v1917_v3  ;;  %3087 = vst [vmem:[#allocation32_spill] sm:$0xff] %v1919_v14  ;;  %v486_v8 = vsel %vm2991_vm5, %v1919_v14, %v481_v26  ;;  %v812_v52 = vsub.f32 4.0, %v727_v28  ;;  %v857_v34 = vsub.f32 4.0, %v737_v56  ;;  %v245_v26 = vsub.f32 %v235_v24, %v1921_v20 }
  0x7e   : > { %v491_v29 = vsel %vm2978_vm0, %v1917_v3, %v486_v8  ;;  %v757_v4 = vmul.f32 %v742_v23, %v727_v28  ;;  %v767_v36 = vmul.f32 %v762_v59, %v717_v51  ;;  %v787_v9 = vmul.f32 %v782_v1, %v742_v23 }
  0x7f   : > { %v496_v37 = vsel %vm2971_vm12, %v1906_v2, %v491_v29  ;;  %v797_v53 = vmul.f32 %v752_v10, %v717_v51  ;;  %v1941_v56 = vsel %vm876_vm1, %v1668_v11, %v961_v18  ;;  %v817_v63 = vmul.f32 %v812_v52, %v752_v10 }
  0x80   : > { %3088 = vst [vmem:[#allocation33_spill] sm:$0xff] %v1941_v56  ;;  %1230 = vmatpush1.msra.mxu0 %v496_v37  ;;  %v772_v19 = vadd.f32 %v767_v36, %v757_v4  ;;  %v792_v8 = vmul.f32 0.5, %v787_v9  ;;  %v837_v59 = vsub.f32 4.0, %v732_v55  ;;  %vm2999_vm11 = vcmp.eq.f32.partialorder %v1902_v27, 2.0 }
  0x81   : > { %v1944_v23 = vmul.f32 0.33333334, %v797_v53  ;;  %vm877_vm12 = vcmp.eq.f32.partialorder %v1902_v27, 1.0  ;;  %v255_v51 = vadd.f32 1.0, %v245_v26  ;;  %v260_v1 = vadd.f32 2.0, %v245_v26 }
  0x82   : > { %v265_v29 = vadd.f32 3.0, %v245_v26  ;;  %v777_v24 = vmul.f32 0.5, %v772_v19  ;;  %v832_v49 = vmul.f32 %v792_v8, %v732_v55  ;;  %v862_v2 = vmul.f32 %v857_v34, %v792_v8 }
  0x83   : > { %v275_v3 = vmul.f32 %v245_v26, %v245_v26  ;;  %v270_v18 = vsub.f32 2.0, %v255_v51  ;;  %v290_v11 = vsub.f32 3.0, %v255_v51  ;;  %v310_v37 = vsub.f32 3.0, %v260_v1 }
  0x84   : > { %v340_v36 = vsub.f32 4.0, %v255_v51  ;;  %vm404_vm0 = vcmp.eq.f32.partialorder %v1634_v22, 1.0  ;;  %v807_v9 = vmul.f32 %v777_v24, %v727_v28  ;;  %v842_v10 = vmul.f32 %v837_v59, %v777_v24 }
  0x85   : > { %v1948_v52 = vmul.f32 0.33333334, %v862_v2  ;;  %v280_v4 = vmul.f32 0.5, %v275_v3  ;;  %v285_v53 = vmul.f32 %v270_v18, %v255_v51  ;;  %v295_v15 = vmul.f32 %v290_v11, %v245_v26 }
  0x86   : > { %v315_v14 = vmul.f32 %v310_v37, %v270_v18  ;;  %v365_v33 = vsub.f32 4.0, %v260_v1  ;;  %v822_v56 = vadd.f32 %v817_v63, %v807_v9  ;;  %v847_v19 = vadd.f32 %v842_v10, %v832_v49 }
  0x87   : > { %v952_v55 = vsel %vm2993_vm2, %v1948_v52, 0.0  ;;  %v325_v34 = vmul.f32 %v280_v4, %v245_v26  ;;  %v300_v8 = vadd.f32 %v295_v15, %v285_v53  ;;  %v345_v39 = vmul.f32 %v340_v36, %v280_v4 }
  0x88   : > { %v320_v7 = vmul.f32 0.5, %v315_v14  ;;  %v385_v58 = vsub.f32 4.0, %v265_v29  ;;  %v1954_v2 = vmul.f32 0.33333334, %v822_v56  ;;  %v1956_v28 = vmul.f32 0.33333334, %v847_v19 }
  0x89   : > { %v1958_v11 = vmul.f32 0.33333334, %v325_v34  ;;  %v1965_v63 = vsel %vm876_vm1, %v1677_v35, %v1836_v62  ;;  %v305_v49 = vmul.f32 0.5, %v300_v8  ;;  %vm3000_vm2 = vcmp.eq.f32.partialorder %v1921_v20, 3.0 }
  0x8a   : > { %v360_v15 = vmul.f32 %v320_v7, %v260_v1  ;;  %v390_v3 = vmul.f32 %v385_v58, %v320_v7  ;;  %v957_v14 = vsel %vm3001_vm3, %v1956_v28, %v952_v55  ;;  %vm3021_vm5 = vcmp.eq.f32.partialorder %v1921_v20, 4.0 }
  0x8b   : > { %v479_v26 = vsel %vm3003_vm6, %v1682_v41, 0.0  ;;  %vm875_vm14 = vcmp.eq.f32.partialorder %v1651_v30, 0.0  ;;  %v962_v62 = vsel %vm2999_vm11, %v1954_v2, %v957_v14  ;;  %v335_v56 = vmul.f32 %v305_v49, %v255_v51 }
  0x8c   : > { %v370_v58 = vmul.f32 %v365_v33, %v305_v49  ;;  %v1979_v7 = vmul.f32 0.33333334, %v390_v3  ;;  %v967_v59 = vsel %vm877_vm12, %v1944_v23, %v962_v62  ;;  %v484_v1 = vsel %vm2994_vm4, %v1693_v47, %v479_v26 }
  0x8d   : > { %v930_v29 = vsel %vm3002_vm10, %v1741_v16, 0.0  ;;  %vm403_vm1 = vcmp.eq.f32.partialorder %v1730_v31, 0.0  ;;  %1231 = vmatprep.subr.mxu0 %v967_v59  ;;  %v350_v24 = vadd.f32 %v345_v39, %v335_v56  ;;  %v489_v18 = vsel %vm409_vm7, %v1691_v46, %v484_v1 }
  0x8e   : > { %v375_v51 = vadd.f32 %v370_v58, %v360_v15  ;;  %v480_v33 = vsel %vm3021_vm5, %v1979_v7, 0.0  ;;  %v494_v37 = vsel %vm404_vm0, %v1675_v25, %v489_v18  ;;  %v935_v36 = vsel %vm2995_vm9, %v1752_v48, %v930_v29  ;;  %v3102_v18 = vld [vmem:[#allocation29_spill] sm:$0xff] }
  0x8f   : > { %v458_v39 = vsel %vm2996_vm15, %v1768_v40, 0.0  ;;  %vm874_vm4 = vcmp.eq.f32.partialorder %v1732_v12, 0.0  ;;  %v2007_v9 = vmul.f32 0.33333334, %v350_v24  ;;  %v940_v4 = vsel %vm880_vm8, %v1750_v45, %v935_v36  ;;  %v3099_v24 = vld [vmem:[#allocation27_spill] sm:$0xff] }
  0x90   : > { %v2009_v10 = vmul.f32 0.33333334, %v375_v51  ;;  %v463_v53 = vsel %vm2997_vm13, %v1778_v57, %v458_v39  ;;  %v945_v19 = vsel %vm875_vm14, %v1725_v5, %v940_v4  ;;  %vm3089_vm7 = vcmp.eq.f32.partialorder %v1730_v31, 1.0  ;;  %v3104_v39 = vld [vmem:[#allocation33_spill] sm:$0xff]  ;;  %v3105_v4 = vld [vmem:[#allocation26_spill] sm:$0xff] }
  0x91   : > { %v468_v55 = vsel %vm3089_vm7, %v1776_v54, %v463_v53  ;;  %vm3090_vm9 = vcmp.eq.f32.partialorder %v1732_v12, 3.0  ;;  %vm402_vm15 = vcmp.eq.f32.partialorder %v1739_v13, 0.0  ;;  %vm3091_vm8 = vcmp.eq.f32.partialorder %v1732_v12, 2.0 }
  0x92   : > { %v929_v34 = vsel %vm3090_vm9, %v1792_v32, 0.0  ;;  %v485_v8 = vsel %vm3000_vm2, %v2009_v10, %v480_v33  ;;  %v473_v49 = vsel %vm403_vm1, %v1771_v43, %v468_v55  ;;  %vm3092_vm14 = vcmp.eq.f32.partialorder %v1739_v13, 3.0  ;;  %v3101_v33 = vld [vmem:[#allocation22_spill] sm:$0xff]  ;;  %v3107_v55 = vld [vmem:[#allocation32_spill] sm:$0xff] }
  0x93   : > { %v934_v15 = vsel %vm3091_vm8, %v1803_v38, %v929_v34  ;;  %v457_v3 = vsel %vm3092_vm14, %v1827_v60, 0.0  ;;  %vm3093_vm9 = vcmp.eq.f32.partialorder %v1921_v20, 2.0  ;;  %vm3094_vm7 = vcmp.eq.f32.partialorder %v1732_v12, 1.0 }
  0x94   : > { %v490_v14 = vsel %vm3093_vm9, %v2007_v9, %v485_v8  ;;  %v939_v26 = vsel %vm3094_vm7, %v1801_v44, %v934_v15  ;;  %vm3095_vm13 = vcmp.eq.f32.partialorder %v1739_v13, 2.0  ;;  %vm873_vm1 = vcmp.eq.f32.partialorder %v1744_v17, 0.0  ;;  %v3109_v15 = vld [vmem:[#allocation24_spill] sm:$0xff] }
  0x95   : > { %v462_v62 = vsel %vm3095_vm13, %v1842_v6, %v457_v3  ;;  %vm3096_vm8 = vcmp.eq.f32.partialorder %v1921_v20, 1.0  ;;  %v944_v58 = vsel %vm874_vm4, %v1782_v61, %v939_v26  ;;  %vm3097_vm14 = vcmp.eq.f32.partialorder %v1739_v13, 1.0 }
  0x96   : > { %v495_v56 = vsel %vm3096_vm8, %v1958_v11, %v490_v14  ;;  %v467_v59 = vsel %vm3097_vm14, %v1840_v0, %v462_v62  ;;  %vm3098_vm9 = vcmp.eq.f32.partialorder %v1744_v17, 3.0  ;;  %vm3100_vm13 = vcmp.eq.f32.partialorder %v1744_v17, 2.0  ;;  %v3110_v14 = vld [vmem:[#allocation31_spill] sm:$0xff] }
  0x97   : > { %v928_v1 = vsel %vm3098_vm9, %v1862_v50, 0.0  ;;  %1232 = vmatpush1.msra.mxu0 %v495_v56  ;;  %v472_v29 = vsel %vm402_vm15, %v1838_v42, %v467_v59  ;;  %vm401_vm7 = vcmp.eq.f32.partialorder %v3101_v33, 0.0  ;;  %vm3103_vm4 = vcmp.eq.f32.partialorder %v3101_v33, 3.0  ;;  %v3112_v56 = vld [vmem:[#allocation30_spill] sm:$0xff] }
  0x98   : > { %v933_v51 = vsel %vm3100_vm13, %v3099_v24, %v928_v1  ;;  %v456_v36 = vsel %vm3103_vm4, %v3102_v18, 0.0  ;;  %1233 = vmatprep.subr.mxu0 %v3104_v39  ;;  %vm3106_vm8 = vcmp.eq.f32.partialorder %v1744_v17, 1.0  ;;  %vm3108_vm14 = vcmp.eq.f32.partialorder %v3101_v33, 2.0  ;;  %v3122_v18 = vld [vmem:[#allocation11_spill] sm:$0xff] }
  0x99   : > { %v938_v53 = vsel %vm3106_vm8, %v3105_v4, %v933_v51  ;;  %v461_v34 = vsel %vm3108_vm14, %v3107_v55, %v456_v36  ;;  %vm872_vm15 = vcmp.eq.f32.partialorder %v1902_v27, 0.0  ;;  %v927_v8 = vsel %vm3001_vm3, %v1948_v52, 0.0  ;;  %1234 = vmatpush1.msra.mxu0 %v494_v37  ;;  %v2125_v4 = vld [vmem:[%s1619_s26 + $0x8] sm:$0xff] }
  0x9a   : > { %v943_v3 = vsel %vm873_vm1, %v3109_v15, %v938_v53  ;;  %vm3111_vm9 = vcmp.eq.f32.partialorder %v3101_v33, 1.0  ;;  %v932_v62 = vsel %vm2999_vm11, %v1956_v28, %v927_v8  ;;  %vm400_vm13 = vcmp.eq.f32.partialorder %v1921_v20, 0.0  ;;  %1235 = vmatprep.subr.mxu0 %v945_v19  ;;  %v3114_v19 = vld [vmem:[#allocation9_spill] sm:$0xff]  ;;  %v3117_v8 = vld [vmem:[#allocation14_spill] sm:$0xff] }
  0x9b   : > { %v466_v26 = vsel %vm3111_vm9, %v3110_v14, %v461_v34  ;;  %v937_v37 = vsel %vm877_vm12, %v1954_v2, %v932_v62  ;;  %v455_v1 = vsel %vm3000_vm2, %v1979_v7, 0.0  ;;  %vm871_vm1 = vcmp.eq.f32.partialorder %v1632_v21, 0.0  ;;  %1236 = vmatpush1.msra.mxu0 %v473_v49  ;;  %v3116_v34 = vld [vmem:[#allocation23_spill] sm:$0xff]  ;;  %v3118_v62 = vld [vmem:[#allocation4_spill] sm:$0xff]  ;;  %v3123_v33 = vld [vmem:[#allocation25_spill] sm:$0xff] }
  0x9c   : > { %v471_v59 = vsel %vm401_vm7, %v3112_v56, %v466_v26  ;;  %v942_v51 = vsel %vm872_vm15, %v1944_v23, %v937_v37  ;;  %vm3113_vm4 = vcmp.eq.f32.partialorder %v1921_v20, 2.0  ;;  %v941_v39 = vsel %vm871_vm1, %v3114_v19, %v1965_v63  ;;  %1237 = vmatprep.subr.mxu0 %v944_v58  ;;  %v3120_v56 = vld [vmem:[#allocation6_spill] sm:$0xff] }
  0x9d   : > { %v460_v36 = vsel %vm3113_vm4, %v2009_v10, %v455_v1  ;;  %vm399_vm7 = vcmp.eq.f32.partialorder %v1634_v22, 0.0  ;;  %vm3115_vm12 = vcmp.eq.f32.partialorder %v1921_v20, 1.0  ;;  %v464_v49 = vsel %vm404_vm0, %v1691_v46, %v3116_v34  ;;  %1238 = vmatpush1.msra.mxu0 %v472_v29  ;;  %v3119_v1 = vld [vmem:[#allocation5_spill] sm:$0xff]  ;;  %v3121_v34 = vld [vmem:[#allocation7_spill] sm:$0xff]  ;;  %v3124_v29 = vld [vmem:[#allocation28_spill] sm:$0xff] }
  0x9e   : > { %v465_v53 = vsel %vm3115_vm12, %v2007_v9, %v460_v36  ;;  %v679_v26 = vadd.f32 1.0, %v3117_v8  ;;  %v1442_v37 = vmul.f32 -1.442695, %v3118_v62  ;;  %v469_v58 = vsel %vm399_vm7, %v1675_v25, %v464_v49  ;;  %1239 = vmatprep.subr.mxu0 %v943_v3  ;;  %v2129_v49 = vld [vmem:[%s1619_s26] sm:$0xff] }
  0x9f   : > { %v470_v63 = vsel %vm400_vm13, %v1958_v11, %v465_v53  ;;  %v1456_v36 = vmul.f32 -1.442695, %v3119_v1  ;;  %v1441_v14 = vmul.f32 -1.442695, %v3120_v56  ;;  %v1455_v55 = vmul.f32 -1.442695, %v3121_v34  ;;  %1240 = vmatpush1.msra.mxu0 %v471_v59 }
  0xa0   : > { %1496 = vrcp.f32 %v679_v26  ;;  %v1440_v8 = vmul.f32 -1.442695, %v3122_v18  ;;  %v1454_v62 = vmul.f32 -1.442695, %v3123_v33  ;;  %v1439_v15 = vmul.f32 -1.442695, %v3124_v29  ;;  %1241 = vmatprep.subr.mxu0 %v942_v51 }
  0xa1   : > { %1498 = vpow2.f32 %v1442_v37  ;;  %v1453_v53 = vmul.f32 -1.442695, %v2125_v4  ;;  %v1438_v56 = vmul.f32 -1.442695, %v2129_v49  ;;  %vm897_vm0 = vcmp.eq.f32.partialorder %v1902_v27, 5.0  ;;  %1242 = vmatpush1.msra.mxu0 %v470_v63  ;;  %v3125_v37 = vld [vmem:[#allocation8_spill] sm:$0xff] }
  0xa2   : > { %1500 = vpow2.f32 %v1456_v36  ;;  %vm902_vm8 = vcmp.eq.f32.partialorder %v1902_v27, 6.0  ;;  %vm3056_vm14 = vcmp.eq.f32.partialorder %v1902_v27, 7.0  ;;  %vm3055_vm15 = vcmp.eq.f32.partialorder %v1902_v27, 8.0  ;;  %1243 = vmatprep.subr.mxu0 %v941_v39  ;;  %v3126_v63 = vld [vmem:[#allocation10_spill] sm:$0xff] }
  0xa3   : > { %1502 = vpow2.f32 %v1441_v14  ;;  %vm3022_vm9 = vcmp.eq.f32.partialorder %v1921_v20, 5.0  ;;  %vm3054_vm13 = vcmp.eq.f32.partialorder %v1921_v20, 6.0  ;;  %v1052_v18 = vsel %vm3055_vm15, %v1948_v52, 0.0  ;;  %1244 = vmatpush1.msra.mxu0 %v469_v58 }
  0xa4   : > { %1504 = vpow2.f32 %v1455_v55  ;;  %vm3058_vm1 = vcmp.eq.f32.partialorder %v1921_v20, 7.0  ;;  %vm3005_vm4 = vcmp.eq.f32.partialorder %v1921_v20, 8.0  ;;  %v1057_v3 = vsel %vm3056_vm14, %v1956_v28, %v1052_v18 }
  0xa5   : > { %1506 = vpow2.f32 %v1440_v8  ;;  %v580_v14 = vsel %vm3005_vm4, %v1979_v7, 0.0  ;;  %vm3006_vm7 = vcmp.eq.f32.partialorder %v1632_v21, 6.0  ;;  %v1062_v55 = vsel %vm902_vm8, %v1954_v2, %v1057_v3 }
  0xa6   : > { %1508 = vpow2.f32 %v1454_v62  ;;  %v585_v59 = vsel %vm3058_vm1, %v2009_v10, %v580_v14  ;;  %vm3007_vm12 = vcmp.eq.f32.partialorder %v1632_v21, 7.0  ;;  %v2160_v51 = vsel %vm897_vm0, %v1944_v23, %v1062_v55 }
  0xa7   : > { %1510 = vpow2.f32 %v1439_v15  ;;  %v590_v39 = vsel %vm3054_vm13, %v2007_v9, %v585_v59  ;;  %vm3004_vm11 = vcmp.eq.f32.partialorder %v1632_v21, 8.0  ;;  %vm3011_vm2 = vcmp.eq.f32.partialorder %v1634_v22, 6.0 }
  0xa8   : > { %1512 = vpow2.f32 %v1453_v53  ;;  %v2169_v26 = vsel %vm3022_vm9, %v1958_v11, %v590_v39  ;;  %v1051_v15 = vsel %vm3004_vm11, %v3125_v37, 0.0  ;;  %vm3009_vm3 = vcmp.eq.f32.partialorder %v1634_v22, 7.0  ;;  %v1536_v39 = vld [vmem:[%s1619_s26 + $0x48] sm:$0xff] }
  0xa9   : > { %1514 = vpow2.f32 %v1438_v56  ;;  %v1056_v58 = vsel %vm3007_vm12, %v3126_v63, %v1051_v15  ;;  %vm3008_vm10 = vcmp.eq.f32.partialorder %v1634_v22, 8.0  ;;  %vm3012_vm6 = vcmp.eq.f32.partialorder %v1651_v30, 5.0 }
  0xaa   : > { %v1061_v1 = vsel %vm3006_vm7, %v1677_v35, %v1056_v58  ;;  %v579_v36 = vsel %vm3008_vm10, %v1682_v41, 0.0  ;;  %vm3010_vm11 = vcmp.eq.f32.partialorder %v1651_v30, 6.0  ;;  %vm3127_vm4 = vcmp.eq.f32.partialorder %v1632_v21, 5.0 }
  0xab   : > { %v2191_v34 = vsel %vm3127_vm4, %v3114_v19, %v1061_v1  ;;  %v584_v8 = vsel %vm3009_vm3, %v1693_v47, %v579_v36  ;;  %vm3015_vm7 = vcmp.eq.f32.partialorder %v1651_v30, 7.0  ;;  %vm3020_vm12 = vcmp.eq.f32.partialorder %v1651_v30, 8.0 }
  0xac   : > { %v589_v62 = vsel %vm3011_vm2, %v1691_v46, %v584_v8  ;;  %v1030_v53 = vsel %vm3015_vm7, %v1741_v16, 0.0  ;;  %vm920_vm10 = vcmp.eq.f32.partialorder %v1651_v30, 9.0  ;;  %vm925_vm4 = vcmp.eq.f32.partialorder %v1651_v30, 10.0 }
  0xad   : > { %v1497_v56 = vpop.eup %1496  ;;  %vm3128_vm3 = vcmp.eq.f32.partialorder %v1634_v22, 5.0  ;;  %v1035_v3 = vsel %vm3010_vm11, %v1752_v48, %v1030_v53  ;;  %v2217_v14 = vsel %vm3020_vm12, %v1741_v16, 0.0  ;;  %v2222_v55 = vsel %vm920_vm10, %v1741_v16, 0.0 }
  0xae   : > { %v2209_v18 = vsel %vm3128_vm3, %v1675_v25, %v589_v62  ;;  %3129 = vst [vmem:[#allocation33_spill] sm:$0xff] %v2217_v14  ;;  %v1499_v59 = vpop.eup %1498  ;;  %v694_v15 = vmul.f32 %v1536_v39, %v1497_v56  ;;  %v1040_v58 = vsel %vm3012_vm6, %v1750_v45, %v1035_v3  ;;  %v1105_v1 = vsel %vm925_vm4, %v1741_v16, 0.0 }
  0xaf   : > { %vm3016_vm3 = vcmp.eq.f32.partialorder %v1730_v31, 5.0  ;;  %v1501_v36 = vpop.eup %1500  ;;  %v208_v8 = vadd.f32 1.0, %v1499_v59  ;;  %vm3130_vm11 = vcmp.eq.f32.partialorder %v1651_v30, 4.0  ;;  %v1110_v53 = vsel %vm920_vm10, %v1752_v48, %v1105_v1 }
  0xb0   : > { %v2233_v62 = vsel %vm3130_vm11, %v1725_v5, %v1040_v58  ;;  %vm3017_vm2 = vcmp.eq.f32.partialorder %v1730_v31, 6.0  ;;  %v1503_v56 = vpop.eup %1502  ;;  %1245 = vmatprep.subr.mxu0 %v694_v15  ;;  %v678_v3 = vadd.f32 1.0, %v1501_v36  ;;  %v1115_v39 = vsel %vm3020_vm12, %v1750_v45, %v1110_v53 }
  0xb1   : > { %vm3019_vm4 = vcmp.eq.f32.partialorder %v1730_v31, 7.0  ;;  %vm3018_vm6 = vcmp.eq.f32.partialorder %v1730_v31, 8.0  ;;  %v1505_v59 = vpop.eup %1504  ;;  %1516 = vrcp.f32 %v208_v8  ;;  %v207_v58 = vadd.f32 1.0, %v1503_v56 }
  0xb2   : > { %v1120_v1 = vsel %vm3015_vm7, %v1725_v5, %v1115_v39  ;;  %v558_v15 = vsel %vm3019_vm4, %v1768_v40, 0.0  ;;  %v1507_v36 = vpop.eup %1506  ;;  %1518 = vrcp.f32 %v678_v3  ;;  %v677_v14 = vadd.f32 1.0, %v1505_v59 }
  0xb3   : > { %1300 = vmatprep.subr.mxu1 %v1120_v1  ;;  %v563_v53 = vsel %vm3017_vm2, %v1778_v57, %v558_v15  ;;  %vm448_vm10 = vcmp.eq.f32.partialorder %v1730_v31, 9.0  ;;  %v1509_v8 = vpop.eup %1508  ;;  %1520 = vrcp.f32 %v207_v58  ;;  %v206_v56 = vadd.f32 1.0, %v1507_v36 }
  0xb4   : > { %v568_v39 = vsel %vm3016_vm3, %v1776_v54, %v563_v53  ;;  %vm453_vm11 = vcmp.eq.f32.partialorder %v1730_v31, 10.0  ;;  %v1511_v5 = vpop.eup %1510  ;;  %1522 = vrcp.f32 %v677_v14  ;;  %v676_v3 = vadd.f32 1.0, %v1509_v8 }
  0xb5   : > { %vm3131_vm7 = vcmp.eq.f32.partialorder %v1730_v31, 4.0  ;;  %v2266_v1 = vsel %vm3018_vm6, %v1768_v40, 0.0  ;;  %v1513_v58 = vpop.eup %1512  ;;  %1524 = vrcp.f32 %v206_v56  ;;  %v205_v15 = vadd.f32 1.0, %v1511_v5 }
  0xb6   : > { %v2261_v59 = vsel %vm3131_vm7, %v1771_v43, %v568_v39  ;;  %3132 = vst [vmem:[#allocation9_spill] sm:$0xff] %v2266_v1  ;;  %v2271_v36 = vsel %vm448_vm10, %v1768_v40, 0.0  ;;  %v633_v14 = vsel %vm453_vm11, %v1768_v40, 0.0  ;;  %v1515_v53 = vpop.eup %1514  ;;  %1526 = vrcp.f32 %v676_v3 }
  0xb7   : > { %v675_v8 = vadd.f32 1.0, %v1513_v58  ;;  %v638_v39 = vsel %vm448_vm10, %v1778_v57, %v633_v14  ;;  %vm3024_vm7 = vcmp.eq.f32.partialorder %v1732_v12, 5.0  ;;  %1528 = vrcp.f32 %v205_v15 }
  0xb8   : > { %v204_v1 = vadd.f32 1.0, %v1515_v53  ;;  %v643_v5 = vsel %vm3018_vm6, %v1776_v54, %v638_v39  ;;  %vm3023_vm3 = vcmp.eq.f32.partialorder %v1732_v12, 6.0  ;;  %vm3026_vm11 = vcmp.eq.f32.partialorder %v1732_v12, 7.0 }
  0xb9   : > { %1530 = vrcp.f32 %v675_v8  ;;  %v648_v56 = vsel %vm3019_vm4, %v1771_v43, %v643_v5  ;;  %vm3025_vm2 = vcmp.eq.f32.partialorder %v1732_v12, 8.0  ;;  %v1029_v3 = vsel %vm3026_vm11, %v1792_v32, 0.0 }
  0xba   : > { %1532 = vrcp.f32 %v204_v1  ;;  %1301 = vmatpush1.msra.mxu1 %v648_v56  ;;  %vm919_vm10 = vcmp.eq.f32.partialorder %v1732_v12, 9.0  ;;  %vm924_vm6 = vcmp.eq.f32.partialorder %v1732_v12, 10.0  ;;  %v1034_v58 = vsel %vm3023_vm3, %v1803_v38, %v1029_v3 }
  0xbb   : > { %v1104_v15 = vsel %vm924_vm6, %v1792_v32, 0.0  ;;  %vm427_vm4 = vcmp.eq.f32.partialorder %v1739_v13, 5.0  ;;  %vm3027_vm12 = vcmp.eq.f32.partialorder %v1739_v13, 6.0  ;;  %v1039_v1 = vsel %vm3024_vm7, %v1801_v44, %v1034_v58 }
  0xbc   : > { %v1109_v14 = vsel %vm919_vm10, %v1803_v38, %v1104_v15  ;;  %vm3044_vm5 = vcmp.eq.f32.partialorder %v1739_v13, 7.0  ;;  %vm3043_vm9 = vcmp.eq.f32.partialorder %v1739_v13, 8.0  ;;  %vm3133_vm3 = vcmp.eq.f32.partialorder %v1732_v12, 4.0  ;;  %v3136_v12 = vld [vmem:[#allocation24_spill] sm:$0xff] }
  0xbd   : > { %v2309_v53 = vsel %vm3133_vm3, %v1782_v61, %v1039_v1  ;;  %v1114_v8 = vsel %vm3025_vm2, %v1801_v44, %v1109_v14  ;;  %v557_v39 = vsel %vm3044_vm5, %v1827_v60, 0.0  ;;  %vm3048_vm6 = vcmp.eq.f32.partialorder %v1739_v13, 9.0  ;;  %v1537_v14 = vld [vmem:[%s1619_s26 + $0x40] sm:$0xff]  ;;  %v1538_v44 = vld [vmem:[%s1619_s26 + $0x38] sm:$0xff] }
  0xbe   : > { %v1119_v5 = vsel %vm3026_vm11, %v1782_v61, %v1114_v8  ;;  %v562_v56 = vsel %vm3027_vm12, %v1842_v6, %v557_v39  ;;  %vm452_vm3 = vcmp.eq.f32.partialorder %v1739_v13, 10.0  ;;  %vm3047_vm7 = vcmp.eq.f32.partialorder %v1744_v17, 5.0  ;;  %v1517_v3 = vpop.eup %1516 }
  0xbf   : > { %1302 = vmatprep.subr.mxu1 %v1119_v5  ;;  %v567_v58 = vsel %vm427_vm4, %v1840_v0, %v562_v56  ;;  %v632_v15 = vsel %vm452_vm3, %v1827_v60, 0.0  ;;  %vm3042_vm2 = vcmp.eq.f32.partialorder %v1744_v17, 6.0  ;;  %vm3053_vm11 = vcmp.eq.f32.partialorder %v1744_v17, 7.0  ;;  %v1519_v1 = vpop.eup %1518 }
  0xc0   : > { %v223_v8 = vmul.f32 %v1537_v14, %v1517_v3  ;;  %vm3134_vm12 = vcmp.eq.f32.partialorder %v1739_v13, 4.0  ;;  %v637_v5 = vsel %vm3048_vm6, %v1842_v6, %v632_v15  ;;  %v1028_v56 = vsel %vm3053_vm11, %v1862_v50, 0.0  ;;  %v1521_v61 = vpop.eup %1520  ;;  %v1539_v15 = vld [vmem:[%s1619_s26 + $0x30] sm:$0xff] }
  0xc1   : > { %v2336_v39 = vsel %vm3134_vm12, %v1838_v42, %v567_v58  ;;  %v693_v60 = vmul.f32 %v1538_v44, %v1519_v1  ;;  %v642_v3 = vsel %vm3043_vm9, %v1840_v0, %v637_v5  ;;  %v1033_v58 = vsel %vm3042_vm2, %v3099_v24, %v1028_v56  ;;  %v1523_v14 = vpop.eup %1522  ;;  %v3135_v44 = vld [vmem:[#allocation26_spill] sm:$0xff]  ;;  %v1540_v56 = vld [vmem:[%s1619_s26 + $0x28] sm:$0xff] }
  0xc2   : > { %vm3050_vm12 = vcmp.eq.f32.partialorder %v1744_v17, 8.0  ;;  %1246 = vmatpush1.msra.mxu0 %v223_v8  ;;  %v222_v6 = vmul.f32 %v1539_v15, %v1521_v61  ;;  %v647_v38 = vsel %vm3044_vm5, %v1838_v42, %v642_v3  ;;  %v1038_v1 = vsel %vm3047_vm7, %v3135_v44, %v1033_v58  ;;  %v1525_v5 = vpop.eup %1524  ;;  %v3138_v61 = vld [vmem:[#allocation22_spill] sm:$0xff] }
  0xc3   : > { %vm918_vm3 = vcmp.eq.f32.partialorder %v1744_v17, 9.0  ;;  %1247 = vmatprep.subr.mxu0 %v693_v60  ;;  %v692_v0 = vmul.f32 %v1540_v56, %v1523_v14  ;;  %1303 = vmatpush1.msra.mxu1 %v647_v38  ;;  %vm3137_vm2 = vcmp.eq.f32.partialorder %v1744_v17, 4.0  ;;  %vm923_vm9 = vcmp.eq.f32.partialorder %v1744_v17, 10.0  ;;  %v1527_v3 = vpop.eup %1526  ;;  %v1541_v15 = vld [vmem:[%s1619_s26 + $0x20] sm:$0xff] }
  0xc4   : > { %v2364_v8 = vsel %vm3137_vm2, %v3136_v12, %v1038_v1  ;;  %vm3052_vm5 = vcmp.eq.f32.partialorder %v3138_v61, 5.0  ;;  %1248 = vmatpush1.msra.mxu0 %v222_v6  ;;  %v221_v58 = vmul.f32 %v1541_v15, %v1525_v5  ;;  %v1103_v42 = vsel %vm923_vm9, %v1862_v50, 0.0  ;;  %v1529_v38 = vpop.eup %1528  ;;  %v3139_v1 = vld [vmem:[#allocation29_spill] sm:$0xff]  ;;  %v3140_v15 = vld [vmem:[#allocation32_spill] sm:$0xff] }
  0xc5   : > { %vm3051_vm7 = vcmp.eq.f32.partialorder %v3138_v61, 6.0  ;;  %vm436_vm6 = vcmp.eq.f32.partialorder %v3138_v61, 7.0  ;;  %1249 = vmatprep.subr.mxu0 %v692_v0  ;;  %v691_v60 = vmul.f32 %v1527_v3, %v3123_v33  ;;  %v1108_v14 = vsel %vm918_vm3, %v3099_v24, %v1103_v42  ;;  %v3141_v24 = vld [vmem:[#allocation31_spill] sm:$0xff] }
  0xc6   : > { %v556_v6 = vsel %vm436_vm6, %v3139_v1, 0.0  ;;  %vm441_vm2 = vcmp.eq.f32.partialorder %v3138_v61, 8.0  ;;  %v1531_v5 = vpop.eup %1530  ;;  %1250 = vmatpush1.msra.mxu0 %v221_v58  ;;  %v220_v56 = vmul.f32 %v1529_v38, %v3124_v29  ;;  %v1113_v0 = vsel %vm3050_vm12, %v3135_v44, %v1108_v14  ;;  %v3142_v14 = vld [vmem:[#allocation30_spill] sm:$0xff] }
  0xc7   : > { %v561_v33 = vsel %vm3051_vm7, %v3140_v15, %v556_v6  ;;  %vm446_vm9 = vcmp.eq.f32.partialorder %v3138_v61, 9.0  ;;  %v1533_v42 = vpop.eup %1532  ;;  %1251 = vmatprep.subr.mxu0 %v691_v60  ;;  %v690_v3 = vmul.f32 %v2125_v4, %v1531_v5  ;;  %v1118_v58 = vsel %vm3053_vm11, %v3136_v12, %v1113_v0 }
  0xc8   : > { %v566_v29 = vsel %vm3052_vm5, %v3141_v24, %v561_v33  ;;  %vm451_vm12 = vcmp.eq.f32.partialorder %v3138_v61, 10.0  ;;  %1252 = vmatpush1.msra.mxu0 %v220_v56  ;;  %v219_v38 = vmul.f32 %v2129_v49, %v1533_v42  ;;  %1304 = vmatprep.subr.mxu1 %v1118_v58  ;;  %vm3143_vm7 = vcmp.eq.f32.partialorder %v3138_v61, 4.0 }
  0xc9   : > { %v571_v60 = vsel %vm3143_vm7, %v3142_v14, %v566_v29  ;;  %v631_v4 = vsel %vm451_vm12, %v3139_v1, 0.0  ;;  %v1027_v6 = vsel %vm3056_vm14, %v1948_v52, 0.0  ;;  %1253 = vmatprep.subr.mxu0 %v690_v3  ;;  %vm917_vm5 = vcmp.eq.f32.partialorder %v1902_v27, 9.0 }
  0xca   : > { %v636_v5 = vsel %vm446_vm9, %v3140_v15, %v631_v4  ;;  %v1032_v49 = vsel %vm902_vm8, %v1956_v28, %v1027_v6  ;;  %vm922_vm11 = vcmp.eq.f32.partialorder %v1902_v27, 10.0  ;;  %1254 = vmatpush1.msra.mxu0 %v219_v38  ;;  %v555_v42 = vsel %vm3058_vm1, %v1979_v7, 0.0 }
  0xcb   : > { %v641_v56 = vsel %vm441_vm2, %v3141_v24, %v636_v5  ;;  %v1037_v0 = vsel %vm897_vm0, %v1954_v2, %v1032_v49  ;;  %v1102_v33 = vsel %vm922_vm11, %v1948_v52, 0.0  ;;  %1255 = vmatprep.subr.mxu0 %v2160_v51  ;;  %vm3144_vm7 = vcmp.eq.f32.partialorder %v1902_v27, 4.0 }
  0xcc   : > { %v646_v3 = vsel %vm436_vm6, %v3142_v14, %v641_v56  ;;  %v1042_v58 = vsel %vm3144_vm7, %v1944_v23, %v1037_v0  ;;  %v1107_v29 = vsel %vm917_vm5, %v1956_v28, %v1102_v33  ;;  %v560_v38 = vsel %vm3054_vm13, %v2009_v10, %v555_v42  ;;  %1256 = vmatpush2.msra.mxu0 %v2169_v26 }
  0xcd   : > { %1305 = vmatpush1.msra.mxu1 %v646_v3  ;;  %v1112_v51 = vsel %vm3055_vm15, %v1954_v2, %v1107_v29  ;;  %vm3145_vm11 = vcmp.eq.f32.partialorder %v1921_v20, 5.0  ;;  %vm3057_vm12 = vcmp.eq.f32.partialorder %v1921_v20, 9.0  ;;  %vm450_vm7 = vcmp.eq.f32.partialorder %v1921_v20, 10.0  ;;  %1257 = vmatprep.subr.mxu0 %v2191_v34 }
  0xce   : > { %v565_v4 = vsel %vm3145_vm11, %v2007_v9, %v560_v38  ;;  %v1117_v6 = vsel %vm3056_vm14, %v1944_v23, %v1112_v51  ;;  %vm3146_vm13 = vcmp.eq.f32.partialorder %v1921_v20, 4.0  ;;  %v630_v5 = vsel %vm450_vm7, %v1979_v7, 0.0  ;;  %1258 = vmatpush2.msra.mxu0 %v2209_v18 }
  0xcf   : > { %v570_v26 = vsel %vm3146_vm13, %v1958_v11, %v565_v4  ;;  %vm3147_vm15 = vcmp.eq.f32.partialorder %v1632_v21, 7.0  ;;  %1306 = vmatprep.subr.mxu1 %v1117_v6  ;;  %v635_v34 = vsel %vm3057_vm12, %v2009_v10, %v630_v5  ;;  %vm3148_vm11 = vcmp.eq.f32.partialorder %v1632_v21, 6.0  ;;  %1259 = vmatprep.subr.mxu0 %v2233_v62 }
  0xd0   : > { %v1026_v49 = vsel %vm3147_vm15, %v3125_v37, 0.0  ;;  %vm916_vm14 = vcmp.eq.f32.partialorder %v1632_v21, 9.0  ;;  %vm921_vm13 = vcmp.eq.f32.partialorder %v1632_v21, 10.0  ;;  %vm3149_vm15 = vcmp.eq.f32.partialorder %v1921_v20, 8.0  ;;  %1260 = vmatpush2.msra.mxu0 %v2261_v59 }
  0xd1   : > { %v1031_v56 = vsel %vm3148_vm11, %v3126_v63, %v1026_v49  ;;  %v640_v0 = vsel %vm3149_vm15, %v2007_v9, %v635_v34  ;;  %vm3150_vm7 = vcmp.eq.f32.partialorder %v1632_v21, 5.0  ;;  %v1101_v33 = vsel %vm921_vm13, %v3125_v37, 0.0  ;;  %1261 = vmatprep.subr.mxu0 %v2309_v53 }
  0xd2   : > { %v1036_v18 = vsel %vm3150_vm7, %v1677_v35, %v1031_v56  ;;  %vm3151_vm12 = vcmp.eq.f32.partialorder %v1634_v22, 7.0  ;;  %v645_v62 = vsel %vm3058_vm1, %v1958_v11, %v640_v0  ;;  %vm3152_vm11 = vcmp.eq.f32.partialorder %v1632_v21, 4.0  ;;  %1262 = vmatpush2.msra.mxu0 %v2336_v39 }
  0xd3   : > { %v554_v42 = vsel %vm3151_vm12, %v1682_v41, 0.0  ;;  %v1041_v3 = vsel %vm3152_vm11, %v3114_v19, %v1036_v18  ;;  %v1106_v29 = vsel %vm916_vm14, %v3126_v63, %v1101_v33  ;;  %vm3153_vm13 = vcmp.eq.f32.partialorder %v1634_v22, 6.0  ;;  %1307 = vmatpush1.msra.mxu1 %v645_v62  ;;  %1263 = vmatprep.subr.mxu0 %v2364_v8  ;;  %v3167_v33 = vld [vmem:[#allocation12_spill] sm:$0xff] }
  0xd4   : > { %v559_v38 = vsel %vm3153_vm13, %v1693_v47, %v554_v42  ;;  %vm3154_vm12 = vcmp.eq.f32.partialorder %v1632_v21, 8.0  ;;  %vm3155_vm15 = vcmp.eq.f32.partialorder %v1634_v22, 5.0  ;;  %vm444_vm7 = vcmp.eq.f32.partialorder %v1634_v22, 9.0  ;;  %1264 = vmatpush2.msra.mxu0 %v571_v60 }
  0xd5   : > { %v1111_v59 = vsel %vm3154_vm12, %v1677_v35, %v1106_v29  ;;  %v564_v51 = vsel %vm3155_vm15, %v1691_v46, %v559_v38  ;;  %vm449_vm11 = vcmp.eq.f32.partialorder %v1634_v22, 10.0  ;;  %vm3156_vm13 = vcmp.eq.f32.partialorder %v1632_v21, 7.0  ;;  %1265 = vmatprep.subr.mxu0 %v1042_v58 }
  0xd6   : > { %v1116_v4 = vsel %vm3156_vm13, %v3114_v19, %v1111_v59  ;;  %vm3157_vm1 = vcmp.eq.f32.partialorder %v1634_v22, 4.0  ;;  %v629_v6 = vsel %vm449_vm11, %v1682_v41, 0.0  ;;  %vm3158_vm12 = vcmp.eq.f32.partialorder %v1651_v30, 6.0  ;;  %1266 = vmatpush2.msra.mxu0 %v570_v26  ;;  %v3173_v59 = vld [vmem:[#allocation13_spill] sm:$0xff] }
  0xd7   : > { %v569_v53 = vsel %vm3157_vm1, %v1675_v25, %v564_v51  ;;  %v1005_v5 = vsel %vm3158_vm12, %v1741_v16, 0.0  ;;  %1308 = vmatprep.subr.mxu1 %v1116_v4  ;;  %v634_v39 = vsel %vm444_vm7, %v1693_v47, %v629_v6  ;;  %vm3159_vm15 = vcmp.eq.f32.partialorder %v1651_v30, 5.0  ;;  %1267 = vmatprep.subr.mxu0 %v1041_v3  ;;  %v3176_v6 = vld [vmem:[#allocation17_spill] sm:$0xff] }
  0xd8   : > { %v1010_v49 = vsel %vm3159_vm15, %v1752_v48, %v1005_v5  ;;  %vm3160_vm1 = vcmp.eq.f32.partialorder %v1651_v30, 8.0  ;;  %vm3161_vm11 = vcmp.eq.f32.partialorder %v1730_v31, 6.0  ;;  %vm3162_vm13 = vcmp.eq.f32.partialorder %v1634_v22, 8.0  ;;  %1268 = vmatpush2.msra.mxu0 %v569_v53 }
  0xd9   : > { %v1085_v34 = vsel %vm3160_vm1, %v1752_v48, %v2222_v55  ;;  %v533_v56 = vsel %vm3161_vm11, %v1768_v40, 0.0  ;;  %v639_v8 = vsel %vm3162_vm13, %v1691_v46, %v634_v39  ;;  %vm3163_vm12 = vcmp.eq.f32.partialorder %v1651_v30, 4.0  ;;  %v3179_v39 = vld [vmem:[#allocation18_spill] sm:$0xff] }
  0xda   : > { %v1015_v0 = vsel %vm3163_vm12, %v1750_v45, %v1010_v49  ;;  %vm3164_vm15 = vcmp.eq.f32.partialorder %v1651_v30, 7.0  ;;  %vm3165_vm1 = vcmp.eq.f32.partialorder %v1730_v31, 5.0  ;;  %vm3166_vm11 = vcmp.eq.f32.partialorder %v1634_v22, 7.0 }
  0xdb   : > { %v1090_v18 = vsel %vm3164_vm15, %v1750_v45, %v1085_v34  ;;  %v538_v55 = vsel %vm3165_vm1, %v1778_v57, %v533_v56  ;;  %v644_v60 = vsel %vm3166_vm11, %v1675_v25, %v639_v8  ;;  %vm3168_vm13 = vcmp.eq.f32.partialorder %v1651_v30, 3.0  ;;  %v3182_v34 = vld [vmem:[#allocation16_spill] sm:$0xff] }
  0xdc   : > { %v1020_v42 = vsel %vm3168_vm13, %v3167_v33, %v1015_v0  ;;  %vm3169_vm12 = vcmp.eq.f32.partialorder %v1651_v30, 6.0  ;;  %vm3170_vm15 = vcmp.eq.f32.partialorder %v1730_v31, 4.0  ;;  %1309 = vmatpush1.msra.mxu1 %v644_v60  ;;  %vm3171_vm1 = vcmp.eq.f32.partialorder %v1730_v31, 3.0  ;;  %v3185_v0 = vld [vmem:[#allocation21_spill] sm:$0xff] }
  0xdd   : > { %v1095_v62 = vsel %vm3169_vm12, %v3167_v33, %v1090_v18  ;;  %v543_v29 = vsel %vm3170_vm15, %v1776_v54, %v538_v55  ;;  %vm3172_vm11 = vcmp.eq.f32.partialorder %v1730_v31, 8.0  ;;  %vm3174_vm13 = vcmp.eq.f32.partialorder %v3173_v59, 6.0  ;;  %1269 = vmatprep.subr.mxu0 %v1020_v42  ;;  %v3186_v55 = vld [vmem:[#allocation15_spill] sm:$0xff] }
  0xde   : > { %v548_v58 = vsel %vm3171_vm1, %v1771_v43, %v543_v29  ;;  %v613_v38 = vsel %vm3172_vm11, %v1778_v57, %v2271_v36  ;;  %v1004_v51 = vsel %vm3174_vm13, %v1792_v32, 0.0  ;;  %v1079_v4 = vsel %vm919_vm10, %v1792_v32, 0.0  ;;  %1310 = vmatprep.subr.mxu1 %v1095_v62  ;;  %v3189_v62 = vld [vmem:[#allocation20_spill] sm:$0xff]  ;;  %v3192_v42 = vld [vmem:[#allocation19_spill] sm:$0xff] }
  0xdf   : > { %vm3175_vm12 = vcmp.eq.f32.partialorder %v1730_v31, 7.0  ;;  %vm3177_vm15 = vcmp.eq.f32.partialorder %v3173_v59, 5.0  ;;  %vm3178_vm1 = vcmp.eq.f32.partialorder %v3173_v59, 8.0  ;;  %vm3180_vm11 = vcmp.eq.f32.partialorder %v1739_v13, 6.0  ;;  %1270 = vmatpush2.msra.mxu0 %v548_v58 }
  0xe0   : > { %v618_v26 = vsel %vm3175_vm12, %v1776_v54, %v613_v38  ;;  %v1009_v5 = vsel %vm3177_vm15, %v3176_v6, %v1004_v51  ;;  %v1084_v36 = vsel %vm3178_vm1, %v3176_v6, %v1079_v4  ;;  %v532_v49 = vsel %vm3180_vm11, %v3179_v39, 0.0 }
  0xe1   : > { %vm3181_vm10 = vcmp.eq.f32.partialorder %v1730_v31, 6.0  ;;  %vm3183_vm13 = vcmp.eq.f32.partialorder %v3173_v59, 4.0  ;;  %vm3184_vm12 = vcmp.eq.f32.partialorder %v3173_v59, 7.0  ;;  %v537_v18 = vsel %vm427_vm4, %v3185_v0, %v532_v49 }
  0xe2   : > { %v623_v3 = vsel %vm3181_vm10, %v1771_v43, %v618_v26  ;;  %v1014_v56 = vsel %vm3183_vm13, %v3182_v34, %v1009_v5  ;;  %v1089_v8 = vsel %vm3184_vm12, %v3182_v34, %v1084_v36  ;;  %vm3187_vm15 = vcmp.eq.f32.partialorder %v3173_v59, 3.0  ;;  %v3197_v36 = vld [vmem:[#allocation27_spill] sm:$0xff] }
  0xe3   : > { %1311 = vmatpush1.msra.mxu1 %v623_v3  ;;  %v1019_v53 = vsel %vm3187_vm15, %v3186_v55, %v1014_v56  ;;  %vm3188_vm1 = vcmp.eq.f32.partialorder %v3173_v59, 6.0  ;;  %vm3190_vm11 = vcmp.eq.f32.partialorder %v1739_v13, 4.0  ;;  %vm3191_vm10 = vcmp.eq.f32.partialorder %v1739_v13, 9.0 }
  0xe4   : > { %v1094_v60 = vsel %vm3188_vm1, %v3186_v55, %v1089_v8  ;;  %v542_v29 = vsel %vm3190_vm11, %v3189_v62, %v537_v18  ;;  %v607_v38 = vsel %vm3191_vm10, %v3179_v39, 0.0  ;;  %vm3193_vm13 = vcmp.eq.f32.partialorder %v1739_v13, 3.0  ;;  %1271 = vmatprep.subr.mxu0 %v1019_v53 }
  0xe5   : > { %1312 = vmatprep.subr.mxu1 %v1094_v60  ;;  %v547_v51 = vsel %vm3193_vm13, %v3192_v42, %v542_v29  ;;  %vm3194_vm12 = vcmp.eq.f32.partialorder %v1739_v13, 8.0  ;;  %vm3195_vm15 = vcmp.eq.f32.partialorder %v1744_v17, 6.0  ;;  %v1078_v5 = vsel %vm918_vm3, %v1862_v50, 0.0 }
  0xe6   : > { %v612_v4 = vsel %vm3194_vm12, %v3185_v0, %v607_v38  ;;  %v1003_v26 = vsel %vm3195_vm15, %v1862_v50, 0.0  ;;  %vm3196_vm1 = vcmp.eq.f32.partialorder %v1739_v13, 7.0  ;;  %vm3198_vm11 = vcmp.eq.f32.partialorder %v1744_v17, 5.0  ;;  %1272 = vmatpush2.msra.mxu0 %v547_v51 }
  0xe7   : > { %v617_v58 = vsel %vm3196_vm1, %v3189_v62, %v612_v4  ;;  %v1008_v49 = vsel %vm3198_vm11, %v3197_v36, %v1003_v26  ;;  %vm3199_vm10 = vcmp.eq.f32.partialorder %v1744_v17, 8.0  ;;  %vm3200_vm13 = vcmp.eq.f32.partialorder %v3138_v61, 6.0 }
  0xe8   : > { %v1083_v3 = vsel %vm3199_vm10, %v3197_v36, %v1078_v5  ;;  %v531_v56 = vsel %vm3200_vm13, %v3139_v1, 0.0  ;;  %vm3201_vm3 = vcmp.eq.f32.partialorder %v1739_v13, 6.0  ;;  %vm3202_vm12 = vcmp.eq.f32.partialorder %v1744_v17, 4.0 }
  0xe9   : > { %v622_v8 = vsel %vm3201_vm3, %v3192_v42, %v617_v58  ;;  %v1013_v18 = vsel %vm3202_vm12, %v3135_v44, %v1008_v49  ;;  %vm3203_vm15 = vcmp.eq.f32.partialorder %v1744_v17, 7.0  ;;  %vm3204_vm1 = vcmp.eq.f32.partialorder %v3138_v61, 5.0 }
  0xea   : > { %v1088_v53 = vsel %vm3203_vm15, %v3135_v44, %v1083_v3  ;;  %v536_v60 = vsel %vm3204_vm1, %v3140_v15, %v531_v56  ;;  %1313 = vmatpush1.msra.mxu1 %v622_v8  ;;  %vm3205_vm11 = vcmp.eq.f32.partialorder %v1744_v17, 3.0  ;;  %vm3206_vm10 = vcmp.eq.f32.partialorder %v1744_v17, 6.0 }
  0xeb   : > { %v1018_v29 = vsel %vm3205_vm11, %v3136_v12, %v1013_v18  ;;  %v1093_v38 = vsel %vm3206_vm10, %v3136_v12, %v1088_v53  ;;  %vm3207_vm13 = vcmp.eq.f32.partialorder %v3138_v61, 4.0  ;;  %v606_v4 = vsel %vm446_vm9, %v3139_v1, 0.0 }
  0xec   : > { %v541_v51 = vsel %vm3207_vm13, %v3141_v24, %v536_v60  ;;  %1273 = vmatprep.subr.mxu0 %v1018_v29  ;;  %1314 = vmatprep.subr.mxu1 %v1093_v38  ;;  %vm3208_vm3 = vcmp.eq.f32.partialorder %v3138_v61, 3.0  ;;  %v611_v5 = vsel %vm441_vm2, %v3140_v15, %v606_v4  ;;  %v1002_v58 = vsel %vm902_vm8, %v1948_v52, 0.0 }
  0xed   : > { %v546_v26 = vsel %vm3208_vm3, %v3142_v14, %v541_v51  ;;  %v1077_v49 = vsel %vm917_vm5, %v1948_v52, 0.0  ;;  %v616_v3 = vsel %vm436_vm6, %v3141_v24, %v611_v5  ;;  %v1007_v56 = vsel %vm897_vm0, %v1956_v28, %v1002_v58 }
  0xee   : > { %1274 = vmatpush2.msra.mxu0 %v546_v26  ;;  %vm3209_vm9 = vcmp.eq.f32.partialorder %v1902_v27, 8.0  ;;  %vm3210_vm12 = vcmp.eq.f32.partialorder %v1921_v20, 6.0  ;;  %vm3211_vm5 = vcmp.eq.f32.partialorder %v3138_v61, 6.0  ;;  %vm3212_vm15 = vcmp.eq.f32.partialorder %v1902_v27, 4.0 }
  0xef   : > { %v1082_v8 = vsel %vm3209_vm9, %v1956_v28, %v1077_v49  ;;  %v530_v18 = vsel %vm3210_vm12, %v1979_v7, 0.0  ;;  %v621_v53 = vsel %vm3211_vm5, %v3142_v14, %v616_v3  ;;  %v1012_v60 = vsel %vm3212_vm15, %v1954_v2, %v1007_v56 }
  0xf0   : > { %vm3213_vm1 = vcmp.eq.f32.partialorder %v1902_v27, 7.0  ;;  %vm3214_vm11 = vcmp.eq.f32.partialorder %v1921_v20, 5.0  ;;  %1315 = vmatpush1.msra.mxu1 %v621_v53  ;;  %vm3215_vm10 = vcmp.eq.f32.partialorder %v1902_v27, 3.0  ;;  %vm3216_vm13 = vcmp.eq.f32.partialorder %v1921_v20, 4.0 }
  0xf1   : > { %v1087_v29 = vsel %vm3213_vm1, %v1954_v2, %v1082_v8  ;;  %v535_v38 = vsel %vm3214_vm11, %v2009_v10, %v530_v18  ;;  %v1017_v51 = vsel %vm3215_vm10, %v1944_v23, %v1012_v60  ;;  %vm3217_vm3 = vcmp.eq.f32.partialorder %v1921_v20, 9.0 }
  0xf2   : > { %v1092_v4 = vsel %vm902_vm8, %v1944_v23, %v1087_v29  ;;  %v540_v26 = vsel %vm3216_vm13, %v2007_v9, %v535_v38  ;;  %v605_v5 = vsel %vm3217_vm3, %v1979_v7, 0.0  ;;  %1275 = vmatprep.subr.mxu0 %v1017_v51  ;;  %vm3218_vm9 = vcmp.eq.f32.partialorder %v1921_v20, 3.0 }
  0xf3   : > { %1316 = vmatprep.subr.mxu1 %v1092_v4  ;;  %v545_v58 = vsel %vm3218_vm9, %v1958_v11, %v540_v26  ;;  %vm3219_vm12 = vcmp.eq.f32.partialorder %v1921_v20, 8.0  ;;  %vm3220_vm8 = vcmp.eq.f32.partialorder %v1632_v21, 6.0  ;;  %v1076_v56 = vsel %vm916_vm14, %v3125_v37, 0.0 }
  0xf4   : > { %v610_v49 = vsel %vm3219_vm12, %v2009_v10, %v605_v5  ;;  %v1001_v3 = vsel %vm3220_vm8, %v3125_v37, 0.0  ;;  %1276 = vmatpush2.msra.mxu0 %v545_v58  ;;  %vm3221_vm5 = vcmp.eq.f32.partialorder %v1921_v20, 7.0  ;;  %vm3222_vm15 = vcmp.eq.f32.partialorder %v1632_v21, 5.0  ;;  %vm3230_vm12 = vmmov %vm3220_vm8 }
  0xf5   : > { %v615_v8 = vsel %vm3221_vm5, %v2007_v9, %v610_v49  ;;  %v1006_v18 = vsel %vm3222_vm15, %v3126_v63, %v1001_v3  ;;  %vm3223_vm1 = vcmp.eq.f32.partialorder %v1632_v21, 8.0  ;;  %vm3224_vm11 = vcmp.eq.f32.partialorder %v1634_v22, 6.0 }
  0xf6   : > { %v1081_v53 = vsel %vm3223_vm1, %v3126_v63, %v1076_v56  ;;  %v529_v60 = vsel %vm3224_vm11, %v1682_v41, 0.0  ;;  %vm3225_vm14 = vcmp.eq.f32.partialorder %v1921_v20, 6.0  ;;  %vm3226_vm10 = vcmp.eq.f32.partialorder %v1632_v21, 4.0 }
  0xf7   : > { %v620_v37 = vsel %vm3225_vm14, %v1958_v11, %v615_v8  ;;  %v1011_v29 = vsel %vm3226_vm10, %v1677_v35, %v1006_v18  ;;  %vm3227_vm13 = vcmp.eq.f32.partialorder %v1632_v21, 7.0  ;;  %vm3228_vm3 = vcmp.eq.f32.partialorder %v1634_v22, 5.0 }
  0xf8   : > { %v1086_v38 = vsel %vm3227_vm13, %v1677_v35, %v1081_v53  ;;  %v534_v63 = vsel %vm3228_vm3, %v1693_v47, %v529_v60  ;;  %1317 = vmatpush1.msra.mxu1 %v620_v37  ;;  %vm3229_vm9 = vcmp.eq.f32.partialorder %v1632_v21, 3.0  ;;  %vm3231_vm8 = vcmp.eq.f32.partialorder %v1634_v22, 4.0 }
  0xf9   : > { %v1016_v51 = vsel %vm3229_vm9, %v3114_v19, %v1011_v29  ;;  %v1091_v4 = vsel %vm3230_vm12, %v3114_v19, %v1086_v38  ;;  %v539_v26 = vsel %vm3231_vm8, %v1691_v46, %v534_v63  ;;  %v604_v35 = vsel %vm444_vm7, %v1682_v41, 0.0  ;;  %v3235_v19 = vld [vmem:[#allocation33_spill] sm:$0xff] }
  0xfa   : > { %1277 = vmatprep.subr.mxu0 %v1016_v51  ;;  %1318 = vmatprep.subr.mxu1 %v1091_v4  ;;  %vm3232_vm5 = vcmp.eq.f32.partialorder %v1634_v22, 3.0  ;;  %vm3233_vm15 = vcmp.eq.f32.partialorder %v1634_v22, 8.0  ;;  %vm3234_vm1 = vcmp.eq.f32.partialorder %v1651_v30, 5.0  ;;  %vm3236_vm11 = vcmp.eq.f32.partialorder %v1651_v30, 7.0 }
  0xfb   : > { %v544_v5 = vsel %vm3232_vm5, %v1675_v25, %v539_v26  ;;  %v609_v58 = vsel %vm3233_vm15, %v1693_v47, %v604_v35  ;;  %v980_v21 = vsel %vm3234_vm1, %v1741_v16, 0.0  ;;  %v1060_v49 = vsel %vm3236_vm11, %v1752_v48, %v3235_v19  ;;  %vm3243_vm12 = vmmov %vm3234_vm1 }
  0xfc   : > { %1278 = vmatpush2.msra.mxu0 %v544_v5  ;;  %vm3237_vm7 = vcmp.eq.f32.partialorder %v1634_v22, 7.0  ;;  %vm3238_vm14 = vcmp.eq.f32.partialorder %v1651_v30, 4.0  ;;  %vm3239_vm10 = vcmp.eq.f32.partialorder %v1651_v30, 6.0  ;;  %vm3240_vm13 = vcmp.eq.f32.partialorder %v1730_v31, 5.0 }
  0xfd   : > { %v614_v41 = vsel %vm3237_vm7, %v1691_v46, %v609_v58  ;;  %v985_v3 = vsel %vm3238_vm14, %v1752_v48, %v980_v21  ;;  %v1065_v47 = vsel %vm3239_vm10, %v1750_v45, %v1060_v49  ;;  %v508_v16 = vsel %vm3240_vm13, %v1768_v40, 0.0 }
  0xfe   : > { %vm3241_vm3 = vcmp.eq.f32.partialorder %v1634_v22, 6.0  ;;  %vm3242_vm9 = vcmp.eq.f32.partialorder %v1651_v30, 3.0  ;;  %v1070_v48 = vsel %vm3243_vm12, %v3167_v33, %v1065_v47  ;;  %vm3244_vm8 = vcmp.eq.f32.partialorder %v1730_v31, 4.0 }
  0xff   : > { %v619_v56 = vsel %vm3241_vm3, %v1675_v25, %v614_v41  ;;  %v990_v46 = vsel %vm3242_vm9, %v1750_v45, %v985_v3  ;;  %v513_v8 = vsel %vm3244_vm8, %v1778_v57, %v508_v16  ;;  %vm3245_vm5 = vcmp.eq.f32.partialorder %v1651_v30, 2.0  ;;  %v3247_v25 = vld [vmem:[#allocation9_spill] sm:$0xff] }
 0x100   : > { %1319 = vmatpush1.msra.mxu1 %v619_v56  ;;  %v995_v40 = vsel %vm3245_vm5, %v3167_v33, %v990_v46  ;;  %vm3246_vm15 = vcmp.eq.f32.partialorder %v1730_v31, 3.0  ;;  %vm3248_vm1 = vcmp.eq.f32.partialorder %v1730_v31, 7.0  ;;  %vm3249_vm11 = vcmp.eq.f32.partialorder %v3173_v59, 5.0 }
 0x101   : > { %v518_v22 = vsel %vm3246_vm15, %v1776_v54, %v513_v8  ;;  %v588_v45 = vsel %vm3248_vm1, %v1778_v57, %v3247_v25  ;;  %v979_v18 = vsel %vm3249_vm11, %v1792_v32, 0.0  ;;  %1279 = vmatprep.subr.mxu0 %v995_v40  ;;  %1320 = vmatprep.subr.mxu1 %v1070_v48  ;;  %vm3250_vm7 = vcmp.eq.f32.partialorder %v1730_v31, 2.0 }
 0x102   : > { %v523_v30 = vsel %vm3250_vm7, %v1771_v43, %v518_v22  ;;  %vm3251_vm14 = vcmp.eq.f32.partialorder %v1730_v31, 6.0  ;;  %vm3252_vm10 = vcmp.eq.f32.partialorder %v3173_v59, 4.0  ;;  %vm3253_vm13 = vcmp.eq.f32.partialorder %v3173_v59, 8.0 }
 0x103   : > { %v593_v33 = vsel %vm3251_vm14, %v1776_v54, %v588_v45  ;;  %v984_v53 = vsel %vm3252_vm10, %v3176_v6, %v979_v18  ;;  %v1054_v57 = vsel %vm3253_vm13, %v1792_v32, 0.0  ;;  %1280 = vmatpush2.msra.mxu0 %v523_v30  ;;  %vm3254_vm3 = vcmp.eq.f32.partialorder %v1730_v31, 5.0 }
 0x104   : > { %v598_v60 = vsel %vm3254_vm3, %v1771_v43, %v593_v33  ;;  %vm3255_vm9 = vcmp.eq.f32.partialorder %v3173_v59, 3.0  ;;  %vm3256_vm12 = vcmp.eq.f32.partialorder %v3173_v59, 7.0  ;;  %v507_v29 = vsel %vm427_vm4, %v3179_v39, 0.0 }
 0x105   : > { %v989_v37 = vsel %vm3255_vm9, %v3182_v34, %v984_v53  ;;  %v1059_v54 = vsel %vm3256_vm12, %v3176_v6, %v1054_v57  ;;  %1321 = vmatpush1.msra.mxu1 %v598_v60  ;;  %vm3257_vm8 = vcmp.eq.f32.partialorder %v3173_v59, 2.0  ;;  %vm3258_vm5 = vcmp.eq.f32.partialorder %v3173_v59, 6.0 }
 0x106   : > { %v994_v32 = vsel %vm3257_vm8, %v3186_v55, %v989_v37  ;;  %v1064_v31 = vsel %vm3258_vm5, %v3182_v34, %v1059_v54  ;;  %vm3259_vm15 = vcmp.eq.f32.partialorder %v1739_v13, 4.0  ;;  %vm3260_vm1 = vcmp.eq.f32.partialorder %v1739_v13, 8.0 }
 0x107   : > { %v512_v43 = vsel %vm3259_vm15, %v3185_v0, %v507_v29  ;;  %v582_v6 = vsel %vm3260_vm1, %v3179_v39, 0.0  ;;  %1281 = vmatprep.subr.mxu0 %v994_v32  ;;  %v1069_v38 = vsel %vm3249_vm11, %v3186_v55, %v1064_v31  ;;  %vm3261_vm7 = vcmp.eq.f32.partialorder %v1739_v13, 3.0 }
 0x108   : > { %v517_v63 = vsel %vm3261_vm7, %v3189_v62, %v512_v43  ;;  %vm3262_vm14 = vcmp.eq.f32.partialorder %v1739_v13, 7.0  ;;  %vm3263_vm10 = vcmp.eq.f32.partialorder %v1744_v17, 5.0  ;;  %1322 = vmatprep.subr.mxu1 %v1069_v38  ;;  %vm3264_vm13 = vcmp.eq.f32.partialorder %v1739_v13, 2.0 }
 0x109   : > { %v587_v34 = vsel %vm3262_vm14, %v3185_v0, %v582_v6  ;;  %v978_v51 = vsel %vm3263_vm10, %v1862_v50, 0.0  ;;  %v522_v39 = vsel %vm3264_vm13, %v3192_v42, %v517_v63  ;;  %vm3265_vm3 = vcmp.eq.f32.partialorder %v1739_v13, 6.0  ;;  %vm3274_vm7 = vmmov %vm3263_vm10 }
 0x10a   : > { %v592_v59 = vsel %vm3265_vm3, %v3189_v62, %v587_v34  ;;  %vm3266_vm9 = vcmp.eq.f32.partialorder %v1744_v17, 4.0  ;;  %vm3267_vm12 = vcmp.eq.f32.partialorder %v1744_v17, 8.0  ;;  %1282 = vmatpush2.msra.mxu0 %v522_v39  ;;  %vm3268_vm8 = vcmp.eq.f32.partialorder %v1744_v17, 3.0 }
 0x10b   : > { %v983_v55 = vsel %vm3266_vm9, %v3197_v36, %v978_v51  ;;  %v1053_v0 = vsel %vm3267_vm12, %v1862_v50, 0.0  ;;  %v597_v4 = vsel %vm427_vm4, %v3192_v42, %v592_v59  ;;  %vm3269_vm5 = vcmp.eq.f32.partialorder %v1744_v17, 7.0 }
 0x10c   : > { %v988_v26 = vsel %vm3268_vm8, %v3135_v44, %v983_v55  ;;  %v1058_v62 = vsel %vm3269_vm5, %v3197_v36, %v1053_v0  ;;  %vm3270_vm15 = vcmp.eq.f32.partialorder %v3138_v61, 5.0  ;;  %1323 = vmatpush1.msra.mxu1 %v597_v4  ;;  %vm3271_vm1 = vcmp.eq.f32.partialorder %v1744_v17, 2.0 }
 0x10d   : > { %v506_v35 = vsel %vm3270_vm15, %v3139_v1, 0.0  ;;  %v993_v50 = vsel %vm3271_vm1, %v3136_v12, %v988_v26  ;;  %vm3272_vm4 = vcmp.eq.f32.partialorder %v1744_v17, 6.0  ;;  %vm3273_vm11 = vcmp.eq.f32.partialorder %v3138_v61, 4.0  ;;  %v1128_v17 = vld [vmem:[%s2937_s1 + $0x10] sm:$0xff]  ;;  %vm3278_vm13 = vmmov %vm3270_vm15 }
 0x10e   : > { %v1063_v13 = vsel %vm3272_vm4, %v3135_v44, %v1058_v62  ;;  %v511_v42 = vsel %vm3273_vm11, %v3140_v15, %v506_v35  ;;  %v581_v36 = vsel %vm441_vm2, %v3139_v1, 0.0  ;;  %1283 = vmatprep.subr.mxu0 %v993_v50  ;;  %vm3275_vm14 = vcmp.eq.f32.partialorder %v3138_v61, 3.0 }
 0x10f   : > { %v1068_v5 = vsel %vm3274_vm7, %v3136_v12, %v1063_v13  ;;  %v516_v58 = vsel %vm3275_vm14, %v3141_v24, %v511_v42  ;;  %v586_v44 = vsel %vm436_vm6, %v3140_v15, %v581_v36  ;;  %vm3276_vm10 = vcmp.eq.f32.partialorder %v3138_v61, 2.0 }
 0x110   : > { %1324 = vmatprep.subr.mxu1 %v1068_v5  ;;  %v521_v21 = vsel %vm3276_vm10, %v3142_v14, %v516_v58  ;;  %vm3277_vm2 = vcmp.eq.f32.partialorder %v3138_v61, 6.0  ;;  %v1566_v19 = vmov 0.0   ;;  %v977_v12 = vsel %vm897_vm0, %v1948_v52, 0.0 }
 0x111   : > { %v591_v1 = vsel %vm3277_vm2, %v3141_v24, %v586_v44  ;;  %1358 = vmatprep.mubr.f32.mxu1 %v1566_v19  ;;  %vm1219_vm6 = vcmask 850944   ;;  %1284 = vmatpush2.msra.mxu0 %v521_v21  ;;  %vm3279_vm3 = vcmp.eq.f32.partialorder %v1902_v27, 4.0  ;;  %vm3280_vm9 = vcmp.eq.f32.partialorder %v1921_v20, 5.0 }
 0x112   : > { %v596_v15 = vsel %vm3278_vm13, %v3142_v14, %v591_v1  ;;  %v982_v24 = vsel %vm3279_vm3, %v1956_v28, %v977_v12  ;;  %v505_v49 = vsel %vm3280_vm9, %v1979_v7, 0.0  ;;  %vm3281_vm0 = vcmp.eq.f32.partialorder %v1902_v27, 3.0  ;;  %v1126_v7 = vld [vmem:[%s2937_s1] sm:$0xff] }
 0x113   : > { %1325 = vmatpush1.msra.mxu1 %v596_v15  ;;  %v987_v52 = vsel %vm3281_vm0, %v1954_v2, %v982_v24  ;;  %vm3282_vm12 = vcmp.eq.f32.partialorder %v1921_v20, 4.0  ;;  %vm3283_vm8 = vcmp.eq.f32.partialorder %v1902_v27, 2.0  ;;  %vm3284_vm5 = vcmp.eq.f32.partialorder %v1921_v20, 3.0 }
 0x114   : > { %v510_v41 = vsel %vm3282_vm12, %v2009_v10, %v505_v49  ;;  %v992_v61 = vsel %vm3283_vm8, %v1944_v23, %v987_v52  ;;  %1463 = vmatmul.mubr.msk.f32.vlgmr.msra.gmra.mxu1 %vm1219_vm6, %v1128_v17  ;;  %vm3285_vm15 = vcmp.eq.f32.partialorder %v1921_v20, 2.0 }
 0x115   : > { %v515_v28 = vsel %vm3284_vm5, %v2007_v9, %v510_v41  ;;  %1285 = vmatprep.subr.mxu0 %v992_v61 }
 0x116   : > { %v520_v2 = vsel %vm3285_vm15, %v1958_v11, %v515_v28 }
 0x117   : > { %1286 = vmatpush2.msra.mxu0 %v520_v2 }
 0x118   : > { %1288 = vmatmul.mubr.f32.vlgmr.msra.gmra.mxu0 %v1126_v7 }
 0x1d4   : > { %v1360_v27 = vpop.f32.mrf.mxu1 }
 0x1d6   : > { %v1362_v10 = vpop.f32.mrf.mxu1 }
 0x1d8   : > { %v1289_v23 = vpop.f32.mrf.mxu0 }
 0x1d9   : > { %v1361_v9 = vadd.f32 %v1360_v27, %v1289_v23 }
 0x1da   : > { %v1291_v14 = vpop.f32.mrf.mxu0 }
 0x1db   : > { %1365 = vst [vmem:[%s182_s9] sm:$0xff] %v1361_v9  ;;  %v1363_v3 = vadd.f32 %v1362_v10, %v1291_v14 }
 0x1dd   : > { %1366 = vst [vmem:[%s182_s9 + $0x8] sm:$0xff] %v1363_v3 }
 0x1de PF: > { %p9_p9 = scmp.ge.s32.totalorder %s1599_s13, 4   ;;  %s3286_s9 = smov %s1560_s10 }
 0x1df   : > { %s3287_s10 = smov %s1608_s16  ;;  %s3288_s11 = smov %s1599_s13 }
 0x1e0   :  { %11 = sbr.rel (!%p9_p9) target bundleno = 2 (0x2), region = 88 }

// kernel: a_call__.3
= control target key start
LH: loop header
LB: loop body
LE: loop exit
PB: predicated region body
PF: predicated region fallthrough
CT: control target
= control target key end

     0   :  { %s2553_s9 = smov 0   ;;  %s2555_s10 = smov 0   ;;  %s4899_s0 = inlined_call_operand.vmem [shape: f32[72,512], index: 0, kind: input, shape index: {}]   ;;  %s4900_s1 = inlined_call_operand.vmem [shape: f32[8,648], index: 1, kind: input, shape index: {}]   ;;  %s4901_s2 = inlined_call_operand.vmem [shape: f32[8,512], index: 2, kind: output, shape index: {}]  }
   0x1   :  { %s2557_s11 = smov 0  }
   0x2 LB: > { %s2343_s12 = sadd.s32 4294967295, %s2536_s11   ;;  %s2570_s13 = sadd.s32 1, %s2536_s11   ;;  %s2536_s11 = sphi %s2557_s11, %s6005_s11   ;;  %s2532_s10 = sphi %s2555_s10, %s6004_s10   ;;  %s2528_s9 = sphi %s2553_s9, %s6003_s9  }
   0x3   : > { %s16_s14 = ssub.s32 %s2536_s11, %s2570_s13  ;;  %s19_s15 = sadd.s32 1, %s2532_s10 }
   0x4   : > { %p17_p0 = scmp.eq.s32.totalorder %s16_s14, 0  ;;  %p26_p1 = scmp.ne.s32.totalorder %s2532_s10, %s2528_s9 }
   0x5   : > { %p27_p2 = scmp.eq.s32.totalorder %s2536_s11, 0  ;;  %p2346_p4 = scmp.ge.s32.totalorder %s2536_s11, 2 }
   0x6   : > { %s2579_s16 = scalar_select %p17_p0, %s2532_s10, %s19_s15  }
   0x7   : > { %p28_p3 = por %p27_p2, %p26_p1  ;;  %102 = sbr.rel (%p2346_p4) target bundleno = 25 (0x19), region = 20 }
   0xc   : > { %105 = sbr.rel (!%p28_p3) target bundleno = 25 (0x19), region = 24  ;;  %s107_s17 = sand.u32 (%p28_p3), 1, %s2532_s10  }
   0xd   : > { %s2400_s18 = sshll.u32 (%p28_p3), %s2536_s11, 4  ;;  %s2401_s19 = smul.u32 (%p28_p3), 144, %s107_s17 }
   0xe   : > { %s2587_s22 = scalar_lea.vmem (%p28_p3), %s4899_s0, %s2400_s18 }
   0xf   : > { %v125_v0 = vld [vmem:[%s2587_s22] sm:$0xff] (%p28_p3)  ;;  %v127_v1 = vld [vmem:[%s2587_s22 + $0x8] sm:$0xff] (%p28_p3)  ;;  %s109_s23 = scalar_lea.vmem (%p28_p3), [#allocation3], %s2401_s19 }
  0x10   : > { %v129_v2 = vld [vmem:[%s2587_s22 + $0x20] sm:$0xff] (%p28_p3)  ;;  %v131_v3 = vld [vmem:[%s2587_s22 + $0x28] sm:$0xff] (%p28_p3)  ;;  %126 = vst [vmem:[%s109_s23] sm:$0xff] (%p28_p3), %v125_v0  ;;  %128 = vst [vmem:[%s109_s23 + $0x8] sm:$0xff] (%p28_p3), %v127_v1 }
  0x11   : > { %v133_v4 = vld [vmem:[%s2587_s22 + $0x40] sm:$0xff]  ;;  %v135_v5 = vld [vmem:[%s2587_s22 + $0x48] sm:$0xff]  ;;  %130 = vst [vmem:[%s109_s23 + $0x10] sm:$0xff] %v129_v2  ;;  %132 = vst [vmem:[%s109_s23 + $0x18] sm:$0xff] %v131_v3 }
  0x12   : > { %134 = vst [vmem:[%s109_s23 + $0x20] sm:$0xff] %v133_v4  ;;  %136 = vst [vmem:[%s109_s23 + $0x28] sm:$0xff] %v135_v5  ;;  %v137_v6 = vld [vmem:[%s2587_s22 + $0x60] sm:$0xff]  ;;  %v139_v7 = vld [vmem:[%s2587_s22 + $0x68] sm:$0xff] }
  0x13   : > { %v141_v8 = vld [vmem:[%s2587_s22 + $0x80] sm:$0xff]  ;;  %138 = vst [vmem:[%s109_s23 + $0x30] sm:$0xff] %v137_v6  ;;  %140 = vst [vmem:[%s109_s23 + $0x38] sm:$0xff] %v139_v7  ;;  %v143_v9 = vld [vmem:[%s2587_s22 + $0x88] sm:$0xff] }
  0x14   : > { %142 = vst [vmem:[%s109_s23 + $0x40] sm:$0xff] %v141_v8  ;;  %v145_v10 = vld [vmem:[%s2587_s22 + $0xa0] sm:$0xff]  ;;  %v147_v11 = vld [vmem:[%s2587_s22 + $0xa8] sm:$0xff]  ;;  %144 = vst [vmem:[%s109_s23 + $0x48] sm:$0xff] %v143_v9 }
  0x15   : > { %146 = vst [vmem:[%s109_s23 + $0x50] sm:$0xff] %v145_v10  ;;  %148 = vst [vmem:[%s109_s23 + $0x58] sm:$0xff] %v147_v11  ;;  %v149_v12 = vld [vmem:[%s2587_s22 + $0xc0] sm:$0xff]  ;;  %v151_v13 = vld [vmem:[%s2587_s22 + $0xc8] sm:$0xff] }
  0x16   : > { %v153_v14 = vld [vmem:[%s2587_s22 + $0xe0] sm:$0xff]  ;;  %150 = vst [vmem:[%s109_s23 + $0x60] sm:$0xff] %v149_v12  ;;  %152 = vst [vmem:[%s109_s23 + $0x68] sm:$0xff] %v151_v13  ;;  %v155_v15 = vld [vmem:[%s2587_s22 + $0xe8] sm:$0xff] }
  0x17   : > { %154 = vst [vmem:[%s109_s23 + $0x70] sm:$0xff] %v153_v14  ;;  %v157_v16 = vld [vmem:[%s2587_s22 + $0x100] sm:$0xff]  ;;  %v159_v17 = vld [vmem:[%s2587_s22 + $0x108] sm:$0xff]  ;;  %156 = vst [vmem:[%s109_s23 + $0x78] sm:$0xff] %v155_v15 }
  0x18   : > { %158 = vst [vmem:[%s109_s23 + $0x80] sm:$0xff] %v157_v16  ;;  %160 = vst [vmem:[%s109_s23 + $0x88] sm:$0xff] %v159_v17 }
  0x19 PF: > { %p2349_p5 = scmp.ge.s32.totalorder %s2536_s11, 1  ;;  %p165_p6 = scmp.lt.s32.totalorder %s2536_s11, 3 }
  0x1b   : > { %p166_p7 = pnand %p2349_p5, %p165_p6 }
  0x1d   : > { %169 = sbr.rel (%p166_p7) target bundleno = 689 (0x2b1), region = 47 }
  0x22   : > { %s172_s24 = sand.u32 1, %s2528_s9   ;;  %s2350_s15 = sshll.u32 %s2343_s12, 1 }
  0x23   : > { %s2402_s25 = smul.u32 144, %s172_s24  ;;  %p195_p8 = scmp.lt.s32.totalorder %s2350_s15, 3 }
  0x25   : > { %s2610_s26 = scalar_lea.vmem [#allocation3], %s2402_s25  ;;  %s6007_s15 = smov (!%p195_p8, %s2350_s15), 3 }
  0x26   : > { %v2376_v18 = vld [vmem:[%s2610_s26 + $0x68] sm:$0xff]  ;;  %v206_v20 = vld [vmem:[%s2610_s26 + $0x60] sm:$0xff]  ;;  %v2375_v29 = vld [vmem:[%s2610_s26 + $0x58] sm:$0xff]  ;;  %s2351_s17 = sshll.u32 %s6007_s15, 3 }
  0x27   : > { %v2372_v19 = vld [vmem:[%s2610_s26 + $0x28] sm:$0xff]  ;;  %v2394_v21 = vadd.f32 2.2, %v2376_v18  ;;  %v2367_v23 = vadd.f32 2.2, %v206_v20  ;;  %v202_v24 = vld [vmem:[%s2610_s26 + $0x20] sm:$0xff]  ;;  %s198_s20 = scalar_lea.vmem %s4901_s2, %s2351_s17 }
  0x28   : > { %v2390_v22 = vadd.f32 2.2, %v2372_v19  ;;  %v2363_v28 = vadd.f32 2.2, %v202_v24  ;;  %v2371_v30 = vld [vmem:[%s2610_s26 + $0x18] sm:$0xff]  ;;  %v205_v33 = vld [vmem:[%s2610_s26 + $0x50] sm:$0xff] }
  0x29   : > { %v1144_v25 = vmul.f32 2.5, %v2394_v21  ;;  %v2616_v27 = vmul.f32 2.5, %v2367_v23  ;;  %v2626_v35 = vadd.f32 2.2, %v2375_v29  ;;  %v2628_v36 = vadd.f32 2.2, %v2371_v30 }
  0x2a   : > { %v1140_v26 = vmul.f32 2.5, %v2390_v22  ;;  %v2634_v39 = vmul.f32 2.5, %v2363_v28  ;;  %v2636_v40 = vadd.f32 2.2, %v205_v33 }
  0x2b   : > { %v2620_v31 = vfloor.f32 %v1144_v25  ;;  %v2632_v38 = vfloor.f32 %v2616_v27 }
  0x2c   : > { %v2622_v32 = vfloor.f32 %v1140_v26 }
  0x2d   : > { %5315 = vst [vmem:[#allocation4_spill] sm:$0xff] %v2620_v31  ;;  %v1162_v34 = vsub.f32 %v1144_v25, %v2620_v31  ;;  %5317 = vst [vmem:[#allocation6_spill] sm:$0xff] %v2632_v38  ;;  %vm5073_vm0 = vcmp.eq.f32.partialorder %v2620_v31, 3.0  ;;  %vm4910_vm1 = vcmp.eq.f32.partialorder %v2620_v31, 2.0  ;;  %vm4906_vm2 = vcmp.eq.f32.partialorder %v2620_v31, 1.0 }
  0x2e   : > { %5316 = vst [vmem:[#allocation5_spill] sm:$0xff] %v2622_v32  ;;  %v1158_v37 = vsub.f32 %v1140_v26, %v2622_v32  ;;  %vm1441_vm3 = vcmp.eq.f32.partialorder %v2620_v31, 0.0  ;;  %vm5010_vm4 = vcmp.eq.f32.partialorder %v2622_v32, 5.0  ;;  %vm5056_vm5 = vcmp.eq.f32.partialorder %v2622_v32, 4.0 }
  0x2f   : > { %v1180_v41 = vadd.f32 1.0, %v1162_v34  ;;  %v1189_v42 = vadd.f32 2.0, %v1162_v34  ;;  %v1198_v43 = vadd.f32 3.0, %v1162_v34  ;;  %v1216_v44 = vmul.f32 %v1162_v34, %v1162_v34 }
  0x30   : > { %v1176_v45 = vadd.f32 1.0, %v1158_v37  ;;  %v1185_v46 = vadd.f32 2.0, %v1158_v37  ;;  %v1212_v47 = vmul.f32 %v1158_v37, %v1158_v37  ;;  %v1194_v54 = vadd.f32 3.0, %v1158_v37 }
  0x31   : > { %v1207_v48 = vsub.f32 2.0, %v1180_v41  ;;  %v1225_v49 = vmul.f32 0.5, %v1216_v44  ;;  %v1243_v50 = vsub.f32 3.0, %v1180_v41  ;;  %v1279_v51 = vsub.f32 3.0, %v1189_v42 }
  0x32   : > { %v1333_v52 = vsub.f32 4.0, %v1180_v41  ;;  %v1414_v53 = vsub.f32 4.0, %v1198_v43  ;;  %v1203_v55 = vsub.f32 2.0, %v1176_v45  ;;  %v1378_v60 = vsub.f32 4.0, %v1189_v42 }
  0x33   : > { %v1234_v56 = vmul.f32 %v1207_v48, %v1180_v41  ;;  %v1252_v57 = vmul.f32 %v1243_v50, %v1162_v34  ;;  %v1288_v58 = vmul.f32 %v1279_v51, %v1207_v48  ;;  %v1306_v59 = vmul.f32 %v1225_v49, %v1162_v34 }
  0x34   : > { %v1221_v61 = vmul.f32 0.5, %v1212_v47  ;;  %v1230_v62 = vmul.f32 %v1203_v55, %v1176_v45  ;;  %v1239_v63 = vsub.f32 3.0, %v1176_v45  ;;  %v1342_v2 = vmul.f32 %v1333_v52, %v1225_v49 }
  0x35   : > { %v1261_v0 = vadd.f32 %v1252_v57, %v1234_v56  ;;  %v1297_v1 = vmul.f32 0.5, %v1288_v58  ;;  %v1275_v3 = vsub.f32 3.0, %v1185_v46  ;;  %v2641_v4 = vmul.f32 0.33333334, %v1306_v59 }
  0x36   : > { %v1248_v5 = vmul.f32 %v1239_v63, %v1158_v37  ;;  %v1302_v6 = vmul.f32 %v1221_v61, %v1158_v37  ;;  %v1329_v7 = vsub.f32 4.0, %v1176_v45  ;;  %v1374_v14 = vsub.f32 4.0, %v1185_v46 }
  0x37   : > { %5318 = vst [vmem:[#allocation7_spill] sm:$0xff] %v2641_v4  ;;  %v1270_v8 = vmul.f32 0.5, %v1261_v0  ;;  %v1369_v9 = vmul.f32 %v1297_v1, %v1189_v42  ;;  %v1423_v10 = vmul.f32 %v1414_v53, %v1297_v1  ;;  %v1284_v11 = vmul.f32 %v1275_v3, %v1203_v55 }
  0x38   : > { %v1257_v12 = vadd.f32 %v1248_v5, %v1230_v62  ;;  %v1338_v13 = vmul.f32 %v1329_v7, %v1221_v61  ;;  %v1410_v15 = vsub.f32 4.0, %v1194_v54  ;;  %vm5020_vm6 = vcmp.eq.f32.partialorder %v2622_v32, 6.0 }
  0x39   : > { %v1324_v16 = vmul.f32 %v1270_v8, %v1180_v41  ;;  %v1387_v17 = vmul.f32 %v1378_v60, %v1270_v8  ;;  %v2645_v18 = vmul.f32 0.33333334, %v1423_v10  ;;  %v1293_v19 = vmul.f32 0.5, %v1284_v11 }
  0x3a   : > { %v1266_v20 = vmul.f32 0.5, %v1257_v12  ;;  %vm4904_vm7 = vcmp.eq.f32.partialorder %v2622_v32, 7.0  ;;  %v314_v21 = vsub.f32 %v2616_v27, %v2632_v38  ;;  %v2667_v50 = vmul.f32 0.33333334, %v1302_v6  ;;  %v201_v6 = vld [vmem:[%s2610_s26 + $0x10] sm:$0xff] }
  0x3b   : > { %5319 = vst [vmem:[#allocation8_spill] sm:$0xff] %v2645_v18  ;;  %v1351_v22 = vadd.f32 %v1342_v2, %v1324_v16  ;;  %v1396_v23 = vadd.f32 %v1387_v17, %v1369_v9  ;;  %v1540_v24 = vsel %vm5073_vm0, %v2645_v18, 0.0  ;;  %v1365_v25 = vmul.f32 %v1293_v19, %v1185_v46 }
  0x3c   : > { %v1320_v26 = vmul.f32 %v1266_v20, %v1176_v45  ;;  %v1383_v28 = vmul.f32 %v1374_v14, %v1266_v20  ;;  %v1419_v29 = vmul.f32 %v1410_v15, %v1293_v19  ;;  %v332_v30 = vadd.f32 1.0, %v314_v21  ;;  %5323 = vst [vmem:[#allocation12_spill] sm:$0xff] %v2667_v50 }
  0x3d   : > { %v2655_v33 = vmul.f32 0.33333334, %v1351_v22  ;;  %v2657_v34 = vmul.f32 0.33333334, %v1396_v23  ;;  %v341_v37 = vadd.f32 2.0, %v314_v21  ;;  %v350_v41 = vadd.f32 3.0, %v314_v21 }
  0x3e   : > { %v1347_v42 = vadd.f32 %v1338_v13, %v1320_v26  ;;  %v1392_v43 = vadd.f32 %v1383_v28, %v1365_v25  ;;  %v2659_v27 = vmul.f32 0.33333334, %v1419_v29  ;;  %v359_v44 = vsub.f32 2.0, %v332_v30 }
  0x3f   : > { %5320 = vst [vmem:[#allocation9_spill] sm:$0xff] %v2655_v33  ;;  %5321 = vst [vmem:[#allocation10_spill] sm:$0xff] %v2657_v34  ;;  %v1549_v47 = vsel %vm4910_vm1, %v2657_v34, %v1540_v24  ;;  %v368_v46 = vmul.f32 %v314_v21, %v314_v21  ;;  %v395_v45 = vsub.f32 3.0, %v332_v30  ;;  %v431_v48 = vsub.f32 3.0, %v341_v37 }
  0x40   : > { %5322 = vst [vmem:[#allocation11_spill] sm:$0xff] %v2659_v27  ;;  %v1558_v49 = vsel %vm4906_vm2, %v2655_v33, %v1549_v47  ;;  %v2669_v51 = vmul.f32 0.33333334, %v1347_v42  ;;  %v2671_v52 = vmul.f32 0.33333334, %v1392_v43  ;;  %v1716_v54 = vsel %vm4904_vm7, %v2659_v27, 0.0 }
  0x41   : > { %v1567_v53 = vsel %vm1441_vm3, %v2641_v4, %v1558_v49  ;;  %v377_v55 = vmul.f32 0.5, %v368_v46  ;;  %v386_v56 = vmul.f32 %v359_v44, %v332_v30  ;;  %v404_v58 = vmul.f32 %v395_v45, %v314_v21 }
  0x42   : > { %5324 = vst [vmem:[#allocation13_spill] sm:$0xff] %v2669_v51  ;;  %5325 = vst [vmem:[#allocation14_spill] sm:$0xff] %v2671_v52  ;;  %2066 = vmatprep.subr.mxu0 %v1567_v53  ;;  %v1725_v57 = vsel %vm5020_vm6, %v2671_v52, %v1716_v54  ;;  %v440_v59 = vmul.f32 %v431_v48, %v359_v44  ;;  %v485_v60 = vsub.f32 4.0, %v332_v30  ;;  %v566_v63 = vsub.f32 4.0, %v350_v41 }
  0x43   : > { %v1734_v61 = vsel %vm5010_vm4, %v2669_v51, %v1725_v57  ;;  %v458_v62 = vmul.f32 %v377_v55, %v314_v21  ;;  %v1143_v0 = vmul.f32 2.5, %v2626_v35  ;;  %v413_v2 = vadd.f32 %v404_v58, %v386_v56 }
  0x44   : > { %v1743_v1 = vsel %vm5056_vm5, %v2667_v50, %v1734_v61  ;;  %v449_v3 = vmul.f32 0.5, %v440_v59  ;;  %v530_v5 = vsub.f32 4.0, %v341_v37  ;;  %v2691_v7 = vmul.f32 2.5, %v2628_v36 }
  0x45   : > { %2137 = vmatprep.subr.mxu1 %v1743_v1  ;;  %v2694_v8 = vmul.f32 2.5, %v2636_v40  ;;  %v422_v9 = vmul.f32 0.5, %v413_v2  ;;  %v494_v10 = vmul.f32 %v485_v60, %v377_v55  ;;  %v2696_v35 = vmul.f32 0.33333334, %v458_v62 }
  0x46   : > { %v521_v11 = vmul.f32 %v449_v3, %v341_v37  ;;  %v575_v12 = vmul.f32 %v566_v63, %v449_v3  ;;  %vm5075_vm8 = vcmp.eq.f32.partialorder %v2632_v38, 3.0  ;;  %v2700_v13 = vfloor.f32 %v2634_v39 }
  0x47   : > { %5326 = vst [vmem:[#allocation15_spill] sm:$0xff] %v2696_v35  ;;  %v2702_v14 = vadd.f32 2.2, %v201_v6  ;;  %v476_v15 = vmul.f32 %v422_v9, %v332_v30  ;;  %v539_v16 = vmul.f32 %v530_v5, %v422_v9  ;;  %v2706_v17 = vfloor.f32 %v1143_v0 }
  0x48   : > { %5327 = vst [vmem:[#allocation16_spill] sm:$0xff] %v2700_v13  ;;  %v2704_v36 = vmul.f32 0.33333334, %v575_v12  ;;  %vm593_vm9 = vcmp.eq.f32.partialorder %v2632_v38, 0.0  ;;  %vm4903_vm10 = vcmp.eq.f32.partialorder %v2632_v38, 1.0  ;;  %vm4909_vm11 = vcmp.eq.f32.partialorder %v2632_v38, 2.0 }
  0x49   : > { %5329 = vst [vmem:[#allocation18_spill] sm:$0xff] %v2706_v17  ;;  %v310_v40 = vsub.f32 %v2634_v39, %v2700_v13  ;;  %v503_v19 = vadd.f32 %v494_v10, %v476_v15  ;;  %v548_v20 = vadd.f32 %v539_v16, %v521_v11  ;;  %v2717_v22 = vfloor.f32 %v2691_v7 }
  0x4a   : > { %5328 = vst [vmem:[#allocation17_spill] sm:$0xff] %v2704_v36  ;;  %v692_v21 = vsel %vm5075_vm8, %v2704_v36, 0.0  ;;  %v1161_v30 = vsub.f32 %v1143_v0, %v2706_v17  ;;  %v2725_v39 = vfloor.f32 %v2694_v8  ;;  %vm4902_vm12 = vcmp.eq.f32.partialorder %v2700_v13, 7.0 }
  0x4b   : > { %5330 = vst [vmem:[#allocation19_spill] sm:$0xff] %v2717_v22  ;;  %v328_v23 = vadd.f32 1.0, %v310_v40  ;;  %v337_v24 = vadd.f32 2.0, %v310_v40  ;;  %v346_v25 = vadd.f32 3.0, %v310_v40  ;;  %v364_v26 = vmul.f32 %v310_v40, %v310_v40 }
  0x4c   : > { %v2719_v28 = vmul.f32 0.33333334, %v503_v19  ;;  %v2721_v29 = vmul.f32 0.33333334, %v548_v20  ;;  %5333 = vst [vmem:[#allocation22_spill] sm:$0xff] %v2725_v39  ;;  %v1179_v57 = vadd.f32 1.0, %v1161_v30  ;;  %v1215_v0 = vmul.f32 %v1161_v30, %v1161_v30 }
  0x4d   : > { %v355_v37 = vsub.f32 2.0, %v328_v23  ;;  %v373_v41 = vmul.f32 0.5, %v364_v26  ;;  %v391_v42 = vsub.f32 3.0, %v328_v23  ;;  %v427_v43 = vsub.f32 3.0, %v337_v24 }
  0x4e   : > { %5331 = vst [vmem:[#allocation20_spill] sm:$0xff] %v2719_v28  ;;  %5332 = vst [vmem:[#allocation21_spill] sm:$0xff] %v2721_v29  ;;  %v701_v44 = vsel %vm4909_vm11, %v2721_v29, %v692_v21  ;;  %v481_v47 = vsub.f32 4.0, %v328_v23  ;;  %v562_v46 = vsub.f32 4.0, %v346_v25  ;;  %v526_v56 = vsub.f32 4.0, %v337_v24 }
  0x4f   : > { %v710_v45 = vsel %vm4903_vm10, %v2719_v28, %v701_v44  ;;  %v382_v48 = vmul.f32 %v355_v37, %v328_v23  ;;  %v400_v49 = vmul.f32 %v391_v42, %v310_v40  ;;  %v436_v53 = vmul.f32 %v427_v43, %v355_v37 }
  0x50   : > { %v719_v54 = vsel %vm593_vm9, %v2696_v35, %v710_v45  ;;  %v454_v55 = vmul.f32 %v373_v41, %v310_v40  ;;  %v490_v60 = vmul.f32 %v481_v47, %v373_v41  ;;  %vm5008_vm13 = vcmp.eq.f32.partialorder %v2700_v13, 5.0 }
  0x51   : > { %2067 = vmatpush1.msra.mxu0 %v719_v54  ;;  %v409_v58 = vadd.f32 %v400_v49, %v382_v48  ;;  %v445_v59 = vmul.f32 0.5, %v436_v53  ;;  %v1188_v61 = vadd.f32 2.0, %v1161_v30  ;;  %vm4968_vm14 = vcmp.eq.f32.partialorder %v2700_v13, 4.0 }
  0x52   : > { %v1197_v62 = vadd.f32 3.0, %v1161_v30  ;;  %v1206_v63 = vsub.f32 2.0, %v1179_v57  ;;  %v1242_v1 = vsub.f32 3.0, %v1179_v57  ;;  %v1224_v9 = vmul.f32 0.5, %v1215_v0 }
  0x53   : > { %v418_v2 = vmul.f32 0.5, %v409_v58  ;;  %v517_v3 = vmul.f32 %v445_v59, %v337_v24  ;;  %v571_v5 = vmul.f32 %v562_v46, %v445_v59  ;;  %v1278_v6 = vsub.f32 3.0, %v1188_v61 }
  0x54   : > { %v1233_v10 = vmul.f32 %v1206_v63, %v1179_v57  ;;  %v1251_v11 = vmul.f32 %v1242_v1, %v1161_v30  ;;  %v1332_v12 = vsub.f32 4.0, %v1179_v57  ;;  %vm5009_vm15 = vcmp.eq.f32.partialorder %v2700_v13, 6.0 }
  0x55   : > { %v472_v15 = vmul.f32 %v418_v2, %v328_v23  ;;  %v535_v16 = vmul.f32 %v526_v56, %v418_v2  ;;  %v2739_v40 = vmul.f32 0.33333334, %v571_v5  ;;  %v1287_v19 = vmul.f32 %v1278_v6, %v1206_v63 }
  0x56   : > { %v1260_v20 = vadd.f32 %v1251_v11, %v1233_v10  ;;  %v1305_v21 = vmul.f32 %v1224_v9, %v1161_v30  ;;  %v1377_v25 = vsub.f32 4.0, %v1188_v61  ;;  %v2742_v26 = vmul.f32 0.33333334, %v454_v55 }
  0x57   : > { %5334 = vst [vmem:[#allocation23_spill] sm:$0xff] %v2739_v40  ;;  %v499_v37 = vadd.f32 %v490_v60, %v472_v15  ;;  %v544_v24 = vadd.f32 %v535_v16, %v517_v3  ;;  %v1296_v41 = vmul.f32 0.5, %v1287_v19  ;;  %v868_v42 = vsel %vm4902_vm12, %v2739_v40, 0.0 }
  0x58   : > { %5335 = vst [vmem:[#allocation24_spill] sm:$0xff] %v2742_v26  ;;  %v1269_v43 = vmul.f32 0.5, %v1260_v20  ;;  %v1341_v23 = vmul.f32 %v1332_v12, %v1224_v9  ;;  %v1413_v44 = vsub.f32 4.0, %v1197_v62  ;;  %v2751_v45 = vmul.f32 0.33333334, %v1305_v21 }
  0x59   : > { %v2747_v47 = vmul.f32 0.33333334, %v499_v37  ;;  %v2749_v46 = vmul.f32 0.33333334, %v544_v24  ;;  %v1368_v30 = vmul.f32 %v1296_v41, %v1188_v61  ;;  %vm4905_vm3 = vcmp.eq.f32.partialorder %v2706_v17, 1.0 }
  0x5a   : > { %5338 = vst [vmem:[#allocation27_spill] sm:$0xff] %v2751_v45  ;;  %v1323_v48 = vmul.f32 %v1269_v43, %v1179_v57  ;;  %v1386_v49 = vmul.f32 %v1377_v25, %v1269_v43  ;;  %v1422_v53 = vmul.f32 %v1413_v44, %v1296_v41  ;;  %vm4908_vm9 = vcmp.eq.f32.partialorder %v2706_v17, 2.0 }
  0x5b   : > { %5336 = vst [vmem:[#allocation25_spill] sm:$0xff] %v2747_v47  ;;  %5337 = vst [vmem:[#allocation26_spill] sm:$0xff] %v2749_v46  ;;  %v877_v54 = vsel %vm5009_vm15, %v2749_v46, %v868_v42  ;;  %vm5085_vm12 = vcmp.eq.f32.partialorder %v2706_v17, 3.0  ;;  %v1157_v55 = vsub.f32 %v2691_v7, %v2717_v22  ;;  %vm1440_vm10 = vcmp.eq.f32.partialorder %v2706_v17, 0.0 }
  0x5c   : > { %v886_v56 = vsel %vm5008_vm13, %v2747_v47, %v877_v54  ;;  %v1350_v57 = vadd.f32 %v1341_v23, %v1323_v48  ;;  %v1395_v58 = vadd.f32 %v1386_v49, %v1368_v30  ;;  %v2764_v59 = vmul.f32 0.33333334, %v1422_v53 }
  0x5d   : > { %v895_v60 = vsel %vm4968_vm14, %v2742_v26, %v886_v56  ;;  %v1175_v61 = vadd.f32 1.0, %v1157_v55  ;;  %v1184_v62 = vadd.f32 2.0, %v1157_v55  ;;  %v1193_v63 = vadd.f32 3.0, %v1157_v55 }
  0x5e   : > { %5339 = vst [vmem:[#allocation28_spill] sm:$0xff] %v2764_v59  ;;  %2138 = vmatpush1.msra.mxu1 %v895_v60  ;;  %v2769_v0 = vmul.f32 0.33333334, %v1350_v57  ;;  %v2771_v1 = vmul.f32 0.33333334, %v1395_v58  ;;  %v1539_v7 = vsel %vm5085_vm12, %v2764_v59, 0.0  ;;  %v1211_v2 = vmul.f32 %v1157_v55, %v1157_v55 }
  0x5f   : > { %v1202_v3 = vsub.f32 2.0, %v1175_v61  ;;  %v1238_v5 = vsub.f32 3.0, %v1175_v61  ;;  %v1274_v6 = vsub.f32 3.0, %v1184_v62  ;;  %v1328_v11 = vsub.f32 4.0, %v1175_v61 }
  0x60   : > { %5340 = vst [vmem:[#allocation29_spill] sm:$0xff] %v2769_v0  ;;  %5341 = vst [vmem:[#allocation30_spill] sm:$0xff] %v2771_v1  ;;  %v1548_v9 = vsel %vm4908_vm9, %v2771_v1, %v1539_v7  ;;  %v1220_v10 = vmul.f32 0.5, %v1211_v2  ;;  %v1409_v12 = vsub.f32 4.0, %v1193_v63  ;;  %v291_v25 = vmul.f32 2.5, %v2702_v14 }
  0x61   : > { %v1557_v15 = vsel %vm4905_vm3, %v2769_v0, %v1548_v9  ;;  %v1229_v16 = vmul.f32 %v1202_v3, %v1175_v61  ;;  %v1247_v19 = vmul.f32 %v1238_v5, %v1157_v55  ;;  %v1283_v20 = vmul.f32 %v1274_v6, %v1202_v3 }
  0x62   : > { %v1566_v21 = vsel %vm1440_vm10, %v2751_v45, %v1557_v15  ;;  %v1373_v41 = vsub.f32 4.0, %v1184_v62  ;;  %v313_v42 = vsub.f32 %v2694_v8, %v2725_v39  ;;  %v1301_v43 = vmul.f32 %v1220_v10, %v1157_v55 }
  0x63   : > { %2068 = vmatprep.subr.mxu0 %v1566_v21  ;;  %v1256_v37 = vadd.f32 %v1247_v19, %v1229_v16  ;;  %v1292_v24 = vmul.f32 0.5, %v1283_v20  ;;  %v1337_v23 = vmul.f32 %v1328_v11, %v1220_v10  ;;  %vm4911_vm7 = vcmp.eq.f32.partialorder %v2717_v22, 4.0 }
  0x64   : > { %vm4914_vm3 = vcmp.eq.f32.partialorder %v2717_v22, 5.0  ;;  %v331_v49 = vadd.f32 1.0, %v313_v42  ;;  %vm4907_vm10 = vcmp.eq.f32.partialorder %v2717_v22, 7.0  ;;  %v340_v14 = vadd.f32 2.0, %v313_v42 }
  0x65   : > { %v1265_v44 = vmul.f32 0.5, %v1256_v37  ;;  %v1364_v30 = vmul.f32 %v1292_v24, %v1184_v62  ;;  %v1418_v48 = vmul.f32 %v1409_v12, %v1292_v24  ;;  %v349_v53 = vadd.f32 3.0, %v313_v42 }
  0x66   : > { %v367_v54 = vmul.f32 %v313_v42, %v313_v42  ;;  %v358_v8 = vsub.f32 2.0, %v331_v49  ;;  %vm4916_vm2 = vcmp.eq.f32.partialorder %v2717_v22, 6.0  ;;  %v394_v60 = vsub.f32 3.0, %v331_v49 }
  0x67   : > { %v1319_v56 = vmul.f32 %v1265_v44, %v1175_v61  ;;  %v1382_v57 = vmul.f32 %v1373_v41, %v1265_v44  ;;  %v2790_v58 = vmul.f32 0.33333334, %v1418_v48  ;;  %v430_v63 = vsub.f32 3.0, %v340_v14  ;;  %v2374_v44 = vld [vmem:[%s2610_s26 + $0x48] sm:$0xff] }
  0x68   : > { %v376_v55 = vmul.f32 0.5, %v367_v54  ;;  %v385_v62 = vmul.f32 %v358_v8, %v331_v49  ;;  %v484_v3 = vsub.f32 4.0, %v331_v49  ;;  %v2793_v5 = vmul.f32 0.33333334, %v1301_v43 }
  0x69   : > { %5342 = vst [vmem:[#allocation31_spill] sm:$0xff] %v2790_v58  ;;  %v1346_v7 = vadd.f32 %v1337_v23, %v1319_v56  ;;  %v1391_v2 = vadd.f32 %v1382_v57, %v1364_v30  ;;  %v1715_v6 = vsel %vm4907_vm10, %v2790_v58, 0.0  ;;  %v403_v61 = vmul.f32 %v394_v60, %v313_v42 }
  0x6a   : > { %5343 = vst [vmem:[#allocation32_spill] sm:$0xff] %v2793_v5  ;;  %v439_v9 = vmul.f32 %v430_v63, %v358_v8  ;;  %v457_v12 = vmul.f32 %v376_v55, %v313_v42  ;;  %v565_v15 = vsub.f32 4.0, %v349_v53  ;;  %v529_v20 = vsub.f32 4.0, %v340_v14  ;;  %v2370_v53 = vld [vmem:[%s2610_s26 + $0x8] sm:$0xff] }
  0x6b   : > { %v2798_v10 = vmul.f32 0.33333334, %v1346_v7  ;;  %v2800_v11 = vmul.f32 0.33333334, %v1391_v2  ;;  %v412_v16 = vadd.f32 %v403_v61, %v385_v62  ;;  %v2802_v21 = vfloor.f32 %v291_v25 }
  0x6c   : > { %v448_v19 = vmul.f32 0.5, %v439_v9  ;;  %v493_v24 = vmul.f32 %v484_v3, %v376_v55  ;;  %vm592_vm10 = vcmp.eq.f32.partialorder %v2725_v39, 0.0  ;;  %vm4913_vm9 = vcmp.eq.f32.partialorder %v2725_v39, 1.0 }
  0x6d   : > { %5344 = vst [vmem:[#allocation33_spill] sm:$0xff] %v2798_v10  ;;  %5345 = vst [vmem:[#allocation34_spill] sm:$0xff] %v2800_v11  ;;  %v1724_v37 = vsel %vm4916_vm2, %v2800_v11, %v1715_v6  ;;  %v421_v42 = vmul.f32 0.5, %v412_v16  ;;  %vm4912_vm11 = vcmp.eq.f32.partialorder %v2725_v39, 2.0  ;;  %vm5060_vm1 = vcmp.eq.f32.partialorder %v2725_v39, 3.0  ;;  %v204_v6 = vld [vmem:[%s2610_s26 + $0x40] sm:$0xff] }
  0x6e   : > { %5346 = vst [vmem:[#allocation35_spill] sm:$0xff] %v2802_v21  ;;  %v1733_v41 = vsel %vm4914_vm3, %v2798_v10, %v1724_v37  ;;  %v520_v43 = vmul.f32 %v448_v19, %v340_v14  ;;  %v574_v23 = vmul.f32 %v565_v15, %v448_v19  ;;  %v309_v48 = vsub.f32 %v291_v25, %v2802_v21 }
  0x6f   : > { %v1742_v30 = vsel %vm4911_vm7, %v2793_v5, %v1733_v41  ;;  %v2820_v54 = vmul.f32 0.33333334, %v457_v12  ;;  %v475_v56 = vmul.f32 %v421_v42, %v331_v49  ;;  %v538_v57 = vmul.f32 %v529_v20, %v421_v42 }
  0x70   : > { %2139 = vmatprep.subr.mxu1 %v1742_v30  ;;  %v2822_v14 = vmul.f32 0.33333334, %v574_v23  ;;  %v327_v8 = vadd.f32 1.0, %v309_v48  ;;  %v336_v55 = vadd.f32 2.0, %v309_v48  ;;  %v363_v60 = vmul.f32 %v309_v48, %v309_v48 }
  0x71   : > { %5347 = vst [vmem:[#allocation36_spill] sm:$0xff] %v2820_v54  ;;  %v2392_v63 = vadd.f32 2.2, %v2374_v44  ;;  %v502_v7 = vadd.f32 %v493_v24, %v475_v56  ;;  %v547_v2 = vadd.f32 %v538_v57, %v520_v43  ;;  %v345_v62 = vadd.f32 3.0, %v309_v48 }
  0x72   : > { %5348 = vst [vmem:[#allocation37_spill] sm:$0xff] %v2822_v14  ;;  %v2388_v3 = vadd.f32 2.2, %v2370_v53  ;;  %v691_v25 = vsel %vm5060_vm1, %v2822_v14, 0.0  ;;  %v354_v61 = vsub.f32 2.0, %v327_v8  ;;  %v390_v9 = vsub.f32 3.0, %v327_v8 }
  0x73   : > { %v426_v12 = vsub.f32 3.0, %v336_v55  ;;  %v2828_v49 = vmul.f32 0.33333334, %v502_v7  ;;  %v2830_v15 = vmul.f32 0.33333334, %v547_v2  ;;  %v372_v16 = vmul.f32 0.5, %v363_v60 }
  0x74   : > { %v480_v19 = vsub.f32 4.0, %v327_v8  ;;  %v381_v20 = vmul.f32 %v354_v61, %v327_v8  ;;  %v399_v37 = vmul.f32 %v390_v9, %v309_v48  ;;  %v2365_v41 = vadd.f32 2.2, %v204_v6 }
  0x75   : > { %5349 = vst [vmem:[#allocation38_spill] sm:$0xff] %v2828_v49  ;;  %5350 = vst [vmem:[#allocation39_spill] sm:$0xff] %v2830_v15  ;;  %v435_v24 = vmul.f32 %v426_v12, %v354_v61  ;;  %v700_v42 = vsel %vm4912_vm11, %v2830_v15, %v691_v25  ;;  %v525_v43 = vsub.f32 4.0, %v336_v55  ;;  %v561_v23 = vsub.f32 4.0, %v345_v62 }
  0x76   : > { %v1142_v44 = vmul.f32 2.5, %v2392_v63  ;;  %v709_v30 = vsel %vm4913_vm9, %v2828_v49, %v700_v42  ;;  %v408_v53 = vadd.f32 %v399_v37, %v381_v20  ;;  %v453_v57 = vmul.f32 %v372_v16, %v309_v48 }
  0x77   : > { %v444_v56 = vmul.f32 0.5, %v435_v24  ;;  %v718_v60 = vsel %vm592_vm10, %v2820_v54, %v709_v30  ;;  %v489_v7 = vmul.f32 %v480_v19, %v372_v16  ;;  %vm4936_vm7 = vcmp.eq.f32.partialorder %v2802_v21, 4.0 }
  0x78   : > { %v2842_v2 = vfloor.f32 %v1142_v44  ;;  %2069 = vmatpush1.msra.mxu0 %v718_v60  ;;  %v417_v6 = vmul.f32 0.5, %v408_v53  ;;  %v1138_v25 = vmul.f32 2.5, %v2388_v3  ;;  %vm4965_vm11 = vcmp.eq.f32.partialorder %v2802_v21, 5.0 }
  0x79   : > { %v516_v62 = vmul.f32 %v444_v56, %v336_v55  ;;  %v570_v63 = vmul.f32 %v561_v23, %v444_v56  ;;  %vm4917_vm9 = vcmp.eq.f32.partialorder %v2802_v21, 6.0  ;;  %vm4915_vm3 = vcmp.eq.f32.partialorder %v2802_v21, 7.0 }
  0x7a   : > { %5351 = vst [vmem:[#allocation40_spill] sm:$0xff] %v2842_v2  ;;  %v1160_v48 = vsub.f32 %v1142_v44, %v2842_v2  ;;  %v2848_v61 = vmul.f32 0.33333334, %v453_v57  ;;  %v471_v9 = vmul.f32 %v417_v6, %v327_v8  ;;  %v534_v12 = vmul.f32 %v525_v43, %v417_v6 }
  0x7b   : > { %v2850_v16 = vmul.f32 0.33333334, %v570_v63  ;;  %v2852_v55 = vmul.f32 2.5, %v2365_v41  ;;  %v2854_v23 = vfloor.f32 %v1138_v25  ;;  %vm5059_vm10 = vcmp.eq.f32.partialorder %v2842_v2, 3.0 }
  0x7c   : > { %5352 = vst [vmem:[#allocation41_spill] sm:$0xff] %v2848_v61  ;;  %v1178_v19 = vadd.f32 1.0, %v1160_v48  ;;  %v1187_v20 = vadd.f32 2.0, %v1160_v48  ;;  %v1214_v37 = vmul.f32 %v1160_v48, %v1160_v48  ;;  %v498_v3 = vadd.f32 %v489_v7, %v471_v9 }
  0x7d   : > { %5353 = vst [vmem:[#allocation42_spill] sm:$0xff] %v2850_v16  ;;  %v543_v24 = vadd.f32 %v534_v12, %v516_v62  ;;  %v1196_v42 = vadd.f32 3.0, %v1160_v48  ;;  %v867_v44 = vsel %vm4915_vm3, %v2850_v16, 0.0  ;;  %vm4937_vm3 = vcmp.eq.f32.partialorder %v2842_v2, 2.0 }
  0x7e   : > { %v1205_v30 = vsub.f32 2.0, %v1178_v19  ;;  %v1241_v53 = vsub.f32 3.0, %v1178_v19  ;;  %v1277_v8 = vsub.f32 3.0, %v1187_v20  ;;  %v2859_v43 = vmul.f32 0.33333334, %v498_v3 }
  0x7f   : > { %v2861_v56 = vmul.f32 0.33333334, %v543_v24  ;;  %v1223_v57 = vmul.f32 0.5, %v1214_v37  ;;  %v1331_v60 = vsub.f32 4.0, %v1178_v19  ;;  %v1376_v63 = vsub.f32 4.0, %v1187_v20 }
  0x80   : > { %5354 = vst [vmem:[#allocation43_spill] sm:$0xff] %v2859_v43  ;;  %v1232_v41 = vmul.f32 %v1205_v30, %v1178_v19  ;;  %v1250_v6 = vmul.f32 %v1241_v53, %v1160_v48  ;;  %v1286_v7 = vmul.f32 %v1277_v8, %v1205_v30  ;;  %v1412_v9 = vsub.f32 4.0, %v1196_v42 }
  0x81   : > { %5355 = vst [vmem:[#allocation44_spill] sm:$0xff] %v2861_v56  ;;  %v876_v62 = vsel %vm4917_vm9, %v2861_v56, %v867_v44  ;;  %v1156_v12 = vsub.f32 %v1138_v25, %v2854_v23  ;;  %v1304_v53 = vmul.f32 %v1223_v57, %v1160_v48  ;;  %vm4938_vm2 = vcmp.eq.f32.partialorder %v2842_v2, 1.0 }
  0x82   : > { %v885_v37 = vsel %vm4965_vm11, %v2859_v43, %v876_v62  ;;  %v1259_v3 = vadd.f32 %v1250_v6, %v1232_v41  ;;  %v1295_v24 = vmul.f32 0.5, %v1286_v7  ;;  %v1340_v44 = vmul.f32 %v1331_v60, %v1223_v57 }
  0x83   : > { %v894_v30 = vsel %vm4936_vm7, %v2848_v61, %v885_v37  ;;  %vm1439_vm9 = vcmp.eq.f32.partialorder %v2842_v2, 0.0  ;;  %v1174_v42 = vadd.f32 1.0, %v1156_v12  ;;  %v1183_v8 = vadd.f32 2.0, %v1156_v12 }
  0x84   : > { %2140 = vmatpush1.msra.mxu1 %v894_v30  ;;  %v1268_v25 = vmul.f32 0.5, %v1259_v3  ;;  %v1367_v54 = vmul.f32 %v1295_v24, %v1187_v20  ;;  %v1421_v49 = vmul.f32 %v1412_v9, %v1295_v24  ;;  %v1210_v15 = vmul.f32 %v1156_v12, %v1156_v12 }
  0x85   : > { %v1192_v62 = vadd.f32 3.0, %v1156_v12  ;;  %v1201_v41 = vsub.f32 2.0, %v1174_v42  ;;  %v1237_v6 = vsub.f32 3.0, %v1174_v42  ;;  %v1273_v48 = vsub.f32 3.0, %v1183_v8 }
  0x86   : > { %v1322_v7 = vmul.f32 %v1268_v25, %v1178_v19  ;;  %v1385_v14 = vmul.f32 %v1376_v63, %v1268_v25  ;;  %v2877_v45 = vmul.f32 0.33333334, %v1421_v49  ;;  %v1327_v37 = vsub.f32 4.0, %v1174_v42  ;;  %v200_v63 = vld [vmem:[%s2610_s26] sm:$0xff] }
  0x87   : > { %v1219_v57 = vmul.f32 0.5, %v1210_v15  ;;  %v1228_v60 = vmul.f32 %v1201_v41, %v1174_v42  ;;  %v1246_v39 = vmul.f32 %v1237_v6, %v1156_v12  ;;  %v1282_v0 = vmul.f32 %v1273_v48, %v1201_v41 }
  0x88   : > { %5356 = vst [vmem:[#allocation45_spill] sm:$0xff] %v2877_v45  ;;  %v2879_v1 = vmul.f32 0.33333334, %v1304_v53  ;;  %v1349_v3 = vadd.f32 %v1340_v44, %v1322_v7  ;;  %v1394_v20 = vadd.f32 %v1385_v14, %v1367_v54  ;;  %v1372_v9 = vsub.f32 4.0, %v1183_v8 }
  0x89   : > { %v1538_v24 = vsel %vm5059_vm10, %v2877_v45, 0.0  ;;  %v1255_v30 = vadd.f32 %v1246_v39, %v1228_v60  ;;  %v1291_v19 = vmul.f32 0.5, %v1282_v0  ;;  %v1408_v59 = vsub.f32 4.0, %v1192_v62 }
  0x8a   : > { %5357 = vst [vmem:[#allocation46_spill] sm:$0xff] %v2879_v1  ;;  %v2885_v49 = vmul.f32 0.33333334, %v1349_v3  ;;  %v2887_v25 = vmul.f32 0.33333334, %v1394_v20  ;;  %v1300_v15 = vmul.f32 %v1219_v57, %v1156_v12  ;;  %v2890_v41 = vfloor.f32 %v2852_v55 }
  0x8b   : > { %v1264_v53 = vmul.f32 0.5, %v1255_v30  ;;  %v1336_v44 = vmul.f32 %v1327_v37, %v1219_v57  ;;  %v1363_v54 = vmul.f32 %v1291_v19, %v1183_v8  ;;  %v1417_v14 = vmul.f32 %v1408_v59, %v1291_v19 }
  0x8c   : > { %5358 = vst [vmem:[#allocation47_spill] sm:$0xff] %v2885_v49  ;;  %5359 = vst [vmem:[#allocation48_spill] sm:$0xff] %v2887_v25  ;;  %v1547_v6 = vsel %vm4937_vm3, %v2887_v25, %v1538_v24  ;;  %vm4939_vm7 = vcmp.eq.f32.partialorder %v2854_v23, 7.0  ;;  %v2361_v39 = vadd.f32 2.2, %v200_v63  ;;  %v312_v7 = vsub.f32 %v2852_v55, %v2890_v41 }
  0x8d   : > { %5360 = vst [vmem:[#allocation49_spill] sm:$0xff] %v2890_v41  ;;  %v1556_v0 = vsel %vm4938_vm2, %v2885_v49, %v1547_v6  ;;  %v1318_v62 = vmul.f32 %v1264_v53, %v1174_v42  ;;  %v1381_v12 = vmul.f32 %v1372_v9, %v1264_v53  ;;  %v2899_v48 = vmul.f32 0.33333334, %v1417_v14 }
  0x8e   : > { %v1565_v8 = vsel %vm1439_vm9, %v2879_v1, %v1556_v0  ;;  %v2904_v59 = vmul.f32 0.33333334, %v1300_v15  ;;  %vm4940_vm3 = vcmp.eq.f32.partialorder %v2854_v23, 6.0  ;;  %v330_v60 = vadd.f32 1.0, %v312_v7 }
  0x8f   : > { %5361 = vst [vmem:[#allocation50_spill] sm:$0xff] %v2899_v48  ;;  %2070 = vmatprep.subr.mxu0 %v1565_v8  ;;  %v1345_v37 = vadd.f32 %v1336_v44, %v1318_v62  ;;  %v1390_v57 = vadd.f32 %v1381_v12, %v1363_v54  ;;  %v1714_v42 = vsel %vm4939_vm7, %v2899_v48, 0.0  ;;  %v339_v3 = vadd.f32 2.0, %v312_v7 }
  0x90   : > { %5362 = vst [vmem:[#allocation51_spill] sm:$0xff] %v2904_v59  ;;  %v348_v20 = vadd.f32 3.0, %v312_v7  ;;  %v366_v9 = vmul.f32 %v312_v7, %v312_v7  ;;  %vm4941_vm9 = vcmp.eq.f32.partialorder %v2854_v23, 5.0  ;;  %v290_v55 = vmul.f32 2.5, %v2361_v39 }
  0x91   : > { %v2912_v24 = vmul.f32 0.33333334, %v1345_v37  ;;  %v2914_v30 = vmul.f32 0.33333334, %v1390_v57  ;;  %vm4942_vm2 = vcmp.eq.f32.partialorder %v2854_v23, 4.0  ;;  %v357_v19 = vsub.f32 2.0, %v330_v60 }
  0x92   : > { %v393_v63 = vsub.f32 3.0, %v330_v60  ;;  %v429_v15 = vsub.f32 3.0, %v339_v3  ;;  %v375_v44 = vmul.f32 0.5, %v366_v9  ;;  %v483_v54 = vsub.f32 4.0, %v330_v60  ;;  %v2930_v37 = vld [vmem:[%s2610_s26 + $0x38] sm:$0xff] }
  0x93   : > { %5363 = vst [vmem:[#allocation52_spill] sm:$0xff] %v2912_v24  ;;  %5364 = vst [vmem:[#allocation53_spill] sm:$0xff] %v2914_v30  ;;  %v1723_v53 = vsel %vm4940_vm3, %v2914_v30, %v1714_v42  ;;  %v564_v14 = vsub.f32 4.0, %v348_v20  ;;  %v384_v0 = vmul.f32 %v357_v19, %v330_v60  ;;  %v2927_v8 = vfloor.f32 %v290_v55  ;;  %v2935_v20 = vld [vmem:[%s2610_s26 + $0x88] sm:$0xff] }
  0x94   : > { %v1732_v6 = vsel %vm4941_vm9, %v2912_v24, %v1723_v53  ;;  %v402_v62 = vmul.f32 %v393_v63, %v312_v7  ;;  %v438_v39 = vmul.f32 %v429_v15, %v357_v19  ;;  %5366 = vst [vmem:[#allocation55_spill] sm:$0xff] %v2930_v37  ;;  %v528_v9 = vsub.f32 4.0, %v339_v3  ;;  %5367 = vst [vmem:[#allocation56_spill] sm:$0xff] %v2935_v20 }
  0x95   : > { %v1741_v12 = vsel %vm4942_vm2, %v2904_v59, %v1732_v6  ;;  %5365 = vst [vmem:[#allocation54_spill] sm:$0xff] %v2927_v8  ;;  %vm4967_vm7 = vcmp.eq.f32.partialorder %v2890_v41, 1.0  ;;  %vm4966_vm3 = vcmp.eq.f32.partialorder %v2890_v41, 2.0  ;;  %v456_v63 = vmul.f32 %v375_v44, %v312_v7 }
  0x96   : > { %2141 = vmatprep.subr.mxu1 %v1741_v12  ;;  %v411_v57 = vadd.f32 %v402_v62, %v384_v0  ;;  %v447_v42 = vmul.f32 0.5, %v438_v39  ;;  %v492_v19 = vmul.f32 %v483_v54, %v375_v44  ;;  %vm591_vm9 = vcmp.eq.f32.partialorder %v2890_v41, 0.0 }
  0x97   : > { %vm5058_vm2 = vcmp.eq.f32.partialorder %v2890_v41, 3.0  ;;  %v308_v15 = vsub.f32 %v290_v55, %v2927_v8  ;;  %v2391_v0 = vadd.f32 2.2, %v2930_v37  ;;  %v2396_v49 = vadd.f32 2.2, %v2935_v20 }
  0x98   : > { %v420_v53 = vmul.f32 0.5, %v411_v57  ;;  %v519_v6 = vmul.f32 %v447_v42, %v339_v3  ;;  %v573_v12 = vmul.f32 %v564_v14, %v447_v42  ;;  %v2944_v57 = vmul.f32 0.33333334, %v456_v63 }
  0x99   : > { %v326_v62 = vadd.f32 1.0, %v308_v15  ;;  %v335_v39 = vadd.f32 2.0, %v308_v15  ;;  %v362_v1 = vmul.f32 %v308_v15, %v308_v15  ;;  %v344_v54 = vadd.f32 3.0, %v308_v15 }
  0x9a   : > { %v474_v25 = vmul.f32 %v420_v53, %v330_v60  ;;  %v537_v7 = vmul.f32 %v528_v9, %v420_v53  ;;  %v2942_v44 = vmul.f32 0.33333334, %v573_v12  ;;  %5369 = vst [vmem:[#allocation58_spill] sm:$0xff] %v2944_v57  ;;  %v2950_v9 = vld [vmem:[%s2610_s26 + $0x30] sm:$0xff]  ;;  %vm4999_vm11 = vcmp.eq.f32.partialorder %v2927_v8, 4.0 }
  0x9b   : > { %v353_v45 = vsub.f32 2.0, %v326_v62  ;;  %v371_v2 = vmul.f32 0.5, %v362_v1  ;;  %v389_v59 = vsub.f32 3.0, %v326_v62  ;;  %v425_v55 = vsub.f32 3.0, %v335_v39  ;;  %5370 = vst [vmem:[#allocation59_spill] sm:$0xff] %v2950_v9 }
  0x9c   : > { %5368 = vst [vmem:[#allocation57_spill] sm:$0xff] %v2942_v44  ;;  %v501_v3 = vadd.f32 %v492_v19, %v474_v25  ;;  %v546_v14 = vadd.f32 %v537_v7, %v519_v6  ;;  %v479_v42 = vsub.f32 4.0, %v326_v62  ;;  %v690_v37 = vsel %vm5058_vm2, %v2942_v44, 0.0 }
  0x9d   : > { %v380_v20 = vmul.f32 %v353_v45, %v326_v62  ;;  %v398_v60 = vmul.f32 %v389_v59, %v308_v15  ;;  %v434_v24 = vmul.f32 %v425_v55, %v353_v45  ;;  %v452_v1 = vmul.f32 %v371_v2, %v308_v15 }
  0x9e   : > { %v2952_v53 = vmul.f32 0.33333334, %v501_v3  ;;  %v2954_v12 = vmul.f32 0.33333334, %v546_v14  ;;  %v488_v30 = vmul.f32 %v479_v42, %v371_v2  ;;  %v524_v25 = vsub.f32 4.0, %v335_v39 }
  0x9f   : > { %v407_v63 = vadd.f32 %v398_v60, %v380_v20  ;;  %v443_v35 = vmul.f32 0.5, %v434_v24  ;;  %v560_v19 = vsub.f32 4.0, %v344_v54  ;;  %v1141_v7 = vmul.f32 2.5, %v2391_v0 }
  0xa0   : > { %5371 = vst [vmem:[#allocation60_spill] sm:$0xff] %v2952_v53  ;;  %5372 = vst [vmem:[#allocation61_spill] sm:$0xff] %v2954_v12  ;;  %v699_v6 = vsel %vm4966_vm3, %v2954_v12, %v690_v37  ;;  %v1146_v44 = vmul.f32 2.5, %v2396_v49  ;;  %v2364_v45 = vadd.f32 2.2, %v2950_v9  ;;  %vm4998_vm3 = vcmp.eq.f32.partialorder %v2927_v8, 7.0 }
  0xa1   : > { %v708_v59 = vsel %vm4967_vm7, %v2952_v53, %v699_v6  ;;  %v416_v55 = vmul.f32 0.5, %v407_v63  ;;  %v515_v15 = vmul.f32 %v443_v35, %v335_v39  ;;  %v569_v2 = vmul.f32 %v560_v19, %v443_v35  ;;  %v2980_v39 = vld [vmem:[%s2610_s26 + $0x80] sm:$0xff] }
  0xa2   : > { %v717_v24 = vsel %vm591_vm9, %v2944_v57, %v708_v59  ;;  %v2968_v37 = vfloor.f32 %v1141_v7  ;;  %v2972_v54 = vfloor.f32 %v1146_v44  ;;  %v2974_v3 = vmul.f32 0.33333334, %v452_v1  ;;  %5376 = vst [vmem:[#allocation65_spill] sm:$0xff] %v2980_v39 }
  0xa3   : > { %2071 = vmatpush1.msra.mxu0 %v717_v24  ;;  %v470_v49 = vmul.f32 %v416_v55, %v326_v62  ;;  %v533_v20 = vmul.f32 %v524_v25, %v416_v55  ;;  %v2970_v0 = vmul.f32 0.33333334, %v569_v2  ;;  %vm5000_vm7 = vcmp.eq.f32.partialorder %v2927_v8, 5.0 }
  0xa4   : > { %5374 = vst [vmem:[#allocation63_spill] sm:$0xff] %v2972_v54  ;;  %5375 = vst [vmem:[#allocation64_spill] sm:$0xff] %v2974_v3  ;;  %vm5001_vm14 = vcmp.eq.f32.partialorder %v2927_v8, 6.0  ;;  %v1159_v35 = vsub.f32 %v1141_v7, %v2968_v37  ;;  %v2985_v60 = vmul.f32 2.5, %v2364_v45  ;;  %v1164_v7 = vsub.f32 %v1146_v44, %v2972_v54 }
  0xa5   : > { %5373 = vst [vmem:[#allocation62_spill] sm:$0xff] %v2970_v0  ;;  %v497_v14 = vadd.f32 %v488_v30, %v470_v49  ;;  %v542_v42 = vadd.f32 %v533_v20, %v515_v15  ;;  %v866_v62 = vsel %vm4998_vm3, %v2970_v0, 0.0  ;;  %v2369_v55 = vadd.f32 2.2, %v2980_v39 }
  0xa6   : > { %v1177_v63 = vadd.f32 1.0, %v1159_v35  ;;  %v1186_v25 = vadd.f32 2.0, %v1159_v35  ;;  %v1195_v1 = vadd.f32 3.0, %v1159_v35  ;;  %v1213_v19 = vmul.f32 %v1159_v35, %v1159_v35 }
  0xa7   : > { %v2987_v6 = vmul.f32 0.33333334, %v497_v14  ;;  %v2989_v59 = vmul.f32 0.33333334, %v542_v42  ;;  %vm5019_vm9 = vcmp.eq.f32.partialorder %v2968_v37, 3.0  ;;  %v1182_v12 = vadd.f32 1.0, %v1164_v7 }
  0xa8   : > { %v1204_v30 = vsub.f32 2.0, %v1177_v63  ;;  %v1222_v15 = vmul.f32 0.5, %v1213_v19  ;;  %v1240_v2 = vsub.f32 3.0, %v1177_v63  ;;  %v1276_v24 = vsub.f32 3.0, %v1186_v25 }
  0xa9   : > { %5377 = vst [vmem:[#allocation66_spill] sm:$0xff] %v2987_v6  ;;  %5378 = vst [vmem:[#allocation67_spill] sm:$0xff] %v2989_v59  ;;  %v875_v45 = vsel %vm5001_vm14, %v2989_v59, %v866_v62  ;;  %v1330_v49 = vsub.f32 4.0, %v1177_v63  ;;  %v1411_v20 = vsub.f32 4.0, %v1195_v1  ;;  %v1375_v53 = vsub.f32 4.0, %v1186_v25 }
  0xaa   : > { %v884_v14 = vsel %vm5000_vm7, %v2987_v6, %v875_v45  ;;  %v1231_v42 = vmul.f32 %v1204_v30, %v1177_v63  ;;  %v1249_v44 = vmul.f32 %v1240_v2, %v1159_v35  ;;  %v1285_v9 = vmul.f32 %v1276_v24, %v1204_v30 }
  0xab   : > { %v893_v19 = vsel %vm4999_vm11, %v2974_v3, %v884_v14  ;;  %v1303_v57 = vmul.f32 %v1222_v15, %v1159_v35  ;;  %v1339_v1 = vmul.f32 %v1330_v49, %v1222_v15  ;;  %v1191_v39 = vadd.f32 2.0, %v1164_v7 }
  0xac   : > { %2142 = vmatpush1.msra.mxu1 %v893_v19  ;;  %v1258_v62 = vadd.f32 %v1249_v44, %v1231_v42  ;;  %v1294_v41 = vmul.f32 0.5, %v1285_v9  ;;  %v1200_v59 = vadd.f32 3.0, %v1164_v7  ;;  %v1209_v0 = vsub.f32 2.0, %v1182_v12 }
  0xad   : > { %v1218_v17 = vmul.f32 %v1164_v7, %v1164_v7  ;;  %v1245_v48 = vsub.f32 3.0, %v1182_v12  ;;  %v1281_v30 = vsub.f32 3.0, %v1191_v39  ;;  %v1335_v14 = vsub.f32 4.0, %v1182_v12 }
  0xae   : > { %v1267_v45 = vmul.f32 0.5, %v1258_v62  ;;  %v1366_v6 = vmul.f32 %v1294_v41, %v1186_v25  ;;  %v1420_v2 = vmul.f32 %v1411_v20, %v1294_v41  ;;  %v1236_v28 = vmul.f32 %v1209_v0, %v1182_v12 }
  0xaf   : > { %v1227_v24 = vmul.f32 0.5, %v1218_v17  ;;  %v1254_v8 = vmul.f32 %v1245_v48, %v1164_v7  ;;  %v1290_v42 = vmul.f32 %v1281_v30, %v1209_v0  ;;  %vm5003_vm3 = vcmp.eq.f32.partialorder %v2968_v37, 1.0 }
  0xb0   : > { %v1321_v35 = vmul.f32 %v1267_v45, %v1177_v63  ;;  %v1384_v3 = vmul.f32 %v1375_v53, %v1267_v45  ;;  %v3003_v29 = vmul.f32 0.33333334, %v1420_v2  ;;  %vm5002_vm11 = vcmp.eq.f32.partialorder %v2968_v37, 2.0 }
  0xb1   : > { %v1263_v9 = vadd.f32 %v1254_v8, %v1236_v28  ;;  %v1380_v15 = vsub.f32 4.0, %v1191_v39  ;;  %v3007_v49 = vmul.f32 0.33333334, %v1303_v57  ;;  %v1299_v20 = vmul.f32 0.5, %v1290_v42 }
  0xb2   : > { %5379 = vst [vmem:[#allocation68_spill] sm:$0xff] %v3003_v29  ;;  %v1348_v25 = vadd.f32 %v1339_v1, %v1321_v35  ;;  %v1393_v41 = vadd.f32 %v1384_v3, %v1366_v6  ;;  %v1537_v17 = vsel %vm5019_vm9, %v3003_v29, 0.0  ;;  %v1344_v53 = vmul.f32 %v1335_v14, %v1227_v24 }
  0xb3   : > { %5380 = vst [vmem:[#allocation69_spill] sm:$0xff] %v3007_v49  ;;  %v1272_v48 = vmul.f32 0.5, %v1263_v9  ;;  %v1416_v63 = vsub.f32 4.0, %v1200_v59  ;;  %v1308_v19 = vmul.f32 %v1227_v24, %v1164_v7  ;;  %v1371_v62 = vmul.f32 %v1299_v20, %v1191_v39 }
  0xb4   : > { %v3012_v44 = vmul.f32 0.33333334, %v1348_v25  ;;  %v3014_v0 = vmul.f32 0.33333334, %v1393_v41  ;;  %vm1438_vm7 = vcmp.eq.f32.partialorder %v2968_v37, 0.0  ;;  %vm5004_vm14 = vcmp.eq.f32.partialorder %v2972_v54, 6.0 }
  0xb5   : > { %v1326_v28 = vmul.f32 %v1272_v48, %v1182_v12  ;;  %v1389_v8 = vmul.f32 %v1380_v15, %v1272_v48  ;;  %v1425_v57 = vmul.f32 %v1416_v63, %v1299_v20  ;;  %v3022_v6 = vfloor.f32 %v2985_v60 }
  0xb6   : > { %5381 = vst [vmem:[#allocation70_spill] sm:$0xff] %v3012_v44  ;;  %5382 = vst [vmem:[#allocation71_spill] sm:$0xff] %v3014_v0  ;;  %v1546_v3 = vsel %vm5002_vm11, %v3014_v0, %v1537_v17  ;;  %v298_v59 = vmul.f32 2.5, %v2369_v55  ;;  %v3030_v2 = vmul.f32 0.33333334, %v1308_v19  ;;  %vm5006_vm11 = vcmp.eq.f32.partialorder %v2972_v54, 5.0 }
  0xb7   : > { %5383 = vst [vmem:[#allocation72_spill] sm:$0xff] %v3022_v6  ;;  %v1555_v7 = vsel %vm5003_vm3, %v3012_v44, %v1546_v3  ;;  %v1353_v39 = vadd.f32 %v1344_v53, %v1326_v28  ;;  %v1398_v1 = vadd.f32 %v1389_v8, %v1371_v62  ;;  %v3027_v45 = vmul.f32 0.33333334, %v1425_v57 }
  0xb8   : > { %v1564_v12 = vsel %vm1438_vm7, %v3007_v49, %v1555_v7  ;;  %5385 = vst [vmem:[#allocation74_spill] sm:$0xff] %v3030_v2  ;;  %v311_v30 = vsub.f32 %v2985_v60, %v3022_v6  ;;  %vm5005_vm3 = vcmp.eq.f32.partialorder %v2972_v54, 4.0  ;;  %vm5007_vm7 = vcmp.eq.f32.partialorder %v2972_v54, 3.0 }
  0xb9   : > { %5384 = vst [vmem:[#allocation73_spill] sm:$0xff] %v3027_v45  ;;  %2072 = vmatprep.subr.mxu0 %v1564_v12  ;;  %v3035_v24 = vmul.f32 0.33333334, %v1353_v39  ;;  %v3037_v55 = vmul.f32 0.33333334, %v1398_v1  ;;  %v1677_v14 = vsel %vm5004_vm14, %v3027_v45, 0.0  ;;  %v3047_v25 = vfloor.f32 %v298_v59 }
  0xba   : > { %v329_v35 = vadd.f32 1.0, %v311_v30  ;;  %v338_v42 = vadd.f32 2.0, %v311_v30  ;;  %v365_v9 = vmul.f32 %v311_v30, %v311_v30  ;;  %v347_v15 = vadd.f32 3.0, %v311_v30 }
  0xbb   : > { %5386 = vst [vmem:[#allocation75_spill] sm:$0xff] %v3035_v24  ;;  %5387 = vst [vmem:[#allocation76_spill] sm:$0xff] %v3037_v55  ;;  %v1686_v60 = vsel %vm5006_vm11, %v3037_v55, %v1677_v14  ;;  %v316_v7 = vsub.f32 %v298_v59, %v3047_v25  ;;  %vm5021_vm14 = vcmp.eq.f32.partialorder %v3022_v6, 1.0  ;;  %vm5041_vm11 = vcmp.eq.f32.partialorder %v3022_v6, 3.0 }
  0xbc   : > { %5388 = vst [vmem:[#allocation77_spill] sm:$0xff] %v3047_v25  ;;  %v1695_v41 = vsel %vm5005_vm3, %v3035_v24, %v1686_v60  ;;  %v356_v20 = vsub.f32 2.0, %v329_v35  ;;  %v374_v17 = vmul.f32 0.5, %v365_v9  ;;  %v392_v48 = vsub.f32 3.0, %v329_v35 }
  0xbd   : > { %v1704_v53 = vsel %vm5007_vm7, %v3030_v2, %v1695_v41  ;;  %v428_v63 = vsub.f32 3.0, %v338_v42  ;;  %v482_v19 = vsub.f32 4.0, %v329_v35  ;;  %v563_v3 = vsub.f32 4.0, %v347_v15 }
  0xbe   : > { %2143 = vmatprep.subr.mxu1 %v1704_v53  ;;  %v383_v62 = vmul.f32 %v356_v20, %v329_v35  ;;  %v401_v28 = vmul.f32 %v392_v48, %v311_v30  ;;  %v455_v8 = vmul.f32 %v374_v17, %v311_v30  ;;  %v527_v1 = vsub.f32 4.0, %v338_v42 }
  0xbf   : > { %v437_v57 = vmul.f32 %v428_v63, %v356_v20  ;;  %vm5025_vm3 = vcmp.eq.f32.partialorder %v3022_v6, 2.0  ;;  %v491_v14 = vmul.f32 %v482_v19, %v374_v17  ;;  %vm590_vm7 = vcmp.eq.f32.partialorder %v3022_v6, 0.0 }
  0xc0   : > { %v410_v39 = vadd.f32 %v401_v28, %v383_v62  ;;  %v334_v9 = vadd.f32 1.0, %v316_v7  ;;  %v343_v60 = vadd.f32 2.0, %v316_v7  ;;  %vm5022_vm13 = vcmp.eq.f32.partialorder %v2622_v32, 1.0 }
  0xc1   : > { %v446_v12 = vmul.f32 0.5, %v437_v57  ;;  %v3061_v15 = vmul.f32 0.33333334, %v455_v8  ;;  %v352_v59 = vadd.f32 3.0, %v316_v7  ;;  %v370_v41 = vmul.f32 %v316_v7, %v316_v7 }
  0xc2   : > { %v419_v30 = vmul.f32 0.5, %v410_v39  ;;  %vm1437_vm15 = vcmp.eq.f32.partialorder %v2622_v32, 0.0  ;;  %v361_v53 = vsub.f32 2.0, %v334_v9  ;;  %v397_v63 = vsub.f32 3.0, %v334_v9 }
  0xc3   : > { %5389 = vst [vmem:[#allocation78_spill] sm:$0xff] %v3061_v15  ;;  %v518_v20 = vmul.f32 %v446_v12, %v338_v42  ;;  %v572_v48 = vmul.f32 %v563_v3, %v446_v12  ;;  %vm5024_vm4 = vcmp.eq.f32.partialorder %v3047_v25, 6.0  ;;  %v379_v62 = vmul.f32 0.5, %v370_v41  ;;  %v3069_v42 = vld [vmem:[%s2610_s26 + $0x78] sm:$0xff] }
  0xc4   : > { %v473_v17 = vmul.f32 %v419_v30, %v329_v35  ;;  %v536_v19 = vmul.f32 %v527_v1, %v419_v30  ;;  %v433_v28 = vsub.f32 3.0, %v343_v60  ;;  %v388_v39 = vmul.f32 %v361_v53, %v334_v9 }
  0xc5   : > { %v3065_v57 = vmul.f32 0.33333334, %v572_v48  ;;  %v406_v8 = vmul.f32 %v397_v63, %v316_v7  ;;  %v487_v2 = vsub.f32 4.0, %v334_v9  ;;  %vm5023_vm9 = vcmp.eq.f32.partialorder %v2622_v32, 2.0 }
  0xc6   : > { %v500_v24 = vadd.f32 %v491_v14, %v473_v17  ;;  %v545_v55 = vadd.f32 %v536_v19, %v518_v20  ;;  %v442_v45 = vmul.f32 %v433_v28, %v361_v53  ;;  %v460_v1 = vmul.f32 %v379_v62, %v316_v7 }
  0xc7   : > { %5390 = vst [vmem:[#allocation79_spill] sm:$0xff] %v3065_v57  ;;  %v689_v3 = vsel %vm5041_vm11, %v3065_v57, 0.0  ;;  %v415_v35 = vadd.f32 %v406_v8, %v388_v39  ;;  %v532_v12 = vsub.f32 4.0, %v343_v60  ;;  %v568_v63 = vsub.f32 4.0, %v352_v59 }
  0xc8   : > { %v3074_v30 = vmul.f32 0.33333334, %v500_v24  ;;  %v3076_v41 = vmul.f32 0.33333334, %v545_v55  ;;  %v451_v48 = vmul.f32 0.5, %v442_v45  ;;  %v496_v20 = vmul.f32 %v487_v2, %v379_v62 }
  0xc9   : > { %v424_v14 = vmul.f32 0.5, %v415_v35  ;;  %vm5040_vm6 = vcmp.eq.f32.partialorder %v2622_v32, 3.0  ;;  %v2395_v53 = vadd.f32 2.2, %v3069_v42  ;;  %v3103_v35 = vmul.f32 0.33333334, %v460_v1 }
  0xca   : > { %5391 = vst [vmem:[#allocation80_spill] sm:$0xff] %v3074_v30  ;;  %5392 = vst [vmem:[#allocation81_spill] sm:$0xff] %v3076_v41  ;;  %v698_v17 = vsel %vm5025_vm3, %v3076_v41, %v689_v3  ;;  %v523_v19 = vmul.f32 %v451_v48, %v343_v60  ;;  %v577_v28 = vmul.f32 %v568_v63, %v451_v48  ;;  %v1536_v24 = vsel %vm5040_vm6, %v2659_v27, 0.0  ;;  %v3112_v63 = vld [vmem:[%s2610_s26 + $0x70] sm:$0xff] }
  0xcb   : > { %v707_v45 = vsel %vm5021_vm14, %v3074_v30, %v698_v17  ;;  %v478_v55 = vmul.f32 %v424_v14, %v334_v9  ;;  %v541_v2 = vmul.f32 %v532_v12, %v424_v14  ;;  %v1545_v7 = vsel %vm5023_vm9, %v2671_v52, %v1536_v24  ;;  %5394 = vst [vmem:[#allocation83_spill] sm:$0xff] %v3103_v35 }
  0xcc   : > { %v716_v60 = vsel %vm590_vm7, %v3061_v15, %v707_v45  ;;  %v3095_v59 = vmul.f32 0.33333334, %v577_v28  ;;  %v1554_v62 = vsel %vm5022_vm13, %v2669_v51, %v1545_v7  ;;  %v1145_v39 = vmul.f32 2.5, %v2395_v53 }
  0xcd   : > { %2073 = vmatpush1.msra.mxu0 %v716_v60  ;;  %v505_v8 = vadd.f32 %v496_v20, %v478_v55  ;;  %v550_v9 = vadd.f32 %v541_v2, %v523_v19  ;;  %v1563_v3 = vsel %vm1437_vm15, %v2667_v50, %v1554_v62  ;;  %vm5038_vm14 = vcmp.eq.f32.partialorder %v3047_v25, 5.0 }
  0xce   : > { %5393 = vst [vmem:[#allocation82_spill] sm:$0xff] %v3095_v59  ;;  %v829_v12 = vsel %vm5024_vm4, %v3095_v59, 0.0  ;;  %2074 = vmatprep.subr.mxu0 %v1563_v3  ;;  %v3109_v48 = vfloor.f32 %v1145_v39  ;;  %vm5037_vm7 = vcmp.eq.f32.partialorder %v3047_v25, 4.0  ;;  %vm5039_vm15 = vcmp.eq.f32.partialorder %v2700_v13, 3.0 }
  0xcf   : > { %v3114_v14 = vmul.f32 0.33333334, %v505_v8  ;;  %v3116_v20 = vmul.f32 0.33333334, %v550_v9  ;;  %vm5036_vm13 = vcmp.eq.f32.partialorder %v3047_v25, 3.0  ;;  %vm589_vm9 = vcmp.eq.f32.partialorder %v2700_v13, 0.0 }
  0xd0   : > { %5395 = vst [vmem:[#allocation84_spill] sm:$0xff] %v3109_v48  ;;  %v1163_v1 = vsub.f32 %v1145_v39, %v3109_v48  ;;  %vm5034_vm4 = vcmp.eq.f32.partialorder %v2700_v13, 2.0  ;;  %vm5035_vm3 = vcmp.eq.f32.partialorder %v2700_v13, 1.0  ;;  %v688_v17 = vsel %vm5039_vm15, %v2739_v40, 0.0 }
  0xd1   : > { %5396 = vst [vmem:[#allocation85_spill] sm:$0xff] %v3114_v14  ;;  %5397 = vst [vmem:[#allocation86_spill] sm:$0xff] %v3116_v20  ;;  %v838_v53 = vsel %vm5038_vm14, %v3116_v20, %v829_v12  ;;  %v2368_v19 = vadd.f32 2.2, %v3112_v63  ;;  %v697_v60 = vsel %vm5034_vm4, %v2749_v46, %v688_v17  ;;  %v3150_v17 = vsel %vm5056_vm5, %v2659_v27, 0.0 }
  0xd2   : > { %v847_v28 = vsel %vm5037_vm7, %v3114_v14, %v838_v53  ;;  %v1181_v24 = vadd.f32 1.0, %v1163_v1  ;;  %v1190_v45 = vadd.f32 2.0, %v1163_v1  ;;  %v1199_v55 = vadd.f32 3.0, %v1163_v1  ;;  %5398 = vst [vmem:[#allocation87_spill] sm:$0xff] %v3150_v17 }
  0xd3   : > { %v856_v2 = vsel %vm5036_vm13, %v3103_v35, %v847_v28  ;;  %v1217_v7 = vmul.f32 %v1163_v1, %v1163_v1  ;;  %v297_v62 = vmul.f32 2.5, %v2368_v19  ;;  %v706_v14 = vsel %vm5035_vm3, %v2747_v47, %v697_v60 }
  0xd4   : > { %2144 = vmatpush1.msra.mxu1 %v856_v2  ;;  %v1208_v39 = vsub.f32 2.0, %v1181_v24  ;;  %v1244_v8 = vsub.f32 3.0, %v1181_v24  ;;  %v1280_v9 = vsub.f32 3.0, %v1190_v45  ;;  %v1334_v12 = vsub.f32 4.0, %v1181_v24 }
  0xd5   : > { %v1226_v3 = vmul.f32 0.5, %v1217_v7  ;;  %v1415_v53 = vsub.f32 4.0, %v1199_v55  ;;  %v715_v35 = vsel %vm589_vm9, %v2742_v26, %v706_v14  ;;  %vm5061_vm4 = vcmp.eq.f32.partialorder %v3109_v48, 5.0 }
  0xd6   : > { %v1235_v20 = vmul.f32 %v1208_v39, %v1181_v24  ;;  %v1253_v59 = vmul.f32 %v1244_v8, %v1163_v1  ;;  %v1289_v28 = vmul.f32 %v1280_v9, %v1208_v39  ;;  %2075 = vmatpush1.msra.mxu0 %v715_v35  ;;  %v3153_v55 = vfloor.f32 %v297_v62 }
  0xd7   : > { %v1307_v19 = vmul.f32 %v1226_v3, %v1163_v1  ;;  %v1379_v60 = vsub.f32 4.0, %v1190_v45  ;;  %vm1478_vm3 = vcmp.eq.f32.partialorder %v3109_v48, 4.0  ;;  %vm5057_vm13 = vcmp.eq.f32.partialorder %v3109_v48, 6.0 }
  0xd8   : > { %v1262_v2 = vadd.f32 %v1253_v59, %v1235_v20  ;;  %v1298_v7 = vmul.f32 0.5, %v1289_v28  ;;  %v1343_v39 = vmul.f32 %v1334_v12, %v1226_v3  ;;  %vm5064_vm9 = vcmp.eq.f32.partialorder %v3109_v48, 3.0 }
  0xd9   : > { %v315_v14 = vsub.f32 %v297_v62, %v3153_v55  ;;  %vm5063_vm7 = vcmp.eq.f32.partialorder %v2717_v22, 2.0  ;;  %vm5062_vm14 = vcmp.eq.f32.partialorder %v2717_v22, 3.0  ;;  %v3161_v35 = vmul.f32 0.33333334, %v1307_v19 }
  0xda   : > { %v1271_v1 = vmul.f32 0.5, %v1262_v2  ;;  %v1370_v8 = vmul.f32 %v1298_v7, %v1190_v45  ;;  %v1424_v59 = vmul.f32 %v1415_v53, %v1298_v7  ;;  %vm5065_vm15 = vcmp.eq.f32.partialorder %v2717_v22, 1.0 }
  0xdb   : > { %5399 = vst [vmem:[#allocation88_spill] sm:$0xff] %v3161_v35  ;;  %v333_v20 = vadd.f32 1.0, %v315_v14  ;;  %v342_v9 = vadd.f32 2.0, %v315_v14  ;;  %v351_v28 = vadd.f32 3.0, %v315_v14  ;;  %v369_v17 = vmul.f32 %v315_v14, %v315_v14 }
  0xdc   : > { %vm1436_vm6 = vcmp.eq.f32.partialorder %v2717_v22, 0.0  ;;  %v1325_v3 = vmul.f32 %v1271_v1, %v1181_v24  ;;  %v1388_v12 = vmul.f32 %v1379_v60, %v1271_v1  ;;  %v3165_v62 = vmul.f32 0.33333334, %v1424_v59 }
  0xdd   : > { %vm5067_vm11 = vcmp.eq.f32.partialorder %v3153_v55, 6.0  ;;  %v360_v25 = vsub.f32 2.0, %v333_v20  ;;  %v378_v2 = vmul.f32 0.5, %v369_v17  ;;  %v396_v19 = vsub.f32 3.0, %v333_v20 }
  0xde   : > { %v432_v54 = vsub.f32 3.0, %v342_v9  ;;  %v1352_v45 = vadd.f32 %v1343_v39, %v1325_v3  ;;  %v1397_v53 = vadd.f32 %v1388_v12, %v1370_v8  ;;  %v1676_v7 = vsel %vm5057_vm13, %v3165_v62, 0.0 }
  0xdf   : > { %v486_v26 = vsub.f32 4.0, %v333_v20  ;;  %v387_v47 = vmul.f32 %v360_v25, %v333_v20  ;;  %v405_v46 = vmul.f32 %v396_v19, %v315_v14  ;;  %v459_v24 = vmul.f32 %v378_v2, %v315_v14 }
  0xe0   : > { %v441_v50 = vmul.f32 %v432_v54, %v360_v25  ;;  %v3171_v60 = vmul.f32 0.33333334, %v1352_v45  ;;  %v3173_v1 = vmul.f32 0.33333334, %v1397_v53  ;;  %v531_v15 = vsub.f32 4.0, %v342_v9 }
  0xe1   : > { %v495_v59 = vmul.f32 %v486_v26, %v378_v2  ;;  %vm5200_vm5 = vcmp.eq.f32.partialorder %v3153_v55, 5.0  ;;  %v414_v17 = vadd.f32 %v405_v46, %v387_v47  ;;  %v3176_v8 = vmul.f32 0.33333334, %v459_v24 }
  0xe2   : > { %5400 = vst [vmem:[#allocation89_spill] sm:$0xff] %v3171_v60  ;;  %5401 = vst [vmem:[#allocation90_spill] sm:$0xff] %v3173_v1  ;;  %v450_v39 = vmul.f32 0.5, %v441_v50  ;;  %v567_v3 = vsub.f32 4.0, %v351_v28  ;;  %vm5174_vm13 = vcmp.eq.f32.partialorder %v3153_v55, 4.0  ;;  %v1685_v54 = vsel %vm5061_vm4, %v3173_v1, %v1676_v7 }
  0xe3   : > { %5402 = vst [vmem:[#allocation91_spill] sm:$0xff] %v3176_v8  ;;  %vm5169_vm2 = vcmp.eq.f32.partialorder %v3153_v55, 3.0  ;;  %v1535_v26 = vsel %vm5062_vm14, %v2790_v58, 0.0  ;;  %vm5068_vm10 = vcmp.eq.f32.partialorder %v2620_v31, 4.0  ;;  %vm5069_vm1 = vcmp.eq.f32.partialorder %v2620_v31, 5.0 }
  0xe4   : > { %v1694_v50 = vsel %vm1478_vm3, %v3171_v60, %v1685_v54  ;;  %v423_v47 = vmul.f32 0.5, %v414_v17  ;;  %v522_v46 = vmul.f32 %v450_v39, %v342_v9  ;;  %v576_v25 = vmul.f32 %v567_v3, %v450_v39 }
  0xe5   : > { %v1703_v14 = vsel %vm5064_vm9, %v3161_v35, %v1694_v50  ;;  %v1544_v28 = vsel %vm5063_vm7, %v2800_v11, %v1535_v26  ;;  %vm5066_vm4 = vcmp.eq.f32.partialorder %v2620_v31, 6.0  ;;  %vm588_vm14 = vcmp.eq.f32.partialorder %v2802_v21, 0.0  ;;  %v1895_v50 = vld [vmem:[%s4900_s1 + $0x8] sm:$0xff] }
  0xe6   : > { %2145 = vmatprep.subr.mxu1 %v1703_v14  ;;  %v477_v12 = vmul.f32 %v423_v47, %v333_v20  ;;  %v540_v2 = vmul.f32 %v531_v15, %v423_v47  ;;  %v3199_v19 = vmul.f32 0.33333334, %v576_v25  ;;  %v1553_v9 = vsel %vm5065_vm15, %v2798_v10, %v1544_v28  ;;  %2130 = vmatprep.mubr.f32.mxu0 %v1895_v50  ;;  %v1897_v14 = vld [vmem:[%s4900_s1 + $0x18] sm:$0xff] }
  0xe7   : > { %v1562_v45 = vsel %vm1436_vm6, %v2793_v5, %v1553_v9  ;;  %v1675_v53 = vsel %vm5066_vm4, %v2645_v18, 0.0  ;;  %vm5071_vm7 = vcmp.eq.f32.partialorder %v2802_v21, 1.0  ;;  %vm5070_vm9 = vcmp.eq.f32.partialorder %v2802_v21, 2.0  ;;  %2201 = vmatprep.mubr.f32.mxu1 %v1897_v14 }
  0xe8   : > { %5403 = vst [vmem:[#allocation92_spill] sm:$0xff] %v3199_v19  ;;  %v504_v20 = vadd.f32 %v495_v59, %v477_v12  ;;  %v549_v15 = vadd.f32 %v540_v2, %v522_v46  ;;  %v828_v7 = vsel %vm5067_vm11, %v3199_v19, 0.0  ;;  %2076 = vmatprep.subr.mxu0 %v1562_v45  ;;  %v1684_v24 = vsel %vm5069_vm1, %v2657_v34, %v1675_v53  ;;  %v5406_v2 = vld [vmem:[#allocation21_spill] sm:$0xff]  ;;  %v5407_v53 = vld [vmem:[#allocation20_spill] sm:$0xff] }
  0xe9   : > { %v1693_v17 = vsel %vm5068_vm10, %v2655_v33, %v1684_v24  ;;  %vm615_vm6 = vcmp.eq.f32.partialorder %v2802_v21, 3.0  ;;  %vm5074_vm15 = vcmp.eq.f32.partialorder %v2632_v38, 4.0  ;;  %vm5213_vm4 = vcmp.eq.f32.partialorder %v2632_v38, 5.0  ;;  %v5409_v24 = vld [vmem:[#allocation18_spill] sm:$0xff]  ;;  %v5425_v33 = vld [vmem:[#allocation40_spill] sm:$0xff]  ;;  %v5431_v34 = vld [vmem:[#allocation49_spill] sm:$0xff] }
  0xea   : > { %v3224_v59 = vmul.f32 0.33333334, %v504_v20  ;;  %v3226_v39 = vmul.f32 0.33333334, %v549_v15  ;;  %v1702_v3 = vsel %vm5073_vm0, %v2641_v4, %v1693_v17  ;;  %v687_v54 = vsel %vm615_vm6, %v2850_v16, 0.0  ;;  %v5408_v15 = vld [vmem:[#allocation50_spill] sm:$0xff] }
  0xeb   : > { %v696_v26 = vsel %vm5070_vm9, %v2861_v56, %v687_v54  ;;  %vm5072_vm11 = vcmp.eq.f32.partialorder %v2632_v38, 6.0  ;;  %vm1435_vm10 = vcmp.eq.f32.partialorder %v2854_v23, 0.0  ;;  %vm5077_vm1 = vcmp.eq.f32.partialorder %v2854_v23, 1.0  ;;  %v5410_v17 = vld [vmem:[#allocation15_spill] sm:$0xff]  ;;  %v5424_v4 = vld [vmem:[#allocation37_spill] sm:$0xff] }
  0xec   : > { %5404 = vst [vmem:[#allocation93_spill] sm:$0xff] %v3224_v59  ;;  %5405 = vst [vmem:[#allocation94_spill] sm:$0xff] %v3226_v39  ;;  %v837_v47 = vsel %vm5200_vm5, %v3226_v39, %v828_v7  ;;  %v705_v46 = vsel %vm5071_vm7, %v2859_v43, %v696_v26  ;;  %v827_v25 = vsel %vm5072_vm11, %v2704_v36, 0.0  ;;  %vm5076_vm9 = vcmp.eq.f32.partialorder %v2854_v23, 2.0  ;;  %v5411_v26 = vld [vmem:[#allocation53_spill] sm:$0xff] }
  0xed   : > { %v846_v28 = vsel %vm5174_vm13, %v3224_v59, %v837_v47  ;;  %v714_v12 = vsel %vm588_vm14, %v2848_v61, %v705_v46  ;;  %v836_v9 = vsel %vm5213_vm4, %v5406_v2, %v827_v25  ;;  %vm5210_vm7 = vcmp.eq.f32.partialorder %v2854_v23, 3.0  ;;  %v5412_v47 = vld [vmem:[#allocation52_spill] sm:$0xff]  ;;  %v5430_v38 = vld [vmem:[#allocation65_spill] sm:$0xff] }
  0xee   : > { %v855_v45 = vsel %vm5169_vm2, %v3176_v8, %v846_v28  ;;  %2077 = vmatpush1.msra.mxu0 %v714_v12  ;;  %v845_v20 = vsel %vm5074_vm15, %v5407_v53, %v836_v9  ;;  %v1534_v7 = vsel %vm5210_vm7, %v5408_v15, 0.0  ;;  %vm5084_vm14 = vcmp.eq.f32.partialorder %v5409_v24, 4.0  ;;  %v5413_v25 = vld [vmem:[#allocation28_spill] sm:$0xff]  ;;  %v5414_v28 = vld [vmem:[#allocation54_spill] sm:$0xff]  ;;  %v5415_v12 = vld [vmem:[#allocation51_spill] sm:$0xff] }
  0xef   : > { %2146 = vmatpush1.msra.mxu1 %v855_v45  ;;  %v854_v54 = vsel %vm5075_vm8, %v5410_v17, %v845_v20  ;;  %v1543_v50 = vsel %vm5076_vm9, %v5411_v26, %v1534_v7  ;;  %vm5079_vm11 = vcmp.eq.f32.partialorder %v5409_v24, 5.0  ;;  %vm5078_vm0 = vcmp.eq.f32.partialorder %v5409_v24, 6.0  ;;  %v5416_v45 = vld [vmem:[#allocation30_spill] sm:$0xff]  ;;  %v5417_v20 = vld [vmem:[#allocation29_spill] sm:$0xff]  ;;  %v5422_v17 = vld [vmem:[#allocation56_spill] sm:$0xff] }
  0xf0   : > { %2147 = vmatprep.subr.mxu1 %v1702_v3  ;;  %v1552_v46 = vsel %vm5077_vm1, %v5412_v47, %v1543_v50  ;;  %v1674_v14 = vsel %vm5078_vm0, %v5413_v25, 0.0  ;;  %vm587_vm15 = vcmp.eq.f32.partialorder %v5414_v28, 0.0  ;;  %vm5094_vm8 = vcmp.eq.f32.partialorder %v5414_v28, 1.0  ;;  %v5418_v50 = vld [vmem:[#allocation62_spill] sm:$0xff] }
  0xf1   : > { %2148 = vmatpush1.msra.mxu1 %v854_v54  ;;  %v1561_v9 = vsel %vm1435_vm10, %v5415_v12, %v1552_v46  ;;  %v1683_v3 = vsel %vm5079_vm11, %v5416_v45, %v1674_v14  ;;  %vm5086_vm9 = vcmp.eq.f32.partialorder %v5414_v28, 2.0  ;;  %vm5140_vm1 = vcmp.eq.f32.partialorder %v5414_v28, 3.0  ;;  %v5419_v25 = vld [vmem:[#allocation22_spill] sm:$0xff]  ;;  %v5420_v46 = vld [vmem:[#allocation27_spill] sm:$0xff] }
  0xf2   : > { %2078 = vmatprep.subr.mxu0 %v1561_v9  ;;  %v1692_v7 = vsel %vm5084_vm14, %v5417_v20, %v1683_v3  ;;  %v686_v54 = vsel %vm5140_vm1, %v5418_v50, 0.0  ;;  %vm5096_vm0 = vcmp.eq.f32.partialorder %v5419_v25, 4.0  ;;  %vm637_vm10 = vcmp.eq.f32.partialorder %v5419_v25, 5.0  ;;  %v5421_v45 = vld [vmem:[#allocation67_spill] sm:$0xff]  ;;  %v5423_v20 = vld [vmem:[#allocation66_spill] sm:$0xff] }
  0xf3   : > { %v1701_v14 = vsel %vm5085_vm12, %v5420_v46, %v1692_v7  ;;  %v695_v9 = vsel %vm5086_vm9, %v5421_v45, %v686_v54  ;;  %vm5095_vm11 = vcmp.eq.f32.partialorder %v5419_v25, 6.0  ;;  %v2387_v3 = vmul.f32 -1.442695, %v5422_v17  ;;  %v5426_v7 = vld [vmem:[#allocation64_spill] sm:$0xff]  ;;  %v5427_v46 = vld [vmem:[#allocation39_spill] sm:$0xff] }
  0xf4   : > { %2149 = vmatprep.subr.mxu1 %v1701_v14  ;;  %v704_v53 = vsel %vm5094_vm8, %v5423_v20, %v695_v9  ;;  %v826_v2 = vsel %vm5095_vm11, %v5424_v4, 0.0  ;;  %vm5099_vm14 = vcmp.eq.f32.partialorder %v5425_v33, 4.0  ;;  %vm5102_vm12 = vcmp.eq.f32.partialorder %v5425_v33, 5.0  ;;  %v5428_v14 = vld [vmem:[#allocation38_spill] sm:$0xff]  ;;  %v5429_v4 = vld [vmem:[#allocation45_spill] sm:$0xff] }
  0xf5   : > { %v713_v54 = vsel %vm587_vm15, %v5426_v7, %v704_v53  ;;  %v835_v17 = vsel %vm637_vm10, %v5427_v46, %v826_v2  ;;  %2427 = vpow2.f32 %v2387_v3  ;;  %vm5098_vm9 = vcmp.eq.f32.partialorder %v5425_v33, 6.0  ;;  %v5432_v53 = vld [vmem:[#allocation36_spill] sm:$0xff] }
  0xf6   : > { %2079 = vmatpush1.msra.mxu0 %v713_v54  ;;  %v844_v9 = vsel %vm5096_vm0, %v5428_v14, %v835_v17  ;;  %v1673_v24 = vsel %vm5098_vm9, %v5429_v4, 0.0  ;;  %v2360_v36 = vmul.f32 -1.442695, %v5430_v38  ;;  %vm5103_vm15 = vcmp.eq.f32.partialorder %v5431_v34, 4.0  ;;  %v5434_v3 = vld [vmem:[#allocation48_spill] sm:$0xff]  ;;  %v5435_v17 = vld [vmem:[#allocation47_spill] sm:$0xff] }
  0xf7   : > { %vm5433_vm8 = vcmp.eq.f32.partialorder %v5419_v25, 3.0  ;;  %v1682_v54 = vsel %vm5102_vm12, %v5434_v3, %v1673_v24  ;;  %vm5101_vm11 = vcmp.eq.f32.partialorder %v5431_v34, 5.0  ;;  %vm5100_vm0 = vcmp.eq.f32.partialorder %v5431_v34, 6.0  ;;  %v5436_v14 = vld [vmem:[#allocation57_spill] sm:$0xff] }
  0xf8   : > { %v853_v2 = vsel %vm5433_vm8, %v5432_v53, %v844_v9  ;;  %v1691_v4 = vsel %vm5099_vm14, %v5435_v17, %v1682_v54  ;;  %2429 = vpow2.f32 %v2360_v36  ;;  %v825_v46 = vsel %vm5100_vm0, %v5436_v14, 0.0  ;;  %v5437_v53 = vld [vmem:[#allocation46_spill] sm:$0xff]  ;;  %v5439_v3 = vld [vmem:[#allocation61_spill] sm:$0xff]  ;;  %v5440_v36 = vld [vmem:[#allocation60_spill] sm:$0xff] }
  0xf9   : > { %2150 = vmatpush1.msra.mxu1 %v853_v2  ;;  %v2386_v9 = vmul.f32 -1.442695, %v3069_v42  ;;  %vm5438_vm8 = vcmp.eq.f32.partialorder %v5425_v33, 3.0  ;;  %v834_v25 = vsel %vm5101_vm11, %v5439_v3, %v825_v46  ;;  %vm5187_vm9 = vcmp.eq.f32.partialorder %v2968_v37, 4.0  ;;  %v5441_v54 = vld [vmem:[#allocation58_spill] sm:$0xff] }
  0xfa   : > { %v1700_v24 = vsel %vm5438_vm8, %v5437_v53, %v1691_v4  ;;  %vm1483_vm14 = vcmp.eq.f32.partialorder %v2968_v37, 5.0  ;;  %v843_v2 = vsel %vm5103_vm15, %v5440_v36, %v834_v25  ;;  %vm5106_vm0 = vcmp.eq.f32.partialorder %v2968_v37, 6.0 }
  0xfb   : > { %2151 = vmatprep.subr.mxu1 %v1700_v24  ;;  %2431 = vpow2.f32 %v2386_v9  ;;  %v2359_v4 = vmul.f32 -1.442695, %v3112_v63  ;;  %vm5442_vm8 = vcmp.eq.f32.partialorder %v5431_v34, 3.0  ;;  %v1672_v3 = vsel %vm5106_vm0, %v3003_v29, 0.0  ;;  %v3380_v9 = vld [vmem:[%s2610_s26 + $0x68] sm:$0xff] }
  0xfc   : > { %v852_v46 = vsel %vm5442_vm8, %v5441_v54, %v843_v2  ;;  %vm5119_vm11 = vcmp.eq.f32.partialorder %v3022_v6, 4.0  ;;  %vm5116_vm12 = vcmp.eq.f32.partialorder %v3022_v6, 5.0  ;;  %v1681_v25 = vsel %vm1483_vm14, %v3014_v0, %v1672_v3 }
  0xfd   : > { %2152 = vmatpush1.msra.mxu1 %v852_v46  ;;  %2433 = vpow2.f32 %v2359_v4  ;;  %vm5109_vm15 = vcmp.eq.f32.partialorder %v3022_v6, 6.0  ;;  %v2385_v24 = vmul.f32 -1.442695, %v3380_v9  ;;  %v1690_v2 = vsel %vm5187_vm9, %v3012_v44, %v1681_v25  ;;  %v3393_v4 = vld [vmem:[%s2610_s26 + $0x60] sm:$0xff] }
  0xfe   : > { %v824_v29 = vsel %vm5109_vm15, %v3065_v57, 0.0  ;;  %vm5443_vm8 = vcmp.eq.f32.partialorder %v2622_v32, 6.0  ;;  %v2358_v46 = vmul.f32 -1.442695, %v3393_v4  ;;  %vm5444_vm0 = vcmp.eq.f32.partialorder %v2968_v37, 3.0 }
  0xff   : > { %v1671_v3 = vsel %vm5443_vm8, %v2659_v27, 0.0  ;;  %v1699_v0 = vsel %vm5444_vm0, %v3007_v49, %v1690_v2  ;;  %v833_v25 = vsel %vm5116_vm12, %v3076_v41, %v824_v29  ;;  %2435 = vpow2.f32 %v2385_v24  ;;  %v5448_v2 = vld [vmem:[#allocation78_spill] sm:$0xff]  ;;  %v5450_v41 = vld [vmem:[#allocation12_spill] sm:$0xff] }
 0x100   : > { %vm5445_vm15 = vcmp.eq.f32.partialorder %v2622_v32, 5.0  ;;  %2153 = vmatprep.subr.mxu1 %v1699_v0  ;;  %v842_v27 = vsel %vm5119_vm11, %v3074_v30, %v833_v25  ;;  %vm5446_vm8 = vcmp.eq.f32.partialorder %v2622_v32, 4.0  ;;  %2437 = vpow2.f32 %v2358_v46  ;;  %v5454_v46 = vld [vmem:[#allocation25_spill] sm:$0xff] }
 0x101   : > { %v1680_v44 = vsel %vm5445_vm15, %v2671_v52, %v1671_v3  ;;  %vm5447_vm0 = vcmp.eq.f32.partialorder %v2700_v13, 6.0  ;;  %vm5449_vm12 = vcmp.eq.f32.partialorder %v3022_v6, 3.0  ;;  %vm5451_vm15 = vcmp.eq.f32.partialorder %v2622_v32, 3.0  ;;  %v5452_v3 = vld [vmem:[#allocation26_spill] sm:$0xff]  ;;  %v3424_v52 = vld [vmem:[%s2610_s26 + $0x58] sm:$0xff] }
 0x102   : > { %v1689_v57 = vsel %vm5446_vm8, %v2669_v51, %v1680_v44  ;;  %v823_v29 = vsel %vm5447_vm0, %v2739_v40, 0.0  ;;  %v851_v24 = vsel %vm5449_vm12, %v5448_v2, %v842_v27  ;;  %vm5453_vm11 = vcmp.eq.f32.partialorder %v2700_v13, 5.0  ;;  %v3434_v51 = vld [vmem:[%s2610_s26 + $0x50] sm:$0xff]  ;;  %v5486_v32 = vld [vmem:[#allocation85_spill] sm:$0xff] }
 0x103   : > { %v1698_v0 = vsel %vm5451_vm15, %v5450_v41, %v1689_v57  ;;  %v832_v25 = vsel %vm5453_vm11, %v5452_v3, %v823_v29  ;;  %v2384_v44 = vmul.f32 -1.442695, %v3424_v52  ;;  %2154 = vmatpush1.msra.mxu1 %v851_v24  ;;  %vm5455_vm8 = vcmp.eq.f32.partialorder %v2700_v13, 4.0  ;;  %v2428_v3 = vpop.eup %2427  ;;  %v5458_v24 = vld [vmem:[#allocation24_spill] sm:$0xff] }
 0x104   : > { %v841_v40 = vsel %vm5455_vm8, %v5454_v46, %v832_v25  ;;  %vm5456_vm12 = vcmp.eq.f32.partialorder %v2717_v22, 6.0  ;;  %v2357_v57 = vmul.f32 -1.442695, %v3434_v51  ;;  %vm5457_vm11 = vcmp.eq.f32.partialorder %v2802_v21, 6.0  ;;  %2155 = vmatprep.subr.mxu1 %v1698_v0 }
 0x105   : > { %v1670_v27 = vsel %vm5456_vm12, %v2790_v58, 0.0  ;;  %v822_v29 = vsel %vm5457_vm11, %v2850_v16, 0.0  ;;  %vm5459_vm0 = vcmp.eq.f32.partialorder %v2700_v13, 3.0  ;;  %2439 = vpow2.f32 %v2384_v44 }
 0x106   : > { %v850_v41 = vsel %vm5459_vm0, %v5458_v24, %v841_v40  ;;  %vm5460_vm15 = vcmp.eq.f32.partialorder %v2717_v22, 5.0  ;;  %vm5461_vm8 = vcmp.eq.f32.partialorder %v2802_v21, 5.0  ;;  %v1091_v58 = vadd.f32 1.0, %v2428_v3 }
 0x107   : > { %v1679_v25 = vsel %vm5460_vm15, %v2800_v11, %v1670_v27  ;;  %v831_v46 = vsel %vm5461_vm8, %v2861_v56, %v822_v29  ;;  %2156 = vmatpush1.msra.mxu1 %v850_v41  ;;  %vm5462_vm12 = vcmp.eq.f32.partialorder %v2717_v22, 4.0  ;;  %2441 = vpow2.f32 %v2357_v57  ;;  %v3462_v29 = vld [vmem:[%s2610_s26 + $0x48] sm:$0xff]  ;;  %v2430_v57 = vpop.eup %2429  ;;  %v5483_v11 = vld [vmem:[#allocation86_spill] sm:$0xff] }
 0x108   : > { %v1688_v0 = vsel %vm5462_vm12, %v2798_v10, %v1679_v25  ;;  %vm5463_vm11 = vcmp.eq.f32.partialorder %v2802_v21, 4.0  ;;  %vm5464_vm0 = vcmp.eq.f32.partialorder %v2717_v22, 3.0  ;;  %v2383_v41 = vmul.f32 -1.442695, %v3462_v29  ;;  %v3472_v25 = vld [vmem:[%s2610_s26 + $0x40] sm:$0xff] }
 0x109   : > { %v840_v40 = vsel %vm5463_vm11, %v2859_v43, %v831_v46  ;;  %v1697_v44 = vsel %vm5464_vm0, %v2793_v5, %v1688_v0  ;;  %vm5465_vm15 = vcmp.eq.f32.partialorder %v2854_v23, 6.0  ;;  %2443 = vrcp.f32 %v1091_v58  ;;  %v5485_v22 = vld [vmem:[#allocation74_spill] sm:$0xff] }
 0x10a   : > { %v849_v27 = vsel %vm615_vm6, %v2848_v61, %v840_v40  ;;  %v1669_v3 = vsel %vm5465_vm15, %v5408_v15, 0.0  ;;  %2157 = vmatprep.subr.mxu1 %v1697_v44  ;;  %vm5466_vm8 = vcmp.eq.f32.partialorder %v2854_v23, 5.0  ;;  %v2356_v0 = vmul.f32 -1.442695, %v3472_v25 }
 0x10b   : > { %v1678_v46 = vsel %vm5466_vm8, %v5411_v26, %v1669_v3  ;;  %vm5467_vm12 = vcmp.eq.f32.partialorder %v5414_v28, 6.0  ;;  %v244_v61 = vadd.f32 1.0, %v2430_v57  ;;  %2158 = vmatpush1.msra.mxu1 %v849_v27  ;;  %2445 = vpow2.f32 %v2383_v41  ;;  %v2432_v3 = vpop.eup %2431  ;;  %v5471_v27 = vld [vmem:[#allocation55_spill] sm:$0xff] }
 0x10c   : > { %v821_v40 = vsel %vm5467_vm12, %v5418_v50, 0.0  ;;  %vm5468_vm11 = vcmp.eq.f32.partialorder %v2854_v23, 4.0  ;;  %vm5469_vm0 = vcmp.eq.f32.partialorder %v5414_v28, 5.0  ;;  %2447 = vpow2.f32 %v2356_v0  ;;  %v2434_v21 = vpop.eup %2433  ;;  %v5473_v0 = vld [vmem:[#allocation73_spill] sm:$0xff] }
 0x10d   : > { %v1687_v58 = vsel %vm5468_vm11, %v5412_v47, %v1678_v46  ;;  %v830_v44 = vsel %vm5469_vm0, %v5421_v45, %v821_v40  ;;  %vm5470_vm15 = vcmp.eq.f32.partialorder %v5414_v28, 4.0  ;;  %v2382_v41 = vmul.f32 -1.442695, %v5471_v27  ;;  %v5472_v40 = vld [vmem:[#allocation63_spill] sm:$0xff]  ;;  %v5476_v27 = vld [vmem:[#allocation77_spill] sm:$0xff] }
 0x10e   : > { %v1696_v43 = vsel %vm5210_vm7, %v5415_v12, %v1687_v58  ;;  %v839_v57 = vsel %vm5470_vm15, %v5423_v20, %v830_v44  ;;  %2449 = vrcp.f32 %v244_v61  ;;  %v1090_v56 = vadd.f32 1.0, %v2432_v3  ;;  %v5475_v44 = vld [vmem:[#allocation59_spill] sm:$0xff] }
 0x10f   : > { %2159 = vmatprep.subr.mxu1 %v1696_v43  ;;  %v848_v46 = vsel %vm5140_vm1, %v5426_v7, %v839_v57  ;;  %vm1461_vm8 = vcmp.eq.f32.partialorder %v5472_v40, 2.0  ;;  %2451 = vpow2.f32 %v2382_v41  ;;  %vm5474_vm12 = vcmp.eq.f32.partialorder %v5472_v40, 5.0  ;;  %v5477_v43 = vld [vmem:[#allocation76_spill] sm:$0xff]  ;;  %v5479_v57 = vld [vmem:[#allocation82_spill] sm:$0xff]  ;;  %v5481_v41 = vld [vmem:[#allocation75_spill] sm:$0xff] }
 0x110   : > { %2160 = vmatpush1.msra.mxu1 %v848_v46  ;;  %v1632_v58 = vsel %vm5474_vm12, %v5473_v0, 0.0  ;;  %v2355_v16 = vmul.f32 -1.442695, %v5475_v44  ;;  %vm5219_vm11 = vcmp.eq.f32.partialorder %v5476_v27, 2.0  ;;  %2453 = vrcp.f32 %v1090_v56  ;;  %v2436_v46 = vpop.eup %2435 }
 0x111   : > { %v243_v61 = vadd.f32 1.0, %v2434_v21  ;;  %vm5478_vm0 = vcmp.eq.f32.partialorder %v5472_v40, 4.0  ;;  %vm5480_vm15 = vcmp.eq.f32.partialorder %v5476_v27, 5.0  ;;  %vm5482_vm1 = vcmp.eq.f32.partialorder %v5472_v40, 3.0  ;;  %v3513_v21 = vld [vmem:[%s2610_s26 + $0x28] sm:$0xff] }
 0x112   : > { %v1641_v3 = vsel %vm5478_vm0, %v5477_v43, %v1632_v58  ;;  %v784_v5 = vsel %vm5480_vm15, %v5479_v57, 0.0  ;;  %2455 = vpow2.f32 %v2355_v16  ;;  %vm5484_vm12 = vcmp.eq.f32.partialorder %v5476_v27, 4.0  ;;  %v2438_v58 = vpop.eup %2437 }
 0x113   : > { %v1650_v10 = vsel %vm5482_vm1, %v5481_v41, %v1641_v3  ;;  %v793_v44 = vsel %vm5484_vm12, %v5483_v11, %v784_v5  ;;  %v2381_v56 = vmul.f32 -1.442695, %v3513_v21  ;;  %2457 = vrcp.f32 %v243_v61  ;;  %v5488_v5 = vld [vmem:[#allocation83_spill] sm:$0xff]  ;;  %v3530_v61 = vld [vmem:[%s2610_s26 + $0x20] sm:$0xff] }
 0x114   : > { %v1089_v24 = vadd.f32 1.0, %v2436_v46  ;;  %v1659_v13 = vsel %vm1461_vm8, %v5485_v22, %v1650_v10  ;;  %vm5487_vm1 = vcmp.eq.f32.partialorder %v5476_v27, 3.0  ;;  %v242_v3 = vadd.f32 1.0, %v2438_v58  ;;  %5490 = vst [vmem:[#allocation56_spill] sm:$0xff] %v3530_v61 }
 0x115   : > { %v802_v16 = vsel %vm5487_vm1, %v5486_v32, %v793_v44  ;;  %2161 = vmatprep.subr.mxu1 %v1659_v13  ;;  %2459 = vpow2.f32 %v2381_v56  ;;  %vm5176_vm0 = vcmp.eq.f32.partialorder %v3109_v48, 2.0  ;;  %vm5489_vm15 = vcmp.eq.f32.partialorder %v3109_v48, 5.0  ;;  %v2440_v13 = vpop.eup %2439 }
 0x116   : > { %v811_v11 = vsel %vm5219_vm11, %v5488_v5, %v802_v16  ;;  %2461 = vrcp.f32 %v1089_v24  ;;  %v1631_v10 = vsel %vm5489_vm15, %v3165_v62, 0.0  ;;  %v2354_v46 = vmul.f32 -1.442695, %v3530_v61  ;;  %v3541_v24 = vld [vmem:[%s2610_s26 + $0x18] sm:$0xff]  ;;  %v2442_v58 = vpop.eup %2441 }
 0x117   : > { %2162 = vmatpush1.msra.mxu1 %v811_v11  ;;  %vm5168_vm12 = vcmp.eq.f32.partialorder %v3153_v55, 2.0  ;;  %2463 = vrcp.f32 %v242_v3  ;;  %v1640_v44 = vsel %vm1478_vm3, %v3173_v1, %v1631_v10  ;;  %v783_v11 = vsel %vm5200_vm5, %v3199_v19, 0.0  ;;  %5491 = vst [vmem:[#allocation65_spill] sm:$0xff] %v3541_v24 }
 0x118   : > { %v2380_v56 = vmul.f32 -1.442695, %v3541_v24  ;;  %v1088_v16 = vadd.f32 1.0, %v2440_v13  ;;  %vm5492_vm1 = vcmp.eq.f32.partialorder %v3109_v48, 3.0  ;;  %2465 = vpow2.f32 %v2354_v46  ;;  %v2444_v13 = vpop.eup %2443 }
 0x119   : > { %v1649_v3 = vsel %vm5492_vm1, %v3171_v60, %v1640_v44  ;;  %v792_v10 = vsel %vm5174_vm13, %v3226_v39, %v783_v11  ;;  %v241_v61 = vadd.f32 1.0, %v2442_v58  ;;  %vm5493_vm15 = vcmp.eq.f32.partialorder %v2620_v31, 5.0  ;;  %v3563_v11 = vld [vmem:[%s2610_s26 + $0x10] sm:$0xff]  ;;  %v2509_v39 = vld [vmem:[%s2610_s26 + $0x88] sm:$0xff] }
 0x11a   : > { %v1658_v19 = vsel %vm5176_vm0, %v3161_v35, %v1649_v3  ;;  %v801_v24 = vsel %vm5169_vm2, %v3224_v59, %v792_v10  ;;  %2467 = vpow2.f32 %v2380_v56  ;;  %v1630_v44 = vsel %vm5493_vm15, %v2645_v18, 0.0  ;;  %5494 = vst [vmem:[#allocation49_spill] sm:$0xff] %v3563_v11  ;;  %v2446_v3 = vpop.eup %2445  ;;  %v5495_v56 = vld [vmem:[#allocation10_spill] sm:$0xff]  ;;  %v5499_v35 = vld [vmem:[#allocation9_spill] sm:$0xff] }
 0x11b   : > { %2469 = vrcp.f32 %v1088_v16  ;;  %2163 = vmatprep.subr.mxu1 %v1658_v19  ;;  %v810_v46 = vsel %vm5168_vm12, %v3176_v8, %v801_v24  ;;  %v2353_v58 = vmul.f32 -1.442695, %v3563_v11  ;;  %v1118_v10 = vmul.f32 %v2509_v39, %v2444_v13  ;;  %v5497_v16 = vld [vmem:[#allocation17_spill] sm:$0xff]  ;;  %v5498_v24 = vld [vmem:[#allocation6_spill] sm:$0xff]  ;;  %v2448_v59 = vpop.eup %2447 }
 0x11c   : > { %2471 = vrcp.f32 %v241_v61  ;;  %2164 = vmatpush1.msra.mxu1 %v810_v46  ;;  %vm5496_vm1 = vcmp.eq.f32.partialorder %v2620_v31, 4.0  ;;  %v782_v8 = vsel %vm5213_vm4, %v5497_v16, 0.0  ;;  %v1087_v18 = vadd.f32 1.0, %v2446_v3  ;;  %v5501_v60 = vld [vmem:[#allocation21_spill] sm:$0xff]  ;;  %v2450_v61 = vpop.eup %2449  ;;  %v5503_v46 = vld [vmem:[#allocation7_spill] sm:$0xff]  ;;  %v5505_v16 = vld [vmem:[#allocation20_spill] sm:$0xff] }
 0x11d   : > { %v1639_v19 = vsel %vm5496_vm1, %v5495_v56, %v1630_v44  ;;  %vm5500_vm15 = vcmp.eq.f32.partialorder %v2620_v31, 3.0  ;;  %2473 = vpow2.f32 %v2353_v58  ;;  %vm5502_vm12 = vcmp.eq.f32.partialorder %v5498_v24, 4.0  ;;  %2080 = vmatprep.subr.mxu0 %v1118_v10  ;;  %v3586_v56 = vld [vmem:[%s2610_s26 + $0x8] sm:$0xff]  ;;  %v5510_v10 = vld [vmem:[#allocation28_spill] sm:$0xff] }
 0x11e   : > { %v1648_v11 = vsel %vm5500_vm15, %v5499_v35, %v1639_v19  ;;  %v791_v39 = vsel %vm5502_vm12, %v5501_v60, %v782_v8  ;;  %v240_v13 = vadd.f32 1.0, %v2448_v59  ;;  %vm5504_vm1 = vcmp.eq.f32.partialorder %v2620_v31, 2.0  ;;  %5507 = vst [vmem:[#allocation55_spill] sm:$0xff] %v3586_v56  ;;  %v2452_v19 = vpop.eup %2451  ;;  %v5508_v8 = vld [vmem:[#allocation15_spill] sm:$0xff]  ;;  %v5511_v60 = vld [vmem:[#allocation18_spill] sm:$0xff] }
 0x11f   : > { %v1657_v44 = vsel %vm5504_vm1, %v5503_v46, %v1648_v11  ;;  %vm5506_vm2 = vcmp.eq.f32.partialorder %v5498_v24, 3.0  ;;  %v2379_v58 = vmul.f32 -1.442695, %v3586_v56  ;;  %v271_v35 = vmul.f32 %v2450_v61, %v5430_v38  ;;  %v2454_v46 = vpop.eup %2453  ;;  %v3600_v31 = vld [vmem:[%s2610_s26] sm:$0xff] }
 0x120   : > { %v800_v3 = vsel %vm5506_vm2, %v5505_v16, %v791_v39  ;;  %2475 = vrcp.f32 %v1087_v18  ;;  %2165 = vmatprep.subr.mxu1 %v1657_v44  ;;  %vm5509_vm12 = vcmp.eq.f32.partialorder %v5498_v24, 2.0  ;;  %vm5512_vm15 = vcmp.eq.f32.partialorder %v5511_v60, 5.0  ;;  %v5513_v16 = vld [vmem:[#allocation30_spill] sm:$0xff]  ;;  %5515 = vst [vmem:[#allocation63_spill] sm:$0xff] %v3600_v31  ;;  %v2456_v18 = vpop.eup %2455  ;;  %v5516_v44 = vld [vmem:[#allocation29_spill] sm:$0xff] }
 0x121   : > { %v809_v59 = vsel %vm5509_vm12, %v5508_v8, %v800_v3  ;;  %v1629_v11 = vsel %vm5512_vm15, %v5510_v10, 0.0  ;;  %2477 = vrcp.f32 %v240_v13  ;;  %v1086_v39 = vadd.f32 1.0, %v2452_v19  ;;  %2081 = vmatpush1.msra.mxu0 %v271_v35  ;;  %v5518_v13 = vld [vmem:[#allocation37_spill] sm:$0xff]  ;;  %v5519_v19 = vld [vmem:[#allocation22_spill] sm:$0xff]  ;;  %v2458_v8 = vpop.eup %2457  ;;  %v5522_v10 = vld [vmem:[#allocation39_spill] sm:$0xff] }
 0x122   : > { %2166 = vmatpush1.msra.mxu1 %v809_v59  ;;  %vm5514_vm2 = vcmp.eq.f32.partialorder %v5511_v60, 4.0  ;;  %v2352_v38 = vmul.f32 -1.442695, %v3600_v31  ;;  %v1117_v61 = vmul.f32 %v2454_v46, %v3069_v42  ;;  %2479 = vpow2.f32 %v2379_v58  ;;  %v2460_v35 = vpop.eup %2459 }
 0x123   : > { %v1638_v56 = vsel %vm5514_vm2, %v5513_v16, %v1629_v11  ;;  %vm5517_vm1 = vcmp.eq.f32.partialorder %v5511_v60, 3.0  ;;  %v781_v59 = vsel %vm637_vm10, %v5518_v13, 0.0  ;;  %2481 = vrcp.f32 %v1086_v39  ;;  %v5520_v16 = vld [vmem:[#allocation27_spill] sm:$0xff]  ;;  %v5526_v39 = vld [vmem:[#allocation45_spill] sm:$0xff]  ;;  %v2462_v13 = vpop.eup %2461 }
 0x124   : > { %v1647_v3 = vsel %vm5517_vm1, %v5516_v44, %v1638_v56  ;;  %v239_v11 = vadd.f32 1.0, %v2456_v18  ;;  %vm5521_vm12 = vcmp.eq.f32.partialorder %v5511_v60, 2.0  ;;  %vm5523_vm15 = vcmp.eq.f32.partialorder %v5519_v19, 4.0  ;;  %2082 = vmatprep.subr.mxu0 %v1117_v61  ;;  %v5524_v56 = vld [vmem:[#allocation38_spill] sm:$0xff]  ;;  %v5530_v61 = vld [vmem:[#allocation48_spill] sm:$0xff] }
 0x125   : > { %v1656_v31 = vsel %vm5521_vm12, %v5520_v16, %v1647_v3  ;;  %v790_v42 = vsel %vm5523_vm15, %v5522_v10, %v781_v59  ;;  %v270_v46 = vmul.f32 %v2458_v8, %v3112_v63  ;;  %2483 = vpow2.f32 %v2352_v38  ;;  %v5528_v16 = vld [vmem:[#allocation36_spill] sm:$0xff]  ;;  %v2464_v63 = vpop.eup %2463 }
 0x126   : > { %2167 = vmatprep.subr.mxu1 %v1656_v31  ;;  %vm5525_vm2 = vcmp.eq.f32.partialorder %v5519_v19, 3.0  ;;  %vm5527_vm1 = vcmp.eq.f32.partialorder %v5425_v33, 5.0  ;;  %2485 = vrcp.f32 %v239_v11  ;;  %v1085_v3 = vadd.f32 1.0, %v2460_v35  ;;  %v2466_v11 = vpop.eup %2465 }
 0x127   : > { %v799_v58 = vsel %vm5525_vm2, %v5524_v56, %v790_v42  ;;  %v1628_v18 = vsel %vm5527_vm1, %v5526_v39, 0.0  ;;  %vm5529_vm12 = vcmp.eq.f32.partialorder %v5519_v19, 2.0  ;;  %vm5531_vm15 = vcmp.eq.f32.partialorder %v5425_v33, 4.0  ;;  %2083 = vmatpush1.msra.mxu0 %v270_v46 }
 0x128   : > { %v808_v59 = vsel %vm5529_vm12, %v5528_v16, %v799_v58  ;;  %v1637_v31 = vsel %vm5531_vm15, %v5530_v61, %v1628_v18  ;;  %v1116_v8 = vmul.f32 %v3380_v9, %v2462_v13  ;;  %vm5532_vm2 = vcmp.eq.f32.partialorder %v5425_v33, 3.0  ;;  %v2468_v13 = vpop.eup %2467 }
 0x129   : > { %2168 = vmatpush1.msra.mxu1 %v808_v59  ;;  %v1646_v38 = vsel %vm5532_vm2, %v5435_v17, %v1637_v31  ;;  %vm5177_vm1 = vcmp.eq.f32.partialorder %v2854_v23, 8.0  ;;  %vm5175_vm13 = vcmp.eq.f32.partialorder %v2854_v23, 9.0  ;;  %v269_v42 = vmul.f32 %v3393_v4, %v2464_v63  ;;  %v2470_v18 = vpop.eup %2469  ;;  %v5536_v31 = vld [vmem:[#allocation61_spill] sm:$0xff] }
 0x12a   : > { %2487 = vrcp.f32 %v1085_v3  ;;  %vm5533_vm12 = vcmp.eq.f32.partialorder %v5425_v33, 2.0  ;;  %v1804_v9 = vsel %vm5175_vm13, %v5408_v15, 0.0  ;;  %2084 = vmatprep.subr.mxu0 %v1116_v8  ;;  %v238_v46 = vadd.f32 1.0, %v2466_v11  ;;  %v2472_v8 = vpop.eup %2471 }
 0x12b   : > { %v3639_v35 = vsel %vm5533_vm12, %v5437_v53, %v1646_v38  ;;  %v1813_v58 = vsel %vm5177_vm1, %v5411_v26, %v1804_v9  ;;  %vm5534_vm15 = vcmp.eq.f32.partialorder %v5431_v34, 5.0  ;;  %vm659_vm2 = vcmp.eq.f32.partialorder %v5414_v28, 8.0  ;;  %2085 = vmatpush1.msra.mxu0 %v269_v42  ;;  %v2474_v9 = vpop.eup %2473 }
 0x12c   : > { %v780_v4 = vsel %vm5534_vm15, %v5436_v14, 0.0  ;;  %v1084_v3 = vadd.f32 1.0, %v2468_v13  ;;  %vm5535_vm12 = vcmp.eq.f32.partialorder %v2854_v23, 7.0  ;;  %vm5537_vm13 = vcmp.eq.f32.partialorder %v5431_v34, 4.0 }
 0x12d   : > { %v1822_v59 = vsel %vm5535_vm12, %v5412_v47, %v1813_v58  ;;  %v789_v63 = vsel %vm5537_vm13, %v5536_v31, %v780_v4  ;;  %vm5178_vm0 = vcmp.eq.f32.partialorder %v5414_v28, 9.0  ;;  %v1115_v38 = vmul.f32 %v3424_v52, %v2470_v18  ;;  %v5541_v18 = vld [vmem:[#allocation68_spill] sm:$0xff] }
 0x12e   : > { %2489 = vrcp.f32 %v238_v46  ;;  %vm5538_vm15 = vcmp.eq.f32.partialorder %v2854_v23, 6.0  ;;  %vm5539_vm1 = vcmp.eq.f32.partialorder %v5431_v34, 3.0  ;;  %v268_v13 = vmul.f32 %v3434_v51, %v2472_v8 }
 0x12f   : > { %v1831_v11 = vsel %vm5538_vm15, %v5415_v12, %v1822_v59  ;;  %v798_v42 = vsel %vm5539_vm1, %v5440_v36, %v789_v63  ;;  %2491 = vrcp.f32 %v1084_v3  ;;  %vm5540_vm13 = vcmp.eq.f32.partialorder %v5431_v34, 2.0  ;;  %2086 = vmatprep.subr.mxu0 %v1115_v38  ;;  %v2476_v3 = vpop.eup %2475  ;;  %v5543_v63 = vld [vmem:[#allocation71_spill] sm:$0xff]  ;;  %v5585_v36 = vld [vmem:[#allocation24_spill] sm:$0xff] }
 0x130   : > { %2169 = vmatprep.subr.mxu1 %v1831_v11  ;;  %v3669_v58 = vsel %vm5540_vm13, %v5441_v54, %v798_v42  ;;  %v956_v52 = vsel %vm5178_vm0, %v5418_v50, 0.0  ;;  %v237_v46 = vadd.f32 1.0, %v2474_v9  ;;  %v1627_v51 = vsel %vm1483_vm14, %v5541_v18, 0.0  ;;  %2087 = vmatpush1.msra.mxu0 %v268_v13  ;;  %v5544_v38 = vld [vmem:[#allocation79_spill] sm:$0xff]  ;;  %v2478_v42 = vpop.eup %2477  ;;  %v5581_v54 = vld [vmem:[#allocation25_spill] sm:$0xff]  ;;  %v5583_v18 = vld [vmem:[#allocation92_spill] sm:$0xff] }
 0x131   : > { %v965_v4 = vsel %vm659_vm2, %v5421_v45, %v956_v52  ;;  %vm5182_vm1 = vcmp.eq.f32.partialorder %v5472_v40, 7.0  ;;  %vm5542_vm12 = vcmp.eq.f32.partialorder %v5414_v28, 7.0  ;;  %v1636_v8 = vsel %vm5187_vm9, %v5543_v63, %v1627_v51  ;;  %v5547_v52 = vld [vmem:[#allocation70_spill] sm:$0xff]  ;;  %v2480_v51 = vpop.eup %2479 }
 0x132   : > { %v974_v59 = vsel %vm5542_vm12, %v5423_v20, %v965_v4  ;;  %vm5181_vm15 = vcmp.eq.f32.partialorder %v5472_v40, 8.0  ;;  %vm5545_vm13 = vcmp.eq.f32.partialorder %v3022_v6, 5.0  ;;  %v1114_v9 = vmul.f32 %v3462_v29, %v2476_v3 }
 0x133   : > { %v779_v11 = vsel %vm5545_vm13, %v5544_v38, 0.0  ;;  %2493 = vrcp.f32 %v237_v46  ;;  %vm5546_vm0 = vcmp.eq.f32.partialorder %v5414_v28, 6.0  ;;  %vm5548_vm12 = vcmp.eq.f32.partialorder %v2968_v37, 3.0  ;;  %v5550_v46 = vld [vmem:[#allocation81_spill] sm:$0xff] }
 0x134   : > { %v983_v13 = vsel %vm5546_vm0, %v5426_v7, %v974_v59  ;;  %v1645_v4 = vsel %vm5548_vm12, %v5547_v52, %v1636_v8  ;;  %v267_v63 = vmul.f32 %v3472_v25, %v2478_v42  ;;  %vm5549_vm13 = vcmp.eq.f32.partialorder %v2968_v37, 2.0  ;;  %v2482_v59 = vpop.eup %2481  ;;  %2088 = vmatprep.subr.mxu0 %v1114_v9  ;;  %v5579_v52 = vld [vmem:[#allocation88_spill] sm:$0xff] }
 0x135   : > { %2170 = vmatpush2.msra.mxu1 %v983_v13  ;;  %v3702_v38 = vsel %vm5549_vm13, %v3007_v49, %v1645_v4  ;;  %v1767_v29 = vsel %vm5181_vm15, %v5473_v0, 0.0  ;;  %vm5551_vm0 = vcmp.eq.f32.partialorder %v3022_v6, 4.0  ;;  %v1083_v8 = vadd.f32 1.0, %v2480_v51  ;;  %v2484_v13 = vpop.eup %2483  ;;  %v2512_v4 = vld [vmem:[%s2610_s26 + $0x38] sm:$0xff] }
 0x136   : > { %v788_v3 = vsel %vm5551_vm0, %v5550_v46, %v779_v11  ;;  %v1776_v25 = vsel %vm5182_vm1, %v5477_v43, %v1767_v29  ;;  %vm5552_vm12 = vcmp.eq.f32.partialorder %v3022_v6, 3.0  ;;  %vm5188_vm13 = vcmp.eq.f32.partialorder %v5476_v27, 7.0  ;;  %2089 = vmatpush1.msra.mxu0 %v267_v63  ;;  %v2486_v51 = vpop.eup %2485 }
 0x137   : > { %v797_v42 = vsel %vm5552_vm12, %v3074_v30, %v788_v3  ;;  %v1113_v49 = vmul.f32 %v2512_v4, %v2482_v59  ;;  %vm5553_vm0 = vcmp.eq.f32.partialorder %v5472_v40, 6.0  ;;  %vm5554_vm15 = vcmp.eq.f32.partialorder %v3022_v6, 2.0  ;;  %v2513_v59 = vld [vmem:[%s2610_s26 + $0x30] sm:$0xff]  ;;  %v5558_v30 = vld [vmem:[#allocation5_spill] sm:$0xff] }
 0x138   : > { %v1785_v11 = vsel %vm5553_vm0, %v5481_v41, %v1776_v25  ;;  %v3724_v9 = vsel %vm5554_vm15, %v5448_v2, %v797_v42  ;;  %vm5186_vm1 = vcmp.eq.f32.partialorder %v5476_v27, 8.0  ;;  %2495 = vrcp.f32 %v1083_v8  ;;  %v5556_v4 = vld [vmem:[#allocation86_spill] sm:$0xff]  ;;  %v5557_v2 = vld [vmem:[#allocation11_spill] sm:$0xff] }
 0x139   : > { %v236_v29 = vadd.f32 1.0, %v2484_v13  ;;  %vm5555_vm12 = vcmp.eq.f32.partialorder %v5472_v40, 5.0  ;;  %v919_v3 = vsel %vm5186_vm1, %v5479_v57, 0.0  ;;  %2090 = vmatprep.subr.mxu0 %v1113_v49  ;;  %v266_v25 = vmul.f32 %v2513_v59, %v2486_v51  ;;  %v2488_v13 = vpop.eup %2487  ;;  %v5561_v49 = vld [vmem:[#allocation14_spill] sm:$0xff]  ;;  %v5564_v59 = vld [vmem:[#allocation13_spill] sm:$0xff] }
 0x13a   : > { %v1794_v63 = vsel %vm5555_vm12, %v5485_v22, %v1785_v11  ;;  %v928_v42 = vsel %vm5188_vm13, %v5556_v4, %v919_v3  ;;  %vm5559_vm15 = vcmp.eq.f32.partialorder %v5558_v30, 5.0  ;;  %vm5190_vm0 = vcmp.eq.f32.partialorder %v3109_v48, 7.0 }
 0x13b   : > { %2171 = vmatprep.subr.mxu1 %v1794_v63  ;;  %v1626_v8 = vsel %vm5559_vm15, %v5557_v2, 0.0  ;;  %2497 = vrcp.f32 %v236_v29  ;;  %vm5560_vm12 = vcmp.eq.f32.partialorder %v5476_v27, 6.0  ;;  %vm5562_vm1 = vcmp.eq.f32.partialorder %v5558_v30, 4.0  ;;  %2091 = vmatpush1.msra.mxu0 %v266_v25  ;;  %v5566_v2 = vld [vmem:[#allocation12_spill] sm:$0xff]  ;;  %v5568_v25 = vld [vmem:[#allocation23_spill] sm:$0xff] }
 0x13c   : > { %v937_v11 = vsel %vm5560_vm12, %v5486_v32, %v928_v42  ;;  %v1635_v51 = vsel %vm5562_vm1, %v5561_v49, %v1626_v8  ;;  %vm5189_vm9 = vcmp.eq.f32.partialorder %v3109_v48, 8.0  ;;  %v1112_v63 = vmul.f32 %v3513_v21, %v2488_v13  ;;  %v5569_v13 = vld [vmem:[#allocation16_spill] sm:$0xff]  ;;  %v5573_v49 = vld [vmem:[#allocation26_spill] sm:$0xff] }
 0x13d   : > { %vm5563_vm15 = vcmp.eq.f32.partialorder %v5476_v27, 5.0  ;;  %vm5565_vm13 = vcmp.eq.f32.partialorder %v5558_v30, 3.0  ;;  %v1766_v42 = vsel %vm5189_vm9, %v3165_v62, 0.0  ;;  %vm5567_vm1 = vcmp.eq.f32.partialorder %v5558_v30, 2.0 }
 0x13e   : > { %v946_v3 = vsel %vm5563_vm15, %v5488_v5, %v937_v11  ;;  %v1644_v29 = vsel %vm5565_vm13, %v5564_v59, %v1635_v51  ;;  %v1775_v21 = vsel %vm5190_vm0, %v3173_v1, %v1766_v42  ;;  %vm5570_vm12 = vcmp.eq.f32.partialorder %v5569_v13, 5.0  ;;  %v2490_v51 = vpop.eup %2489  ;;  %2092 = vmatprep.subr.mxu0 %v1112_v63  ;;  %v5571_v59 = vld [vmem:[#allocation89_spill] sm:$0xff]  ;;  %v5576_v42 = vld [vmem:[#allocation19_spill] sm:$0xff] }
 0x13f   : > { %2172 = vmatpush2.msra.mxu1 %v946_v3  ;;  %v3761_v8 = vsel %vm5567_vm1, %v5566_v2, %v1644_v29  ;;  %v778_v11 = vsel %vm5570_vm12, %v5568_v25, 0.0  ;;  %vm657_vm13 = vcmp.eq.f32.partialorder %v3153_v55, 7.0  ;;  %vm5572_vm15 = vcmp.eq.f32.partialorder %v3109_v48, 6.0  ;;  %v5575_v2 = vld [vmem:[#allocation31_spill] sm:$0xff]  ;;  %v2492_v46 = vpop.eup %2491  ;;  %v5578_v25 = vld [vmem:[#allocation56_spill] sm:$0xff] }
 0x140   : > { %v1784_v3 = vsel %vm5572_vm15, %v5571_v59, %v1775_v21  ;;  %vm5574_vm1 = vcmp.eq.f32.partialorder %v5569_v13, 4.0  ;;  %vm5196_vm9 = vcmp.eq.f32.partialorder %v3153_v55, 8.0  ;;  %vm5577_vm0 = vcmp.eq.f32.partialorder %v5576_v42, 5.0 }
 0x141   : > { %v787_v29 = vsel %vm5574_vm1, %v5573_v49, %v778_v11  ;;  %v1625_v30 = vsel %vm5577_vm0, %v5575_v2, 0.0  ;;  %v265_v6 = vmul.f32 %v5578_v25, %v2490_v51  ;;  %vm5580_vm12 = vcmp.eq.f32.partialorder %v3109_v48, 5.0  ;;  %v5584_v49 = vld [vmem:[#allocation65_spill] sm:$0xff]  ;;  %v5587_v25 = vld [vmem:[#allocation94_spill] sm:$0xff] }
 0x142   : > { %v1793_v63 = vsel %vm5580_vm12, %v5579_v52, %v1784_v3  ;;  %vm5582_vm15 = vcmp.eq.f32.partialorder %v5569_v13, 3.0  ;;  %v918_v11 = vsel %vm5196_vm9, %v5583_v18, 0.0  ;;  %v1111_v59 = vmul.f32 %v5584_v49, %v2492_v46  ;;  %v5588_v3 = vld [vmem:[#allocation34_spill] sm:$0xff]  ;;  %v5592_v46 = vld [vmem:[#allocation33_spill] sm:$0xff] }
 0x143   : > { %v796_v21 = vsel %vm5582_vm15, %v5581_v54, %v787_v29  ;;  %2173 = vmatprep.subr.mxu1 %v1793_v63  ;;  %vm5586_vm0 = vcmp.eq.f32.partialorder %v5569_v13, 2.0  ;;  %v927_v51 = vsel %vm657_vm13, %v5587_v25, %v918_v11  ;;  %vm5589_vm1 = vcmp.eq.f32.partialorder %v5576_v42, 4.0  ;;  %2093 = vmatpush1.msra.mxu0 %v265_v6  ;;  %v5590_v54 = vld [vmem:[#allocation93_spill] sm:$0xff]  ;;  %v5594_v63 = vld [vmem:[#allocation4_spill] sm:$0xff]  ;;  %v5595_v11 = vld [vmem:[#allocation91_spill] sm:$0xff] }
 0x144   : > { %v3794_v2 = vsel %vm5586_vm0, %v5585_v36, %v796_v21  ;;  %v1634_v29 = vsel %vm5589_vm1, %v5588_v3, %v1625_v30  ;;  %vm5591_vm12 = vcmp.eq.f32.partialorder %v3153_v55, 6.0  ;;  %vm5593_vm15 = vcmp.eq.f32.partialorder %v5576_v42, 3.0  ;;  %v2494_v21 = vpop.eup %2493  ;;  %2094 = vmatprep.subr.mxu0 %v1111_v59  ;;  %v5596_v30 = vld [vmem:[#allocation32_spill] sm:$0xff]  ;;  %v5603_v59 = vld [vmem:[#allocation10_spill] sm:$0xff] }
 0x145   : > { %v936_v18 = vsel %vm5591_vm12, %v5590_v54, %v927_v51  ;;  %v1643_v49 = vsel %vm5593_vm15, %v5592_v46, %v1634_v29  ;;  %vm5201_vm0 = vcmp.eq.f32.partialorder %v5594_v63, 7.0  ;;  %vm5198_vm9 = vcmp.eq.f32.partialorder %v5594_v63, 8.0  ;;  %v5598_v51 = vld [vmem:[#allocation8_spill] sm:$0xff]  ;;  %v5599_v29 = vld [vmem:[#allocation42_spill] sm:$0xff]  ;;  %v5600_v46 = vld [vmem:[#allocation35_spill] sm:$0xff] }
 0x146   : > { %v945_v36 = vsel %vm5200_vm5, %v5595_v11, %v936_v18  ;;  %vm5597_vm1 = vcmp.eq.f32.partialorder %v5576_v42, 2.0  ;;  %v1765_v3 = vsel %vm5198_vm9, %v5598_v51, 0.0  ;;  %vm5601_vm12 = vcmp.eq.f32.partialorder %v5600_v46, 5.0  ;;  %v5602_v54 = vld [vmem:[#allocation49_spill] sm:$0xff]  ;;  %v5604_v11 = vld [vmem:[#allocation44_spill] sm:$0xff]  ;;  %v5608_v51 = vld [vmem:[#allocation43_spill] sm:$0xff] }
 0x147   : > { %v3816_v6 = vsel %vm5597_vm1, %v5596_v30, %v1643_v49  ;;  %v777_v13 = vsel %vm5601_vm12, %v5599_v29, 0.0  ;;  %v264_v25 = vmul.f32 %v5602_v54, %v2494_v21  ;;  %2174 = vmatpush2.msra.mxu1 %v945_v36  ;;  %v1774_v18 = vsel %vm5201_vm0, %v5603_v59, %v1765_v3  ;;  %v5606_v30 = vld [vmem:[#allocation9_spill] sm:$0xff]  ;;  %v5610_v54 = vld [vmem:[#allocation7_spill] sm:$0xff] }
 0x148   : > { %vm5605_vm15 = vcmp.eq.f32.partialorder %v5600_v46, 4.0  ;;  %vm5295_vm1 = vcmp.eq.f32.partialorder %v5498_v24, 7.0  ;;  %vm5607_vm9 = vcmp.eq.f32.partialorder %v5594_v63, 6.0  ;;  %vm5208_vm12 = vcmp.eq.f32.partialorder %v5498_v24, 8.0  ;;  %v5612_v3 = vld [vmem:[#allocation41_spill] sm:$0xff] }
 0x149   : > { %v786_v49 = vsel %vm5605_vm15, %v5604_v11, %v777_v13  ;;  %v1783_v42 = vsel %vm5607_vm9, %v5606_v30, %v1774_v18  ;;  %vm5609_vm5 = vcmp.eq.f32.partialorder %v2854_v23, 5.0  ;;  %2095 = vmatpush1.msra.mxu0 %v264_v25  ;;  %vm5611_vm15 = vcmp.eq.f32.partialorder %v5594_v63, 5.0  ;;  %v5614_v18 = vld [vmem:[#allocation17_spill] sm:$0xff]  ;;  %v2496_v11 = vpop.eup %2495 }
 0x14a   : > { %v795_v29 = vsel %vm615_vm6, %v5608_v51, %v786_v49  ;;  %v1624_v36 = vsel %vm5609_vm5, %v5408_v15, 0.0  ;;  %v1792_v13 = vsel %vm5611_vm15, %v5610_v54, %v1783_v42  ;;  %vm5613_vm0 = vcmp.eq.f32.partialorder %v5600_v46, 2.0  ;;  %v5616_v25 = vld [vmem:[#allocation21_spill] sm:$0xff]  ;;  %v5618_v46 = vld [vmem:[#allocation20_spill] sm:$0xff]  ;;  %v5623_v54 = vld [vmem:[#allocation30_spill] sm:$0xff] }
 0x14b   : > { %v3848_v21 = vsel %vm5613_vm0, %v5612_v3, %v795_v29  ;;  %v917_v49 = vsel %vm5208_vm12, %v5614_v18, 0.0  ;;  %vm5615_vm9 = vcmp.eq.f32.partialorder %v2854_v23, 4.0  ;;  %2175 = vmatprep.subr.mxu1 %v1792_v13  ;;  %vm5209_vm5 = vcmp.eq.f32.partialorder %v5511_v60, 7.0  ;;  %v5617_v29 = vld [vmem:[#allocation55_spill] sm:$0xff] }
 0x14c   : > { %v1633_v51 = vsel %vm5615_vm9, %v5411_v26, %v1624_v36  ;;  %v926_v15 = vsel %vm5295_vm1, %v5616_v25, %v917_v49  ;;  %vm5206_vm0 = vcmp.eq.f32.partialorder %v5511_v60, 8.0  ;;  %v1110_v3 = vmul.f32 %v5617_v29, %v2496_v11  ;;  %v5621_v49 = vld [vmem:[#allocation28_spill] sm:$0xff] }
 0x14d   : > { %v1642_v42 = vsel %vm5210_vm7, %v5412_v47, %v1633_v51  ;;  %vm5619_vm15 = vcmp.eq.f32.partialorder %v5498_v24, 6.0  ;;  %vm5620_vm9 = vcmp.eq.f32.partialorder %v2854_v23, 2.0  ;;  %v1764_v26 = vsel %vm5206_vm0, %v5621_v49, 0.0  ;;  %v2498_v51 = vpop.eup %2497  ;;  %v5622_v47 = vld [vmem:[#allocation15_spill] sm:$0xff] }
 0x14e   : > { %v935_v36 = vsel %vm5619_vm15, %v5618_v46, %v926_v15  ;;  %v3871_v13 = vsel %vm5620_vm9, %v5415_v12, %v1642_v42  ;;  %v1773_v11 = vsel %vm5209_vm5, %v5623_v54, %v1764_v26  ;;  %vm5624_vm15 = vcmp.eq.f32.partialorder %v5414_v28, 5.0  ;;  %2096 = vmatprep.subr.mxu0 %v1110_v3  ;;  %v5625_v42 = vld [vmem:[#allocation63_spill] sm:$0xff] }
 0x14f   : > { %v944_v25 = vsel %vm5213_vm4, %v5622_v47, %v935_v36  ;;  %v776_v15 = vsel %vm5624_vm15, %v5418_v50, 0.0  ;;  %vm5214_vm9 = vcmp.eq.f32.partialorder %v5519_v19, 7.0  ;;  %v263_v29 = vmul.f32 %v5625_v42, %v2498_v51  ;;  %v5628_v26 = vld [vmem:[#allocation27_spill] sm:$0xff]  ;;  %v5631_v51 = vld [vmem:[#allocation37_spill] sm:$0xff] }
 0x150   : > { %2176 = vmatpush2.msra.mxu1 %v944_v25  ;;  %vm5626_vm0 = vcmp.eq.f32.partialorder %v5511_v60, 6.0  ;;  %vm5627_vm12 = vcmp.eq.f32.partialorder %v5414_v28, 4.0  ;;  %vm5212_vm5 = vcmp.eq.f32.partialorder %v5519_v19, 8.0  ;;  %vm5629_vm7 = vcmp.eq.f32.partialorder %v5511_v60, 5.0 }
 0x151   : > { %v1782_v12 = vsel %vm5626_vm0, %v5516_v44, %v1773_v11  ;;  %v785_v36 = vsel %vm5627_vm12, %v5421_v45, %v776_v15  ;;  %vm5630_vm15 = vcmp.eq.f32.partialorder %v5414_v28, 3.0  ;;  %v916_v25 = vsel %vm5212_vm5, %v5631_v51, 0.0  ;;  %2097 = vmatpush1.msra.mxu0 %v263_v29 }
 0x152   : > { %v1791_v50 = vsel %vm5629_vm7, %v5628_v26, %v1782_v12  ;;  %v794_v3 = vsel %vm5630_vm15, %v5423_v20, %v785_v36  ;;  %vm5216_vm0 = vcmp.eq.f32.partialorder %v5472_v40, 1.0  ;;  %vm5632_vm12 = vcmp.eq.f32.partialorder %v5414_v28, 2.0  ;;  %2098 = vmatprep.subr.mxu0 %v3639_v35 }
 0x153   : > { %2177 = vmatprep.subr.mxu1 %v1791_v50  ;;  %v803_v11 = vsel %vm5632_vm12, %v5426_v7, %v794_v3  ;;  %v925_v12 = vsel %vm5214_vm9, %v5522_v10, %v916_v25  ;;  %vm5633_vm7 = vcmp.eq.f32.partialorder %v5472_v40, 4.0  ;;  %vm5299_vm15 = vcmp.eq.f32.partialorder %v5425_v33, 7.0  ;;  %2099 = vmatpush2.msra.mxu0 %v3669_v58 }
 0x154   : > { %v1587_v15 = vsel %vm5633_vm7, %v5473_v0, 0.0  ;;  %vm5634_vm5 = vcmp.eq.f32.partialorder %v5519_v19, 6.0  ;;  %vm5635_vm4 = vcmp.eq.f32.partialorder %v5472_v40, 3.0  ;;  %vm5215_vm12 = vcmp.eq.f32.partialorder %v5425_v33, 8.0  ;;  %2100 = vmatprep.subr.mxu0 %v3702_v38 }
 0x155   : > { %v934_v50 = vsel %vm5634_vm5, %v5524_v56, %v925_v12  ;;  %v1596_v42 = vsel %vm5635_vm4, %v5477_v43, %v1587_v15  ;;  %vm5217_vm9 = vcmp.eq.f32.partialorder %v5476_v27, 1.0  ;;  %v1763_v36 = vsel %vm5215_vm12, %v5526_v39, 0.0  ;;  %2101 = vmatpush2.msra.mxu0 %v3724_v9 }
 0x156   : > { %v943_v29 = vsel %vm637_vm10, %v5528_v16, %v934_v50  ;;  %v1605_v35 = vsel %vm1461_vm8, %v5481_v41, %v1596_v42  ;;  %vm5636_vm4 = vcmp.eq.f32.partialorder %v5476_v27, 4.0  ;;  %v1772_v25 = vsel %vm5299_vm15, %v5530_v61, %v1763_v36  ;;  %2102 = vmatprep.subr.mxu0 %v3761_v8  ;;  %v5641_v36 = vld [vmem:[#allocation60_spill] sm:$0xff] }
 0x157   : > { %v739_v3 = vsel %vm5636_vm4, %v5479_v57, 0.0  ;;  %2178 = vmatpush2.msra.mxu1 %v943_v29  ;;  %v1614_v58 = vsel %vm5216_vm0, %v5485_v22, %v1605_v35  ;;  %vm5637_vm5 = vcmp.eq.f32.partialorder %v5476_v27, 3.0  ;;  %vm5220_vm7 = vcmp.eq.f32.partialorder %v5431_v34, 7.0  ;;  %2103 = vmatpush2.msra.mxu0 %v3794_v2  ;;  %v5643_v2 = vld [vmem:[#allocation89_spill] sm:$0xff] }
 0x158   : > { %v748_v12 = vsel %vm5637_vm5, %v5556_v4, %v739_v3  ;;  %vm5638_vm4 = vcmp.eq.f32.partialorder %v5425_v33, 6.0  ;;  %vm5218_vm12 = vcmp.eq.f32.partialorder %v5431_v34, 8.0  ;;  %vm5223_vm0 = vcmp.eq.f32.partialorder %v3109_v48, 1.0  ;;  %2104 = vmatprep.subr.mxu0 %v3816_v6 }
 0x159   : > { %v1781_v38 = vsel %vm5638_vm4, %v5435_v17, %v1772_v25  ;;  %v757_v15 = vsel %vm5219_vm11, %v5486_v32, %v748_v12  ;;  %vm5639_vm5 = vcmp.eq.f32.partialorder %v5425_v33, 5.0  ;;  %v915_v42 = vsel %vm5218_vm12, %v5436_v14, 0.0  ;;  %v5645_v12 = vld [vmem:[#allocation68_spill] sm:$0xff]  ;;  %2105 = vmatpush2.msra.mxu0 %v3848_v21  ;;  %v5651_v21 = vld [vmem:[#allocation70_spill] sm:$0xff]  ;;  %v5663_v32 = vld [vmem:[#allocation81_spill] sm:$0xff] }
 0x15a   : > { %v1790_v50 = vsel %vm5639_vm5, %v5437_v53, %v1781_v38  ;;  %v766_v9 = vsel %vm5217_vm9, %v5488_v5, %v757_v15  ;;  %v1586_v29 = vsel %vm1478_vm3, %v3165_v62, 0.0  ;;  %v924_v8 = vsel %vm5220_vm7, %v5536_v31, %v915_v42  ;;  %v5646_v15 = vld [vmem:[#allocation58_spill] sm:$0xff]  ;;  %v5648_v42 = vld [vmem:[#allocation71_spill] sm:$0xff]  ;;  %2106 = vmatprep.subr.mxu0 %v3871_v13 }
 0x15b   : > { %2179 = vmatprep.subr.mxu1 %v1790_v50  ;;  %vm5640_vm4 = vcmp.eq.f32.partialorder %v3109_v48, 3.0  ;;  %vm5307_vm5 = vcmp.eq.f32.partialorder %v2968_v37, 7.0  ;;  %vm5222_vm9 = vcmp.eq.f32.partialorder %v2968_v37, 8.0  ;;  %vm5642_vm12 = vcmp.eq.f32.partialorder %v5431_v34, 6.0  ;;  %2107 = vmatpush2.msra.mxu0 %v803_v11 }
 0x15c   : > { %v1595_v35 = vsel %vm5640_vm4, %v3173_v1, %v1586_v29  ;;  %v933_v3 = vsel %vm5642_vm12, %v5641_v36, %v924_v8  ;;  %vm5644_vm11 = vcmp.eq.f32.partialorder %v3109_v48, 2.0  ;;  %v1762_v38 = vsel %vm5222_vm9, %v5645_v12, 0.0  ;;  %v5649_v8 = vld [vmem:[#allocation92_spill] sm:$0xff]  ;;  %2108 = vmatprep.subr.mxu0 %v1614_v58 }
 0x15d   : > { %v1604_v25 = vsel %vm5644_vm11, %v5643_v2, %v1595_v35  ;;  %vm5231_vm4 = vcmp.eq.f32.partialorder %v3153_v55, 1.0  ;;  %vm5647_vm7 = vcmp.eq.f32.partialorder %v5431_v34, 5.0  ;;  %v1771_v29 = vsel %vm5307_vm5, %v5648_v42, %v1762_v38  ;;  %v5656_v38 = vld [vmem:[#allocation69_spill] sm:$0xff]  ;;  %v5660_v1 = vld [vmem:[#allocation8_spill] sm:$0xff]  ;;  %2109 = vmatpush2.msra.mxu0 %v766_v9 }
 0x15e   : > { %v942_v6 = vsel %vm5647_vm7, %v5646_v15, %v933_v3  ;;  %v1613_v50 = vsel %vm5223_vm0, %v5579_v52, %v1604_v25  ;;  %vm5650_vm11 = vcmp.eq.f32.partialorder %v3153_v55, 4.0  ;;  %vm5652_vm12 = vcmp.eq.f32.partialorder %v2968_v37, 6.0  ;;  %v5653_v3 = vld [vmem:[#allocation94_spill] sm:$0xff]  ;;  %v5655_v25 = vld [vmem:[#allocation72_spill] sm:$0xff] }
 0x15f   : > { %v738_v35 = vsel %vm5650_vm11, %v5649_v8, 0.0  ;;  %2180 = vmatpush2.msra.mxu1 %v942_v6  ;;  %v1780_v2 = vsel %vm5652_vm12, %v5651_v21, %v1771_v29  ;;  %vm5654_vm7 = vcmp.eq.f32.partialorder %v3153_v55, 3.0  ;;  %vm5237_vm9 = vcmp.eq.f32.partialorder %v5655_v25, 7.0  ;;  %v5657_v8 = vld [vmem:[#allocation93_spill] sm:$0xff]  ;;  %v5659_v6 = vld [vmem:[#allocation79_spill] sm:$0xff]  ;;  %v5666_v48 = vld [vmem:[#allocation80_spill] sm:$0xff]  ;;  %2110 = vmatprep.subr.mxu0 %v1613_v50 }
 0x160   : > { %v747_v5 = vsel %vm5654_vm7, %v5653_v3, %v738_v35  ;;  %vm5230_vm0 = vcmp.eq.f32.partialorder %v5655_v25, 8.0  ;;  %v1789_v52 = vsel %vm1483_vm14, %v5656_v38, %v1780_v2  ;;  %vm5658_vm11 = vcmp.eq.f32.partialorder %v3153_v55, 2.0  ;;  %v5662_v3 = vld [vmem:[#allocation91_spill] sm:$0xff] }
 0x161   : > { %v756_v13 = vsel %vm5658_vm11, %v5657_v8, %v747_v5  ;;  %v914_v29 = vsel %vm5230_vm0, %v5659_v6, 0.0  ;;  %vm5661_vm12 = vcmp.eq.f32.partialorder %v5594_v63, 4.0  ;;  %2181 = vmatprep.subr.mxu1 %v1789_v52  ;;  %vm5664_vm7 = vcmp.eq.f32.partialorder %v5594_v63, 3.0  ;;  %v5665_v8 = vld [vmem:[#allocation5_spill] sm:$0xff] }
 0x162   : > { %v1585_v35 = vsel %vm5661_vm12, %v5660_v1, 0.0  ;;  %v765_v11 = vsel %vm5231_vm4, %v5662_v3, %v756_v13  ;;  %v923_v2 = vsel %vm5237_vm9, %v5663_v32, %v914_v29  ;;  %vm5234_vm11 = vcmp.eq.f32.partialorder %v5665_v8, 8.0  ;;  %v5669_v13 = vld [vmem:[#allocation11_spill] sm:$0xff]  ;;  %v5675_v1 = vld [vmem:[#allocation14_spill] sm:$0xff] }
 0x163   : > { %v1594_v5 = vsel %vm5664_vm7, %v5603_v59, %v1585_v35  ;;  %vm5667_vm12 = vcmp.eq.f32.partialorder %v5655_v25, 6.0  ;;  %vm5668_vm0 = vcmp.eq.f32.partialorder %v5594_v63, 2.0  ;;  %v1761_v3 = vsel %vm5234_vm11, %v5669_v13, 0.0  ;;  %v5671_v35 = vld [vmem:[#allocation78_spill] sm:$0xff]  ;;  %v5673_v59 = vld [vmem:[#allocation7_spill] sm:$0xff]  ;;  %2111 = vmatpush2.msra.mxu0 %v765_v11 }
 0x164   : > { %v932_v58 = vsel %vm5667_vm12, %v5666_v48, %v923_v2  ;;  %v1603_v52 = vsel %vm5668_vm0, %v5606_v30, %v1594_v5  ;;  %vm5670_vm4 = vcmp.eq.f32.partialorder %v5498_v24, 4.0  ;;  %vm5672_vm7 = vcmp.eq.f32.partialorder %v5655_v25, 5.0  ;;  %v5677_v30 = vld [vmem:[#allocation21_spill] sm:$0xff] }
 0x165   : > { %v737_v29 = vsel %vm5670_vm4, %v5614_v18, 0.0  ;;  %v941_v9 = vsel %vm5672_vm7, %v5671_v35, %v932_v58  ;;  %vm5674_vm12 = vcmp.eq.f32.partialorder %v5594_v63, 1.0  ;;  %vm5676_vm0 = vcmp.eq.f32.partialorder %v5665_v8, 7.0  ;;  %v5679_v18 = vld [vmem:[#allocation13_spill] sm:$0xff]  ;;  %v5682_v63 = vld [vmem:[#allocation16_spill] sm:$0xff] }
 0x166   : > { %v1612_v2 = vsel %vm5674_vm12, %v5673_v59, %v1603_v52  ;;  %v1770_v5 = vsel %vm5676_vm0, %v5675_v1, %v1761_v3  ;;  %vm5678_vm11 = vcmp.eq.f32.partialorder %v5498_v24, 3.0  ;;  %2182 = vmatpush2.msra.mxu1 %v941_v9  ;;  %vm5680_vm4 = vcmp.eq.f32.partialorder %v5665_v8, 6.0  ;;  %v5684_v52 = vld [vmem:[#allocation12_spill] sm:$0xff]  ;;  %v5687_v9 = vld [vmem:[#allocation23_spill] sm:$0xff] }
 0x167   : > { %v746_v13 = vsel %vm5678_vm11, %v5677_v30, %v737_v29  ;;  %v1779_v50 = vsel %vm5680_vm4, %v5679_v18, %v1770_v5  ;;  %vm5681_vm7 = vcmp.eq.f32.partialorder %v5498_v24, 2.0  ;;  %vm5241_vm12 = vcmp.eq.f32.partialorder %v5682_v63, 8.0  ;;  %2112 = vmatprep.subr.mxu0 %v1612_v2  ;;  %v5717_v30 = vld [vmem:[#allocation43_spill] sm:$0xff] }
 0x168   : > { %v755_v58 = vsel %vm5681_vm7, %v5618_v46, %v746_v13  ;;  %vm5683_vm9 = vcmp.eq.f32.partialorder %v5511_v60, 4.0  ;;  %vm5685_vm11 = vcmp.eq.f32.partialorder %v5665_v8, 5.0  ;;  %vm5686_vm0 = vcmp.eq.f32.partialorder %v5498_v24, 1.0  ;;  %v5692_v46 = vld [vmem:[#allocation19_spill] sm:$0xff] }
 0x169   : > { %v1584_v3 = vsel %vm5683_vm9, %v5621_v49, 0.0  ;;  %v1788_v11 = vsel %vm5685_vm11, %v5684_v52, %v1779_v50  ;;  %v764_v29 = vsel %vm5686_vm0, %v5622_v47, %v755_v58  ;;  %v913_v5 = vsel %vm5241_vm12, %v5687_v9, 0.0  ;;  %v5689_v49 = vld [vmem:[#allocation26_spill] sm:$0xff]  ;;  %v5694_v47 = vld [vmem:[#allocation25_spill] sm:$0xff] }
 0x16a   : > { %vm5688_vm4 = vcmp.eq.f32.partialorder %v5511_v60, 3.0  ;;  %2183 = vmatprep.subr.mxu1 %v1788_v11  ;;  %2113 = vmatpush2.msra.mxu0 %v764_v29  ;;  %vm5690_vm9 = vcmp.eq.f32.partialorder %v5682_v63, 7.0  ;;  %vm5691_vm7 = vcmp.eq.f32.partialorder %v5511_v60, 2.0  ;;  %vm5247_vm11 = vcmp.eq.f32.partialorder %v5692_v46, 8.0  ;;  %v5697_v29 = vld [vmem:[#allocation31_spill] sm:$0xff] }
 0x16b   : > { %v1593_v13 = vsel %vm5688_vm4, %v5623_v54, %v1584_v3  ;;  %v922_v2 = vsel %vm5690_vm9, %v5689_v49, %v913_v5  ;;  %vm5693_vm0 = vcmp.eq.f32.partialorder %v5519_v19, 4.0  ;;  %vm5695_vm12 = vcmp.eq.f32.partialorder %v5682_v63, 6.0  ;;  %v5701_v54 = vld [vmem:[#allocation34_spill] sm:$0xff] }
 0x16c   : > { %v1602_v50 = vsel %vm5691_vm7, %v5516_v44, %v1593_v13  ;;  %v736_v58 = vsel %vm5693_vm0, %v5631_v51, 0.0  ;;  %v931_v3 = vsel %vm5695_vm12, %v5694_v47, %v922_v2  ;;  %vm5696_vm4 = vcmp.eq.f32.partialorder %v5511_v60, 1.0  ;;  %v5699_v44 = vld [vmem:[#allocation24_spill] sm:$0xff]  ;;  %v5705_v60 = vld [vmem:[#allocation33_spill] sm:$0xff] }
 0x16d   : > { %v1611_v11 = vsel %vm5696_vm4, %v5628_v26, %v1602_v50  ;;  %v1760_v5 = vsel %vm5247_vm11, %v5697_v29, 0.0  ;;  %vm5698_vm9 = vcmp.eq.f32.partialorder %v5519_v19, 3.0  ;;  %vm5700_vm7 = vcmp.eq.f32.partialorder %v5682_v63, 5.0  ;;  %v5704_v26 = vld [vmem:[#allocation35_spill] sm:$0xff] }
 0x16e   : > { %v745_v13 = vsel %vm5698_vm9, %v5522_v10, %v736_v58  ;;  %v940_v51 = vsel %vm5700_vm7, %v5699_v44, %v931_v3  ;;  %2114 = vmatprep.subr.mxu0 %v1611_v11  ;;  %vm5702_vm12 = vcmp.eq.f32.partialorder %v5692_v46, 7.0  ;;  %vm5703_vm0 = vcmp.eq.f32.partialorder %v5519_v19, 2.0  ;;  %v5708_v11 = vld [vmem:[#allocation42_spill] sm:$0xff] }
 0x16f   : > { %v1769_v2 = vsel %vm5702_vm12, %v5701_v54, %v1760_v5  ;;  %v754_v50 = vsel %vm5703_vm0, %v5524_v56, %v745_v13  ;;  %vm5254_vm4 = vcmp.eq.f32.partialorder %v5704_v26, 8.0  ;;  %2184 = vmatpush2.msra.mxu1 %v940_v51  ;;  %vm5706_vm11 = vcmp.eq.f32.partialorder %v5692_v46, 6.0  ;;  %v5710_v13 = vld [vmem:[#allocation32_spill] sm:$0xff] }
 0x170   : > { %v1778_v58 = vsel %vm5706_vm11, %v5705_v60, %v1769_v2  ;;  %vm5707_vm9 = vcmp.eq.f32.partialorder %v5519_v19, 1.0  ;;  %v912_v10 = vsel %vm5254_vm4, %v5708_v11, 0.0  ;;  %vm5709_vm7 = vcmp.eq.f32.partialorder %v5425_v33, 4.0  ;;  %v5712_v56 = vld [vmem:[#allocation44_spill] sm:$0xff] }
 0x171   : > { %v763_v3 = vsel %vm5707_vm9, %v5528_v16, %v754_v50  ;;  %v1583_v5 = vsel %vm5709_vm7, %v5526_v39, 0.0  ;;  %vm5711_vm12 = vcmp.eq.f32.partialorder %v5692_v46, 5.0  ;;  %vm5713_vm11 = vcmp.eq.f32.partialorder %v5704_v26, 7.0  ;;  %v5715_v16 = vld [vmem:[#allocation50_spill] sm:$0xff] }
 0x172   : > { %v1787_v51 = vsel %vm5711_vm12, %v5710_v13, %v1778_v58  ;;  %2115 = vmatpush2.msra.mxu0 %v763_v3  ;;  %v921_v2 = vsel %vm5713_vm11, %v5712_v56, %v912_v10  ;;  %vm5714_vm0 = vcmp.eq.f32.partialorder %v5425_v33, 3.0  ;;  %vm5716_vm9 = vcmp.eq.f32.partialorder %v2854_v23, 8.0  ;;  %v5720_v3 = vld [vmem:[#allocation53_spill] sm:$0xff] }
 0x173   : > { %v1592_v50 = vsel %vm5714_vm0, %v5530_v61, %v1583_v5  ;;  %v1759_v19 = vsel %vm5716_vm9, %v5715_v16, 0.0  ;;  %2185 = vmatprep.subr.mxu1 %v1787_v51  ;;  %vm5718_vm7 = vcmp.eq.f32.partialorder %v5704_v26, 6.0  ;;  %vm5719_vm12 = vcmp.eq.f32.partialorder %v5425_v33, 2.0  ;;  %v5723_v61 = vld [vmem:[#allocation41_spill] sm:$0xff]  ;;  %v5726_v16 = vld [vmem:[#allocation52_spill] sm:$0xff] }
 0x174   : > { %v930_v39 = vsel %vm5718_vm7, %v5717_v30, %v921_v2  ;;  %v1601_v58 = vsel %vm5719_vm12, %v5435_v17, %v1592_v50  ;;  %vm5721_vm11 = vcmp.eq.f32.partialorder %v2854_v23, 7.0  ;;  %vm5722_vm0 = vcmp.eq.f32.partialorder %v5431_v34, 4.0  ;;  %v5729_v17 = vld [vmem:[#allocation51_spill] sm:$0xff] }
 0x175   : > { %v1768_v10 = vsel %vm5721_vm11, %v5720_v3, %v1759_v19  ;;  %v735_v5 = vsel %vm5722_vm0, %v5436_v14, 0.0  ;;  %vm5724_vm9 = vcmp.eq.f32.partialorder %v5704_v26, 5.0  ;;  %vm5725_vm4 = vcmp.eq.f32.partialorder %v5425_v33, 1.0  ;;  %v5732_v33 = vld [vmem:[#allocation62_spill] sm:$0xff] }
 0x176   : > { %v939_v51 = vsel %vm5724_vm9, %v5723_v61, %v930_v39  ;;  %v1610_v2 = vsel %vm5725_vm4, %v5437_v53, %v1601_v58  ;;  %vm5727_vm7 = vcmp.eq.f32.partialorder %v2854_v23, 6.0  ;;  %vm5728_vm12 = vcmp.eq.f32.partialorder %v5431_v34, 3.0 }
 0x177   : > { %v1777_v50 = vsel %vm5727_vm7, %v5726_v16, %v1768_v10  ;;  %v744_v19 = vsel %vm5728_vm12, %v5536_v31, %v735_v5  ;;  %2186 = vmatpush2.msra.mxu1 %v939_v51  ;;  %2116 = vmatprep.subr.mxu0 %v1610_v2  ;;  %vm5730_vm11 = vcmp.eq.f32.partialorder %v2854_v23, 5.0  ;;  %vm5731_vm0 = vcmp.eq.f32.partialorder %v5431_v34, 2.0 }
 0x178   : > { %v1786_v14 = vsel %vm5730_vm11, %v5729_v17, %v1777_v50  ;;  %v753_v39 = vsel %vm5731_vm0, %v5641_v36, %v744_v19  ;;  %v911_v58 = vsel %vm659_vm2, %v5732_v33, 0.0  ;;  %vm5733_vm4 = vcmp.eq.f32.partialorder %v2968_v37, 4.0 }
 0x179   : > { %v1582_v10 = vsel %vm5733_vm4, %v5645_v12, 0.0  ;;  %2187 = vmatprep.subr.mxu1 %v1786_v14  ;;  %vm5734_vm9 = vcmp.eq.f32.partialorder %v5431_v34, 1.0  ;;  %vm5735_vm7 = vcmp.eq.f32.partialorder %v5414_v28, 7.0  ;;  %vm5736_vm12 = vcmp.eq.f32.partialorder %v2968_v37, 3.0 }
 0x17a   : > { %v762_v5 = vsel %vm5734_vm9, %v5646_v15, %v753_v39  ;;  %v920_v51 = vsel %vm5735_vm7, %v5421_v45, %v911_v58  ;;  %v1591_v2 = vsel %vm5736_vm12, %v5648_v42, %v1582_v10  ;;  %vm5737_vm11 = vcmp.eq.f32.partialorder %v5472_v40, 7.0 }
 0x17b   : > { %v1722_v50 = vsel %vm5737_vm11, %v5473_v0, 0.0  ;;  %2117 = vmatpush2.msra.mxu0 %v762_v5  ;;  %vm5738_vm0 = vcmp.eq.f32.partialorder %v5414_v28, 6.0  ;;  %vm5739_vm4 = vcmp.eq.f32.partialorder %v2968_v37, 2.0  ;;  %vm5740_vm9 = vcmp.eq.f32.partialorder %v5472_v40, 6.0 }
 0x17c   : > { %v929_v14 = vsel %vm5738_vm0, %v5423_v20, %v920_v51  ;;  %v1600_v19 = vsel %vm5739_vm4, %v5651_v21, %v1591_v2  ;;  %v1731_v39 = vsel %vm5740_vm9, %v5477_v43, %v1722_v50  ;;  %vm5741_vm7 = vcmp.eq.f32.partialorder %v5655_v25, 4.0 }
 0x17d   : > { %v734_v58 = vsel %vm5741_vm7, %v5659_v6, 0.0  ;;  %vm5742_vm12 = vcmp.eq.f32.partialorder %v5414_v28, 5.0  ;;  %vm5743_vm11 = vcmp.eq.f32.partialorder %v2968_v37, 1.0  ;;  %vm5744_vm0 = vcmp.eq.f32.partialorder %v5472_v40, 5.0 }
 0x17e   : > { %v938_v10 = vsel %vm5742_vm12, %v5426_v7, %v929_v14  ;;  %v1609_v5 = vsel %vm5743_vm11, %v5656_v38, %v1600_v19  ;;  %v1740_v51 = vsel %vm5744_vm0, %v5481_v41, %v1731_v39  ;;  %vm5745_vm4 = vcmp.eq.f32.partialorder %v5655_v25, 3.0  ;;  %v5749_v38 = vld [vmem:[#allocation87_spill] sm:$0xff] }
 0x17f   : > { %v743_v2 = vsel %vm5745_vm4, %v5663_v32, %v734_v58  ;;  %2188 = vmatpush2.msra.mxu1 %v938_v10  ;;  %2118 = vmatprep.subr.mxu0 %v1609_v5  ;;  %vm5746_vm9 = vcmp.eq.f32.partialorder %v5472_v40, 4.0  ;;  %vm5747_vm7 = vcmp.eq.f32.partialorder %v5655_v25, 2.0  ;;  %vm5748_vm12 = vcmp.eq.f32.partialorder %v5476_v27, 7.0  ;;  %v5780_v32 = vld [vmem:[#allocation91_spill] sm:$0xff] }
 0x180   : > { %v1749_v50 = vsel %vm5746_vm9, %v5485_v22, %v1740_v51  ;;  %v752_v14 = vsel %vm5747_vm7, %v5666_v48, %v743_v2  ;;  %v874_v19 = vsel %vm5748_vm12, %v5479_v57, 0.0  ;;  %vm5750_vm11 = vcmp.eq.f32.partialorder %v5665_v8, 3.0  ;;  %v5754_v51 = vld [vmem:[#allocation84_spill] sm:$0xff]  ;;  %v5756_v48 = vld [vmem:[#allocation85_spill] sm:$0xff] }
 0x181   : > { %v1590_v39 = vsel %vm5750_vm11, %v5675_v1, %v5749_v38  ;;  %2189 = vmatprep.subr.mxu1 %v1749_v50  ;;  %vm5751_vm0 = vcmp.eq.f32.partialorder %v5655_v25, 1.0  ;;  %vm5752_vm4 = vcmp.eq.f32.partialorder %v5476_v27, 6.0  ;;  %vm5753_vm9 = vcmp.eq.f32.partialorder %v5665_v8, 2.0  ;;  %v5764_v1 = vld [vmem:[#allocation89_spill] sm:$0xff] }
 0x182   : > { %v761_v58 = vsel %vm5751_vm0, %v5671_v35, %v752_v14  ;;  %v883_v10 = vsel %vm5752_vm4, %v5556_v4, %v874_v19  ;;  %v1599_v5 = vsel %vm5753_vm9, %v5679_v18, %v1590_v39  ;;  %vm5755_vm7 = vcmp.eq.f32.partialorder %v5754_v51, 7.0  ;;  %v5759_v14 = vld [vmem:[#allocation90_spill] sm:$0xff]  ;;  %v5762_v18 = vld [vmem:[#allocation83_spill] sm:$0xff]  ;;  %v5778_v35 = vld [vmem:[#allocation4_spill] sm:$0xff] }
 0x183   : > { %v1721_v2 = vsel %vm5755_vm7, %v3165_v62, 0.0  ;;  %2119 = vmatpush2.msra.mxu0 %v761_v58  ;;  %vm5757_vm12 = vcmp.eq.f32.partialorder %v5476_v27, 5.0  ;;  %vm5758_vm11 = vcmp.eq.f32.partialorder %v5665_v8, 1.0  ;;  %vm5760_vm0 = vcmp.eq.f32.partialorder %v5754_v51, 6.0  ;;  %v5768_v8 = vld [vmem:[#allocation88_spill] sm:$0xff] }
 0x184   : > { %v892_v38 = vsel %vm5757_vm12, %v5756_v48, %v883_v10  ;;  %v1608_v50 = vsel %vm5758_vm11, %v5684_v52, %v1599_v5  ;;  %v1730_v19 = vsel %vm5760_vm0, %v5759_v14, %v1721_v2  ;;  %vm5761_vm4 = vcmp.eq.f32.partialorder %v5682_v63, 4.0  ;;  %v5767_v52 = vld [vmem:[#allocation92_spill] sm:$0xff] }
 0x185   : > { %v733_v39 = vsel %vm5761_vm4, %v5687_v9, 0.0  ;;  %vm5763_vm9 = vcmp.eq.f32.partialorder %v5476_v27, 4.0  ;;  %2120 = vmatprep.subr.mxu0 %v1608_v50  ;;  %vm5765_vm7 = vcmp.eq.f32.partialorder %v5754_v51, 5.0  ;;  %vm5766_vm12 = vcmp.eq.f32.partialorder %v5682_v63, 3.0  ;;  %v5770_v50 = vld [vmem:[#allocation94_spill] sm:$0xff] }
 0x186   : > { %v901_v58 = vsel %vm5763_vm9, %v5762_v18, %v892_v38  ;;  %v1739_v10 = vsel %vm5765_vm7, %v5764_v1, %v1730_v19  ;;  %v742_v5 = vsel %vm5766_vm12, %v5689_v49, %v733_v39  ;;  %v873_v2 = vsel %vm657_vm13, %v5767_v52, 0.0  ;;  %v5774_v49 = vld [vmem:[#allocation93_spill] sm:$0xff] }
 0x187   : > { %2190 = vmatpush2.msra.mxu1 %v901_v58  ;;  %v1748_v9 = vsel %vm1478_vm3, %v5768_v8, %v1739_v10  ;;  %vm5769_vm11 = vcmp.eq.f32.partialorder %v5682_v63, 2.0  ;;  %vm5771_vm0 = vcmp.eq.f32.partialorder %v3153_v55, 6.0  ;;  %vm5772_vm4 = vcmp.eq.f32.partialorder %v5692_v46, 4.0 }
 0x188   : > { %v751_v38 = vsel %vm5769_vm11, %v5694_v47, %v742_v5  ;;  %v882_v19 = vsel %vm5771_vm0, %v5770_v50, %v873_v2  ;;  %v1580_v39 = vsel %vm5772_vm4, %v5697_v29, 0.0  ;;  %2191 = vmatprep.subr.mxu1 %v1748_v9  ;;  %vm5773_vm9 = vcmp.eq.f32.partialorder %v5682_v63, 1.0  ;;  %v5777_v47 = vld [vmem:[#allocation8_spill] sm:$0xff]  ;;  %v5783_v29 = vld [vmem:[#allocation10_spill] sm:$0xff] }
 0x189   : > { %v760_v58 = vsel %vm5773_vm9, %v5699_v44, %v751_v38  ;;  %vm5775_vm3 = vcmp.eq.f32.partialorder %v3153_v55, 5.0  ;;  %vm5776_vm7 = vcmp.eq.f32.partialorder %v5692_v46, 3.0  ;;  %vm5779_vm12 = vcmp.eq.f32.partialorder %v5778_v35, 7.0  ;;  %v5801_v44 = vld [vmem:[#allocation18_spill] sm:$0xff] }
 0x18a   : > { %v891_v10 = vsel %vm5775_vm3, %v5774_v49, %v882_v19  ;;  %v1589_v5 = vsel %vm5776_vm7, %v5701_v54, %v1580_v39  ;;  %v1720_v2 = vsel %vm5779_vm12, %v5777_v47, 0.0  ;;  %2121 = vmatpush2.msra.mxu0 %v760_v58  ;;  %vm5781_vm11 = vcmp.eq.f32.partialorder %v3153_v55, 4.0  ;;  %v5787_v54 = vld [vmem:[#allocation9_spill] sm:$0xff] }
 0x18b   : > { %v900_v9 = vsel %vm5781_vm11, %v5780_v32, %v891_v10  ;;  %vm5782_vm0 = vcmp.eq.f32.partialorder %v5692_v46, 2.0  ;;  %vm5784_vm4 = vcmp.eq.f32.partialorder %v5778_v35, 6.0  ;;  %vm5785_vm9 = vcmp.eq.f32.partialorder %v5704_v26, 4.0 }
 0x18c   : > { %v1598_v38 = vsel %vm5782_vm0, %v5705_v60, %v1589_v5  ;;  %v1729_v19 = vsel %vm5784_vm4, %v5783_v29, %v1720_v2  ;;  %v732_v39 = vsel %vm5785_vm9, %v5708_v11, 0.0  ;;  %2192 = vmatpush2.msra.mxu1 %v900_v9  ;;  %vm5786_vm3 = vcmp.eq.f32.partialorder %v5692_v46, 1.0  ;;  %v5789_v60 = vld [vmem:[#allocation17_spill] sm:$0xff]  ;;  %v5794_v11 = vld [vmem:[#allocation50_spill] sm:$0xff]  ;;  %v5803_v46 = vld [vmem:[#allocation15_spill] sm:$0xff] }
 0x18d   : > { %v1607_v58 = vsel %vm5786_vm3, %v5710_v13, %v1598_v38  ;;  %vm5788_vm7 = vcmp.eq.f32.partialorder %v5778_v35, 5.0  ;;  %v741_v5 = vsel %vm615_vm6, %v5712_v56, %v732_v39  ;;  %v872_v2 = vsel %vm5295_vm1, %v5789_v60, 0.0  ;;  %v5792_v13 = vld [vmem:[#allocation21_spill] sm:$0xff]  ;;  %v5797_v56 = vld [vmem:[#allocation20_spill] sm:$0xff] }
 0x18e   : > { %v1738_v10 = vsel %vm5788_vm7, %v5787_v54, %v1729_v19  ;;  %2122 = vmatprep.subr.mxu0 %v1607_v58  ;;  %vm5790_vm12 = vcmp.eq.f32.partialorder %v5778_v35, 4.0  ;;  %vm5791_vm11 = vcmp.eq.f32.partialorder %v5704_v26, 2.0  ;;  %vm5793_vm0 = vcmp.eq.f32.partialorder %v5498_v24, 6.0 }
 0x18f   : > { %v1747_v9 = vsel %vm5790_vm12, %v5673_v59, %v1738_v10  ;;  %v750_v38 = vsel %vm5791_vm11, %v5717_v30, %v741_v5  ;;  %v881_v19 = vsel %vm5793_vm0, %v5792_v13, %v872_v2  ;;  %vm5795_vm6 = vcmp.eq.f32.partialorder %v2854_v23, 4.0  ;;  %v5800_v30 = vld [vmem:[#allocation28_spill] sm:$0xff] }
 0x190   : > { %v1579_v39 = vsel %vm5795_vm6, %v5794_v11, 0.0  ;;  %2193 = vmatprep.subr.mxu1 %v1747_v9  ;;  %vm5796_vm4 = vcmp.eq.f32.partialorder %v5704_v26, 1.0  ;;  %vm5798_vm9 = vcmp.eq.f32.partialorder %v5498_v24, 5.0  ;;  %vm5799_vm3 = vcmp.eq.f32.partialorder %v2854_v23, 3.0  ;;  %v5814_v11 = vld [vmem:[#allocation22_spill] sm:$0xff]  ;;  %v5816_v26 = vld [vmem:[#allocation27_spill] sm:$0xff] }
 0x191   : > { %v759_v58 = vsel %vm5796_vm4, %v5723_v61, %v750_v38  ;;  %v890_v10 = vsel %vm5798_vm9, %v5797_v56, %v881_v19  ;;  %v1588_v5 = vsel %vm5799_vm3, %v5720_v3, %v1579_v39  ;;  %vm5802_vm7 = vcmp.eq.f32.partialorder %v5801_v44, 7.0  ;;  %v5806_v61 = vld [vmem:[#allocation30_spill] sm:$0xff]  ;;  %v5810_v3 = vld [vmem:[#allocation29_spill] sm:$0xff] }
 0x192   : > { %v1719_v2 = vsel %vm5802_vm7, %v5800_v30, 0.0  ;;  %2123 = vmatpush2.msra.mxu0 %v759_v58  ;;  %vm5804_vm12 = vcmp.eq.f32.partialorder %v5498_v24, 4.0  ;;  %vm5805_vm11 = vcmp.eq.f32.partialorder %v2854_v23, 2.0  ;;  %vm5807_vm0 = vcmp.eq.f32.partialorder %v5801_v44, 6.0 }
 0x193   : > { %v899_v9 = vsel %vm5804_vm12, %v5803_v46, %v890_v10  ;;  %v1597_v38 = vsel %vm5805_vm11, %v5726_v16, %v1588_v5  ;;  %v1728_v19 = vsel %vm5807_vm0, %v5806_v61, %v1719_v2  ;;  %vm5808_vm6 = vcmp.eq.f32.partialorder %v5414_v28, 4.0  ;;  %v5813_v16 = vld [vmem:[#allocation37_spill] sm:$0xff] }
 0x194   : > { %v731_v39 = vsel %vm5808_vm6, %v5732_v33, 0.0  ;;  %2194 = vmatpush2.msra.mxu1 %v899_v9  ;;  %vm5809_vm4 = vcmp.eq.f32.partialorder %v2854_v23, 1.0  ;;  %vm5811_vm9 = vcmp.eq.f32.partialorder %v5801_v44, 5.0  ;;  %vm5812_vm3 = vcmp.eq.f32.partialorder %v5414_v28, 3.0 }
 0x195   : > { %v1606_v58 = vsel %vm5809_vm4, %v5729_v17, %v1597_v38  ;;  %v1737_v10 = vsel %vm5811_vm9, %v5810_v3, %v1728_v19  ;;  %v740_v5 = vsel %vm5812_vm3, %v5421_v45, %v731_v39  ;;  %vm5815_vm7 = vcmp.eq.f32.partialorder %v5814_v11, 7.0  ;;  %v5819_v17 = vld [vmem:[#allocation39_spill] sm:$0xff] }
 0x196   : > { %v871_v2 = vsel %vm5815_vm7, %v5813_v16, 0.0  ;;  %2124 = vmatprep.subr.mxu0 %v1606_v58  ;;  %vm5817_vm12 = vcmp.eq.f32.partialorder %v5801_v44, 4.0  ;;  %vm5818_vm11 = vcmp.eq.f32.partialorder %v5414_v28, 2.0  ;;  %vm5820_vm0 = vcmp.eq.f32.partialorder %v5814_v11, 6.0  ;;  %v5822_v58 = vld [vmem:[#allocation38_spill] sm:$0xff] }
 0x197   : > { %v1746_v9 = vsel %vm5817_vm12, %v5816_v26, %v1737_v10  ;;  %v749_v38 = vsel %vm5818_vm11, %v5423_v20, %v740_v5  ;;  %v880_v19 = vsel %vm5820_vm0, %v5819_v17, %v871_v2  ;;  %vm1443_vm6 = vcmp.eq.f32.partialorder %v5472_v40, 0.0  ;;  %v5824_v5 = vld [vmem:[#allocation45_spill] sm:$0xff]  ;;  %v5825_v20 = vld [vmem:[#allocation40_spill] sm:$0xff] }
 0x198   : > { %2195 = vmatprep.subr.mxu1 %v1746_v9  ;;  %vm5821_vm4 = vcmp.eq.f32.partialorder %v5414_v28, 1.0  ;;  %v889_v45 = vsel %vm637_vm10, %v5822_v58, %v880_v19  ;;  %vm5823_vm9 = vcmp.eq.f32.partialorder %v5472_v40, 3.0  ;;  %v1718_v33 = vsel %vm5299_vm15, %v5824_v5, 0.0  ;;  %v5826_v2 = vld [vmem:[#allocation36_spill] sm:$0xff] }
 0x199   : > { %v758_v39 = vsel %vm5821_vm4, %v5426_v7, %v749_v38  ;;  %v1542_v10 = vsel %vm5823_vm9, %v5473_v0, 0.0  ;;  %vm5827_vm3 = vcmp.eq.f32.partialorder %v5814_v11, 4.0  ;;  %v5828_v7 = vld [vmem:[#allocation48_spill] sm:$0xff]  ;;  %vm5829_vm10 = vcmp.eq.f32.partialorder %v5825_v20, 6.0 }
 0x19a   : > { %2125 = vmatpush2.msra.mxu0 %v758_v39  ;;  %v898_v9 = vsel %vm5827_vm3, %v5826_v2, %v889_v45  ;;  %v1551_v38 = vsel %vm1461_vm8, %v5477_v43, %v1542_v10  ;;  %v1727_v19 = vsel %vm5829_vm10, %v5828_v7, %v1718_v33  ;;  %vm595_vm7 = vcmp.eq.f32.partialorder %v5476_v27, 0.0  ;;  %v5831_v39 = vld [vmem:[#allocation47_spill] sm:$0xff]  ;;  %v5834_v10 = vld [vmem:[#allocation57_spill] sm:$0xff] }
 0x19b   : > { %2196 = vmatpush2.msra.mxu1 %v898_v9  ;;  %vm5830_vm12 = vcmp.eq.f32.partialorder %v5472_v40, 1.0  ;;  %vm5832_vm11 = vcmp.eq.f32.partialorder %v5825_v20, 5.0  ;;  %vm5833_vm0 = vcmp.eq.f32.partialorder %v5476_v27, 3.0  ;;  %vm5835_vm8 = vcmp.eq.f32.partialorder %v5431_v34, 7.0 }
 0x19c   : > { %v1560_v0 = vsel %vm5830_vm12, %v5481_v41, %v1551_v38  ;;  %v1736_v28 = vsel %vm5832_vm11, %v5831_v39, %v1727_v19  ;;  %v694_v45 = vsel %vm5833_vm0, %v5479_v57, 0.0  ;;  %v870_v43 = vsel %vm5835_vm8, %v5834_v10, 0.0 }
 0x19d   : > { %v1569_v33 = vsel %vm1443_vm6, %v5485_v22, %v1560_v0  ;;  %vm5836_vm4 = vcmp.eq.f32.partialorder %v5825_v20, 4.0  ;;  %vm5837_vm9 = vcmp.eq.f32.partialorder %v5476_v27, 2.0  ;;  %vm5838_vm3 = vcmp.eq.f32.partialorder %v5431_v34, 6.0 }
 0x19e   : > { %v1745_v9 = vsel %vm5836_vm4, %v5437_v53, %v1736_v28  ;;  %v703_v38 = vsel %vm5837_vm9, %v5556_v4, %v694_v45  ;;  %v879_v19 = vsel %vm5838_vm3, %v5536_v31, %v870_v43  ;;  %2126 = vmatprep.subr.mxu0 %v1569_v33  ;;  %vm5839_vm10 = vcmp.eq.f32.partialorder %v5476_v27, 1.0 }
 0x19f   : > { %2197 = vmatprep.subr.mxu1 %v1745_v9  ;;  %v712_v41 = vsel %vm5839_vm10, %v5756_v48, %v703_v38  ;;  %vm5840_vm6 = vcmp.eq.f32.partialorder %v5431_v34, 5.0  ;;  %vm1442_vm12 = vcmp.eq.f32.partialorder %v5754_v51, 0.0  ;;  %vm5841_vm11 = vcmp.eq.f32.partialorder %v5754_v51, 3.0  ;;  %v5854_v48 = vld [vmem:[#allocation80_spill] sm:$0xff] }
 0x1a0   : > { %v888_v0 = vsel %vm5840_vm6, %v5641_v36, %v879_v19  ;;  %v1541_v28 = vsel %vm5841_vm11, %v3165_v62, 0.0  ;;  %v721_v43 = vsel %vm595_vm7, %v5762_v18, %v712_v41  ;;  %vm5842_vm0 = vcmp.eq.f32.partialorder %v5431_v34, 4.0  ;;  %v5852_v18 = vld [vmem:[#allocation81_spill] sm:$0xff] }
 0x1a1   : > { %v897_v45 = vsel %vm5842_vm0, %v5646_v15, %v888_v0  ;;  %vm5843_vm8 = vcmp.eq.f32.partialorder %v5754_v51, 2.0  ;;  %v1717_v9 = vsel %vm5307_vm5, %v5645_v12, 0.0  ;;  %2127 = vmatpush2.msra.mxu0 %v721_v43  ;;  %vm5844_vm4 = vcmp.eq.f32.partialorder %v5754_v51, 1.0 }
 0x1a2   : > { %v1550_v33 = vsel %vm5843_vm8, %v5759_v14, %v1541_v28  ;;  %2198 = vmatpush2.msra.mxu1 %v897_v45  ;;  %vm5845_vm7 = vcmp.eq.f32.partialorder %v2968_v37, 6.0  ;;  %vm594_vm9 = vcmp.eq.f32.partialorder %v3153_v55, 0.0  ;;  %vm5846_vm3 = vcmp.eq.f32.partialorder %v3153_v55, 3.0 }
 0x1a3   : > { %v1559_v38 = vsel %vm5844_vm4, %v5764_v1, %v1550_v33  ;;  %v1726_v41 = vsel %vm5845_vm7, %v5648_v42, %v1717_v9  ;;  %v693_v19 = vsel %vm5846_vm3, %v5767_v52, 0.0  ;;  %vm5847_vm10 = vcmp.eq.f32.partialorder %v3153_v55, 2.0  ;;  %v5849_v33 = vld [vmem:[#allocation69_spill] sm:$0xff] }
 0x1a4   : > { %v1568_v0 = vsel %vm1442_vm12, %v5768_v8, %v1559_v38  ;;  %v1735_v28 = vsel %vm1483_vm14, %v5651_v21, %v1726_v41  ;;  %v702_v43 = vsel %vm5847_vm10, %v5770_v50, %v693_v19  ;;  %vm5848_vm6 = vcmp.eq.f32.partialorder %v5655_v25, 7.0  ;;  %v1894_v19 = vld [vmem:[%s4900_s1] sm:$0xff] }
 0x1a5   : > { %v869_v45 = vsel %vm5848_vm6, %v5659_v6, 0.0  ;;  %2128 = vmatprep.subr.mxu0 %v1568_v0  ;;  %vm5850_vm11 = vcmp.eq.f32.partialorder %v2968_v37, 4.0  ;;  %vm5851_vm12 = vcmp.eq.f32.partialorder %v3153_v55, 1.0  ;;  %vm5853_vm14 = vcmp.eq.f32.partialorder %v5655_v25, 6.0 }
 0x1a6   : > { %v1744_v9 = vsel %vm5850_vm11, %v5849_v33, %v1735_v28  ;;  %v711_v38 = vsel %vm5851_vm12, %v5774_v49, %v702_v43  ;;  %v878_v41 = vsel %vm5853_vm14, %v5852_v18, %v869_v45  ;;  %vm1523_vm0 = vcmp.eq.f32.partialorder %v5754_v51, 9.0  ;;  %v1896_v43 = vld [vmem:[%s4900_s1 + $0x10] sm:$0xff] }
 0x1a7   : > { %2199 = vmatprep.subr.mxu1 %v1744_v9  ;;  %v720_v0 = vsel %vm594_vm9, %v5780_v32, %v711_v38  ;;  %vm5855_vm8 = vcmp.eq.f32.partialorder %v5655_v25, 5.0  ;;  %vm1532_vm4 = vcmp.eq.f32.partialorder %v5754_v51, 10.0  ;;  %vm675_vm7 = vcmp.eq.f32.partialorder %v3153_v55, 9.0  ;;  %v5856_v45 = vld [vmem:[#allocation78_spill] sm:$0xff] }
 0x1a8   : > { %v887_v28 = vsel %vm5855_vm8, %v5854_v48, %v878_v41  ;;  %2129 = vmatpush2.msra.mxu0 %v720_v0  ;;  %vm5857_vm3 = vcmp.eq.f32.partialorder %v5655_v25, 4.0  ;;  %v1856_v9 = vsel %vm1532_vm4, %v3165_v62, 0.0  ;;  %vm684_vm9 = vcmp.eq.f32.partialorder %v3153_v55, 10.0 }
 0x1a9   : > { %v896_v22 = vsel %vm5857_vm3, %v5856_v45, %v887_v28  ;;  %vm1522_vm10 = vcmp.eq.f32.partialorder %v5778_v35, 9.0  ;;  %2131 = vmatmul.mubr.f32.vlgmr.msra.gmra.mxu0 %v1894_v19  ;;  %v1865_v38 = vsel %vm1523_vm0, %v5759_v14, %v1856_v9  ;;  %v1008_v41 = vsel %vm684_vm9, %v5767_v52, 0.0 }
 0x1aa   : > { %2200 = vmatpush2.msra.mxu1 %v896_v22  ;;  %vm1531_vm6 = vcmp.eq.f32.partialorder %v5778_v35, 10.0  ;;  %vm674_vm11 = vcmp.eq.f32.partialorder %v5498_v24, 9.0  ;;  %vm5858_vm12 = vcmp.eq.f32.partialorder %v5754_v51, 8.0  ;;  %v1017_v22 = vsel %vm675_vm7, %v5770_v50, %v1008_v41 }
 0x1ab   : > { %2202 = vmatmul.mubr.f32.vlgmr.msra.gmra.mxu1 %v1896_v43  ;;  %v1874_v0 = vsel %vm5858_vm12, %v5764_v1, %v1865_v38  ;;  %v1855_v19 = vsel %vm1531_vm6, %v5777_v47, 0.0  ;;  %vm683_vm14 = vcmp.eq.f32.partialorder %v5498_v24, 10.0  ;;  %vm5859_vm8 = vcmp.eq.f32.partialorder %v5754_v51, 7.0 }
 0x1ac   : > { %v1883_v28 = vsel %vm5859_vm8, %v5768_v8, %v1874_v0  ;;  %vm5860_vm4 = vcmp.eq.f32.partialorder %v3153_v55, 8.0  ;;  %v1864_v9 = vsel %vm1522_vm10, %v5783_v29, %v1855_v19  ;;  %v1007_v38 = vsel %vm683_vm14, %v5789_v60, 0.0 }
 0x1ad   : > { %v1026_v43 = vsel %vm5860_vm4, %v5774_v49, %v1017_v22  ;;  %2208 = vmatprep.subr.mxu0 %v1883_v28  ;;  %vm5861_vm3 = vcmp.eq.f32.partialorder %v5778_v35, 8.0  ;;  %v1016_v0 = vsel %vm674_vm11, %v5792_v13, %v1007_v38  ;;  %vm5296_vm9 = vcmp.eq.f32.partialorder %v5801_v44, 9.0 }
 0x1ae   : > { %v1035_v41 = vsel %vm657_vm13, %v5780_v32, %v1026_v43  ;;  %v1873_v47 = vsel %vm5861_vm3, %v5787_v54, %v1864_v9  ;;  %vm5862_vm6 = vcmp.eq.f32.partialorder %v5778_v35, 7.0  ;;  %vm5863_vm12 = vcmp.eq.f32.partialorder %v5498_v24, 8.0 }
 0x1af   : > { %2209 = vmatpush1.msra.mxu0 %v1035_v41  ;;  %v1882_v22 = vsel %vm5862_vm6, %v5673_v59, %v1873_v47  ;;  %v1025_v19 = vsel %vm5863_vm12, %v5797_v56, %v1016_v0  ;;  %vm1530_vm14 = vcmp.eq.f32.partialorder %v5801_v44, 10.0  ;;  %vm673_vm8 = vcmp.eq.f32.partialorder %v5814_v11, 9.0 }
 0x1b0   : > { %2210 = vmatprep.subr.mxu0 %v1882_v22  ;;  %v1034_v28 = vsel %vm5295_vm1, %v5803_v46, %v1025_v19  ;;  %v1854_v43 = vsel %vm1530_vm14, %v5800_v30, 0.0  ;;  %vm682_vm4 = vcmp.eq.f32.partialorder %v5814_v11, 10.0  ;;  %vm5298_vm3 = vcmp.eq.f32.partialorder %v5825_v20, 9.0 }
 0x1b1   : > { %2211 = vmatpush1.msra.mxu0 %v1034_v28  ;;  %v1863_v47 = vsel %vm5296_vm9, %v5806_v61, %v1854_v43  ;;  %v1006_v9 = vsel %vm682_vm4, %v5813_v16, 0.0  ;;  %vm1529_vm6 = vcmp.eq.f32.partialorder %v5825_v20, 10.0  ;;  %vm5297_vm12 = vcmp.eq.f32.partialorder %v5431_v34, 9.0 }
 0x1b2   : > { %vm5864_vm1 = vcmp.eq.f32.partialorder %v5801_v44, 8.0  ;;  %v1015_v41 = vsel %vm673_vm8, %v5819_v17, %v1006_v9  ;;  %v1853_v0 = vsel %vm1529_vm6, %v5824_v5, 0.0  ;;  %vm681_vm14 = vcmp.eq.f32.partialorder %v5431_v34, 10.0 }
 0x1b3   : > { %v1872_v38 = vsel %vm5864_vm1, %v5810_v3, %v1863_v47  ;;  %vm5865_vm9 = vcmp.eq.f32.partialorder %v5801_v44, 7.0  ;;  %vm5866_vm4 = vcmp.eq.f32.partialorder %v5814_v11, 8.0  ;;  %v1862_v28 = vsel %vm5298_vm3, %v5828_v7, %v1853_v0 }
 0x1b4   : > { %v1881_v22 = vsel %vm5865_vm9, %v5816_v26, %v1872_v38  ;;  %v1024_v19 = vsel %vm5866_vm4, %v5822_v58, %v1015_v41  ;;  %v1005_v43 = vsel %vm681_vm14, %v5834_v10, 0.0  ;;  %vm5867_vm1 = vcmp.eq.f32.partialorder %v5814_v11, 7.0 }
 0x1b5   : > { %2212 = vmatprep.subr.mxu0 %v1881_v22  ;;  %v1033_v47 = vsel %vm5867_vm1, %v5826_v2, %v1024_v19  ;;  %vm5868_vm6 = vcmp.eq.f32.partialorder %v5825_v20, 8.0  ;;  %v1014_v38 = vsel %vm5297_vm12, %v5536_v31, %v1005_v43  ;;  %vm1519_vm9 = vcmp.eq.f32.partialorder %v2968_v37, 9.0 }
 0x1b6   : > { %v1871_v9 = vsel %vm5868_vm6, %v5831_v39, %v1862_v28  ;;  %2213 = vmatpush1.msra.mxu0 %v1033_v47  ;;  %vm5869_vm14 = vcmp.eq.f32.partialorder %v5431_v34, 8.0  ;;  %vm1528_vm4 = vcmp.eq.f32.partialorder %v2968_v37, 10.0  ;;  %vm5309_vm1 = vcmp.eq.f32.partialorder %v5655_v25, 9.0  ;;  %v5871_v28 = vld [vmem:[#allocation5_spill] sm:$0xff] }
 0x1b7   : > { %v1880_v41 = vsel %vm5299_vm15, %v5437_v53, %v1871_v9  ;;  %v1023_v0 = vsel %vm5869_vm14, %v5641_v36, %v1014_v38  ;;  %vm5870_vm6 = vcmp.eq.f32.partialorder %v5431_v34, 7.0  ;;  %v1852_v19 = vsel %vm1528_vm4, %v5645_v12, 0.0  ;;  %v5904_v36 = vld [vmem:[#allocation52_spill] sm:$0xff] }
 0x1b8   : > { %2214 = vmatprep.subr.mxu0 %v1880_v41  ;;  %v1032_v22 = vsel %vm5870_vm6, %v5646_v15, %v1023_v0  ;;  %vm680_vm12 = vcmp.eq.f32.partialorder %v5655_v25, 10.0  ;;  %vm5306_vm3 = vcmp.eq.f32.partialorder %v5871_v28, 9.0  ;;  %v1861_v43 = vsel %vm1519_vm9, %v5648_v42, %v1852_v19  ;;  %v5873_v41 = vld [vmem:[#allocation11_spill] sm:$0xff]  ;;  %v5875_v15 = vld [vmem:[#allocation14_spill] sm:$0xff] }
 0x1b9   : > { %2215 = vmatpush1.msra.mxu0 %v1032_v22  ;;  %v1004_v47 = vsel %vm680_vm12, %v5659_v6, 0.0  ;;  %vm1527_vm14 = vcmp.eq.f32.partialorder %v5871_v28, 10.0  ;;  %vm5308_vm15 = vcmp.eq.f32.partialorder %v5682_v63, 9.0  ;;  %vm5872_vm6 = vcmp.eq.f32.partialorder %v2968_v37, 8.0 }
 0x1ba   : > { %v1870_v9 = vsel %vm5872_vm6, %v5651_v21, %v1861_v43  ;;  %v1013_v38 = vsel %vm5309_vm1, %v5852_v18, %v1004_v47  ;;  %v1851_v0 = vsel %vm1527_vm14, %v5873_v41, 0.0  ;;  %vm679_vm4 = vcmp.eq.f32.partialorder %v5682_v63, 10.0  ;;  %v5876_v21 = vld [vmem:[#allocation23_spill] sm:$0xff]  ;;  %v5878_v41 = vld [vmem:[#allocation13_spill] sm:$0xff] }
 0x1bb   : > { %v1879_v22 = vsel %vm5307_vm5, %v5849_v33, %v1870_v9  ;;  %vm5874_vm12 = vcmp.eq.f32.partialorder %v5655_v25, 8.0  ;;  %v1860_v43 = vsel %vm5306_vm3, %v5875_v15, %v1851_v0  ;;  %v1003_v53 = vsel %vm679_vm4, %v5876_v21, 0.0  ;;  %v5880_v9 = vld [vmem:[#allocation26_spill] sm:$0xff] }
 0x1bc   : > { %v1022_v19 = vsel %vm5874_vm12, %v5854_v48, %v1013_v38  ;;  %2216 = vmatprep.subr.mxu0 %v1879_v22  ;;  %vm5877_vm14 = vcmp.eq.f32.partialorder %v5655_v25, 7.0  ;;  %vm5879_vm6 = vcmp.eq.f32.partialorder %v5871_v28, 8.0  ;;  %v1012_v33 = vsel %vm5308_vm15, %v5880_v9, %v1003_v53  ;;  %v5881_v38 = vld [vmem:[#allocation19_spill] sm:$0xff]  ;;  %v5882_v48 = vld [vmem:[#allocation12_spill] sm:$0xff]  ;;  %v5884_v22 = vld [vmem:[#allocation25_spill] sm:$0xff] }
 0x1bd   : > { %v1031_v47 = vsel %vm5877_vm14, %v5856_v45, %v1022_v19  ;;  %v1869_v18 = vsel %vm5879_vm6, %v5878_v41, %v1860_v43  ;;  %vm1517_vm12 = vcmp.eq.f32.partialorder %v5881_v38, 9.0  ;;  %vm5883_vm3 = vcmp.eq.f32.partialorder %v5871_v28, 7.0  ;;  %v5886_v19 = vld [vmem:[#allocation35_spill] sm:$0xff]  ;;  %v5887_v43 = vld [vmem:[#allocation24_spill] sm:$0xff]  ;;  %v5894_v28 = vld [vmem:[#allocation33_spill] sm:$0xff] }
 0x1be   : > { %2217 = vmatpush1.msra.mxu0 %v1031_v47  ;;  %v1878_v0 = vsel %vm5883_vm3, %v5882_v48, %v1869_v18  ;;  %vm5885_vm4 = vcmp.eq.f32.partialorder %v5682_v63, 8.0  ;;  %vm1526_vm14 = vcmp.eq.f32.partialorder %v5881_v38, 10.0  ;;  %vm669_vm5 = vcmp.eq.f32.partialorder %v5886_v19, 9.0  ;;  %v5889_v41 = vld [vmem:[#allocation31_spill] sm:$0xff]  ;;  %v5890_v18 = vld [vmem:[#allocation34_spill] sm:$0xff] }
 0x1bf   : > { %v1021_v15 = vsel %vm5885_vm4, %v5884_v22, %v1012_v33  ;;  %2218 = vmatprep.subr.mxu0 %v1878_v0  ;;  %vm5888_vm6 = vcmp.eq.f32.partialorder %v5682_v63, 7.0  ;;  %v1850_v9 = vsel %vm1526_vm14, %v5889_v41, 0.0  ;;  %vm678_vm15 = vcmp.eq.f32.partialorder %v5886_v19, 10.0  ;;  %v5891_v47 = vld [vmem:[#allocation42_spill] sm:$0xff]  ;;  %v5897_v63 = vld [vmem:[#allocation53_spill] sm:$0xff] }
 0x1c0   : > { %v1030_v53 = vsel %vm5888_vm6, %v5887_v43, %v1021_v15  ;;  %vm1525_vm1 = vcmp.eq.f32.partialorder %v2854_v23, 10.0  ;;  %v1859_v33 = vsel %vm1517_vm12, %v5890_v18, %v1850_v9  ;;  %v1002_v48 = vsel %vm678_vm15, %v5891_v47, 0.0  ;;  %v5892_v22 = vld [vmem:[#allocation50_spill] sm:$0xff]  ;;  %v5896_v43 = vld [vmem:[#allocation44_spill] sm:$0xff]  ;;  %v5902_v47 = vld [vmem:[#allocation43_spill] sm:$0xff] }
 0x1c1   : > { %2219 = vmatpush1.msra.mxu0 %v1030_v53  ;;  %v1849_v21 = vsel %vm1525_vm1, %v5892_v22, 0.0  ;;  %v5893_v0 = vld [vmem:[#allocation54_spill] sm:$0xff]  ;;  %vm5895_vm4 = vcmp.eq.f32.partialorder %v5881_v38, 8.0  ;;  %v1011_v41 = vsel %vm669_vm5, %v5896_v43, %v1002_v48  ;;  %vm5898_vm14 = vcmp.eq.f32.partialorder %v2854_v23, 9.0  ;;  %v5900_v18 = vld [vmem:[#allocation32_spill] sm:$0xff] }
 0x1c2   : > { %vm677_vm3 = vcmp.eq.f32.partialorder %v5893_v0, 10.0  ;;  %v1868_v15 = vsel %vm5895_vm4, %v5894_v28, %v1859_v33  ;;  %v1858_v53 = vsel %vm5898_vm14, %v5897_v63, %v1849_v21  ;;  %v5899_v45 = vld [vmem:[#allocation62_spill] sm:$0xff]  ;;  %vm5901_vm15 = vcmp.eq.f32.partialorder %v5881_v38, 7.0  ;;  %v5906_v28 = vld [vmem:[#allocation67_spill] sm:$0xff]  ;;  %v5908_v63 = vld [vmem:[#allocation41_spill] sm:$0xff] }
 0x1c3   : > { %v1001_v9 = vsel %vm677_vm3, %v5899_v45, 0.0  ;;  %v1877_v22 = vsel %vm5901_vm15, %v5900_v18, %v1868_v15  ;;  %vm5903_vm1 = vcmp.eq.f32.partialorder %v5886_v19, 8.0  ;;  %vm5905_vm6 = vcmp.eq.f32.partialorder %v2854_v23, 8.0  ;;  %v5910_v45 = vld [vmem:[#allocation51_spill] sm:$0xff]  ;;  %v5912_v18 = vld [vmem:[#allocation66_spill] sm:$0xff] }
 0x1c4   : > { %v1020_v42 = vsel %vm5903_vm1, %v5902_v47, %v1011_v41  ;;  %v1867_v33 = vsel %vm5905_vm6, %v5904_v36, %v1858_v53  ;;  %vm5907_vm4 = vcmp.eq.f32.partialorder %v5893_v0, 9.0  ;;  %2220 = vmatprep.subr.mxu0 %v1877_v22  ;;  %vm5909_vm3 = vcmp.eq.f32.partialorder %v5886_v19, 7.0  ;;  %v5913_v36 = vld [vmem:[#allocation64_spill] sm:$0xff]  ;;  %v5915_v53 = vld [vmem:[#allocation73_spill] sm:$0xff] }
 0x1c5   : > { %v1010_v48 = vsel %vm5907_vm4, %v5906_v28, %v1001_v9  ;;  %v1029_v21 = vsel %vm5909_vm3, %v5908_v63, %v1020_v42  ;;  %vm5911_vm14 = vcmp.eq.f32.partialorder %v2854_v23, 7.0  ;;  %vm1524_vm15 = vcmp.eq.f32.partialorder %v5472_v40, 9.0  ;;  %v5916_v42 = vld [vmem:[#allocation76_spill] sm:$0xff] }
 0x1c6   : > { %v1876_v15 = vsel %vm5911_vm14, %v5910_v45, %v1867_v33  ;;  %v1019_v41 = vsel %vm659_vm2, %v5912_v18, %v1010_v48  ;;  %2221 = vmatpush1.msra.mxu0 %v1029_v21  ;;  %vm5914_vm1 = vcmp.eq.f32.partialorder %v5893_v0, 7.0  ;;  %v1812_v9 = vsel %vm1524_vm15, %v5915_v53, 0.0  ;;  %v5919_v48 = vld [vmem:[#allocation75_spill] sm:$0xff] }
 0x1c7   : > { %v1028_v28 = vsel %vm5914_vm1, %v5913_v36, %v1019_v41  ;;  %vm676_vm6 = vcmp.eq.f32.partialorder %v5476_v27, 9.0  ;;  %v1811_v23 = vsel %vm1523_vm0, %v3165_v62, 0.0  ;;  %2222 = vmatprep.subr.mxu0 %v1876_v15  ;;  %vm5917_vm2 = vcmp.eq.f32.partialorder %v5472_v40, 8.0  ;;  %v5924_v15 = vld [vmem:[#allocation74_spill] sm:$0xff]  ;;  %v5926_v41 = vld [vmem:[#allocation85_spill] sm:$0xff] }
 0x1c8   : > { %v1821_v18 = vsel %vm5917_vm2, %v5916_v42, %v1812_v9  ;;  %v964_v0 = vsel %vm676_vm6, %v5479_v57, 0.0  ;;  %vm5918_vm4 = vcmp.eq.f32.partialorder %v5754_v51, 8.0  ;;  %v963_v33 = vsel %vm675_vm7, %v5767_v52, 0.0  ;;  %2223 = vmatpush1.msra.mxu0 %v1028_v28  ;;  %v5929_v9 = vld [vmem:[#allocation83_spill] sm:$0xff] }
 0x1c9   : > { %v1820_v22 = vsel %vm5918_vm4, %v5759_v14, %v1811_v23  ;;  %vm5920_vm0 = vcmp.eq.f32.partialorder %v5472_v40, 7.0  ;;  %vm5921_vm3 = vcmp.eq.f32.partialorder %v5476_v27, 8.0  ;;  %vm5922_vm14 = vcmp.eq.f32.partialorder %v5754_v51, 7.0 }
 0x1ca   : > { %v1830_v62 = vsel %vm5920_vm0, %v5919_v48, %v1821_v18  ;;  %v973_v21 = vsel %vm5921_vm3, %v5556_v4, %v964_v0  ;;  %v1829_v45 = vsel %vm5922_vm14, %v5764_v1, %v1820_v22  ;;  %vm5923_vm1 = vcmp.eq.f32.partialorder %v3153_v55, 8.0  ;;  %v5932_v18 = vld [vmem:[#allocation8_spill] sm:$0xff]  ;;  %v5960_v22 = vld [vmem:[#allocation58_spill] sm:$0xff] }
 0x1cb   : > { %v972_v14 = vsel %vm5923_vm1, %v5770_v50, %v963_v33  ;;  %vm5925_vm7 = vcmp.eq.f32.partialorder %v5472_v40, 6.0  ;;  %vm5927_vm2 = vcmp.eq.f32.partialorder %v5476_v27, 7.0  ;;  %vm5928_vm4 = vcmp.eq.f32.partialorder %v5754_v51, 6.0  ;;  %v5962_v33 = vld [vmem:[#allocation70_spill] sm:$0xff] }
 0x1cc   : > { %v1839_v52 = vsel %vm5925_vm7, %v5924_v15, %v1830_v62  ;;  %v982_v36 = vsel %vm5927_vm2, %v5926_v41, %v973_v21  ;;  %v1838_v28 = vsel %vm5928_vm4, %v5768_v8, %v1829_v45  ;;  %v981_v1 = vsel %vm657_vm13, %v5774_v49, %v972_v14  ;;  %v5964_v21 = vld [vmem:[#allocation80_spill] sm:$0xff]  ;;  %v5966_v14 = vld [vmem:[#allocation69_spill] sm:$0xff] }
 0x1cd   : > { %2224 = vmatprep.subr.mxu0 %v1839_v52  ;;  %vm5930_vm0 = vcmp.eq.f32.partialorder %v5476_v27, 6.0  ;;  %vm5931_vm3 = vcmp.eq.f32.partialorder %v3153_v55, 6.0  ;;  %v1810_v0 = vsel %vm1522_vm10, %v5932_v18, 0.0  ;;  %v962_v8 = vsel %vm674_vm11, %v5789_v60, 0.0 }
 0x1ce   : > { %v991_v50 = vsel %vm5930_vm0, %v5929_v9, %v982_v36  ;;  %v990_v23 = vsel %vm5931_vm3, %v5780_v32, %v981_v1  ;;  %vm5933_vm13 = vcmp.eq.f32.partialorder %v5778_v35, 8.0  ;;  %vm5934_vm14 = vcmp.eq.f32.partialorder %v5498_v24, 8.0  ;;  %v5968_v36 = vld [vmem:[#allocation78_spill] sm:$0xff] }
 0x1cf   : > { %2225 = vmatpush1.msra.mxu0 %v991_v50  ;;  %v1819_v49 = vsel %vm5933_vm13, %v5783_v29, %v1810_v0  ;;  %v971_v51 = vsel %vm5934_vm14, %v5792_v13, %v962_v8  ;;  %vm5935_vm1 = vcmp.eq.f32.partialorder %v5801_v44, 9.0  ;;  %v961_v55 = vsel %vm673_vm8, %v5813_v16, 0.0  ;;  %v5973_v50 = vld [vmem:[#allocation23_spill] sm:$0xff]  ;;  %v5976_v0 = vld [vmem:[#allocation14_spill] sm:$0xff] }
 0x1d0   : > { %v1809_v32 = vsel %vm5935_vm1, %v5800_v30, 0.0  ;;  %2226 = vmatprep.subr.mxu0 %v1838_v28  ;;  %vm5936_vm10 = vcmp.eq.f32.partialorder %v5778_v35, 7.0  ;;  %vm5937_vm11 = vcmp.eq.f32.partialorder %v5498_v24, 7.0  ;;  %vm5938_vm7 = vcmp.eq.f32.partialorder %v5801_v44, 8.0  ;;  %v5970_v28 = vld [vmem:[#allocation11_spill] sm:$0xff] }
 0x1d1   : > { %v1828_v60 = vsel %vm5936_vm10, %v5787_v54, %v1819_v49  ;;  %v980_v29 = vsel %vm5937_vm11, %v5797_v56, %v971_v51  ;;  %v1818_v13 = vsel %vm5938_vm7, %v5806_v61, %v1809_v32  ;;  %vm5939_vm2 = vcmp.eq.f32.partialorder %v5814_v11, 8.0  ;;  %2227 = vmatpush1.msra.mxu0 %v990_v23  ;;  %v5974_v23 = vld [vmem:[#allocation16_spill] sm:$0xff]  ;;  %v5978_v49 = vld [vmem:[#allocation26_spill] sm:$0xff]  ;;  %v5980_v51 = vld [vmem:[#allocation31_spill] sm:$0xff] }
 0x1d2   : > { %v970_v30 = vsel %vm5939_vm2, %v5819_v17, %v961_v55  ;;  %vm5940_vm8 = vcmp.eq.f32.partialorder %v5778_v35, 6.0  ;;  %vm5941_vm4 = vcmp.eq.f32.partialorder %v5498_v24, 6.0  ;;  %vm5942_vm0 = vcmp.eq.f32.partialorder %v5801_v44, 7.0  ;;  %v5981_v32 = vld [vmem:[#allocation42_spill] sm:$0xff] }
 0x1d3   : > { %v1837_v16 = vsel %vm5940_vm8, %v5673_v59, %v1828_v60  ;;  %v989_v54 = vsel %vm5941_vm4, %v5803_v46, %v980_v29  ;;  %v1827_v56 = vsel %vm5942_vm0, %v5810_v3, %v1818_v13  ;;  %vm5943_vm3 = vcmp.eq.f32.partialorder %v5814_v11, 7.0  ;;  %v5982_v60 = vld [vmem:[#allocation13_spill] sm:$0xff] }
 0x1d4   : > { %v979_v61 = vsel %vm5943_vm3, %v5822_v58, %v970_v30  ;;  %2228 = vmatprep.subr.mxu0 %v1837_v16  ;;  %vm5944_vm13 = vcmp.eq.f32.partialorder %v5801_v44, 6.0  ;;  %vm5945_vm14 = vcmp.eq.f32.partialorder %v5814_v11, 6.0  ;;  %vm5946_vm1 = vcmp.eq.f32.partialorder %v5825_v20, 9.0  ;;  %v5952_v58 = vld [vmem:[#allocation60_spill] sm:$0xff]  ;;  %v5984_v13 = vld [vmem:[#allocation25_spill] sm:$0xff]  ;;  %v5986_v16 = vld [vmem:[#allocation34_spill] sm:$0xff] }
 0x1d5   : > { %v1836_v17 = vsel %vm5944_vm13, %v5816_v26, %v1827_v56  ;;  %v988_v59 = vsel %vm5945_vm14, %v5826_v2, %v979_v61  ;;  %v1808_v24 = vsel %vm5946_vm1, %v5824_v5, 0.0  ;;  %vm5947_vm10 = vcmp.eq.f32.partialorder %v5431_v34, 9.0  ;;  %2229 = vmatpush1.msra.mxu0 %v989_v54  ;;  %v5954_v5 = vld [vmem:[#allocation71_spill] sm:$0xff]  ;;  %v5956_v2 = vld [vmem:[#allocation81_spill] sm:$0xff]  ;;  %v5989_v61 = vld [vmem:[#allocation12_spill] sm:$0xff] }
 0x1d6   : > { %v960_v46 = vsel %vm5947_vm10, %v5834_v10, 0.0  ;;  %vm5948_vm11 = vcmp.eq.f32.partialorder %v5825_v20, 8.0  ;;  %vm5949_vm7 = vcmp.eq.f32.partialorder %v5431_v34, 8.0  ;;  %v1807_v26 = vsel %vm1519_vm9, %v5645_v12, 0.0  ;;  %2230 = vmatprep.subr.mxu0 %v1836_v17  ;;  %v5958_v10 = vld [vmem:[#allocation46_spill] sm:$0xff] }
 0x1d7   : > { %v1817_v35 = vsel %vm5948_vm11, %v5828_v7, %v1808_v24  ;;  %v969_v44 = vsel %vm5949_vm7, %v5536_v31, %v960_v46  ;;  %vm5950_vm2 = vcmp.eq.f32.partialorder %v5655_v25, 9.0  ;;  %vm5951_vm8 = vcmp.eq.f32.partialorder %v5825_v20, 7.0  ;;  %2231 = vmatpush1.msra.mxu0 %v988_v59  ;;  %v5991_v59 = vld [vmem:[#allocation24_spill] sm:$0xff]  ;;  %v5993_v46 = vld [vmem:[#allocation33_spill] sm:$0xff] }
 0x1d8   : > { %v959_v11 = vsel %vm5950_vm2, %v5659_v6, 0.0  ;;  %v1826_v3 = vsel %vm5951_vm8, %v5831_v39, %v1817_v35  ;;  %vm5953_vm4 = vcmp.eq.f32.partialorder %v5431_v34, 7.0  ;;  %vm5955_vm0 = vcmp.eq.f32.partialorder %v2968_v37, 8.0 }
 0x1d9   : > { %v978_v7 = vsel %vm5953_vm4, %v5952_v58, %v969_v44  ;;  %v1816_v31 = vsel %vm5955_vm0, %v5954_v5, %v1807_v26  ;;  %vm5957_vm9 = vcmp.eq.f32.partialorder %v5655_v25, 8.0  ;;  %vm5959_vm3 = vcmp.eq.f32.partialorder %v5825_v20, 6.0  ;;  %v5996_v26 = vld [vmem:[#allocation32_spill] sm:$0xff] }
 0x1da   : > { %v968_v12 = vsel %vm5957_vm9, %v5956_v2, %v959_v11  ;;  %v1835_v6 = vsel %vm5959_vm3, %v5958_v10, %v1826_v3  ;;  %vm5961_vm13 = vcmp.eq.f32.partialorder %v5431_v34, 6.0  ;;  %vm5963_vm14 = vcmp.eq.f32.partialorder %v2968_v37, 7.0  ;;  %v5971_v34 = vld [vmem:[#allocation5_spill] sm:$0xff] }
 0x1db   : > { %v987_v39 = vsel %vm5961_vm13, %v5960_v22, %v978_v7  ;;  %v1825_v62 = vsel %vm5963_vm14, %v5962_v33, %v1816_v31  ;;  %vm5965_vm1 = vcmp.eq.f32.partialorder %v5655_v25, 7.0  ;;  %2232 = vmatprep.subr.mxu0 %v1835_v6  ;;  %vm5967_vm10 = vcmp.eq.f32.partialorder %v2968_v37, 6.0 }
 0x1dc   : > { %v977_v45 = vsel %vm5965_vm1, %v5964_v21, %v968_v12  ;;  %v1834_v52 = vsel %vm5967_vm10, %v5966_v14, %v1825_v62  ;;  %vm5969_vm11 = vcmp.eq.f32.partialorder %v5655_v25, 6.0  ;;  %vm5972_vm7 = vcmp.eq.f32.partialorder %v5971_v34, 9.0  ;;  %2233 = vmatpush1.msra.mxu0 %v987_v39 }
 0x1dd   : > { %v986_v20 = vsel %vm5969_vm11, %v5968_v36, %v977_v45  ;;  %v1806_v1 = vsel %vm5972_vm7, %v5970_v28, 0.0  ;;  %vm5975_vm2 = vcmp.eq.f32.partialorder %v5974_v23, 9.0  ;;  %vm5977_vm8 = vcmp.eq.f32.partialorder %v5971_v34, 8.0  ;;  %2234 = vmatprep.subr.mxu0 %v1834_v52 }
 0x1de   : > { %v958_v18 = vsel %vm5975_vm2, %v5973_v50, 0.0  ;;  %v1815_v8 = vsel %vm5977_vm8, %v5976_v0, %v1806_v1  ;;  %vm5979_vm4 = vcmp.eq.f32.partialorder %v5974_v23, 8.0  ;;  %v1805_v25 = vsel %vm1517_vm12, %v5980_v51, 0.0  ;;  %2235 = vmatpush1.msra.mxu0 %v986_v20 }
 0x1df   : > { %v967_v37 = vsel %vm5979_vm4, %v5978_v49, %v958_v18  ;;  %v957_v55 = vsel %vm669_vm5, %v5981_v32, 0.0  ;;  %vm5983_vm0 = vcmp.eq.f32.partialorder %v5971_v34, 7.0  ;;  %vm5985_vm9 = vcmp.eq.f32.partialorder %v5974_v23, 7.0 }
 0x1e0   : > { %v1824_v29 = vsel %vm5983_vm0, %v5982_v60, %v1815_v8  ;;  %v976_v30 = vsel %vm5985_vm9, %v5984_v13, %v967_v37  ;;  %vm5987_vm3 = vcmp.eq.f32.partialorder %v5881_v38, 8.0  ;;  %vm5988_vm12 = vcmp.eq.f32.partialorder %v5886_v19, 8.0 }
 0x1e1   : > { %v1814_v54 = vsel %vm5987_vm3, %v5986_v16, %v1805_v25  ;;  %v966_v56 = vsel %vm5988_vm12, %v5896_v43, %v957_v55  ;;  %vm5990_vm5 = vcmp.eq.f32.partialorder %v5971_v34, 6.0  ;;  %vm5992_vm13 = vcmp.eq.f32.partialorder %v5974_v23, 6.0  ;;  %v1899_v43 = vld [vmem:[%s4900_s1 + $0x28] sm:$0xff] }
 0x1e2   : > { %v1833_v17 = vsel %vm5990_vm5, %v5989_v61, %v1824_v29  ;;  %v985_v24 = vsel %vm5992_vm13, %v5991_v59, %v976_v30  ;;  %vm5994_vm14 = vcmp.eq.f32.partialorder %v5881_v38, 7.0  ;;  %vm5995_vm1 = vcmp.eq.f32.partialorder %v5886_v19, 7.0 }
 0x1e3   : > { %v1823_v35 = vsel %vm5994_vm14, %v5993_v46, %v1814_v54  ;;  %v975_v44 = vsel %vm5995_vm1, %v5902_v47, %v966_v56  ;;  %2236 = vmatprep.subr.mxu0 %v1833_v17  ;;  %vm5997_vm10 = vcmp.eq.f32.partialorder %v5881_v38, 6.0  ;;  %vm5998_vm11 = vcmp.eq.f32.partialorder %v5886_v19, 6.0 }
 0x1e4   : > { %v1832_v11 = vsel %vm5997_vm10, %v5996_v26, %v1823_v35  ;;  %v984_v3 = vsel %vm5998_vm11, %v5908_v63, %v975_v44  ;;  %vm1533_vm7 = vcmp.eq.f32.partialorder %v5472_v40, 10.0  ;;  %vm685_vm2 = vcmp.eq.f32.partialorder %v5476_v27, 10.0  ;;  %2237 = vmatpush1.msra.mxu0 %v985_v24 }
 0x1e5   : > { %v1857_v47 = vsel %vm1533_vm7, %v5915_v53, 0.0  ;;  %v1009_v58 = vsel %vm685_vm2, %v5479_v57, 0.0  ;;  %vm2062_vm8 = vcmask 64512   ;;  %2238 = vmatprep.subr.mxu0 %v1832_v11  ;;  %vm5999_vm4 = vcmp.eq.f32.partialorder %v5472_v40, 8.0 }
 0x1e6   : > { %v1866_v38 = vsel %vm1524_vm15, %v5916_v42, %v1857_v47  ;;  %v1018_v19 = vsel %vm676_vm6, %v5556_v4, %v1009_v58  ;;  %2397 = vmatprep.mubr.msk.f32.mxu0 %vm2062_vm8, %v1899_v43  ;;  %2239 = vmatpush1.msra.mxu0 %v984_v3  ;;  %vm6000_vm0 = vcmp.eq.f32.partialorder %v5476_v27, 8.0  ;;  %vm6001_vm9 = vcmp.eq.f32.partialorder %v5472_v40, 7.0  ;;  %v1898_v4 = vld [vmem:[%s4900_s1 + $0x20] sm:$0xff] }
 0x1e7   : > { %v1875_v63 = vsel %vm5999_vm4, %v5919_v48, %v1866_v38  ;;  %v1027_v57 = vsel %vm6000_vm0, %v5926_v41, %v1018_v19  ;;  %vm6002_vm15 = vcmp.eq.f32.partialorder %v5476_v27, 7.0 }
 0x1e8   : > { %v1884_v53 = vsel %vm6001_vm9, %v5924_v15, %v1875_v63  ;;  %v1036_v42 = vsel %vm6002_vm15, %v5929_v9, %v1027_v57 }
 0x1e9   : > { %2270 = vmatprep.subr.mxu0 %v1884_v53 }
 0x1ea   : > { %2271 = vmatpush2.msra.mxu0 %v1036_v42 }
 0x1eb   : > { %2273 = vmatmul.mubr.f32.vlgmr.msra.gmra.mxu0 %v1898_v4 }
 0x269   : > { %v2132_v48 = vpop.f32.mrf.mxu0 }
 0x26b   : > { %v2203_v41 = vpop.f32.mrf.mxu1  ;;  %v2134_v40 = vpop.f32.mrf.mxu0 }
 0x26c   : > { %v2204_v7 = vadd.f32 %v2203_v41, %v2132_v48 }
 0x26d   : > { %v2205_v15 = vpop.f32.mrf.mxu1 }
 0x26e   : > { %v2206_v9 = vadd.f32 %v2205_v15, %v2134_v40 }
 0x2ab   : > { %v2274_v27 = vpop.f32.mrf.mxu0 }
 0x2ac   : > { %v2275_v5 = vadd.f32 %v2274_v27, %v2204_v7 }
 0x2ad   : > { %v2276_v31 = vpop.f32.mrf.mxu0 }
 0x2ae   : > { %2279 = vst [vmem:[%s198_s20] sm:$0xff] %v2275_v5  ;;  %v2277_v2 = vadd.f32 %v2276_v31, %v2206_v9 }
 0x2b0   : > { %2280 = vst [vmem:[%s198_s20 + $0x8] sm:$0xff] %v2277_v2 }
 0x2b1 PF: > { %p9_p9 = scmp.ge.s32.totalorder %s2570_s13, 4   ;;  %s6003_s9 = smov %s2532_s10 }
 0x2b2   : > { %s6004_s10 = smov %s2579_s16  ;;  %s6005_s11 = smov %s2570_s13 }
 0x2b3   :  { %11 = sbr.rel (!%p9_p9) target bundleno = 2 (0x2), region = 88 }

</bundles_post_ra>
